<compile_context>
chip_gen: v7x
topology: tpu7x:2x2x1
jax: 0.10.0
libtpu: 0.0.40
codegen_flags: <defaults>
</compile_context>

<pallas_src>
import functools

import jax
import jax.numpy as jnp
from jax import lax
from jax.experimental import pallas as pl
from jax.experimental.pallas import tpu as pltpu


def _round_up(v, mult):
    return ((v + mult - 1) // mult) * mult


def _default_compute_dtype():
    """bf16 matmuls + bf16 tanh on v6e / v7x; f32 elsewhere (v5e has no bf16 VPU/EUP)."""
    try:
        kind = jax.devices()[0].device_kind.lower()
    except Exception:
        return jnp.float32
    if any(tag in kind for tag in ("v6", "v7", "7x")):
        return jnp.bfloat16
    return jnp.float32


def _auto_tile_n(n, *, max_tile=2048, min_steps=2):
    """Row-tile size: large enough to amortize per-grid-step overhead, but keep
    >= min_steps grid steps so v7x's two TensorCores both get work.  Always a
    multiple of 128 (lane-dense (1, tile_n) output blocks)."""
    n128 = _round_up(max(n, 1), 128)
    if n128 <= 128 * min_steps:
        return 128
    return min(max_tile, _round_up(pl.cdiv(n128, min_steps), 128))


def _resnet_kernel(x_ref,
                   w1, b1, w2, b2, w3, b3, w4, b4, w5, b5, w6, b6,
                   wout, out_ref, *, compute_dtype):
    """Forward pass for one tile of samples in the transposed layout.

      x_ref : (2, TN)    f32             lane-dense input tile
      w1    : (MP, 2)    f32             fc1 weight (out, in) -- VPU only
      b*    : (MP, 1)    f32
      w2..6 : (MP, MP)   compute_dtype   pre-cast in the wrapper
      wout  : (1, MP)    compute_dtype
      out   : (1, TN)    f32             lane-dense output tile
    """
    f32 = jnp.float32
    cdt = compute_dtype
    mp = w2.shape[0]

    x0 = x_ref[0:1, :]                                   # (1, TN)
    x1 = x_ref[1:2, :]                                   # (1, TN)

    # s = x @ Ix in transposed layout: channel 0 carries x0, channel 1 carries
    # x1, all other channels are zero.  Two VPU selects, no MXU push.
    row = lax.broadcasted_iota(jnp.int32, (mp, 1), 0)
    s = jnp.where(row == 0, x0, jnp.where(row == 1, x1, 0.0))     # (MP, TN) f32

    # fc1 has K=2, so it barely uses the MXU -- compute it on the VPU.
    w1f = w1[...]                                        # (MP, 2) f32
    z1 = w1f[:, 0:1] * x0 + w1f[:, 1:2] * x1 + b1[...]   # (MP, TN) f32
    y = jnp.tanh(z1.astype(cdt))

    def fc_tanh(h, w_ref, b_ref):
        # MXU matmul in compute dtype with f32 accumulation; bias added in f32;
        # tanh evaluated in compute dtype (bf16 EUP path on v6e/v7x).
        z = jnp.dot(w_ref[...], h.astype(cdt), preferred_element_type=f32)
        z = z + b_ref[...]
        return jnp.tanh(z.astype(cdt))

    # residual block 1
    y = fc_tanh(y, w2, b2).astype(f32) + s
    s = y
    # residual block 2
    y = fc_tanh(y, w3, b3)
    y = fc_tanh(y, w4, b4).astype(f32) + s
    s = y
    # residual block 3
    y = fc_tanh(y, w5, b5)
    y = fc_tanh(y, w6, b6).astype(f32) + s

    # outlayer (bias-free): (1, MP) @ (MP, TN) -> lane-dense (1, TN)
    out_ref[...] = jnp.dot(wout[...], y.astype(cdt), preferred_element_type=f32)


def _pad_and_cast_params(params, mp, compute_dtype):
    """Transpose to (out, in) kernel layout, zero-pad hidden width to mp, and
    pre-cast the (mp, mp) matmul weights + wout to compute_dtype once.
    Zero padding is numerically exact (tanh(0) = 0 keeps padded channels at 0)."""
    m = params["w1"].shape[1]
    pad = mp - m
    f32 = jnp.float32

    out = {}
    # fc1: params (2, m) [in,out] -> (mp, 2) [out,in]; stays f32 (VPU path).
    out["w1"] = jnp.pad(params["w1"].T.astype(f32), ((0, pad), (0, 0)))
    out["b1"] = jnp.pad(params["b1"].T.astype(f32), ((0, pad), (0, 0)))     # (mp, 1)
    for i in range(2, 7):
        w = jnp.pad(params[f"w{i}"].T.astype(f32), ((0, pad), (0, pad)))    # (mp, mp)
        out[f"w{i}"] = w.astype(compute_dtype)
        out[f"b{i}"] = jnp.pad(params[f"b{i}"].T.astype(f32), ((0, pad), (0, 0)))
    out["wout"] = jnp.pad(params["wout"].T.astype(f32),
                          ((0, 0), (0, pad))).astype(compute_dtype)         # (1, mp)
    return out


def tanh_resnet_forward(x, params, *, tile_n=None, compute_dtype=None):
    """x: (N, 2) float32.  Returns (N,) float32 (the 'none' boundary branch)."""
    N, dim = x.shape
    assert dim == 2, "module hard-codes a 2-D Ix"

    if compute_dtype is None:
        compute_dtype = _default_compute_dtype()
    if tile_n is None:
        tile_n = _auto_tile_n(N)
    assert tile_n % 128 == 0, "(1, tile_n) output block requires tile_n % 128 == 0"

    m = params["w1"].shape[1]
    mp = _round_up(m, 128)
    p = _pad_and_cast_params(params, mp, compute_dtype)

    n_pad = _round_up(N, tile_n)
    grid = n_pad // tile_n

    # Lane-dense input slab: (2, n_pad) so the x DMA uses full-lane descriptors.
    xt = x.T.astype(jnp.float32)
    if n_pad != N:
        xt = jnp.pad(xt, ((0, 0), (0, n_pad - N)))

    weight_order = ["w1", "b1", "w2", "b2", "w3", "b3",
                    "w4", "b4", "w5", "b5", "w6", "b6", "wout"]
    weight_args = [p[k] for k in weight_order]

    # Advisory cost estimate (compute-bound custom call).
    weight_hbm = sum(int(a.size) * a.dtype.itemsize for a in weight_args)
    cost = pl.CostEstimate(
        flops=int(n_pad * (2 * dim * mp + 5 * 2 * mp * mp + 2 * mp + 5 * mp)),
        transcendentals=int(6 * n_pad * mp),
        bytes_accessed=int(n_pad * (dim + 1) * 4 + weight_hbm),
    )

    # Explicit scoped-VMEM budget (never below the per-chip defaults).
    def _vmem_tile_bytes(a):
        r, c = a.shape
        return _round_up(r, 8) * _round_up(c, 128) * a.dtype.itemsize

    vmem_est = (2 * sum(_vmem_tile_bytes(a) for a in weight_args)   # worst case: double-buffered
                + 4 * 8 * tile_n * 4                                # x / out tiles, double-buffered
                + 8 * mp * tile_n * 4)                              # f32 activation headroom
    vmem_limit = int(min(max(vmem_est, 32 * 1024 * 1024), 64 * 1024 * 1024))

    kernel = functools.partial(_resnet_kernel, compute_dtype=compute_dtype)

    def run(single_buffer_weights):
        if single_buffer_weights:
            # Replicated (grid-invariant) blocks: single-buffer them so they sit
            # in VMEM once instead of twice (key for v7x's 64 MiB VMEM at large m).
            rep_spec = lambda a: pl.BlockSpec(a.shape, lambda i: (0, 0),
                                              pipeline_mode=pl.Buffered(1))
        else:
            rep_spec = lambda a: pl.BlockSpec(a.shape, lambda i: (0, 0))

        in_specs = [pl.BlockSpec((dim, tile_n), lambda i: (0, i))]
        in_specs += [rep_spec(a) for a in weight_args]

        return pl.pallas_call(
            kernel,
            out_shape=jax.ShapeDtypeStruct((1, n_pad), jnp.float32),
            grid_spec=pltpu.PrefetchScalarGridSpec(
                num_scalar_prefetch=0,
                grid=(grid,),
                in_specs=in_specs,
                out_specs=pl.BlockSpec((1, tile_n), lambda i: (0, i)),
            ),
            compiler_params=pltpu.CompilerParams(
                dimension_semantics=("parallel",),
                vmem_limit_bytes=vmem_limit),
            cost_estimate=cost,
        )(xt, *weight_args)

    try:
        out = run(single_buffer_weights=True)
    except Exception:
        # Fallback if this JAX build rejects pipeline_mode=pl.Buffered(1) on the
        # top-level pallas_call pipeline; default double-buffering is harmless here.
        out = run(single_buffer_weights=False)

    return out[0, :N]          # lane-dense slab -> (N,)  (y.squeeze(1))


def init_params(key, m, dim=2):
    """Deterministic synthetic parameters matching the PyTorch module's shapes.

    PyTorch nn.Linear stores weight as (out, in); here we keep the transposed
    (in, out) layout so the plain-JAX reference computes y = x @ W + b (the
    wrapper re-transposes/pads for the kernel)."""
    keys = jax.random.split(key, 14)
    scale = 0.3

    def w(k, fan_in, fan_out):
        return (scale * jax.random.normal(k, (fan_in, fan_out))).astype(jnp.float32)

    def b(k, fan_out):
        return (scale * jax.random.normal(k, (1, fan_out))).astype(jnp.float32)

    params = {
        "w1": w(keys[0], dim, m), "b1": b(keys[1], m),
        "w2": w(keys[2], m, m),   "b2": b(keys[3], m),
        "w3": w(keys[4], m, m),   "b3": b(keys[5], m),
        "w4": w(keys[6], m, m),   "b4": b(keys[7], m),
        "w5": w(keys[8], m, m),   "b5": b(keys[9], m),
        "w6": w(keys[10], m, m),  "b6": b(keys[11], m),
        "wout": w(keys[12], m, 1),            # outlayer: Linear(m, 1, bias=False)
    }
    # Ix: zeros([dim, m]) with Ix[0,0] = Ix[1,1] = 1 (used by the reference).
    ix = jnp.zeros((dim, m), jnp.float32)
    ix = ix.at[0, 0].set(1.0).at[1, 1].set(1.0)
    params["ix"] = ix
    return params


def reference_forward(x, p):
    """Plain-JAX reference reproducing the PyTorch forward ('none' branch)."""
    s = x @ p["ix"]
    y = jnp.tanh(x @ p["w1"] + p["b1"])
    y = jnp.tanh(y @ p["w2"] + p["b2"]) + s
    s = y
    y = jnp.tanh(y @ p["w3"] + p["b3"])
    y = jnp.tanh(y @ p["w4"] + p["b4"]) + s
    s = y
    y = jnp.tanh(y @ p["w5"] + p["b5"])
    y = jnp.tanh(y @ p["w6"] + p["b6"]) + s
    return (y @ p["wout"])[:, 0]


if __name__ == "__main__":
    key = jax.random.PRNGKey(0)
    k_x, k_p = jax.random.split(key)

    m = 32          # hidden width (padded to 128 lanes inside the wrapper)
    dim = 2         # input coordinate dimension (module hard-codes a 2-D Ix)
    N = 1000        # exercises row padding and a 2-step grid (v7x-friendly)

    x = jax.random.uniform(k_x, (N, dim), jnp.float32, minval=-1.0, maxval=1.0)
    params = init_params(k_p, m, dim)

    y_ref = reference_forward(x, params)

    # Exact f32 path (all chips): tight check against the plain-JAX reference.
    y_f32 = jax.block_until_ready(
        tanh_resnet_forward(x, params, compute_dtype=jnp.float32))
    assert y_f32.shape == (N,)
    assert jnp.allclose(y_f32, y_ref, atol=2e-5, rtol=2e-4), "f32 mismatch vs reference"

    # Default path: bf16 matmuls/tanh on v6e/v7x, f32 elsewhere.  Loose check
    # (expected bf16 precision loss through 6 layers).
    y_auto = jax.block_until_ready(tanh_resnet_forward(x, params))
    rel = jnp.linalg.norm(y_auto - y_ref) / (jnp.linalg.norm(y_ref) + 1e-12)
    assert float(rel) < 5e-2, f"auto-dtype path rel-L2 err {float(rel)}"

    print("KERNEL_OK")
</pallas_src>

<mosaic_0001>
module attributes {stable_mosaic.version = 11 : i64} {
  func.func @_resnet_kernel(%arg0: i32, %arg1: memref<2x512xf32, #tpu.memory_space<vmem>>, %arg2: memref<128x2xf32, #tpu.memory_space<vmem>>, %arg3: memref<128x1xf32, #tpu.memory_space<vmem>>, %arg4: memref<128x128xf32, #tpu.memory_space<vmem>>, %arg5: memref<128x1xf32, #tpu.memory_space<vmem>>, %arg6: memref<128x128xf32, #tpu.memory_space<vmem>>, %arg7: memref<128x1xf32, #tpu.memory_space<vmem>>, %arg8: memref<128x128xf32, #tpu.memory_space<vmem>>, %arg9: memref<128x1xf32, #tpu.memory_space<vmem>>, %arg10: memref<128x128xf32, #tpu.memory_space<vmem>>, %arg11: memref<128x1xf32, #tpu.memory_space<vmem>>, %arg12: memref<128x128xf32, #tpu.memory_space<vmem>>, %arg13: memref<128x1xf32, #tpu.memory_space<vmem>>, %arg14: memref<1x128xf32, #tpu.memory_space<vmem>>, %arg15: memref<1x512xf32, #tpu.memory_space<vmem>>) attributes {dimension_semantics = [#tpu.dimension_semantics<parallel>], iteration_bounds = array<i64: 2>, scalar_prefetch = 0 : i64, scratch_operands = 0 : i64, tpu.core_type = #tpu.core_type<tc>, window_params = [{transform_indices = @transform_0, window_bounds = array<i64: 2, 512>}, {pipeline_mode = #tpu.pipeline_mode<synchronous>, transform_indices = @transform_1, window_bounds = array<i64: 128, 2>}, {pipeline_mode = #tpu.pipeline_mode<synchronous>, transform_indices = @transform_2, window_bounds = array<i64: 128, 1>}, {pipeline_mode = #tpu.pipeline_mode<synchronous>, transform_indices = @transform_3, window_bounds = array<i64: 128, 128>}, {pipeline_mode = #tpu.pipeline_mode<synchronous>, transform_indices = @transform_4, window_bounds = array<i64: 128, 1>}, {pipeline_mode = #tpu.pipeline_mode<synchronous>, transform_indices = @transform_5, window_bounds = array<i64: 128, 128>}, {pipeline_mode = #tpu.pipeline_mode<synchronous>, transform_indices = @transform_6, window_bounds = array<i64: 128, 1>}, {pipeline_mode = #tpu.pipeline_mode<synchronous>, transform_indices = @transform_7, window_bounds = array<i64: 128, 128>}, {pipeline_mode = #tpu.pipeline_mode<synchronous>, transform_indices = @transform_8, window_bounds = array<i64: 128, 1>}, {pipeline_mode = #tpu.pipeline_mode<synchronous>, transform_indices = @transform_9, window_bounds = array<i64: 128, 128>}, {pipeline_mode = #tpu.pipeline_mode<synchronous>, transform_indices = @transform_10, window_bounds = array<i64: 128, 1>}, {pipeline_mode = #tpu.pipeline_mode<synchronous>, transform_indices = @transform_11, window_bounds = array<i64: 128, 128>}, {pipeline_mode = #tpu.pipeline_mode<synchronous>, transform_indices = @transform_12, window_bounds = array<i64: 128, 1>}, {pipeline_mode = #tpu.pipeline_mode<synchronous>, transform_indices = @transform_13, window_bounds = array<i64: 1, 128>}, {transform_indices = @transform_14, window_bounds = array<i64: 1, 512>}]} {
    %c0 = arith.constant 0 : index
    %c0_0 = arith.constant 0 : index
    %0 = vector.load %arg1[%c0, %c0_0] : memref<2x512xf32, #tpu.memory_space<vmem>>, vector<1x512xf32>
    %c1 = arith.constant 1 : index
    %c0_1 = arith.constant 0 : index
    %1 = vector.load %arg1[%c1, %c0_1] : memref<2x512xf32, #tpu.memory_space<vmem>>, vector<1x512xf32>
    %2 = tpu.iota {dimensions = array<i32: 0>} : vector<128x1xi32>
    %c0_i32 = arith.constant 0 : i32
    %3 = vector.broadcast %c0_i32 : i32 to vector<128x1xi32>
    %4 = arith.cmpi eq, %2, %3 : vector<128x1xi32>
    %c1_i32 = arith.constant 1 : i32
    %5 = vector.broadcast %c1_i32 : i32 to vector<128x1xi32>
    %6 = arith.cmpi eq, %2, %5 : vector<128x1xi32>
    %cst = arith.constant 0.000000e+00 : f32
    %7 = vector.shape_cast %6 : vector<128x1xi1> to vector<128x1xi1>
    %8 = vector.broadcast %7 : vector<128x1xi1> to vector<128x512xi1>
    %9 = vector.shape_cast %1 : vector<1x512xf32> to vector<1x512xf32>
    %10 = vector.broadcast %9 : vector<1x512xf32> to vector<128x512xf32>
    %11 = vector.broadcast %cst : f32 to vector<128x512xf32>
    %12 = arith.select %8, %10, %11 : vector<128x512xi1>, vector<128x512xf32>
    %13 = vector.shape_cast %4 : vector<128x1xi1> to vector<128x1xi1>
    %14 = vector.broadcast %13 : vector<128x1xi1> to vector<128x512xi1>
    %15 = vector.shape_cast %0 : vector<1x512xf32> to vector<1x512xf32>
    %16 = vector.broadcast %15 : vector<1x512xf32> to vector<128x512xf32>
    %17 = arith.select %14, %16, %12 : vector<128x512xi1>, vector<128x512xf32>
    %c0_2 = arith.constant 0 : index
    %c0_3 = arith.constant 0 : index
    %18 = vector.load %arg2[%c0_2, %c0_3] : memref<128x2xf32, #tpu.memory_space<vmem>>, vector<128x2xf32>
    %19 = vector.extract_strided_slice %18 {offsets = [0, 0], sizes = [128, 1], strides = [1, 1]} : vector<128x2xf32> to vector<128x1xf32>
    %20 = vector.broadcast %19 : vector<128x1xf32> to vector<128x512xf32>
    %21 = vector.broadcast %0 : vector<1x512xf32> to vector<128x512xf32>
    %22 = arith.mulf %20, %21 : vector<128x512xf32>
    %23 = vector.extract_strided_slice %18 {offsets = [0, 1], sizes = [128, 1], strides = [1, 1]} : vector<128x2xf32> to vector<128x1xf32>
    %24 = vector.broadcast %23 : vector<128x1xf32> to vector<128x512xf32>
    %25 = vector.broadcast %1 : vector<1x512xf32> to vector<128x512xf32>
    %26 = arith.mulf %24, %25 : vector<128x512xf32>
    %27 = arith.addf %22, %26 : vector<128x512xf32>
    %c0_4 = arith.constant 0 : index
    %c0_5 = arith.constant 0 : index
    %28 = vector.load %arg3[%c0_4, %c0_5] : memref<128x1xf32, #tpu.memory_space<vmem>>, vector<128x1xf32>
    %29 = vector.broadcast %28 : vector<128x1xf32> to vector<128x512xf32>
    %30 = arith.addf %27, %29 : vector<128x512xf32>
    %31 = math.tanh %30 : vector<128x512xf32>
    %c0_6 = arith.constant 0 : index
    %c0_7 = arith.constant 0 : index
    %32 = vector.load %arg4[%c0_6, %c0_7] : memref<128x128xf32, #tpu.memory_space<vmem>>, vector<128x128xf32>
    %cst_8 = arith.constant dense<0.000000e+00> : vector<128x512xf32>
    %33 = tpu.matmul %32, %31, %cst_8 {dimension_numbers = #tpu.dot_dimension_numbers<[1], [0], [0], [1], [0, 0, 1, 1], [], []>} : vector<128x128xf32>, vector<128x512xf32>, vector<128x512xf32> -> vector<128x512xf32>
    %c0_9 = arith.constant 0 : index
    %c0_10 = arith.constant 0 : index
    %34 = vector.load %arg5[%c0_9, %c0_10] : memref<128x1xf32, #tpu.memory_space<vmem>>, vector<128x1xf32>
    %35 = vector.broadcast %34 : vector<128x1xf32> to vector<128x512xf32>
    %36 = arith.addf %33, %35 : vector<128x512xf32>
    %37 = math.tanh %36 : vector<128x512xf32>
    %38 = arith.addf %37, %17 : vector<128x512xf32>
    %c0_11 = arith.constant 0 : index
    %c0_12 = arith.constant 0 : index
    %39 = vector.load %arg6[%c0_11, %c0_12] : memref<128x128xf32, #tpu.memory_space<vmem>>, vector<128x128xf32>
    %cst_13 = arith.constant dense<0.000000e+00> : vector<128x512xf32>
    %40 = tpu.matmul %39, %38, %cst_13 {dimension_numbers = #tpu.dot_dimension_numbers<[1], [0], [0], [1], [0, 0, 1, 1], [], []>} : vector<128x128xf32>, vector<128x512xf32>, vector<128x512xf32> -> vector<128x512xf32>
    %c0_14 = arith.constant 0 : index
    %c0_15 = arith.constant 0 : index
    %41 = vector.load %arg7[%c0_14, %c0_15] : memref<128x1xf32, #tpu.memory_space<vmem>>, vector<128x1xf32>
    %42 = vector.broadcast %41 : vector<128x1xf32> to vector<128x512xf32>
    %43 = arith.addf %40, %42 : vector<128x512xf32>
    %44 = math.tanh %43 : vector<128x512xf32>
    %c0_16 = arith.constant 0 : index
    %c0_17 = arith.constant 0 : index
    %45 = vector.load %arg8[%c0_16, %c0_17] : memref<128x128xf32, #tpu.memory_space<vmem>>, vector<128x128xf32>
    %cst_18 = arith.constant dense<0.000000e+00> : vector<128x512xf32>
    %46 = tpu.matmul %45, %44, %cst_18 {dimension_numbers = #tpu.dot_dimension_numbers<[1], [0], [0], [1], [0, 0, 1, 1], [], []>} : vector<128x128xf32>, vector<128x512xf32>, vector<128x512xf32> -> vector<128x512xf32>
    %c0_19 = arith.constant 0 : index
    %c0_20 = arith.constant 0 : index
    %47 = vector.load %arg9[%c0_19, %c0_20] : memref<128x1xf32, #tpu.memory_space<vmem>>, vector<128x1xf32>
    %48 = vector.broadcast %47 : vector<128x1xf32> to vector<128x512xf32>
    %49 = arith.addf %46, %48 : vector<128x512xf32>
    %50 = math.tanh %49 : vector<128x512xf32>
    %51 = arith.addf %50, %38 : vector<128x512xf32>
    %c0_21 = arith.constant 0 : index
    %c0_22 = arith.constant 0 : index
    %52 = vector.load %arg10[%c0_21, %c0_22] : memref<128x128xf32, #tpu.memory_space<vmem>>, vector<128x128xf32>
    %cst_23 = arith.constant dense<0.000000e+00> : vector<128x512xf32>
    %53 = tpu.matmul %52, %51, %cst_23 {dimension_numbers = #tpu.dot_dimension_numbers<[1], [0], [0], [1], [0, 0, 1, 1], [], []>} : vector<128x128xf32>, vector<128x512xf32>, vector<128x512xf32> -> vector<128x512xf32>
    %c0_24 = arith.constant 0 : index
    %c0_25 = arith.constant 0 : index
    %54 = vector.load %arg11[%c0_24, %c0_25] : memref<128x1xf32, #tpu.memory_space<vmem>>, vector<128x1xf32>
    %55 = vector.broadcast %54 : vector<128x1xf32> to vector<128x512xf32>
    %56 = arith.addf %53, %55 : vector<128x512xf32>
    %57 = math.tanh %56 : vector<128x512xf32>
    %c0_26 = arith.constant 0 : index
    %c0_27 = arith.constant 0 : index
    %58 = vector.load %arg12[%c0_26, %c0_27] : memref<128x128xf32, #tpu.memory_space<vmem>>, vector<128x128xf32>
    %cst_28 = arith.constant dense<0.000000e+00> : vector<128x512xf32>
    %59 = tpu.matmul %58, %57, %cst_28 {dimension_numbers = #tpu.dot_dimension_numbers<[1], [0], [0], [1], [0, 0, 1, 1], [], []>} : vector<128x128xf32>, vector<128x512xf32>, vector<128x512xf32> -> vector<128x512xf32>
    %c0_29 = arith.constant 0 : index
    %c0_30 = arith.constant 0 : index
    %60 = vector.load %arg13[%c0_29, %c0_30] : memref<128x1xf32, #tpu.memory_space<vmem>>, vector<128x1xf32>
    %61 = vector.broadcast %60 : vector<128x1xf32> to vector<128x512xf32>
    %62 = arith.addf %59, %61 : vector<128x512xf32>
    %63 = math.tanh %62 : vector<128x512xf32>
    %64 = arith.addf %63, %51 : vector<128x512xf32>
    %c0_31 = arith.constant 0 : index
    %c0_32 = arith.constant 0 : index
    %65 = vector.load %arg14[%c0_31, %c0_32] : memref<1x128xf32, #tpu.memory_space<vmem>>, vector<1x128xf32>
    %cst_33 = arith.constant dense<0.000000e+00> : vector<1x512xf32>
    %66 = tpu.matmul %65, %64, %cst_33 {dimension_numbers = #tpu.dot_dimension_numbers<[1], [0], [0], [1], [0, 0, 1, 1], [], []>} : vector<1x128xf32>, vector<128x512xf32>, vector<1x512xf32> -> vector<1x512xf32>
    %c0_34 = arith.constant 0 : index
    %c0_35 = arith.constant 0 : index
    %67 = vector.load %arg15[%c0_34, %c0_35] : memref<1x512xf32, #tpu.memory_space<vmem>>, vector<1x512xf32>
    tpu.vector_store %arg15[%c0_34, %c0_35], %66 {strides = array<i32>} : memref<1x512xf32, #tpu.memory_space<vmem>>, vector<1x512xf32>,
    return
  }
  func.func @transform_0(%arg0: i32) -> (i32, i32) {
    %c0_i32 = arith.constant 0 : i32
    %c0_i32_0 = arith.constant 0 : i32
    return %c0_i32, %arg0 : i32, i32
  }
  func.func @transform_1(%arg0: i32) -> (i32, i32) {
    %c0_i32 = arith.constant 0 : i32
    %c0_i32_0 = arith.constant 0 : i32
    %c0_i32_1 = arith.constant 0 : i32
    return %c0_i32, %c0_i32_0 : i32, i32
  }
  func.func @transform_2(%arg0: i32) -> (i32, i32) {
    %c0_i32 = arith.constant 0 : i32
    %c0_i32_0 = arith.constant 0 : i32
    %c0_i32_1 = arith.constant 0 : i32
    return %c0_i32, %c0_i32_0 : i32, i32
  }
  func.func @transform_3(%arg0: i32) -> (i32, i32) {
    %c0_i32 = arith.constant 0 : i32
    %c0_i32_0 = arith.constant 0 : i32
    %c0_i32_1 = arith.constant 0 : i32
    return %c0_i32, %c0_i32_0 : i32, i32
  }
  func.func @transform_4(%arg0: i32) -> (i32, i32) {
    %c0_i32 = arith.constant 0 : i32
    %c0_i32_0 = arith.constant 0 : i32
    %c0_i32_1 = arith.constant 0 : i32
    return %c0_i32, %c0_i32_0 : i32, i32
  }
  func.func @transform_5(%arg0: i32) -> (i32, i32) {
    %c0_i32 = arith.constant 0 : i32
    %c0_i32_0 = arith.constant 0 : i32
    %c0_i32_1 = arith.constant 0 : i32
    return %c0_i32, %c0_i32_0 : i32, i32
  }
  func.func @transform_6(%arg0: i32) -> (i32, i32) {
    %c0_i32 = arith.constant 0 : i32
    %c0_i32_0 = arith.constant 0 : i32
    %c0_i32_1 = arith.constant 0 : i32
    return %c0_i32, %c0_i32_0 : i32, i32
  }
  func.func @transform_7(%arg0: i32) -> (i32, i32) {
    %c0_i32 = arith.constant 0 : i32
    %c0_i32_0 = arith.constant 0 : i32
    %c0_i32_1 = arith.constant 0 : i32
    return %c0_i32, %c0_i32_0 : i32, i32
  }
  func.func @transform_8(%arg0: i32) -> (i32, i32) {
    %c0_i32 = arith.constant 0 : i32
    %c0_i32_0 = arith.constant 0 : i32
    %c0_i32_1 = arith.constant 0 : i32
    return %c0_i32, %c0_i32_0 : i32, i32
  }
  func.func @transform_9(%arg0: i32) -> (i32, i32) {
    %c0_i32 = arith.constant 0 : i32
    %c0_i32_0 = arith.constant 0 : i32
    %c0_i32_1 = arith.constant 0 : i32
    return %c0_i32, %c0_i32_0 : i32, i32
  }
  func.func @transform_10(%arg0: i32) -> (i32, i32) {
    %c0_i32 = arith.constant 0 : i32
    %c0_i32_0 = arith.constant 0 : i32
    %c0_i32_1 = arith.constant 0 : i32
    return %c0_i32, %c0_i32_0 : i32, i32
  }
  func.func @transform_11(%arg0: i32) -> (i32, i32) {
    %c0_i32 = arith.constant 0 : i32
    %c0_i32_0 = arith.constant 0 : i32
    %c0_i32_1 = arith.constant 0 : i32
    return %c0_i32, %c0_i32_0 : i32, i32
  }
  func.func @transform_12(%arg0: i32) -> (i32, i32) {
    %c0_i32 = arith.constant 0 : i32
    %c0_i32_0 = arith.constant 0 : i32
    %c0_i32_1 = arith.constant 0 : i32
    return %c0_i32, %c0_i32_0 : i32, i32
  }
  func.func @transform_13(%arg0: i32) -> (i32, i32) {
    %c0_i32 = arith.constant 0 : i32
    %c0_i32_0 = arith.constant 0 : i32
    %c0_i32_1 = arith.constant 0 : i32
    return %c0_i32, %c0_i32_0 : i32, i32
  }
  func.func @transform_14(%arg0: i32) -> (i32, i32) {
    %c0_i32 = arith.constant 0 : i32
    %c0_i32_0 = arith.constant 0 : i32
    return %c0_i32, %arg0 : i32, i32
  }
}

module attributes {stable_mosaic.version = 11 : i64} {
  func.func @_resnet_kernel(%arg0: i32, %arg1: memref<2x512xf32, #tpu.memory_space<vmem>>, %arg2: memref<128x2xf32, #tpu.memory_space<vmem>>, %arg3: memref<128x1xf32, #tpu.memory_space<vmem>>, %arg4: memref<128x128xf32, #tpu.memory_space<vmem>>, %arg5: memref<128x1xf32, #tpu.memory_space<vmem>>, %arg6: memref<128x128xf32, #tpu.memory_space<vmem>>, %arg7: memref<128x1xf32, #tpu.memory_space<vmem>>, %arg8: memref<128x128xf32, #tpu.memory_space<vmem>>, %arg9: memref<128x1xf32, #tpu.memory_space<vmem>>, %arg10: memref<128x128xf32, #tpu.memory_space<vmem>>, %arg11: memref<128x1xf32, #tpu.memory_space<vmem>>, %arg12: memref<128x128xf32, #tpu.memory_space<vmem>>, %arg13: memref<128x1xf32, #tpu.memory_space<vmem>>, %arg14: memref<1x128xf32, #tpu.memory_space<vmem>>, %arg15: memref<1x512xf32, #tpu.memory_space<vmem>>) attributes {dimension_semantics = [#tpu.dimension_semantics<parallel>], iteration_bounds = array<i64: 2>, scalar_prefetch = 0 : i64, scratch_operands = 0 : i64, tpu.core_type = #tpu.core_type<tc>, window_params = [{transform_indices = @transform_0, window_bounds = array<i64: 2, 512>}, {pipeline_mode = #tpu.pipeline_mode<synchronous>, transform_indices = @transform_1, window_bounds = array<i64: 128, 2>}, {pipeline_mode = #tpu.pipeline_mode<synchronous>, transform_indices = @transform_2, window_bounds = array<i64: 128, 1>}, {pipeline_mode = #tpu.pipeline_mode<synchronous>, transform_indices = @transform_3, window_bounds = array<i64: 128, 128>}, {pipeline_mode = #tpu.pipeline_mode<synchronous>, transform_indices = @transform_4, window_bounds = array<i64: 128, 1>}, {pipeline_mode = #tpu.pipeline_mode<synchronous>, transform_indices = @transform_5, window_bounds = array<i64: 128, 128>}, {pipeline_mode = #tpu.pipeline_mode<synchronous>, transform_indices = @transform_6, window_bounds = array<i64: 128, 1>}, {pipeline_mode = #tpu.pipeline_mode<synchronous>, transform_indices = @transform_7, window_bounds = array<i64: 128, 128>}, {pipeline_mode = #tpu.pipeline_mode<synchronous>, transform_indices = @transform_8, window_bounds = array<i64: 128, 1>}, {pipeline_mode = #tpu.pipeline_mode<synchronous>, transform_indices = @transform_9, window_bounds = array<i64: 128, 128>}, {pipeline_mode = #tpu.pipeline_mode<synchronous>, transform_indices = @transform_10, window_bounds = array<i64: 128, 1>}, {pipeline_mode = #tpu.pipeline_mode<synchronous>, transform_indices = @transform_11, window_bounds = array<i64: 128, 128>}, {pipeline_mode = #tpu.pipeline_mode<synchronous>, transform_indices = @transform_12, window_bounds = array<i64: 128, 1>}, {pipeline_mode = #tpu.pipeline_mode<synchronous>, transform_indices = @transform_13, window_bounds = array<i64: 1, 128>}, {transform_indices = @transform_14, window_bounds = array<i64: 1, 512>}]} {
    %c0 = arith.constant 0 : index
    %c0_0 = arith.constant 0 : index
    %0 = vector.load %arg1[%c0, %c0_0] : memref<2x512xf32, #tpu.memory_space<vmem>>, vector<1x512xf32>
    %c1 = arith.constant 1 : index
    %c0_1 = arith.constant 0 : index
    %1 = vector.load %arg1[%c1, %c0_1] : memref<2x512xf32, #tpu.memory_space<vmem>>, vector<1x512xf32>
    %2 = tpu.iota {dimensions = array<i32: 0>} : vector<128x1xi32>
    %c0_i32 = arith.constant 0 : i32
    %3 = vector.broadcast %c0_i32 : i32 to vector<128x1xi32>
    %4 = arith.cmpi eq, %2, %3 : vector<128x1xi32>
    %c1_i32 = arith.constant 1 : i32
    %5 = vector.broadcast %c1_i32 : i32 to vector<128x1xi32>
    %6 = arith.cmpi eq, %2, %5 : vector<128x1xi32>
    %cst = arith.constant 0.000000e+00 : f32
    %7 = vector.shape_cast %6 : vector<128x1xi1> to vector<128x1xi1>
    %8 = vector.broadcast %7 : vector<128x1xi1> to vector<128x512xi1>
    %9 = vector.shape_cast %1 : vector<1x512xf32> to vector<1x512xf32>
    %10 = vector.broadcast %9 : vector<1x512xf32> to vector<128x512xf32>
    %11 = vector.broadcast %cst : f32 to vector<128x512xf32>
    %12 = arith.select %8, %10, %11 : vector<128x512xi1>, vector<128x512xf32>
    %13 = vector.shape_cast %4 : vector<128x1xi1> to vector<128x1xi1>
    %14 = vector.broadcast %13 : vector<128x1xi1> to vector<128x512xi1>
    %15 = vector.shape_cast %0 : vector<1x512xf32> to vector<1x512xf32>
    %16 = vector.broadcast %15 : vector<1x512xf32> to vector<128x512xf32>
    %17 = arith.select %14, %16, %12 : vector<128x512xi1>, vector<128x512xf32>
    %c0_2 = arith.constant 0 : index
    %c0_3 = arith.constant 0 : index
    %18 = vector.load %arg2[%c0_2, %c0_3] : memref<128x2xf32, #tpu.memory_space<vmem>>, vector<128x2xf32>
    %19 = vector.extract_strided_slice %18 {offsets = [0, 0], sizes = [128, 1], strides = [1, 1]} : vector<128x2xf32> to vector<128x1xf32>
    %20 = vector.broadcast %19 : vector<128x1xf32> to vector<128x512xf32>
    %21 = vector.broadcast %0 : vector<1x512xf32> to vector<128x512xf32>
    %22 = arith.mulf %20, %21 : vector<128x512xf32>
    %23 = vector.extract_strided_slice %18 {offsets = [0, 1], sizes = [128, 1], strides = [1, 1]} : vector<128x2xf32> to vector<128x1xf32>
    %24 = vector.broadcast %23 : vector<128x1xf32> to vector<128x512xf32>
    %25 = vector.broadcast %1 : vector<1x512xf32> to vector<128x512xf32>
    %26 = arith.mulf %24, %25 : vector<128x512xf32>
    %27 = arith.addf %22, %26 : vector<128x512xf32>
    %c0_4 = arith.constant 0 : index
    %c0_5 = arith.constant 0 : index
    %28 = vector.load %arg3[%c0_4, %c0_5] : memref<128x1xf32, #tpu.memory_space<vmem>>, vector<128x1xf32>
    %29 = vector.broadcast %28 : vector<128x1xf32> to vector<128x512xf32>
    %30 = arith.addf %27, %29 : vector<128x512xf32>
    %31 = math.tanh %30 : vector<128x512xf32>
    %c0_6 = arith.constant 0 : index
    %c0_7 = arith.constant 0 : index
    %32 = vector.load %arg4[%c0_6, %c0_7] : memref<128x128xf32, #tpu.memory_space<vmem>>, vector<128x128xf32>
    %cst_8 = arith.constant dense<0.000000e+00> : vector<128x512xf32>
    %33 = tpu.matmul %32, %31, %cst_8 {dimension_numbers = #tpu.dot_dimension_numbers<[1], [0], [0], [1], [0, 0, 1, 1], [], []>} : vector<128x128xf32>, vector<128x512xf32>, vector<128x512xf32> -> vector<128x512xf32>
    %c0_9 = arith.constant 0 : index
    %c0_10 = arith.constant 0 : index
    %34 = vector.load %arg5[%c0_9, %c0_10] : memref<128x1xf32, #tpu.memory_space<vmem>>, vector<128x1xf32>
    %35 = vector.broadcast %34 : vector<128x1xf32> to vector<128x512xf32>
    %36 = arith.addf %33, %35 : vector<128x512xf32>
    %37 = math.tanh %36 : vector<128x512xf32>
    %38 = arith.addf %37, %17 : vector<128x512xf32>
    %c0_11 = arith.constant 0 : index
    %c0_12 = arith.constant 0 : index
    %39 = vector.load %arg6[%c0_11, %c0_12] : memref<128x128xf32, #tpu.memory_space<vmem>>, vector<128x128xf32>
    %cst_13 = arith.constant dense<0.000000e+00> : vector<128x512xf32>
    %40 = tpu.matmul %39, %38, %cst_13 {dimension_numbers = #tpu.dot_dimension_numbers<[1], [0], [0], [1], [0, 0, 1, 1], [], []>} : vector<128x128xf32>, vector<128x512xf32>, vector<128x512xf32> -> vector<128x512xf32>
    %c0_14 = arith.constant 0 : index
    %c0_15 = arith.constant 0 : index
    %41 = vector.load %arg7[%c0_14, %c0_15] : memref<128x1xf32, #tpu.memory_space<vmem>>, vector<128x1xf32>
    %42 = vector.broadcast %41 : vector<128x1xf32> to vector<128x512xf32>
    %43 = arith.addf %40, %42 : vector<128x512xf32>
    %44 = math.tanh %43 : vector<128x512xf32>
    %c0_16 = arith.constant 0 : index
    %c0_17 = arith.constant 0 : index
    %45 = vector.load %arg8[%c0_16, %c0_17] : memref<128x128xf32, #tpu.memory_space<vmem>>, vector<128x128xf32>
    %cst_18 = arith.constant dense<0.000000e+00> : vector<128x512xf32>
    %46 = tpu.matmul %45, %44, %cst_18 {dimension_numbers = #tpu.dot_dimension_numbers<[1], [0], [0], [1], [0, 0, 1, 1], [], []>} : vector<128x128xf32>, vector<128x512xf32>, vector<128x512xf32> -> vector<128x512xf32>
    %c0_19 = arith.constant 0 : index
    %c0_20 = arith.constant 0 : index
    %47 = vector.load %arg9[%c0_19, %c0_20] : memref<128x1xf32, #tpu.memory_space<vmem>>, vector<128x1xf32>
    %48 = vector.broadcast %47 : vector<128x1xf32> to vector<128x512xf32>
    %49 = arith.addf %46, %48 : vector<128x512xf32>
    %50 = math.tanh %49 : vector<128x512xf32>
    %51 = arith.addf %50, %38 : vector<128x512xf32>
    %c0_21 = arith.constant 0 : index
    %c0_22 = arith.constant 0 : index
    %52 = vector.load %arg10[%c0_21, %c0_22] : memref<128x128xf32, #tpu.memory_space<vmem>>, vector<128x128xf32>
    %cst_23 = arith.constant dense<0.000000e+00> : vector<128x512xf32>
    %53 = tpu.matmul %52, %51, %cst_23 {dimension_numbers = #tpu.dot_dimension_numbers<[1], [0], [0], [1], [0, 0, 1, 1], [], []>} : vector<128x128xf32>, vector<128x512xf32>, vector<128x512xf32> -> vector<128x512xf32>
    %c0_24 = arith.constant 0 : index
    %c0_25 = arith.constant 0 : index
    %54 = vector.load %arg11[%c0_24, %c0_25] : memref<128x1xf32, #tpu.memory_space<vmem>>, vector<128x1xf32>
    %55 = vector.broadcast %54 : vector<128x1xf32> to vector<128x512xf32>
    %56 = arith.addf %53, %55 : vector<128x512xf32>
    %57 = math.tanh %56 : vector<128x512xf32>
    %c0_26 = arith.constant 0 : index
    %c0_27 = arith.constant 0 : index
    %58 = vector.load %arg12[%c0_26, %c0_27] : memref<128x128xf32, #tpu.memory_space<vmem>>, vector<128x128xf32>
    %cst_28 = arith.constant dense<0.000000e+00> : vector<128x512xf32>
    %59 = tpu.matmul %58, %57, %cst_28 {dimension_numbers = #tpu.dot_dimension_numbers<[1], [0], [0], [1], [0, 0, 1, 1], [], []>} : vector<128x128xf32>, vector<128x512xf32>, vector<128x512xf32> -> vector<128x512xf32>
    %c0_29 = arith.constant 0 : index
    %c0_30 = arith.constant 0 : index
    %60 = vector.load %arg13[%c0_29, %c0_30] : memref<128x1xf32, #tpu.memory_space<vmem>>, vector<128x1xf32>
    %61 = vector.broadcast %60 : vector<128x1xf32> to vector<128x512xf32>
    %62 = arith.addf %59, %61 : vector<128x512xf32>
    %63 = math.tanh %62 : vector<128x512xf32>
    %64 = arith.addf %63, %51 : vector<128x512xf32>
    %c0_31 = arith.constant 0 : index
    %c0_32 = arith.constant 0 : index
    %65 = vector.load %arg14[%c0_31, %c0_32] : memref<1x128xf32, #tpu.memory_space<vmem>>, vector<1x128xf32>
    %cst_33 = arith.constant dense<0.000000e+00> : vector<1x512xf32>
    %66 = tpu.matmul %65, %64, %cst_33 {dimension_numbers = #tpu.dot_dimension_numbers<[1], [0], [0], [1], [0, 0, 1, 1], [], []>} : vector<1x128xf32>, vector<128x512xf32>, vector<1x512xf32> -> vector<1x512xf32>
    %c0_34 = arith.constant 0 : index
    %c0_35 = arith.constant 0 : index
    %67 = vector.load %arg15[%c0_34, %c0_35] : memref<1x512xf32, #tpu.memory_space<vmem>>, vector<1x512xf32>
    tpu.vector_store %arg15[%c0_34, %c0_35], %66 {strides = array<i32>} : memref<1x512xf32, #tpu.memory_space<vmem>>, vector<1x512xf32>,
    return
  }
  func.func @transform_0(%arg0: i32) -> (i32, i32) {
    %c0_i32 = arith.constant 0 : i32
    %c0_i32_0 = arith.constant 0 : i32
    return %c0_i32, %arg0 : i32, i32
  }
  func.func @transform_1(%arg0: i32) -> (i32, i32) {
    %c0_i32 = arith.constant 0 : i32
    %c0_i32_0 = arith.constant 0 : i32
    %c0_i32_1 = arith.constant 0 : i32
    return %c0_i32, %c0_i32_0 : i32, i32
  }
  func.func @transform_2(%arg0: i32) -> (i32, i32) {
    %c0_i32 = arith.constant 0 : i32
    %c0_i32_0 = arith.constant 0 : i32
    %c0_i32_1 = arith.constant 0 : i32
    return %c0_i32, %c0_i32_0 : i32, i32
  }
  func.func @transform_3(%arg0: i32) -> (i32, i32) {
    %c0_i32 = arith.constant 0 : i32
    %c0_i32_0 = arith.constant 0 : i32
    %c0_i32_1 = arith.constant 0 : i32
    return %c0_i32, %c0_i32_0 : i32, i32
  }
  func.func @transform_4(%arg0: i32) -> (i32, i32) {
    %c0_i32 = arith.constant 0 : i32
    %c0_i32_0 = arith.constant 0 : i32
    %c0_i32_1 = arith.constant 0 : i32
    return %c0_i32, %c0_i32_0 : i32, i32
  }
  func.func @transform_5(%arg0: i32) -> (i32, i32) {
    %c0_i32 = arith.constant 0 : i32
    %c0_i32_0 = arith.constant 0 : i32
    %c0_i32_1 = arith.constant 0 : i32
    return %c0_i32, %c0_i32_0 : i32, i32
  }
  func.func @transform_6(%arg0: i32) -> (i32, i32) {
    %c0_i32 = arith.constant 0 : i32
    %c0_i32_0 = arith.constant 0 : i32
    %c0_i32_1 = arith.constant 0 : i32
    return %c0_i32, %c0_i32_0 : i32, i32
  }
  func.func @transform_7(%arg0: i32) -> (i32, i32) {
    %c0_i32 = arith.constant 0 : i32
    %c0_i32_0 = arith.constant 0 : i32
    %c0_i32_1 = arith.constant 0 : i32
    return %c0_i32, %c0_i32_0 : i32, i32
  }
  func.func @transform_8(%arg0: i32) -> (i32, i32) {
    %c0_i32 = arith.constant 0 : i32
    %c0_i32_0 = arith.constant 0 : i32
    %c0_i32_1 = arith.constant 0 : i32
    return %c0_i32, %c0_i32_0 : i32, i32
  }
  func.func @transform_9(%arg0: i32) -> (i32, i32) {
    %c0_i32 = arith.constant 0 : i32
    %c0_i32_0 = arith.constant 0 : i32
    %c0_i32_1 = arith.constant 0 : i32
    return %c0_i32, %c0_i32_0 : i32, i32
  }
  func.func @transform_10(%arg0: i32) -> (i32, i32) {
    %c0_i32 = arith.constant 0 : i32
    %c0_i32_0 = arith.constant 0 : i32
    %c0_i32_1 = arith.constant 0 : i32
    return %c0_i32, %c0_i32_0 : i32, i32
  }
  func.func @transform_11(%arg0: i32) -> (i32, i32) {
    %c0_i32 = arith.constant 0 : i32
    %c0_i32_0 = arith.constant 0 : i32
    %c0_i32_1 = arith.constant 0 : i32
    return %c0_i32, %c0_i32_0 : i32, i32
  }
  func.func @transform_12(%arg0: i32) -> (i32, i32) {
    %c0_i32 = arith.constant 0 : i32
    %c0_i32_0 = arith.constant 0 : i32
    %c0_i32_1 = arith.constant 0 : i32
    return %c0_i32, %c0_i32_0 : i32, i32
  }
  func.func @transform_13(%arg0: i32) -> (i32, i32) {
    %c0_i32 = arith.constant 0 : i32
    %c0_i32_0 = arith.constant 0 : i32
    %c0_i32_1 = arith.constant 0 : i32
    return %c0_i32, %c0_i32_0 : i32, i32
  }
  func.func @transform_14(%arg0: i32) -> (i32, i32) {
    %c0_i32 = arith.constant 0 : i32
    %c0_i32_0 = arith.constant 0 : i32
    return %c0_i32, %arg0 : i32, i32
  }
}

</mosaic_0001>

<bundles_post_ra>
// kernel: tpu_custom_call.1
= control target key start
LH: loop header
LB: loop body
LE: loop exit
PB: predicated region body
PF: predicated region fallthrough
CT: control target
= control target key end

     0   :  { %s7450_s0 = inlined_call_operand.vmem [shape: f32[2,1024], index: 0, kind: input, shape index: {}]   ;;  %s7451_s1 = inlined_call_operand.vmem [shape: f32[128,2], index: 1, kind: input, shape index: {}]   ;;  %s7452_s2 = inlined_call_operand.vmem [shape: f32[128,1], index: 2, kind: input, shape index: {}]   ;;  %s7453_s3 = inlined_call_operand.vmem [shape: f32[128,128], index: 3, kind: input, shape index: {}]   ;;  %s7454_s4 = inlined_call_operand.vmem [shape: f32[128,1], index: 4, kind: input, shape index: {}]   ;;  %s7455_s5 = inlined_call_operand.vmem [shape: f32[128,128], index: 5, kind: input, shape index: {}]   ;;  %s7456_s6 = inlined_call_operand.vmem [shape: f32[128,1], index: 6, kind: input, shape index: {}]   ;;  %s7457_s7 = inlined_call_operand.vmem [shape: f32[128,128], index: 7, kind: input, shape index: {}]   ;;  %s7458_s8 = inlined_call_operand.vmem [shape: f32[128,1], index: 8, kind: input, shape index: {}]   ;;  %s7459_s9 = inlined_call_operand.vmem [shape: f32[128,128], index: 9, kind: input, shape index: {}]   ;;  %s7460_s10 = inlined_call_operand.vmem [shape: f32[128,1], index: 10, kind: input, shape index: {}]   ;;  %s7461_s11 = inlined_call_operand.vmem [shape: f32[128,128], index: 11, kind: input, shape index: {}]   ;;  %s7462_s12 = inlined_call_operand.vmem [shape: f32[128,1], index: 12, kind: input, shape index: {}]   ;;  %s7463_s13 = inlined_call_operand.vmem [shape: f32[1,128], index: 13, kind: input, shape index: {}]   ;;  %s7464_s14 = inlined_call_operand.hbm [shape: f32[1,1024], index: 14, kind: output, shape index: {}]  }
   0x1   :  { %7523 = sst [smem:[#allocation35_spill]] %s7450_s0 }
   0x2   :  { %7524 = sst [smem:[#allocation36_spill]] %s7451_s1 }
   0x3   :  { %7525 = sst [smem:[#allocation37_spill]] %s7452_s2 }
   0x4   :  { %19 = vsyncpa [#allocation3], 0 }
   0x5   :  { %21 = vsyncpa [#allocation3 + $0x1], 0  ;;  %s5635_s29 = smov 0   ;;  %s5637_s30 = smov 0  }
   0x6   :  { %s5639_s15 = smov 0   ;;  %s5641_s16 = smov 0  }
   0x7 LB: > { %s5656_s17 = sadd.s32 4294967295, %s5553_s16   ;;  %s4264_s18 = sadd.s32 4294967294, %s5553_s16   ;;  %s5553_s16 = sphi %s5641_s16, %s7648_s16   ;;  %s5549_s15 = sphi %s5639_s15, %s7647_s15   ;;  %s5545_s30 = sphi %s5637_s30, %s7646_s30   ;;  %s5541_s29 = sphi %s5635_s29, %s7645_s29  }
   0x8   : > { %s5660_s19 = sadd.s32 1, %s5553_s16   ;;  %s333_s20 = sadd.s32 1, %s5549_s15 }
   0x9   : > { %s330_s21 = ssub.s32 %s5553_s16, %s5660_s19  ;;  %p343_p0 = scmp.ne.s32.totalorder %s5549_s15, %s5545_s30 }
   0xa   : > { %p331_p1 = scmp.eq.s32.totalorder %s330_s21, 0  ;;  %p344_p2 = scmp.eq.s32.totalorder %s5656_s17, 1 }
   0xb   : > { %p349_p3 = scmp.ne.s32.totalorder %s5545_s30, %s5541_s29  ;;  %p350_p4 = scmp.eq.s32.totalorder %s4264_s18, 1 }
   0xc   : > { %s5671_s22 = scalar_select %p331_p1, %s5549_s15, %s333_s20  }
   0xd   : > { %p5673_p5 = por %p344_p2, %p343_p0  ;;  %p5677_p6 = por %p350_p4, %p349_p3 }
   0xe   : > { %7526 = sst [smem:[#allocation5_spill]] %s5671_s22  ;;  %p4267_p7 = scmp.ge.s32.totalorder %s5553_s16, 1 }
   0xf   : > { %p416_p8 = scmp.lt.s32.totalorder %s5553_s16, 3 }
  0x11   : > { %p417_p9 = pnand %p4267_p7, %p416_p8 }
  0x13   : > { %420 = sbr.rel (%p417_p9) target bundleno = 2043 (0x7fb), region = 76 }
  0x1a   : > { %s7529_s1 = sld [smem:[#allocation36_spill]]  ;;  %v5555_v2 = vmov 1   ;;  %v5556_v7 = vmov 0   ;;  %s7530_s2 = sld [smem:[#allocation37_spill]]  ;;  %v1347_v25 = vld [vmem:[%s7454_s4] sm:$0xff]  ;;  %v1349_v26 = vld [vmem:[%s7454_s4 + $0x10] sm:$0xff] }
  0x1b   : > { %4707 = vset.pattern.permute.xlu0 %v5555_v2  ;;  %4705 = vset.pattern.permute.xlu1 %v5555_v2  ;;  %v1351_v28 = vld [vmem:[%s7454_s4 + $0x20] sm:$0xff]  ;;  %v1353_v29 = vld [vmem:[%s7454_s4 + $0x30] sm:$0xff]  ;;  %v1348_v58 = vld [vmem:[%s7454_s4 + $0x8] sm:$0xff]  ;;  %s4269_s25 = sshll.u32 %s5656_s17, 2  ;;  %s7532_s0 = sld [smem:[#allocation35_spill]] }
  0x1c   : > { %v1355_v31 = vld [vmem:[%s7454_s4 + $0x40] sm:$0xff]  ;;  %v1357_v32 = vld [vmem:[%s7454_s4 + $0x50] sm:$0xff]  ;;  %v1350_v61 = vld [vmem:[%s7454_s4 + $0x18] sm:$0xff]  ;;  %p463_p10 = scmp.lt.s32.totalorder %s4269_s25, 7  ;;  %s459_s21 = sand.u32 1, %s5545_s30  }
  0x1d   : > { %v1359_v34 = vld [vmem:[%s7454_s4 + $0x60] sm:$0xff]  ;;  %v1361_v35 = vld [vmem:[%s7454_s4 + $0x70] sm:$0xff] }
  0x1e   : > { %v1909_v37 = vld [vmem:[%s7456_s6] sm:$0xff]  ;;  %v1911_v38 = vld [vmem:[%s7456_s6 + $0x10] sm:$0xff]  ;;  %s7650_s25 = smov (!%p463_p10, %s4269_s25), 7 }
  0x1f   : > { %v1913_v39 = vld [vmem:[%s7456_s6 + $0x20] sm:$0xff]  ;;  %v1915_v41 = vld [vmem:[%s7456_s6 + $0x30] sm:$0xff]  ;;  %s4270_s18 = sshll.u32 %s7650_s25, 1 }
  0x20   : > { %v757_v0 = vld [vmem:[%s7529_s1 + $0x10] sm:$0xff]  ;;  %v755_v1 = vld [vmem:[%s7529_s1] sm:$0xff]  ;;  %v756_v4 = vld [vmem:[%s7529_s1 + $0x8] sm:$0xff] }
  0x21   : > { %924 = vperm.xlu0 %4707, %v757_v0   ;;  %916 = vperm.xlu1 %4705, %v755_v1   ;;  %v759_v3 = vld [vmem:[%s7529_s1 + $0x20] sm:$0xff]  ;;  %v761_v5 = vld [vmem:[%s7529_s1 + $0x30] sm:$0xff]  ;;  %v758_v6 = vld [vmem:[%s7529_s1 + $0x18] sm:$0xff]  ;;  %s466_s26 = scalar_lea.vmem %s7532_s0, %s4270_s18 }
  0x22   : > { %v763_v8 = vld [vmem:[%s7529_s1 + $0x40] sm:$0xff]  ;;  %v765_v9 = vld [vmem:[%s7529_s1 + $0x50] sm:$0xff]  ;;  %v760_v13 = vld [vmem:[%s7529_s1 + $0x28] sm:$0xff] }
  0x23   : > { %v1107_v10 = vld [vmem:[%s7530_s2] sm:$0xff]  ;;  %v5724_v12 = vld [vmem:[%s7529_s1 + $0x70] sm:$0xff]  ;;  %v1108_v15 = vld [vmem:[%s7530_s2 + $0x8] sm:$0xff] }
  0x24   : > { %v5717_v11 = vld [vmem:[%s7529_s1 + $0x60] sm:$0xff]  ;;  %v1109_v14 = vld [vmem:[%s7530_s2 + $0x10] sm:$0xff]  ;;  %v1110_v16 = vld [vmem:[%s7530_s2 + $0x18] sm:$0xff] }
  0x25   : > { %932 = vperm.xlu0 %4707, %v759_v3   ;;  %920 = vperm.xlu1 %4705, %v756_v4   ;;  %v762_v17 = vld [vmem:[%s7529_s1 + $0x38] sm:$0xff]  ;;  %v1112_v18 = vld [vmem:[%s7530_s2 + $0x28] sm:$0xff]  ;;  %v1111_v20 = vld [vmem:[%s7530_s2 + $0x20] sm:$0xff] }
  0x26   : > { %v1114_v19 = vld [vmem:[%s7530_s2 + $0x38] sm:$0xff]  ;;  %v1116_v21 = vld [vmem:[%s7530_s2 + $0x48] sm:$0xff]  ;;  %v1113_v27 = vld [vmem:[%s7530_s2 + $0x30] sm:$0xff] }
  0x27   : > { %v1118_v22 = vld [vmem:[%s7530_s2 + $0x58] sm:$0xff]  ;;  %v764_v23 = vld [vmem:[%s7529_s1 + $0x48] sm:$0xff]  ;;  %v1115_v33 = vld [vmem:[%s7530_s2 + $0x40] sm:$0xff] }
  0x28   : > { %v1120_v24 = vld [vmem:[%s7530_s2 + $0x68] sm:$0xff]  ;;  %v766_v30 = vld [vmem:[%s7529_s1 + $0x58] sm:$0xff]  ;;  %v1117_v40 = vld [vmem:[%s7530_s2 + $0x50] sm:$0xff] }
  0x29   : > { %940 = vperm.xlu0 %4707, %v761_v5   ;;  %4706 = vset.pattern.permute.xlu1 %v5556_v7  ;;  %v768_v36 = vld [vmem:[%s7529_s1 + $0x68] sm:$0xff]  ;;  %v1917_v42 = vld [vmem:[%s7456_s6 + $0x40] sm:$0xff]  ;;  %v770_v43 = vld [vmem:[%s7529_s1 + $0x78] sm:$0xff]  ;;  %s4268_s1 = sshll.u32 %s459_s21, 2 }
  0x2a   : > { %788 = vperm.xlu1 %4706, %v758_v6   ;;  %v1919_v44 = vld [vmem:[%s7456_s6 + $0x50] sm:$0xff]  ;;  %v1921_v45 = vld [vmem:[%s7456_s6 + $0x60] sm:$0xff]  ;;  %v1122_v54 = vld [vmem:[%s7530_s2 + $0x78] sm:$0xff]  ;;  %s461_s27 = scalar_lea.vmem [#allocation2], %s4268_s1 }
  0x2b   : > { %v1119_v46 = vld [vmem:[%s7530_s2 + $0x60] sm:$0xff]  ;;  %v1923_v47 = vld [vmem:[%s7456_s6 + $0x70] sm:$0xff]  ;;  %s4205_s28 = sshll.u32 %s461_s27, 4  ;;  %s7410_s28 = int_to_ptr.vmem [resolvable:$true] %s4205_s28 }
  0x2c   : > { %v1121_v50 = vld [vmem:[%s7530_s2 + $0x70] sm:$0xff]  ;;  %v2407_v51 = vld [vmem:[%s7458_s8] sm:$0xff]  ;;  %s4191_s2 = scalar_lea.sflag [#allocation3], %s459_s21  ;;  %s5491_s22 = scalar_lea.vmem %s7410_s28, 64 }
  0x2d   : > { %948 = vperm.xlu0 %4707, %v763_v8   ;;  %v2409_v55 = vld [vmem:[%s7458_s8 + $0x10] sm:$0xff]  ;;  %v2411_v59 = vld [vmem:[%s7458_s8 + $0x20] sm:$0xff]  ;;  %p5492_p11 = scmp.ne.s32.totalorder %s7410_s28, %s5491_s22 }
  0x2e   : > { %4708 = vset.pattern.permute.xlu1 %v5555_v2  ;;  %v2413_v63 = vld [vmem:[%s7458_s8 + $0x30] sm:$0xff] }
  0x2f   : > { %928 = vperm.xlu1 %4708, %v758_v6   ;;  %v1354_v6 = vld [vmem:[%s7454_s4 + $0x38] sm:$0xff]  ;;  %p5493_p12 = pnand %p5492_p11, %p5673_p5 }
  0x31   : > { %956 = vperm.xlu0 %4707, %v765_v9   ;;  %p5494_p13 = pneg %p5493_p12 }
  0x33   : > { %4709 = vset.pattern.permute.xlu1 %v5556_v7 }
  0x34   : > { %1125 = vperm.xlu1 %4709, %v1107_v10  }
  0x35   : > { %964 = vperm.xlu0 %4707, %v5717_v11  }
  0x38   : > { %793 = vperm.xlu1 %4709, %v759_v3   ;;  %v2415_v3 = vld [vmem:[%s7458_s8 + $0x40] sm:$0xff] }
  0x39   : > { %972 = vperm.xlu0 %4707, %v5724_v12  }
  0x3c   : > { %798 = vperm.xlu1 %4709, %v760_v13  }
  0x3d   : > { %4720 = vset.pattern.permute.xlu0 %v5556_v7 }
  0x3e   : > { %773 = vperm.xlu0 %4720, %v755_v1   ;;  %v1352_v1 = vld [vmem:[%s7454_s4 + $0x28] sm:$0xff] }
  0x40   : > { %4710 = vset.pattern.permute.xlu1 %v5555_v2 }
  0x41   : > { %936 = vperm.xlu1 %4710, %v760_v13   ;;  %v2419_v13 = vld [vmem:[%s7458_s8 + $0x60] sm:$0xff] }
  0x42   : > { %778 = vperm.xlu0 %4720, %v756_v4  }
  0x45   : > { %4711 = vset.pattern.permute.xlu1 %v5556_v7 }
  0x46   : > { %783 = vperm.xlu0 %4720, %v757_v0   ;;  %1135 = vperm.xlu1 %4711, %v1109_v14  }
  0x4a   : > { %1130 = vperm.xlu0 %4720, %v1108_v15   ;;  %803 = vperm.xlu1 %4711, %v761_v5   ;;  %v7465_v5 = vlaneseq }
  0x4c   : > { %v5911_v10 = vshrl.u32 %v7465_v5, 7 }
  0x4e   : > { %1140 = vperm.xlu0 %4720, %v1110_v16   ;;  %808 = vperm.xlu1 %4711, %v762_v17   ;;  %7531 = vst [vmem:[#allocation6_spill] sm:$0xff] %v5911_v10  ;;  %v556_v14 = vsub.s32 0, %v5911_v10  ;;  %v1358_v16 = vld [vmem:[%s7454_s4 + $0x58] sm:$0xff]  ;;  %vm505_vm0 = vcmp.eq.s32.totalorder %v5911_v10, 1  ;;  %vm489_vm1 = vcmp.eq.s32.totalorder %v5911_v10, 0 }
  0x52   : > { %1150 = vperm.xlu0 %4720, %v1112_v18   ;;  %4712 = vset.pattern.permute.xlu1 %v5555_v2  ;;  %v4271_v18 = vld [vmem:[%s466_s26 + $0x1] ss:$2 sm:$0xf] }
  0x53   : > { %944 = vperm.xlu1 %4712, %v762_v17   ;;  %v7466_v17 = vmov 0.0  }
  0x54   : > { %1507 = vmatprep.mubr.f32.mxu0 %v7466_v17  ;;  %1668 = vmatprep.mubr.f32.mxu1 %v7466_v17 }
  0x56   : > { %1160 = vperm.xlu0 %4720, %v1114_v19   ;;  %v560_v19 = vsub.s32 1, %v5911_v10 }
  0x57   : > { %4713 = vset.pattern.permute.xlu1 %v5556_v7 }
  0x58   : > { %1145 = vperm.xlu1 %4713, %v1111_v20   ;;  %v564_v20 = vsub.s32 2, %v5911_v10 }
  0x5a   : > { %1170 = vperm.xlu0 %4720, %v1116_v21   ;;  %v568_v21 = vsub.s32 3, %v5911_v10 }
  0x5c   : > { %813 = vperm.xlu1 %4713, %v763_v8   ;;  %v2417_v8 = vld [vmem:[%s7458_s8 + $0x50] sm:$0xff] }
  0x5e   : > { %1180 = vperm.xlu0 %4720, %v1118_v22   ;;  %v469_v22 = vld [vmem:[%s466_s26] ss:$2 sm:$0xf]  ;;  %s4277_s26 = sshll.u32 %s5656_s17, 6  ;;  %s5559_s17 = smov [#allocation2]  }
  0x5f   : > { %s7408_s20 = scalar_lea.hbm %s7464_s14, %s4277_s26  ;;  %s5495_s1 = sshll.u32 %s5559_s17, 4  ;;  %s5496_s1 = int_to_ptr.vmem [resolvable:$false] %s5495_s1 }
  0x60   : > { %818 = vperm.xlu1 %4713, %v764_v23   ;;  %s5497_s0 = scalar_lea.vmem %s5496_s1, 128  ;;  %p5498_p0 = scmp.lt.s32.totalorder %s7410_s28, %s5496_s1 }
  0x61   : > { %p5499_p1 = scmp.lt.s32.totalorder %s5497_s0, %s5491_s22 }
  0x62   : > { %1190 = vperm.xlu0 %4720, %v1120_v24  }
  0x63   : > { %p5500_p2 = por %p5499_p1, %p5498_p0 }
  0x64   : > { %4714 = vset.pattern.permute.xlu1 %v5555_v2 }
  0x65   : > { %952 = vperm.xlu1 %4714, %v764_v23   ;;  %v2421_v23 = vld [vmem:[%s7458_s8 + $0x70] sm:$0xff]  ;;  %p5501_p3 = pnand %p5500_p2, %p5494_p13 }
  0x66   : > { %1365 = vperm.xlu0 %4720, %v1347_v25   ;;  %v5940_v25 = vrot.slane %v4271_v18, %v556_v14 }
  0x69   : > { %4715 = vset.pattern.permute.xlu1 %v5556_v7 }
  0x6a   : > { %1375 = vperm.xlu0 %4720, %v1349_v26   ;;  %1155 = vperm.xlu1 %4715, %v1113_v27   ;;  %v1360_v27 = vld [vmem:[%s7454_s4 + $0x68] sm:$0xff] }
  0x6e   : > { %1385 = vperm.xlu0 %4720, %v1351_v28   ;;  %823 = vperm.xlu1 %4715, %v765_v9   ;;  %v5947_v28 = vrot.slane %v4271_v18, %v560_v19 }
  0x72   : > { %1395 = vperm.xlu0 %4720, %v1353_v29   ;;  %828 = vperm.xlu1 %4715, %v766_v30   ;;  %v5949_v29 = vrot.slane %v4271_v18, %v564_v20 }
  0x76   : > { %1405 = vperm.xlu0 %4720, %v1355_v31   ;;  %4716 = vset.pattern.permute.xlu1 %v5555_v2  ;;  %v5953_v31 = vrot.slane %v469_v22, %v560_v19 }
  0x77   : > { %960 = vperm.xlu1 %4716, %v766_v30   ;;  %v5951_v30 = vrot.slane %v4271_v18, %v568_v21 }
  0x7a   : > { %1415 = vperm.xlu0 %4720, %v1357_v32   ;;  %v2969_v32 = vld [vmem:[%s7460_s10] sm:$0xff] }
  0x7b   : > { %4717 = vset.pattern.permute.xlu1 %v5556_v7 }
  0x7c   : > { %1165 = vperm.xlu1 %4717, %v1115_v33   ;;  %v5958_v33 = vrot.slane %v469_v22, %v568_v21 }
  0x7e   : > { %1425 = vperm.xlu0 %4720, %v1359_v34  }
  0x80   : > { %833 = vperm.xlu1 %4717, %v5717_v11   ;;  %v1356_v11 = vld [vmem:[%s7454_s4 + $0x48] sm:$0xff] }
  0x82   : > { %1435 = vperm.xlu0 %4720, %v1361_v35  }
  0x84   : > { %838 = vperm.xlu1 %4717, %v768_v36  }
  0x86   : > { %1927 = vperm.xlu0 %4720, %v1909_v37   ;;  %v5968_v37 = vrot.slane %v469_v22, %v564_v20 }
  0x88   : > { %4718 = vset.pattern.permute.xlu1 %v5555_v2 }
  0x89   : > { %968 = vperm.xlu1 %4718, %v768_v36   ;;  %v5966_v36 = vrot.slane %v469_v22, %v556_v14 }
  0x8a   : > { %1937 = vperm.xlu0 %4720, %v1911_v38  }
  0x8d   : > { %4719 = vset.pattern.permute.xlu1 %v5556_v7 }
  0x8e   : > { %1947 = vperm.xlu0 %4720, %v1913_v39   ;;  %1175 = vperm.xlu1 %4719, %v1117_v40   ;;  %v1362_v40 = vld [vmem:[%s7454_s4 + $0x78] sm:$0xff] }
  0x92   : > { %1957 = vperm.xlu0 %4720, %v1915_v41   ;;  %843 = vperm.xlu1 %4719, %v5724_v12  }
  0x96   : > { %1967 = vperm.xlu0 %4720, %v1917_v42   ;;  %848 = vperm.xlu1 %4719, %v770_v43  }
  0x9a   : > { %1977 = vperm.xlu0 %4720, %v1919_v44   ;;  %4721 = vset.pattern.permute.xlu1 %v5555_v2 }
  0x9b   : > { %976 = vperm.xlu1 %4721, %v770_v43  }
  0x9e   : > { %1987 = vperm.xlu0 %4720, %v1921_v45  }
  0x9f   : > { %4722 = vset.pattern.permute.xlu1 %v5556_v7 }
  0xa0   : > { %1185 = vperm.xlu1 %4722, %v1119_v46   ;;  %v5847_v48 = vpop.permute.xlu1 %916  ;;  %v5849_v49 = vpop.permute.xlu0 %924 }
  0xa1   : > { %v5964_v35 = vmul.f32 %v5847_v48, %v5940_v25  ;;  %v980_v41 = vmul.f32 %v5847_v48, %v5947_v28  ;;  %v5979_v42 = vmul.f32 %v5847_v48, %v5949_v29  ;;  %v982_v43 = vmul.f32 %v5847_v48, %v5951_v30  ;;  %v2971_v48 = vld [vmem:[%s7460_s10 + $0x10] sm:$0xff] }
  0xa2   : > { %1997 = vperm.xlu0 %4720, %v1923_v47   ;;  %v987_v45 = vmul.f32 %v5849_v49, %v5940_v25  ;;  %v988_v46 = vmul.f32 %v5849_v49, %v5947_v28  ;;  %v989_v47 = vmul.f32 %v5849_v49, %v5949_v29 }
  0xa4   : > { %1195 = vperm.xlu1 %4722, %v1121_v50   ;;  %v5857_v52 = vpop.permute.xlu1 %920  ;;  %v5859_v53 = vpop.permute.xlu0 %932 }
  0xa6   : > { %2425 = vperm.xlu0 %4720, %v2407_v51   ;;  %v990_v51 = vmul.f32 %v5849_v49, %v5951_v30 }
  0xa8   : > { %1200 = vperm.xlu1 %4722, %v1122_v54   ;;  %v5867_v56 = vpop.permute.xlu0 %940  ;;  %v6000_v54 = vmul.f32 %v5857_v52, %v5940_v25 }
  0xa9   : > { %v5869_v57 = vpop.permute.xlu1 %788  ;;  %v6035_v14 = vmul.f32 %v5867_v56, %v5940_v25 }
  0xaa   : > { %2435 = vperm.xlu0 %4720, %v2409_v55   ;;  %v984_v55 = vmul.f32 %v5857_v52, %v5947_v28  ;;  %v863_v20 = vmul.f32 %v5869_v57, %v5966_v36  ;;  %v864_v21 = vmul.f32 %v5869_v57, %v5953_v31 }
  0xac   : > { %1370 = vperm.xlu1 %4722, %v1348_v58   ;;  %v5877_v60 = vpop.permute.xlu0 %948 }
  0xae   : > { %2445 = vperm.xlu0 %4720, %v2411_v59   ;;  %v5883_v62 = vpop.permute.xlu1 %928  ;;  %v6006_v59 = vmul.f32 %v5857_v52, %v5949_v29 }
  0xb0   : > { %1380 = vperm.xlu1 %4722, %v1350_v61   ;;  %v5888_v0 = vpop.permute.xlu0 %956  ;;  %v986_v61 = vmul.f32 %v5857_v52, %v5951_v30  ;;  %v6029_v52 = vmul.f32 %v5859_v53, %v5951_v30 }
  0xb2   : > { %2455 = vperm.xlu0 %4720, %v2413_v63   ;;  %v6012_v63 = vmul.f32 %v5859_v53, %v5940_v25 }
  0xb3   : > { %v5893_v2 = vpop.permute.xlu1 %1125 }
  0xb4   : > { %1390 = vperm.xlu1 %4722, %v1352_v1   ;;  %v5898_v4 = vpop.permute.xlu0 %964 }
  0xb6   : > { %2465 = vperm.xlu0 %4720, %v2415_v3   ;;  %v1910_v3 = vld [vmem:[%s7456_s6 + $0x8] sm:$0xff] }
  0xb7   : > { %v5903_v7 = vpop.permute.xlu1 %793 }
  0xb8   : > { %1400 = vperm.xlu1 %4722, %v1354_v6   ;;  %v5908_v9 = vpop.permute.xlu0 %972  ;;  %v996_v6 = vmul.f32 %v5859_v53, %v5947_v28 }
  0xba   : > { %2475 = vperm.xlu0 %4720, %v2417_v8   ;;  %v6025_v8 = vmul.f32 %v5859_v53, %v5949_v29  ;;  %v2973_v53 = vld [vmem:[%s7460_s10 + $0x20] sm:$0xff] }
  0xbb   : > { %v5919_v12 = vpop.permute.xlu1 %798 }
  0xbc   : > { %1410 = vperm.xlu1 %4722, %v1356_v11  }
  0xbd   : > { %v5925_v15 = vpop.permute.xlu0 %773 }
  0xbe   : > { %2485 = vperm.xlu0 %4720, %v2419_v13   ;;  %v852_v34 = vmul.f32 %v5925_v15, %v5953_v31  ;;  %v854_v44 = vmul.f32 %v5925_v15, %v5958_v33 }
  0xc0   : > { %1420 = vperm.xlu1 %4722, %v1358_v16   ;;  %v5938_v24 = vpop.permute.xlu1 %936  ;;  %v1044_v58 = vadd.f32 %v980_v41, %v852_v34  ;;  %v1046_v11 = vadd.f32 %v982_v43, %v854_v44  ;;  %v6039_v16 = vmul.f32 %v5867_v56, %v5947_v28  ;;  %v1912_v43 = vld [vmem:[%s7456_s6 + $0x18] sm:$0xff]  ;;  %v866_v44 = vmul.f32 %v5869_v57, %v5958_v33 }
  0xc1   : > { %v5942_v26 = vpop.permute.xlu0 %778 }
  0xc2   : > { %2495 = vperm.xlu0 %4720, %v2421_v23   ;;  %v856_v50 = vmul.f32 %v5942_v26, %v5953_v31  ;;  %v858_v49 = vmul.f32 %v5942_v26, %v5958_v33  ;;  %v1204_v23 = vadd.f32 %v5893_v2, %v1044_v58  ;;  %v992_v58 = vmul.f32 %v5883_v62, %v5947_v28 }
  0xc4   : > { %1430 = vperm.xlu1 %4722, %v1360_v27   ;;  %v1048_v19 = vadd.f32 %v984_v55, %v856_v50  ;;  %v865_v27 = vmul.f32 %v5869_v57, %v5968_v37  ;;  %v1050_v34 = vadd.f32 %v986_v61, %v858_v49  ;;  %v991_v50 = vmul.f32 %v5883_v62, %v5940_v25  ;;  %v2975_v57 = vld [vmem:[%s7460_s10 + $0x30] sm:$0xff] }
  0xc5   : > { %v784_v38 = vpop.permute.xlu0 %783  ;;  %v5970_v39 = vpop.permute.xlu1 %1135  ;;  %v1206_v55 = vadd.f32 %v5893_v2, %v1046_v11  ;;  %v993_v61 = vmul.f32 %v5883_v62, %v5949_v29  ;;  %4723 = vtanh.f32 %v1204_v23 }
  0xc6   : > { %2987 = vperm.xlu0 %4720, %v2969_v32   ;;  %v859_v18 = vmul.f32 %v784_v38, %v5966_v36  ;;  %v860_v22 = vmul.f32 %v784_v38, %v5953_v31  ;;  %v861_v32 = vmul.f32 %v784_v38, %v5968_v37  ;;  %v1055_v17 = vadd.f32 %v991_v50, %v863_v20 }
  0xc8   : > { %1440 = vperm.xlu1 %4722, %v1362_v40   ;;  %v1051_v49 = vadd.f32 %v987_v45, %v859_v18  ;;  %v1052_v11 = vadd.f32 %v988_v46, %v860_v22  ;;  %v855_v45 = vmul.f32 %v5942_v26, %v5966_v36  ;;  %v1053_v18 = vadd.f32 %v989_v47, %v861_v32  ;;  %v2977_v32 = vld [vmem:[%s7460_s10 + $0x40] sm:$0xff] }
  0xc9   : > { %v6016_v1 = vpop.permute.xlu1 %803  ;;  %v6031_v13 = vpop.permute.xlu0 %1130  ;;  %v869_v22 = vmul.f32 %v5903_v7, %v5968_v37  ;;  %v1056_v47 = vadd.f32 %v992_v58, %v864_v21  ;;  %v1916_v58 = vld [vmem:[%s7456_s6 + $0x38] sm:$0xff] }
  0xca   : > { %2997 = vperm.xlu0 %4720, %v2971_v48   ;;  %v1208_v40 = vadd.f32 %v6031_v13, %v1048_v19  ;;  %v862_v48 = vmul.f32 %v784_v38, %v5958_v33  ;;  %v994_v19 = vmul.f32 %v5883_v62, %v5951_v30  ;;  %v867_v38 = vmul.f32 %v5903_v7, %v5966_v36 }
  0xcb   : > { %v857_v62 = vmul.f32 %v5942_v26, %v5968_v37  ;;  %v1211_v23 = vadd.f32 %v5970_v39, %v1051_v49  ;;  %v870_v26 = vmul.f32 %v5903_v7, %v5958_v33  ;;  %v1213_v50 = vadd.f32 %v5970_v39, %v1053_v18 }
  0xcc   : > { %1932 = vperm.xlu1 %4722, %v1910_v3   ;;  %v1210_v3 = vadd.f32 %v6031_v13, %v1050_v34  ;;  %4725 = vtanh.f32 %v1208_v40  ;;  %v1914_v34 = vld [vmem:[%s7456_s6 + $0x28] sm:$0xff]  ;;  %v1054_v5 = vadd.f32 %v990_v51, %v862_v48  ;;  %v1212_v51 = vadd.f32 %v5970_v39, %v1052_v11 }
  0xcd   : > { %v6055_v41 = vpop.permute.xlu1 %808  ;;  %4727 = vtanh.f32 %v1206_v55  ;;  %v1141_v20 = vpop.permute.xlu0 %1140  ;;  %v1057_v40 = vadd.f32 %v993_v61, %v865_v27  ;;  %v1047_v48 = vadd.f32 %v6000_v54, %v855_v45  ;;  %v6101_v55 = vadd.f32 %v6012_v63, %v867_v38 }
  0xce   : > { %3007 = vperm.xlu0 %4720, %v2973_v53   ;;  %v868_v53 = vmul.f32 %v5903_v7, %v5953_v31  ;;  %4729 = vtanh.f32 %v1210_v3  ;;  %v851_v7 = vmul.f32 %v5925_v15, %v5966_v36  ;;  %v853_v27 = vmul.f32 %v5925_v15, %v5968_v37  ;;  %v2979_v15 = vld [vmem:[%s7460_s10 + $0x50] sm:$0xff] }
  0xcf   : > { %v1049_v61 = vadd.f32 %v6006_v59, %v857_v62  ;;  %v999_v54 = vmul.f32 %v5938_v24, %v5940_v25  ;;  %4731 = vtanh.f32 %v1211_v23  ;;  %v1207_v63 = vadd.f32 %v6031_v13, %v1047_v48  ;;  %v4724_v38 = vpop.eup %4723 }
  0xd0   : > { %1942 = vperm.xlu1 %4722, %v1912_v43   ;;  %v1058_v43 = vadd.f32 %v994_v19, %v866_v44  ;;  %v1060_v21 = vadd.f32 %v996_v6, %v868_v53  ;;  %v1214_v44 = vadd.f32 %v5970_v39, %v1054_v5  ;;  %v6118_v49 = vadd.f32 %v6025_v8, %v869_v22  ;;  %v1918_v19 = vld [vmem:[%s7456_s6 + $0x48] sm:$0xff] }
  0xd1   : > { %v1000_v5 = vmul.f32 %v5938_v24, %v5947_v28  ;;  %4733 = vtanh.f32 %v1212_v51  ;;  %v1209_v39 = vadd.f32 %v6031_v13, %v1049_v61  ;;  %v1062_v59 = vadd.f32 %v6029_v52, %v870_v26  ;;  %v6136_v53 = vpop.permute.xlu0 %1150 }
  0xd2   : > { %3017 = vperm.xlu0 %4720, %v2975_v57   ;;  %v6087_v46 = vpop.permute.xlu1 %944  ;;  %v871_v3 = vmul.f32 %v5919_v12, %v5966_v36  ;;  %v872_v8 = vmul.f32 %v5919_v12, %v5953_v31  ;;  %4735 = vtanh.f32 %v1213_v50  ;;  %v1215_v57 = vadd.f32 %v1141_v20, %v1055_v17  ;;  %v1920_v50 = vld [vmem:[%s7456_s6 + $0x58] sm:$0xff] }
  0xd3   : > { %v1043_v11 = vadd.f32 %v5964_v35, %v851_v7  ;;  %v1045_v13 = vadd.f32 %v5979_v42, %v853_v27  ;;  %4737 = vtanh.f32 %v1214_v44  ;;  %v1216_v52 = vadd.f32 %v1141_v20, %v1056_v47  ;;  %v2981_v35 = vld [vmem:[%s7460_s10 + $0x60] sm:$0xff] }
  0xd4   : > { %1952 = vperm.xlu1 %4722, %v1914_v34   ;;  %v1001_v18 = vmul.f32 %v5938_v24, %v5949_v29  ;;  %4739 = vtanh.f32 %v1207_v63  ;;  %v1217_v17 = vadd.f32 %v1141_v20, %v1057_v40  ;;  %v1063_v34 = vadd.f32 %v999_v54, %v871_v3 }
  0xd5   : > { %4741 = vtanh.f32 %v1209_v39  ;;  %v1218_v42 = vadd.f32 %v1141_v20, %v1058_v43  ;;  %v1064_v23 = vadd.f32 %v1000_v5, %v872_v8  ;;  %v873_v26 = vmul.f32 %v5919_v12, %v5968_v37 }
  0xd6   : > { %3027 = vperm.xlu0 %4720, %v2977_v32   ;;  %v4726_v45 = vpop.eup %4725  ;;  %v1002_v51 = vmul.f32 %v5938_v24, %v5951_v30  ;;  %4743 = vtanh.f32 %v1215_v57  ;;  %v1223_v40 = vadd.f32 %v6136_v53, %v1063_v34  ;;  %v874_v20 = vmul.f32 %v5919_v12, %v5958_v33  ;;  %v2983_v12 = vld [vmem:[%s7460_s10 + $0x70] sm:$0xff] }
  0xd7   : > { %v6115_v6 = vpop.permute.xlu1 %1145  ;;  %v4728_v22 = vpop.eup %4727  ;;  %v4278_v47 = vpack.c.bf16 %v4726_v45, %v4724_v38  ;;  %4745 = vtanh.f32 %v1216_v52  ;;  %v1224_v43 = vadd.f32 %v6136_v53, %v1064_v23  ;;  %v1007_v24 = vmul.f32 %v6087_v46, %v5940_v25  ;;  %v3467_v52 = vld [vmem:[%s7462_s12] sm:$0xff] }
  0xd8   : > { %1962 = vperm.xlu1 %4722, %v1916_v58   ;;  %v4730_v32 = vpop.eup %4729  ;;  %v1203_v58 = vadd.f32 %v5893_v2, %v1043_v11  ;;  %4747 = vtanh.f32 %v1217_v17  ;;  %v1220_v7 = vadd.f32 %v6115_v6, %v1060_v21  ;;  %v1205_v44 = vadd.f32 %v5893_v2, %v1045_v13  ;;  %v1922_v2 = vld [vmem:[%s7456_s6 + $0x68] sm:$0xff] }
  0xd9   : > { %4279 = vmatprep.subr.bf16.mxu0 %v4278_v47  ;;  %v4310_v48 = vpack.c.bf16 %v4730_v32, %v4728_v22  ;;  %4749 = vtanh.f32 %v1218_v42  ;;  %v1065_v61 = vadd.f32 %v1001_v18, %v873_v26  ;;  %v1008_v54 = vmul.f32 %v6087_v46, %v5947_v28  ;;  %v6168_v63 = vpop.eup %4731 }
  0xda   : > { %3037 = vperm.xlu0 %4720, %v2979_v15   ;;  %v879_v21 = vmul.f32 %v6055_v41, %v5966_v36  ;;  %v1066_v15 = vadd.f32 %v1002_v51, %v874_v20  ;;  %4751 = vtanh.f32 %v1223_v40  ;;  %v1009_v5 = vmul.f32 %v6087_v46, %v5949_v29 }
  0xdb   : > { %v6140_v62 = vpop.permute.xlu1 %813  ;;  %4311 = vmatprep.subr.bf16.mxu1 %v4310_v48  ;;  %v6177_v39 = vpop.eup %4733  ;;  %v880_v3 = vmul.f32 %v6055_v41, %v5953_v31  ;;  %4753 = vtanh.f32 %v1224_v43  ;;  %v1010_v8 = vmul.f32 %v6087_v46, %v5951_v30  ;;  %v1222_v57 = vadd.f32 %v6115_v6, %v1062_v59 }
  0xdc   : > { %1972 = vperm.xlu1 %4722, %v1918_v19   ;;  %v6184_v19 = vpop.eup %4735  ;;  %v881_v38 = vmul.f32 %v6055_v41, %v5968_v37  ;;  %v1226_v11 = vadd.f32 %v6136_v53, %v1066_v15  ;;  %v1071_v13 = vadd.f32 %v1007_v24, %v879_v21  ;;  %4755 = vtanh.f32 %v1220_v7  ;;  %v1161_v59 = vpop.permute.xlu0 %1160 }
  0xdd   : > { %v6192_v45 = vpop.eup %4737  ;;  %v882_v46 = vmul.f32 %v6055_v41, %v5958_v33  ;;  %v1072_v18 = vadd.f32 %v1008_v54, %v880_v3  ;;  %v1219_v17 = vadd.f32 %v6115_v6, %v6101_v55  ;;  %4757 = vtanh.f32 %v1203_v58  ;;  %v1924_v41 = vld [vmem:[%s7456_s6 + $0x78] sm:$0xff] }
  0xde   : > { %3047 = vperm.xlu0 %4720, %v2981_v35   ;;  %v6200_v35 = vpop.eup %4739  ;;  %v875_v22 = vmul.f32 %v6016_v1, %v5966_v36  ;;  %v1073_v42 = vadd.f32 %v1009_v5, %v881_v38  ;;  %v1221_v23 = vadd.f32 %v6115_v6, %v6118_v49  ;;  %4759 = vtanh.f32 %v1205_v44  ;;  %v2408_v44 = vld [vmem:[%s7458_s8 + $0x8] sm:$0xff]  ;;  %v3471_v5 = vld [vmem:[%s7462_s12 + $0x20] sm:$0xff] }
  0xdf   : > { %v6160_v27 = vpop.permute.xlu1 %818  ;;  %v6209_v47 = vpop.eup %4741  ;;  %v876_v55 = vmul.f32 %v6016_v1, %v5953_v31  ;;  %v1225_v32 = vadd.f32 %v6136_v53, %v1065_v61  ;;  %v1074_v26 = vadd.f32 %v1010_v8, %v882_v46  ;;  %4761 = vtanh.f32 %v1222_v57 }
  0xe0   : > { %1982 = vperm.xlu1 %4722, %v1920_v50   ;;  %v6214_v51 = vpop.eup %4743  ;;  %v1005_v6 = vmul.f32 %v5867_v56, %v5949_v29  ;;  %v877_v49 = vmul.f32 %v6016_v1, %v5968_v37  ;;  %4763 = vtanh.f32 %v1226_v11  ;;  %v1231_v40 = vadd.f32 %v1161_v59, %v1071_v13  ;;  %v3469_v50 = vld [vmem:[%s7462_s12 + $0x10] sm:$0xff] }
  0xe1   : > { %v4746_v20 = vpop.eup %4745  ;;  %v1006_v53 = vmul.f32 %v5867_v56, %v5951_v30  ;;  %v878_v43 = vmul.f32 %v6016_v1, %v5958_v33  ;;  %v1232_v48 = vadd.f32 %v1161_v59, %v1072_v18  ;;  %4765 = vtanh.f32 %v1219_v17 }
  0xe2   : > { %3057 = vperm.xlu0 %4720, %v2983_v12   ;;  %v6227_v58 = vpop.eup %4747  ;;  %v1233_v24 = vadd.f32 %v1161_v59, %v1073_v42  ;;  %4767 = vtanh.f32 %v1221_v23  ;;  %v1067_v12 = vadd.f32 %v6035_v14, %v875_v22  ;;  %v1234_v56 = vadd.f32 %v1161_v59, %v1074_v26  ;;  %v3473_v42 = vld [vmem:[%s7462_s12 + $0x30] sm:$0xff] }
  0xe3   : > { %v4750_v61 = vpop.eup %4749  ;;  %4769 = vtanh.f32 %v1225_v32  ;;  %v1068_v54 = vadd.f32 %v6039_v16, %v876_v55  ;;  %v1069_v21 = vadd.f32 %v1005_v6, %v877_v49  ;;  %v2410_v16 = vld [vmem:[%s7458_s8 + $0x18] sm:$0xff]  ;;  %v4282_v13 = vpack.c.bf16 %v4746_v20, %v6177_v39  ;;  %v3475_v20 = vld [vmem:[%s7462_s12 + $0x40] sm:$0xff] }
  0xe4   : > { %1992 = vperm.xlu1 %4722, %v1922_v2   ;;  %v6198_v34 = vpop.permute.xlu1 %952  ;;  %v6234_v1 = vpop.eup %4751  ;;  %4771 = vtanh.f32 %v1231_v40  ;;  %v1070_v2 = vadd.f32 %v1006_v53, %v878_v43  ;;  %v4314_v18 = vpack.c.bf16 %v4750_v61, %v6192_v45  ;;  %v4284_v39 = vpack.c.bf16 %v6214_v51, %v6168_v63 }
  0xe5   : > { %v4754_v14 = vpop.eup %4753  ;;  %4773 = vtanh.f32 %v1232_v48  ;;  %v4316_v55 = vpack.c.bf16 %v6227_v58, %v6184_v19  ;;  %v1016_v32 = vmul.f32 %v6198_v34, %v5947_v28  ;;  %v887_v51 = vmul.f32 %v6160_v27, %v5966_v36 }
  0xe6   : > { %3485 = vperm.xlu0 %4720, %v3467_v52   ;;  %v4756_v8 = vpop.eup %4755  ;;  %4775 = vtanh.f32 %v1233_v24  ;;  %v1017_v6 = vmul.f32 %v6198_v34, %v5949_v29  ;;  %v1018_v19 = vmul.f32 %v6198_v34, %v5951_v30  ;;  %v889_v43 = vmul.f32 %v6160_v27, %v5968_v37  ;;  %v2414_v24 = vld [vmem:[%s7458_s8 + $0x38] sm:$0xff] }
  0xe7   : > { %v4758_v11 = vpop.eup %4757  ;;  %4777 = vtanh.f32 %v1234_v56  ;;  %v4286_v63 = vpack.c.bf16 %v4754_v14, %v4756_v8  ;;  %v884_v14 = vmul.f32 %v6140_v62, %v5953_v31 }
  0xe8   : > { %2002 = vperm.xlu1 %4722, %v1924_v41   ;;  %v4760_v46 = vpop.eup %4759  ;;  %v4280_v59 = vpack.c.bf16 %v6200_v35, %v4758_v11  ;;  %v1015_v35 = vmul.f32 %v6198_v34, %v5940_v25  ;;  %v2412_v41 = vld [vmem:[%s7458_s8 + $0x28] sm:$0xff]  ;;  %v890_v34 = vmul.f32 %v6160_v27, %v5958_v33 }
  0xe9   : > { %v1156_v7 = vpop.permute.xlu1 %1155  ;;  %v4762_v17 = vpop.eup %4761  ;;  %v4312_v22 = vpack.c.bf16 %v6209_v47, %v4760_v46  ;;  %v1014_v46 = vmul.f32 %v5877_v60, %v5951_v30 }
  0xea   : > { %3495 = vperm.xlu0 %4720, %v3469_v50   ;;  %v1227_v15 = vadd.f32 %v1156_v7, %v1067_v12  ;;  %v1228_v3 = vadd.f32 %v1156_v7, %v1068_v54  ;;  %v1229_v57 = vadd.f32 %v1156_v7, %v1069_v21  ;;  %v1230_v52 = vadd.f32 %v1156_v7, %v1070_v2  ;;  %v4764_v23 = vpop.eup %4763 }
  0xeb   : > { %4281 = vmatpush1.bf16.msra.mxu0 %v4280_v59  ;;  %v4766_v47 = vpop.eup %4765  ;;  %4313 = vmatpush1.bf16.msra.mxu1 %v4312_v22  ;;  %v4318_v49 = vpack.c.bf16 %v4764_v23, %v4762_v17  ;;  %v888_v50 = vmul.f32 %v6160_v27, %v5953_v31  ;;  %v1079_v48 = vadd.f32 %v1015_v35, %v887_v51  ;;  %v1171_v27 = vpop.permute.xlu0 %1170  ;;  %v2418_v51 = vld [vmem:[%s7458_s8 + $0x58] sm:$0xff] }
  0xec   : > { %2430 = vperm.xlu1 %4722, %v2408_v44   ;;  %4779 = vtanh.f32 %v1227_v15  ;;  %4283 = vmatprep.subr.bf16.mxu0 %v4282_v13  ;;  %v4768_v26 = vpop.eup %4767  ;;  %v4288_v58 = vpack.c.bf16 %v6234_v1, %v4766_v47  ;;  %v1011_v54 = vmul.f32 %v5877_v60, %v5940_v25  ;;  %v883_v1 = vmul.f32 %v6140_v62, %v5966_v36  ;;  %v2416_v13 = vld [vmem:[%s7458_s8 + $0x48] sm:$0xff] }
  0xed   : > { %v6239_v38 = vpop.permute.xlu1 %823  ;;  %4781 = vtanh.f32 %v1228_v3  ;;  %4315 = vmatprep.subr.bf16.mxu1 %v4314_v18  ;;  %v4770_v40 = vpop.eup %4769  ;;  %v1080_v12 = vadd.f32 %v1016_v32, %v888_v50  ;;  %v1081_v21 = vadd.f32 %v1017_v6, %v889_v43  ;;  %v1082_v2 = vadd.f32 %v1018_v19, %v890_v34  ;;  %v3477_v3 = vld [vmem:[%s7462_s12 + $0x50] sm:$0xff]  ;;  %v2422_v34 = vld [vmem:[%s7458_s8 + $0x78] sm:$0xff] }
  0xee   : > { %3505 = vperm.xlu0 %4720, %v3471_v5   ;;  %4783 = vtanh.f32 %v1229_v57  ;;  %v4772_v53 = vpop.eup %4771  ;;  %v4320_v44 = vpack.c.bf16 %v4770_v40, %v4768_v26  ;;  %v1012_v5 = vmul.f32 %v5877_v60, %v5947_v28  ;;  %v1013_v57 = vmul.f32 %v5877_v60, %v5949_v29  ;;  %v3479_v60 = vld [vmem:[%s7462_s12 + $0x60] sm:$0xff] }
  0xef   : > { %4785 = vtanh.f32 %v1230_v52  ;;  %4285 = vmatpush1.bf16.msra.mxu0 %v4284_v39  ;;  %v4774_v7 = vpop.eup %4773  ;;  %4317 = vmatpush1.bf16.msra.mxu1 %v4316_v55  ;;  %v1239_v11 = vadd.f32 %v1171_v27, %v1079_v48  ;;  %v886_v59 = vmul.f32 %v6140_v62, %v5958_v33  ;;  %v1240_v18 = vadd.f32 %v1171_v27, %v1080_v12 }
  0xf0   : > { %2440 = vperm.xlu1 %4722, %v2410_v16   ;;  %4287 = vmatprep.subr.bf16.mxu0 %v4286_v63  ;;  %v4776_v56 = vpop.eup %4775  ;;  %v885_v16 = vmul.f32 %v6140_v62, %v5968_v37  ;;  %v1075_v35 = vadd.f32 %v1011_v54, %v883_v1  ;;  %v1242_v47 = vadd.f32 %v1171_v27, %v1082_v2 }
  0xf1   : > { %v6255_v45 = vpop.permute.xlu1 %828  ;;  %4319 = vmatprep.subr.bf16.mxu1 %v4318_v49  ;;  %v4778_v15 = vpop.eup %4777  ;;  %v1076_v32 = vadd.f32 %v1012_v5, %v884_v14  ;;  %4787 = vtanh.f32 %v1239_v11  ;;  %v1078_v6 = vadd.f32 %v1014_v46, %v886_v59  ;;  %v891_v2 = vmul.f32 %v6239_v38, %v5966_v36 }
  0xf2   : > { %3515 = vperm.xlu0 %4720, %v3473_v42   ;;  %v1241_v42 = vadd.f32 %v1171_v27, %v1081_v21  ;;  %v1077_v63 = vadd.f32 %v1013_v57, %v885_v16  ;;  %4789 = vtanh.f32 %v1240_v18  ;;  %v896_v12 = vmul.f32 %v6255_v45, %v5953_v31  ;;  %v1181_v16 = vpop.permute.xlu0 %1180 }
  0xf3   : > { %4289 = vmatpush1.bf16.msra.mxu0 %v4288_v58  ;;  %4321 = vmatpush1.bf16.msra.mxu1 %v4320_v44  ;;  %v897_v54 = vmul.f32 %v6255_v45, %v5968_v37  ;;  %v1020_v46 = vmul.f32 %v5888_v0, %v5947_v28 }
  0xf4   : > { %2450 = vperm.xlu1 %4722, %v2412_v41   ;;  %4791 = vtanh.f32 %v1241_v42  ;;  %v894_v42 = vmul.f32 %v6239_v38, %v5958_v33 }
  0xf5   : > { %4793 = vtanh.f32 %v1242_v47 }
  0xf6   : > { %v6283_v61 = vpop.permute.xlu1 %960  ;;  %3525 = vperm.xlu0 %4720, %v3475_v20   ;;  %v4780_v8 = vpop.eup %4779  ;;  %v3481_v20 = vld [vmem:[%s7462_s12 + $0x70] sm:$0xff] }
  0xf7   : > { %v4782_v52 = vpop.eup %4781  ;;  %v4292_v17 = vpack.c.bf16 %v4772_v53, %v4780_v8  ;;  %v2420_v53 = vld [vmem:[%s7458_s8 + $0x68] sm:$0xff]  ;;  %v1023_v43 = vmul.f32 %v6283_v61, %v5940_v25  ;;  %v1024_v58 = vmul.f32 %v6283_v61, %v5947_v28  ;;  %v1026_v44 = vmul.f32 %v6283_v61, %v5951_v30 }
  0xf8   : > { %2460 = vperm.xlu1 %4722, %v2414_v24   ;;  %v4784_v22 = vpop.eup %4783  ;;  %v4290_v23 = vpack.c.bf16 %v4774_v7, %v4782_v52  ;;  %v895_v24 = vmul.f32 %v6255_v45, %v5966_v36  ;;  %v1025_v7 = vmul.f32 %v6283_v61, %v5949_v29  ;;  %v2970_v8 = vld [vmem:[%s7460_s10 + $0x8] sm:$0xff]  ;;  %v1019_v52 = vmul.f32 %v5888_v0, %v5940_v25 }
  0xf9   : > { %v4786_v41 = vpop.eup %4785  ;;  %v4324_v55 = vpack.c.bf16 %v4776_v56, %v4784_v22  ;;  %v1088_v5 = vadd.f32 %v1024_v58, %v896_v12  ;;  %v1022_v22 = vmul.f32 %v5888_v0, %v5951_v30 }
  0xfa   : > { %3535 = vperm.xlu0 %4720, %v3477_v3   ;;  %4291 = vmatprep.subr.bf16.mxu0 %v4290_v23  ;;  %v4322_v62 = vpack.c.bf16 %v4778_v15, %v4786_v41  ;;  %v1087_v1 = vadd.f32 %v1023_v43, %v895_v24  ;;  %v898_v15 = vmul.f32 %v6255_v45, %v5958_v33 }
  0xfb   : > { %v1166_v39 = vpop.permute.xlu1 %1165  ;;  %4293 = vmatpush1.bf16.msra.mxu0 %v4292_v17  ;;  %v4788_v56 = vpop.eup %4787  ;;  %v892_v3 = vmul.f32 %v6239_v38, %v5953_v31  ;;  %v1089_v61 = vadd.f32 %v1025_v7, %v897_v54  ;;  %v893_v45 = vmul.f32 %v6239_v38, %v5968_v37  ;;  %v1021_v17 = vmul.f32 %v5888_v0, %v5949_v29  ;;  %v2974_v7 = vld [vmem:[%s7460_s10 + $0x28] sm:$0xff] }
  0xfc   : > { %2470 = vperm.xlu1 %4722, %v2416_v13   ;;  %v1235_v26 = vadd.f32 %v1166_v39, %v1075_v35  ;;  %v1236_v49 = vadd.f32 %v1166_v39, %v1076_v32  ;;  %4323 = vmatprep.subr.bf16.mxu1 %v4322_v62  ;;  %v1237_v40 = vadd.f32 %v1166_v39, %v1077_v63  ;;  %v4790_v21 = vpop.eup %4789 }
  0xfd   : > { %4325 = vmatpush1.bf16.msra.mxu1 %v4324_v55  ;;  %v1238_v19 = vadd.f32 %v1166_v39, %v1078_v6  ;;  %v1090_v11 = vadd.f32 %v1026_v44, %v898_v15  ;;  %v1247_v59 = vadd.f32 %v1181_v16, %v1087_v1  ;;  %v1248_v23 = vadd.f32 %v1181_v16, %v1088_v5 }
  0xfe   : > { %3545 = vperm.xlu0 %4720, %v3479_v60   ;;  %4795 = vtanh.f32 %v1235_v26  ;;  %v4792_v14 = vpop.eup %4791  ;;  %v1249_v35 = vadd.f32 %v1181_v16, %v1089_v61  ;;  %v1083_v55 = vadd.f32 %v1019_v52, %v891_v2  ;;  %v1084_v32 = vadd.f32 %v1020_v46, %v892_v3  ;;  %v2972_v60 = vld [vmem:[%s7460_s10 + $0x18] sm:$0xff]  ;;  %v2978_v46 = vld [vmem:[%s7460_s10 + $0x48] sm:$0xff] }
  0xff   : > { %v6313_v50 = vpop.permute.xlu1 %833  ;;  %4797 = vtanh.f32 %v1236_v49  ;;  %v4794_v57 = vpop.eup %4793  ;;  %v1250_v63 = vadd.f32 %v1181_v16, %v1090_v11  ;;  %v1085_v0 = vadd.f32 %v1021_v17, %v893_v45  ;;  %v1027_v61 = vmul.f32 %v5898_v4, %v5940_v25 }
 0x100   : > { %2480 = vperm.xlu1 %4722, %v2418_v51   ;;  %4799 = vtanh.f32 %v1237_v40  ;;  %v1030_v45 = vmul.f32 %v5898_v4, %v5951_v30  ;;  %v899_v11 = vmul.f32 %v6313_v50, %v5966_v36  ;;  %v901_v17 = vmul.f32 %v6313_v50, %v5968_v37 }
 0x101   : > { %4801 = vtanh.f32 %v1238_v19  ;;  %v1086_v19 = vadd.f32 %v1022_v22, %v894_v42 }
 0x102   : > { %3555 = vperm.xlu0 %4720, %v3481_v20   ;;  %4803 = vtanh.f32 %v1247_v59 }
 0x103   : > { %v6323_v48 = vpop.permute.xlu1 %838  ;;  %4805 = vtanh.f32 %v1248_v23 }
 0x104   : > { %2490 = vperm.xlu1 %4722, %v2420_v53   ;;  %4807 = vtanh.f32 %v1249_v35  ;;  %v903_v53 = vmul.f32 %v6323_v48, %v5966_v36  ;;  %v906_v1 = vmul.f32 %v6323_v48, %v5958_v33 }
 0x105   : > { %4809 = vtanh.f32 %v1250_v63  ;;  %v1091_v63 = vadd.f32 %v1027_v61, %v899_v11 }
 0x108   : > { %2500 = vperm.xlu1 %4722, %v2422_v34   ;;  %v969_v27 = vpop.permute.xlu1 %968  ;;  %v4796_v13 = vpop.eup %4795  ;;  %v904_v34 = vmul.f32 %v6323_v48, %v5953_v31 }
 0x109   : > { %v4798_v18 = vpop.eup %4797  ;;  %v4296_v41 = vpack.c.bf16 %v4788_v56, %v4796_v13  ;;  %v1031_v38 = vmul.f32 %v969_v27, %v5940_v25  ;;  %v1032_v40 = vmul.f32 %v969_v27, %v5947_v28  ;;  %v1033_v43 = vmul.f32 %v969_v27, %v5949_v29 }
 0x10a   : > { %v4800_v39 = vpop.eup %4799  ;;  %v4294_v26 = vpack.c.bf16 %v4790_v21, %v4798_v18  ;;  %v1034_v12 = vmul.f32 %v969_v27, %v5951_v30  ;;  %v905_v56 = vmul.f32 %v6323_v48, %v5968_v37  ;;  %v2976_v27 = vld [vmem:[%s7460_s10 + $0x38] sm:$0xff]  ;;  %v1028_v48 = vmul.f32 %v5898_v4, %v5947_v28 }
 0x10b   : > { %v4802_v62 = vpop.eup %4801  ;;  %v4328_v51 = vpack.c.bf16 %v4792_v14, %v4800_v39  ;;  %v1095_v54 = vadd.f32 %v1031_v38, %v903_v53  ;;  %v1096_v21 = vadd.f32 %v1032_v40, %v904_v34  ;;  %v1191_v14 = vpop.permute.xlu0 %1190  ;;  %v900_v13 = vmul.f32 %v6313_v50, %v5953_v31 }
 0x10c   : > { %2992 = vperm.xlu1 %4722, %v2970_v8   ;;  %v4326_v6 = vpack.c.bf16 %v4794_v57, %v4802_v62  ;;  %4295 = vmatprep.subr.bf16.mxu0 %v4294_v26  ;;  %v1097_v15 = vadd.f32 %v1033_v43, %v905_v56  ;;  %v1098_v2 = vadd.f32 %v1034_v12, %v906_v1  ;;  %v4804_v16 = vpop.eup %4803 }
 0x10d   : > { %v1176_v47 = vpop.permute.xlu1 %1175  ;;  %4297 = vmatpush1.bf16.msra.mxu0 %v4296_v41  ;;  %v1255_v3 = vadd.f32 %v1191_v14, %v1095_v54  ;;  %v1029_v8 = vmul.f32 %v5898_v4, %v5949_v29  ;;  %v1256_v57 = vadd.f32 %v1191_v14, %v1096_v21  ;;  %v4806_v59 = vpop.eup %4805  ;;  %v1035_v18 = vmul.f32 %v5908_v9, %v5940_v25  ;;  %v2982_v21 = vld [vmem:[%s7460_s10 + $0x68] sm:$0xff] }
 0x10e   : > { %v1243_v49 = vadd.f32 %v1176_v47, %v1083_v55  ;;  %v1244_v20 = vadd.f32 %v1176_v47, %v1084_v32  ;;  %4327 = vmatprep.subr.bf16.mxu1 %v4326_v6  ;;  %v1245_v58 = vadd.f32 %v1176_v47, %v1085_v0  ;;  %v1246_v44 = vadd.f32 %v1176_v47, %v1086_v19  ;;  %v4808_v23 = vpop.eup %4807 }
 0x10f   : > { %4329 = vmatpush1.bf16.msra.mxu1 %v4328_v51  ;;  %v1257_v52 = vadd.f32 %v1191_v14, %v1097_v15  ;;  %v902_v4 = vmul.f32 %v6313_v50, %v5958_v33  ;;  %v1258_v22 = vadd.f32 %v1191_v14, %v1098_v2  ;;  %v4810_v47 = vpop.eup %4809  ;;  %v1036_v55 = vmul.f32 %v5908_v9, %v5947_v28  ;;  %v2980_v51 = vld [vmem:[%s7460_s10 + $0x58] sm:$0xff] }
 0x110   : > { %3002 = vperm.xlu1 %4722, %v2972_v60   ;;  %4811 = vtanh.f32 %v1243_v49  ;;  %v1037_v32 = vmul.f32 %v5908_v9, %v5949_v29  ;;  %v1038_v50 = vmul.f32 %v5908_v9, %v5951_v30  ;;  %v1092_v26 = vadd.f32 %v1028_v48, %v900_v13 }
 0x111   : > { %v844_v24 = vpop.permute.xlu1 %843  ;;  %4813 = vtanh.f32 %v1244_v20  ;;  %v1093_v6 = vadd.f32 %v1029_v8, %v901_v17  ;;  %v1094_v49 = vadd.f32 %v1030_v45, %v902_v4 }
 0x112   : > { %4815 = vtanh.f32 %v1245_v58  ;;  %v907_v39 = vmul.f32 %v844_v24, %v5966_v36  ;;  %v908_v35 = vmul.f32 %v844_v24, %v5953_v31  ;;  %v909_v41 = vmul.f32 %v844_v24, %v5968_v37 }
 0x113   : > { %4817 = vtanh.f32 %v1246_v44  ;;  %v910_v62 = vmul.f32 %v844_v24, %v5958_v33 }
 0x114   : > { %3012 = vperm.xlu1 %4722, %v2974_v7   ;;  %4819 = vtanh.f32 %v1255_v3  ;;  %v1099_v20 = vadd.f32 %v1035_v18, %v907_v39  ;;  %v1100_v53 = vadd.f32 %v1036_v55, %v908_v35  ;;  %v1101_v43 = vadd.f32 %v1037_v32, %v909_v41 }
 0x115   : > { %v6379_v5 = vpop.permute.xlu1 %848  ;;  %4821 = vtanh.f32 %v1256_v57  ;;  %v1102_v1 = vadd.f32 %v1038_v50, %v910_v62  ;;  %v3470_v50 = vld [vmem:[%s7462_s12 + $0x18] sm:$0xff] }
 0x116   : > { %4823 = vtanh.f32 %v1257_v52  ;;  %v911_v44 = vmul.f32 %v6379_v5, %v5966_v36  ;;  %v912_v2 = vmul.f32 %v6379_v5, %v5953_v31  ;;  %v913_v3 = vmul.f32 %v6379_v5, %v5968_v37  ;;  %v2984_v52 = vld [vmem:[%s7460_s10 + $0x78] sm:$0xff] }
 0x117   : > { %4825 = vtanh.f32 %v1258_v22  ;;  %v914_v11 = vmul.f32 %v6379_v5, %v5958_v33 }
 0x118   : > { %3022 = vperm.xlu1 %4722, %v2976_v27  }
 0x11a   : > { %v977_v42 = vpop.permute.xlu1 %976  ;;  %v4812_v60 = vpop.eup %4811 }
 0x11b   : > { %v4814_v0 = vpop.eup %4813  ;;  %v4300_v38 = vpack.c.bf16 %v4804_v16, %v4812_v60  ;;  %v1039_v15 = vmul.f32 %v977_v42, %v5940_v25  ;;  %v1040_v27 = vmul.f32 %v977_v42, %v5947_v28  ;;  %v1041_v14 = vmul.f32 %v977_v42, %v5949_v29 }
 0x11c   : > { %3032 = vperm.xlu1 %4722, %v2978_v46   ;;  %v4816_v40 = vpop.eup %4815  ;;  %v4298_v19 = vpack.c.bf16 %v4806_v59, %v4814_v0  ;;  %v1042_v61 = vmul.f32 %v977_v42, %v5951_v30 }
 0x11d   : > { %v4818_v58 = vpop.eup %4817  ;;  %v4332_v7 = vpack.c.bf16 %v4808_v23, %v4816_v40  ;;  %v1103_v59 = vadd.f32 %v1039_v15, %v911_v44  ;;  %v1104_v18 = vadd.f32 %v1040_v27, %v912_v2  ;;  %v1105_v17 = vadd.f32 %v1041_v14, %v913_v3  ;;  %v1331_v44 = vld [vmem:[%s7453_s3] sm:$0xff]  ;;  %v1333_v15 = vld [vmem:[%s7453_s3 + $0x10] sm:$0xff]  ;;  %v3480_v27 = vld [vmem:[%s7462_s12 + $0x68] sm:$0xff] }
 0x11e   : > { %4299 = vmatprep.subr.bf16.mxu0 %v4298_v19  ;;  %v4330_v56 = vpack.c.bf16 %v4810_v47, %v4818_v58  ;;  %v4820_v45 = vpop.eup %4819  ;;  %v1106_v42 = vadd.f32 %v1042_v61, %v914_v11  ;;  %v3468_v47 = vld [vmem:[%s7462_s12 + $0x8] sm:$0xff]  ;;  %v1334_v14 = vld [vmem:[%s7453_s3 + $0x18] sm:$0xff]  ;;  %v1335_v3 = vld [vmem:[%s7453_s3 + $0x20] sm:$0xff] }
 0x11f   : > { %v1186_v9 = vpop.permute.xlu1 %1185  ;;  %4301 = vmatpush1.bf16.msra.mxu0 %v4300_v38  ;;  %v4822_v46 = vpop.eup %4821  ;;  %v3482_v2 = vld [vmem:[%s7462_s12 + $0x78] sm:$0xff]  ;;  %v1336_v61 = vld [vmem:[%s7453_s3 + $0x28] sm:$0xff] }
 0x120   : > { %v1251_v24 = vadd.f32 %v1186_v9, %v1091_v63  ;;  %v1252_v34 = vadd.f32 %v1186_v9, %v1092_v26  ;;  %v1253_v12 = vadd.f32 %v1186_v9, %v1093_v6  ;;  %3042 = vperm.xlu1 %4722, %v2980_v51   ;;  %v1254_v54 = vadd.f32 %v1186_v9, %v1094_v49  ;;  %v4824_v4 = vpop.eup %4823  ;;  %v3472_v49 = vld [vmem:[%s7462_s12 + $0x28] sm:$0xff]  ;;  %v1342_v11 = vld [vmem:[%s7453_s3 + $0x58] sm:$0xff] }
 0x121   : > { %4331 = vmatprep.subr.bf16.mxu1 %v4330_v56  ;;  %v4826_v23 = vpop.eup %4825  ;;  %v3476_v56 = vld [vmem:[%s7462_s12 + $0x48] sm:$0xff] }
 0x122   : > { %4827 = vtanh.f32 %v1251_v24  ;;  %4333 = vmatpush1.bf16.msra.mxu1 %v4332_v7 }
 0x123   : > { %4829 = vtanh.f32 %v1252_v34  ;;  %v1196_v48 = vpop.permute.xlu1 %1195 }
 0x124   : > { %4831 = vtanh.f32 %v1253_v12  ;;  %v1259_v8 = vadd.f32 %v1196_v48, %v1099_v20  ;;  %v1260_v57 = vadd.f32 %v1196_v48, %v1100_v53  ;;  %v1261_v16 = vadd.f32 %v1196_v48, %v1101_v43  ;;  %3052 = vperm.xlu1 %4722, %v2982_v21   ;;  %v3474_v53 = vld [vmem:[%s7462_s12 + $0x38] sm:$0xff] }
 0x125   : > { %4833 = vtanh.f32 %v1254_v54  ;;  %v1262_v13 = vadd.f32 %v1196_v48, %v1102_v1  ;;  %v7533_v54 = vmov 0.0   ;;  %v1332_v1 = vld [vmem:[%s7453_s3 + $0x8] sm:$0xff]  ;;  %v3478_v21 = vld [vmem:[%s7462_s12 + $0x58] sm:$0xff]  ;;  %v1337_v48 = vld [vmem:[%s7453_s3 + $0x30] sm:$0xff] }
 0x126   : > { %4835 = vtanh.f32 %v1259_v8  ;;  %v1338_v8 = vld [vmem:[%s7453_s3 + $0x38] sm:$0xff] }
 0x127   : > { %4837 = vtanh.f32 %v1260_v57  ;;  %v1201_v22 = vpop.permute.xlu1 %1200  ;;  %v1339_v57 = vld [vmem:[%s7453_s3 + $0x40] sm:$0xff] }
 0x128   : > { %4839 = vtanh.f32 %v1261_v16  ;;  %v1263_v39 = vadd.f32 %v1201_v22, %v1103_v59  ;;  %v1264_v35 = vadd.f32 %v1201_v22, %v1104_v18  ;;  %v1265_v5 = vadd.f32 %v1201_v22, %v1105_v17  ;;  %3062 = vperm.xlu1 %4722, %v2984_v52   ;;  %v1340_v16 = vld [vmem:[%s7453_s3 + $0x48] sm:$0xff]  ;;  %v1346_v59 = vld [vmem:[%s7453_s3 + $0x78] sm:$0xff]  ;;  %v1366_v18 = vpop.permute.xlu0 %1365 }
 0x129   : > { %4841 = vtanh.f32 %v1262_v13  ;;  %v1266_v41 = vadd.f32 %v1201_v22, %v1106_v42  ;;  %v1343_v13 = vld [vmem:[%s7453_s3 + $0x60] sm:$0xff]  ;;  %v1344_v52 = vld [vmem:[%s7453_s3 + $0x68] sm:$0xff] }
 0x12a   : > { %4843 = vtanh.f32 %v1263_v39 }
 0x12b   : > { %4845 = vtanh.f32 %v1264_v35 }
 0x12c   : > { %v4828_v55 = vpop.eup %4827  ;;  %4847 = vtanh.f32 %v1265_v5  ;;  %3490 = vperm.xlu1 %4722, %v3468_v47   ;;  %v1371_v5 = vpop.permute.xlu1 %1370 }
 0x12d   : > { %v4830_v32 = vpop.eup %4829  ;;  %4849 = vtanh.f32 %v1266_v41  ;;  %v4304_v60 = vpack.c.bf16 %v4820_v45, %v4828_v55  ;;  %v1341_v45 = vld [vmem:[%s7453_s3 + $0x50] sm:$0xff] }
 0x12e   : > { %v4832_v62 = vpop.eup %4831  ;;  %v4302_v63 = vpack.c.bf16 %v4822_v46, %v4830_v32  ;;  %v1345_v46 = vld [vmem:[%s7453_s3 + $0x70] sm:$0xff] }
 0x12f   : > { %v4834_v26 = vpop.eup %4833  ;;  %v4336_v51 = vpack.c.bf16 %v4824_v4, %v4832_v62 }
 0x130   : > { %v4836_v0 = vpop.eup %4835  ;;  %4303 = vmatprep.subr.bf16.mxu0 %v4302_v63  ;;  %v4334_v38 = vpack.c.bf16 %v4826_v23, %v4834_v26  ;;  %3500 = vperm.xlu1 %4722, %v3470_v50   ;;  %v1376_v26 = vpop.permute.xlu0 %1375 }
 0x131   : > { %v4838_v6 = vpop.eup %4837  ;;  %4305 = vmatpush1.bf16.msra.mxu0 %v4304_v60 }
 0x132   : > { %v4840_v40 = vpop.eup %4839  ;;  %4335 = vmatprep.subr.bf16.mxu1 %v4334_v38 }
 0x133   : > { %v4842_v19 = vpop.eup %4841  ;;  %4337 = vmatpush1.bf16.msra.mxu1 %v4336_v51 }
 0x134   : > { %v4844_v9 = vpop.eup %4843  ;;  %3510 = vperm.xlu1 %4722, %v3472_v49  }
 0x135   : > { %v4846_v20 = vpop.eup %4845  ;;  %v4308_v43 = vpack.c.bf16 %v4844_v9, %v4836_v0  ;;  %v575_v9 = vsel %vm505_vm0, %v5947_v28, 0.0 }
 0x136   : > { %v4848_v58 = vpop.eup %4847  ;;  %v4306_v7 = vpack.c.bf16 %v4846_v20, %v4838_v6  ;;  %v1381_v20 = vpop.permute.xlu1 %1380 }
 0x137   : > { %v4850_v24 = vpop.eup %4849  ;;  %v4340_v34 = vpack.c.bf16 %v4848_v58, %v4840_v40  ;;  %v574_v58 = vsel %vm505_vm0, %v5940_v25, 0.0  ;;  %v576_v25 = vsel %vm505_vm0, %v5949_v29, 0.0 }
 0x138   : > { %4307 = vmatprep.subr.bf16.mxu0 %v4306_v7  ;;  %v4338_v12 = vpack.c.bf16 %v4850_v24, %v4842_v19  ;;  %3520 = vperm.xlu1 %4722, %v3474_v53  }
 0x139   : > { %4309 = vmatpush1.bf16.msra.mxu0 %v4308_v43 }
 0x13a   : > { %4339 = vmatprep.subr.bf16.mxu1 %v4338_v12  ;;  %v577_v12 = vsel %vm505_vm0, %v5951_v30, 0.0  ;;  %v691_v30 = vsel %vm489_vm1, %v5966_v36, %v574_v58  ;;  %v693_v36 = vsel %vm489_vm1, %v5968_v37, %v576_v25 }
 0x13b   : > { %4341 = vmatpush1.bf16.msra.mxu1 %v4340_v34 }
 0x13c   : > { %1508 = vmatmul.mubr.f32.vlgmr.msra.gmra.mrb[0].mxu0 %v1331_v44  ;;  %3530 = vperm.xlu1 %4722, %v3476_v56  }
 0x13d   : > { %1513 = vmatprep.mubr.f32.mxu0 %v7533_v54 }
 0x13e   : > { %1669 = vmatmul.mubr.f32.vlgmr.msra.gmra.mrb[0].mxu1 %v1331_v44 }
 0x13f   : > { %1674 = vmatprep.mubr.f32.mxu1 %v7533_v54 }
 0x140   : > { %1514 = vmatmul.mubr.f32.gmra.mrb[2].mxu0 %v1332_v1  ;;  %3540 = vperm.xlu1 %4722, %v3478_v21  }
 0x141   : > { %1519 = vmatprep.mubr.f32.mxu0 %v7533_v54 }
 0x142   : > { %1675 = vmatmul.mubr.f32.gmra.mrb[2].mxu1 %v1332_v1  ;;  %v692_v1 = vsel %vm489_vm1, %v5953_v31, %v575_v9  ;;  %v694_v31 = vsel %vm489_vm1, %v5958_v33, %v577_v12 }
 0x143   : > { %1680 = vmatprep.mubr.f32.mxu1 %v7533_v54 }
 0x144   : > { %1520 = vmatmul.mubr.f32.gmra.mrb[4].mxu0 %v1333_v15  ;;  %3550 = vperm.xlu1 %4722, %v3480_v27  }
 0x145   : > { %1525 = vmatprep.mubr.f32.mxu0 %v7533_v54 }
 0x146   : > { %1681 = vmatmul.mubr.f32.gmra.mrb[4].mxu1 %v1333_v15 }
 0x147   : > { %1686 = vmatprep.mubr.f32.mxu1 %v7533_v54 }
 0x148   : > { %1526 = vmatmul.mubr.f32.gmra.mrb[6].mxu0 %v1334_v14  ;;  %3560 = vperm.xlu1 %4722, %v3482_v2  }
 0x149   : > { %1531 = vmatprep.mubr.f32.mxu0 %v7533_v54 }
 0x14a   : > { %1687 = vmatmul.mubr.f32.gmra.mrb[6].mxu1 %v1334_v14 }
 0x14b   : > { %1692 = vmatprep.mubr.f32.mxu1 %v7533_v54 }
 0x14c   : > { %1532 = vmatmul.mubr.f32.gmra.mrb[8].mxu0 %v1335_v3 }
 0x14d   : > { %1537 = vmatprep.mubr.f32.mxu0 %v7533_v54 }
 0x14e   : > { %1693 = vmatmul.mubr.f32.gmra.mrb[8].mxu1 %v1335_v3  ;;  %v1386_v3 = vpop.permute.xlu0 %1385 }
 0x14f   : > { %1698 = vmatprep.mubr.f32.mxu1 %v7533_v54 }
 0x150   : > { %1538 = vmatmul.mubr.f32.gmra.mrb[10].mxu0 %v1336_v61 }
 0x151   : > { %1543 = vmatprep.mubr.f32.mxu0 %v7533_v54 }
 0x152   : > { %1699 = vmatmul.mubr.f32.gmra.mrb[10].mxu1 %v1336_v61 }
 0x153   : > { %1704 = vmatprep.mubr.f32.mxu1 %v7533_v54 }
 0x154   : > { %1544 = vmatmul.mubr.f32.gmra.mrb[12].mxu0 %v1337_v48 }
 0x155   : > { %1549 = vmatprep.mubr.f32.mxu0 %v7533_v54 }
 0x156   : > { %1705 = vmatmul.mubr.f32.gmra.mrb[12].mxu1 %v1337_v48 }
 0x157   : > { %1710 = vmatprep.mubr.f32.mxu1 %v7533_v54 }
 0x158   : > { %1550 = vmatmul.mubr.f32.gmra.mrb[14].mxu0 %v1338_v8 }
 0x159   : > { %1555 = vmatprep.mubr.f32.mxu0 %v7533_v54 }
 0x15a   : > { %1711 = vmatmul.mubr.f32.gmra.mrb[14].mxu1 %v1338_v8 }
 0x15b   : > { %1716 = vmatprep.mubr.f32.mxu1 %v7533_v54 }
 0x15c   : > { %1556 = vmatmul.mubr.f32.gmra.mrb[16].mxu0 %v1339_v57 }
 0x15d   : > { %1561 = vmatprep.mubr.f32.mxu0 %v7533_v54 }
 0x15e   : > { %1717 = vmatmul.mubr.f32.gmra.mrb[16].mxu1 %v1339_v57 }
 0x15f   : > { %1722 = vmatprep.mubr.f32.mxu1 %v7533_v54 }
 0x160   : > { %1562 = vmatmul.mubr.f32.gmra.mrb[18].mxu0 %v1340_v16 }
 0x161   : > { %1567 = vmatprep.mubr.f32.mxu0 %v7533_v54 }
 0x162   : > { %1723 = vmatmul.mubr.f32.gmra.mrb[18].mxu1 %v1340_v16 }
 0x163   : > { %1728 = vmatprep.mubr.f32.mxu1 %v7533_v54 }
 0x164   : > { %1568 = vmatmul.mubr.f32.gmra.mrb[20].mxu0 %v1341_v45 }
 0x165   : > { %1573 = vmatprep.mubr.f32.mxu0 %v7533_v54 }
 0x166   : > { %1729 = vmatmul.mubr.f32.gmra.mrb[20].mxu1 %v1341_v45 }
 0x167   : > { %1734 = vmatprep.mubr.f32.mxu1 %v7533_v54 }
 0x168   : > { %1574 = vmatmul.mubr.f32.gmra.mrb[22].mxu0 %v1342_v11 }
 0x169   : > { %1579 = vmatprep.mubr.f32.mxu0 %v7533_v54 }
 0x16a   : > { %1735 = vmatmul.mubr.f32.gmra.mrb[22].mxu1 %v1342_v11 }
 0x16b   : > { %1740 = vmatprep.mubr.f32.mxu1 %v7533_v54 }
 0x16c   : > { %1580 = vmatmul.mubr.f32.gmra.mrb[24].mxu0 %v1343_v13 }
 0x16d   : > { %1585 = vmatprep.mubr.f32.mxu0 %v7533_v54 }
 0x16e   : > { %1741 = vmatmul.mubr.f32.gmra.mrb[24].mxu1 %v1343_v13 }
 0x16f   : > { %1746 = vmatprep.mubr.f32.mxu1 %v7533_v54 }
 0x170   : > { %1586 = vmatmul.mubr.f32.gmra.mrb[26].mxu0 %v1344_v52 }
 0x171   : > { %1591 = vmatprep.mubr.f32.mxu0 %v7533_v54 }
 0x172   : > { %1747 = vmatmul.mubr.f32.gmra.mrb[26].mxu1 %v1344_v52 }
 0x173   : > { %1752 = vmatprep.mubr.f32.mxu1 %v7533_v54 }
 0x174   : > { %1592 = vmatmul.mubr.f32.gmra.mrb[28].mxu0 %v1345_v46 }
 0x175   : > { %1597 = vmatprep.mubr.f32.mxu0 %v7533_v54 }
 0x176   : > { %1753 = vmatmul.mubr.f32.gmra.mrb[28].mxu1 %v1345_v46 }
 0x177   : > { %1758 = vmatprep.mubr.f32.mxu1 %v7533_v54 }
 0x178   : > { %1598 = vmatmul.mubr.f32.gmra.mrb[30].mxu0 %v1346_v59 }
 0x179   : > { %2069 = vmatprep.mubr.f32.mxu0 %v7533_v54 }
 0x17a   : > { %1759 = vmatmul.mubr.f32.gmra.mrb[30].mxu1 %v1346_v59 }
 0x17b   : > { %2230 = vmatprep.mubr.f32.mxu1 %v7533_v54 }
 0x20f   : > { %v1509_v17 = vpop.f32.mrb[0].mxu0 }
 0x210   : > { %v1510_v4 = vadd.f32 %v1509_v17, %v1366_v18  ;;  %v1511_v22 = vpop.f32.mrb[1].mxu0 }
 0x211   : > { %v1670_v42 = vpop.f32.mrb[0].mxu1  ;;  %v1512_v23 = vadd.f32 %v1511_v22, %v1366_v18 }
 0x212   : > { %4851 = vtanh.f32 %v1510_v4  ;;  %v1671_v39 = vadd.f32 %v1670_v42, %v1366_v18  ;;  %v1672_v35 = vpop.f32.mrb[1].mxu1  ;;  %v1391_v4 = vpop.permute.xlu1 %1390 }
 0x213   : > { %4853 = vtanh.f32 %v1512_v23  ;;  %v1673_v41 = vadd.f32 %v1672_v35, %v1366_v18  ;;  %v1515_v47 = vpop.f32.mrb[2].mxu0 }
 0x214   : > { %4855 = vtanh.f32 %v1671_v39  ;;  %v1516_v55 = vadd.f32 %v1515_v47, %v1371_v5  ;;  %v1517_v32 = vpop.f32.mrb[3].mxu0 }
 0x215   : > { %4857 = vtanh.f32 %v1673_v41  ;;  %v1676_v50 = vpop.f32.mrb[2].mxu1  ;;  %v1518_v60 = vadd.f32 %v1517_v32, %v1371_v5 }
 0x216   : > { %4859 = vtanh.f32 %v1516_v55  ;;  %v1677_v62 = vadd.f32 %v1676_v50, %v1371_v5  ;;  %v1678_v63 = vpop.f32.mrb[3].mxu1 }
 0x217   : > { %4861 = vtanh.f32 %v1518_v60  ;;  %v1679_v51 = vadd.f32 %v1678_v63, %v1371_v5  ;;  %v1521_v0 = vpop.f32.mrb[4].mxu0 }
 0x218   : > { %4863 = vtanh.f32 %v1677_v62  ;;  %v1522_v38 = vadd.f32 %v1521_v0, %v1376_v26  ;;  %v1523_v6 = vpop.f32.mrb[5].mxu0 }
 0x219   : > { %4865 = vtanh.f32 %v1679_v51  ;;  %v1682_v49 = vpop.f32.mrb[4].mxu1  ;;  %v1524_v40 = vadd.f32 %v1523_v6, %v1376_v26  ;;  %v1396_v51 = vpop.permute.xlu0 %1395 }
 0x21a   : > { %v1684_v19 = vpop.f32.mrb[5].mxu1  ;;  %4867 = vtanh.f32 %v1522_v38  ;;  %v1683_v15 = vadd.f32 %v1682_v49, %v1376_v26 }
 0x21b   : > { %v1685_v53 = vadd.f32 %v1684_v19, %v1376_v26  ;;  %v1527_v43 = vpop.f32.mrb[6].mxu0  ;;  %4869 = vtanh.f32 %v1524_v40 }
 0x21c   : > { %v4852_v7 = vpop.eup %4851  ;;  %v1528_v24 = vadd.f32 %v1527_v43, %v1381_v20  ;;  %v1529_v34 = vpop.f32.mrb[7].mxu0 }
 0x21d   : > { %v4854_v44 = vpop.eup %4853  ;;  %4871 = vtanh.f32 %v1685_v53  ;;  %v1688_v56 = vpop.f32.mrb[6].mxu1  ;;  %v1530_v28 = vadd.f32 %v1529_v34, %v1381_v20  ;;  %v6572_v52 = vadd.f32 %v4852_v7, %v691_v30 }
 0x21e   : > { %v4856_v21 = vpop.eup %4855  ;;  %4873 = vtanh.f32 %v1528_v24  ;;  %v1689_v27 = vadd.f32 %v1688_v56, %v1381_v20  ;;  %v1690_v14 = vpop.f32.mrb[7].mxu1  ;;  %v6565_v16 = vadd.f32 %v4854_v44, %v692_v1 }
 0x21f   : > { %v4858_v2 = vpop.eup %4857  ;;  %4875 = vtanh.f32 %v1530_v28  ;;  %v1691_v61 = vadd.f32 %v1690_v14, %v1381_v20  ;;  %v1533_v48 = vpop.f32.mrb[8].mxu0  ;;  %v6584_v23 = vadd.f32 %v4856_v21, %v693_v36 }
 0x220   : > { %v6563_v8 = vpop.eup %4859  ;;  %4877 = vtanh.f32 %v1689_v27  ;;  %v1534_v29 = vadd.f32 %v1533_v48, %v1386_v3  ;;  %v1535_v57 = vpop.f32.mrb[9].mxu0  ;;  %v6578_v18 = vadd.f32 %v4858_v2, %v694_v31 }
 0x221   : > { %v6570_v45 = vpop.eup %4861  ;;  %4879 = vtanh.f32 %v1691_v61  ;;  %v1694_v11 = vpop.f32.mrb[8].mxu1  ;;  %v1536_v13 = vadd.f32 %v1535_v57, %v1386_v3  ;;  %v4344_v42 = vpack.c.bf16 %v6563_v8, %v6572_v52 }
 0x222   : > { %v6574_v46 = vpop.eup %4863  ;;  %4881 = vtanh.f32 %v1683_v15  ;;  %v1696_v33 = vpop.f32.mrb[9].mxu1  ;;  %v4342_v59 = vpack.c.bf16 %v6570_v45, %v6565_v16  ;;  %v1695_v60 = vadd.f32 %v1694_v11, %v1386_v3 }
 0x223   : > { %v6580_v17 = vpop.eup %4865  ;;  %4883 = vtanh.f32 %v1534_v29  ;;  %v1697_v37 = vadd.f32 %v1696_v33, %v1386_v3  ;;  %v1539_v22 = vpop.f32.mrb[10].mxu0  ;;  %v4376_v32 = vpack.c.bf16 %v6574_v46, %v6584_v23 }
 0x224   : > { %4885 = vtanh.f32 %v1536_v13  ;;  %v1540_v39 = vadd.f32 %v1539_v22, %v1391_v4  ;;  %v1541_v35 = vpop.f32.mrb[11].mxu0  ;;  %4343 = vmatprep.subr.bf16.mxu0 %v4342_v59  ;;  %v4374_v5 = vpack.c.bf16 %v6580_v17, %v6578_v18  ;;  %v6588_v41 = vpop.eup %4867 }
 0x225   : > { %4887 = vtanh.f32 %v1697_v37  ;;  %v1700_v47 = vpop.f32.mrb[10].mxu1  ;;  %v1542_v55 = vadd.f32 %v1541_v35, %v1391_v4  ;;  %4345 = vmatpush1.bf16.msra.mxu0 %v4344_v42  ;;  %v6592_v50 = vpop.eup %4869 }
 0x226   : > { %4889 = vtanh.f32 %v1540_v39  ;;  %v1701_v62 = vadd.f32 %v1700_v47, %v1391_v4  ;;  %v1702_v63 = vpop.f32.mrb[11].mxu1  ;;  %4375 = vmatprep.subr.bf16.mxu1 %v4374_v5  ;;  %v1401_v24 = vpop.permute.xlu1 %1400 }
 0x227   : > { %v6594_v26 = vpop.eup %4871  ;;  %4891 = vtanh.f32 %v1542_v55  ;;  %v1703_v0 = vadd.f32 %v1702_v63, %v1391_v4  ;;  %4377 = vmatpush1.bf16.msra.mxu1 %v4376_v32  ;;  %v1545_v38 = vpop.f32.mrb[12].mxu0 }
 0x228   : > { %v6596_v6 = vpop.eup %4873  ;;  %4893 = vtanh.f32 %v1701_v62  ;;  %v1546_v49 = vadd.f32 %v1545_v38, %v1396_v51  ;;  %v1547_v40 = vpop.f32.mrb[13].mxu0 }
 0x229   : > { %v6598_v19 = vpop.eup %4875  ;;  %4895 = vtanh.f32 %v1703_v0  ;;  %v1706_v9 = vpop.f32.mrb[12].mxu1  ;;  %v1548_v20 = vadd.f32 %v1547_v40, %v1396_v51  ;;  %v4348_v44 = vpack.c.bf16 %v6596_v6, %v6588_v41 }
 0x22a   : > { %v6600_v53 = vpop.eup %4877  ;;  %4897 = vtanh.f32 %v1695_v60  ;;  %v1708_v43 = vpop.f32.mrb[13].mxu1  ;;  %v4346_v58 = vpack.c.bf16 %v6598_v19, %v6592_v50  ;;  %v1707_v2 = vadd.f32 %v1706_v9, %v1396_v51 }
 0x22b   : > { %v6604_v7 = vpop.eup %4879  ;;  %4899 = vtanh.f32 %v1546_v49  ;;  %v1709_v34 = vadd.f32 %v1708_v43, %v1396_v51  ;;  %v1551_v12 = vpop.f32.mrb[14].mxu0 }
 0x22c   : > { %v6608_v56 = vpop.eup %4881  ;;  %4901 = vtanh.f32 %v1548_v20  ;;  %v1552_v28 = vadd.f32 %v1551_v12, %v1401_v24  ;;  %v1553_v1 = vpop.f32.mrb[15].mxu0  ;;  %4347 = vmatprep.subr.bf16.mxu0 %v4346_v58  ;;  %v4378_v25 = vpack.c.bf16 %v6604_v7, %v6594_v26 }
 0x22d   : > { %v6612_v21 = vpop.eup %4883  ;;  %4903 = vtanh.f32 %v1709_v34  ;;  %v1712_v15 = vpop.f32.mrb[14].mxu1  ;;  %v1554_v27 = vadd.f32 %v1553_v1, %v1401_v24  ;;  %4349 = vmatpush1.bf16.msra.mxu0 %v4348_v44  ;;  %v4380_v14 = vpack.c.bf16 %v6600_v53, %v6608_v56 }
 0x22e   : > { %v6616_v30 = vpop.eup %4885  ;;  %4905 = vtanh.f32 %v1552_v28  ;;  %v1713_v3 = vadd.f32 %v1712_v15, %v1401_v24  ;;  %v1714_v61 = vpop.f32.mrb[15].mxu1  ;;  %4379 = vmatprep.subr.bf16.mxu1 %v4378_v25 }
 0x22f   : > { %v6618_v48 = vpop.eup %4887  ;;  %v1406_v31 = vpop.permute.xlu0 %1405  ;;  %4907 = vtanh.f32 %v1554_v27  ;;  %v1715_v29 = vadd.f32 %v1714_v61, %v1401_v24  ;;  %4381 = vmatpush1.bf16.msra.mxu1 %v4380_v14 }
 0x230   : > { %v1557_v57 = vpop.f32.mrb[16].mxu0  ;;  %v6620_v36 = vpop.eup %4889  ;;  %4909 = vtanh.f32 %v1713_v3 }
 0x231   : > { %v1558_v11 = vadd.f32 %v1557_v57, %v1406_v31  ;;  %v1559_v13 = vpop.f32.mrb[17].mxu0  ;;  %v6622_v33 = vpop.eup %4891  ;;  %4911 = vtanh.f32 %v1715_v29  ;;  %v4352_v55 = vpack.c.bf16 %v6620_v36, %v6612_v21 }
 0x232   : > { %v1718_v59 = vpop.f32.mrb[16].mxu1  ;;  %v1560_v4 = vadd.f32 %v1559_v13, %v1406_v31  ;;  %v6624_v37 = vpop.eup %4893  ;;  %4913 = vtanh.f32 %v1707_v2  ;;  %v4350_v42 = vpack.c.bf16 %v6622_v33, %v6616_v30 }
 0x233   : > { %v1720_v22 = vpop.f32.mrb[17].mxu1  ;;  %v6628_v39 = vpop.eup %4895  ;;  %4915 = vtanh.f32 %v1558_v11  ;;  %v1719_v9 = vadd.f32 %v1718_v59, %v1406_v31 }
 0x234   : > { %v1411_v35 = vpop.permute.xlu1 %1410  ;;  %v1721_v5 = vadd.f32 %v1720_v22, %v1406_v31  ;;  %v1563_v47 = vpop.f32.mrb[18].mxu0  ;;  %4917 = vtanh.f32 %v1560_v4  ;;  %4351 = vmatprep.subr.bf16.mxu0 %v4350_v42  ;;  %v4382_v63 = vpack.c.bf16 %v6628_v39, %v6618_v48 }
 0x235   : > { %v6632_v32 = vpop.eup %4897  ;;  %v1564_v60 = vadd.f32 %v1563_v47, %v1411_v35  ;;  %v1565_v62 = vpop.f32.mrb[19].mxu0  ;;  %4353 = vmatpush1.bf16.msra.mxu0 %v4352_v55 }
 0x236   : > { %v6636_v51 = vpop.eup %4899  ;;  %4919 = vtanh.f32 %v1721_v5  ;;  %v1724_v0 = vpop.f32.mrb[18].mxu1  ;;  %v1566_v38 = vadd.f32 %v1565_v62, %v1411_v35  ;;  %v4384_v49 = vpack.c.bf16 %v6624_v37, %v6632_v32  ;;  %4383 = vmatprep.subr.bf16.mxu1 %v4382_v63 }
 0x237   : > { %v6640_v40 = vpop.eup %4901  ;;  %4921 = vtanh.f32 %v1564_v60  ;;  %v1725_v20 = vadd.f32 %v1724_v0, %v1411_v35  ;;  %v1726_v43 = vpop.f32.mrb[19].mxu1 }
 0x238   : > { %v6642_v58 = vpop.eup %4903  ;;  %v1416_v24 = vpop.permute.xlu0 %1415  ;;  %4923 = vtanh.f32 %v1566_v38  ;;  %v1727_v34 = vadd.f32 %v1726_v43, %v1411_v35  ;;  %4385 = vmatpush1.bf16.msra.mxu1 %v4384_v49 }
 0x239   : > { %v1569_v12 = vpop.f32.mrb[20].mxu0  ;;  %v6644_v44 = vpop.eup %4905  ;;  %4925 = vtanh.f32 %v1725_v20 }
 0x23a   : > { %v1570_v28 = vadd.f32 %v1569_v12, %v1416_v24  ;;  %v1571_v1 = vpop.f32.mrb[21].mxu0  ;;  %v6646_v25 = vpop.eup %4907  ;;  %4927 = vtanh.f32 %v1727_v34  ;;  %v4356_v11 = vpack.c.bf16 %v6644_v44, %v6636_v51 }
 0x23b   : > { %v1730_v15 = vpop.f32.mrb[20].mxu1  ;;  %v1572_v27 = vadd.f32 %v1571_v1, %v1416_v24  ;;  %v6648_v14 = vpop.eup %4909  ;;  %4929 = vtanh.f32 %v1719_v9  ;;  %v4354_v3 = vpack.c.bf16 %v6646_v25, %v6640_v40 }
 0x23c   : > { %v1732_v2 = vpop.f32.mrb[21].mxu1  ;;  %v6652_v61 = vpop.eup %4911  ;;  %4931 = vtanh.f32 %v1570_v28  ;;  %v1731_v60 = vadd.f32 %v1730_v15, %v1416_v24 }
 0x23d   : > { %v1421_v31 = vpop.permute.xlu1 %1420  ;;  %v1733_v29 = vadd.f32 %v1732_v2, %v1416_v24  ;;  %v1575_v57 = vpop.f32.mrb[22].mxu0  ;;  %4933 = vtanh.f32 %v1572_v27  ;;  %4355 = vmatprep.subr.bf16.mxu0 %v4354_v3  ;;  %v4386_v22 = vpack.c.bf16 %v6652_v61, %v6642_v58 }
 0x23e   : > { %v6656_v13 = vpop.eup %4913  ;;  %v1576_v59 = vadd.f32 %v1575_v57, %v1421_v31  ;;  %v1577_v4 = vpop.f32.mrb[23].mxu0  ;;  %4357 = vmatpush1.bf16.msra.mxu0 %v4356_v11 }
 0x23f   : > { %v6660_v42 = vpop.eup %4915  ;;  %4935 = vtanh.f32 %v1733_v29  ;;  %v1736_v35 = vpop.f32.mrb[22].mxu1  ;;  %v1578_v5 = vadd.f32 %v1577_v4, %v1421_v31  ;;  %v4388_v47 = vpack.c.bf16 %v6648_v14, %v6656_v13  ;;  %4387 = vmatprep.subr.bf16.mxu1 %v4386_v22 }
 0x240   : > { %v6664_v55 = vpop.eup %4917  ;;  %4937 = vtanh.f32 %v1576_v59  ;;  %v1737_v62 = vadd.f32 %v1736_v35, %v1421_v31  ;;  %v1738_v63 = vpop.f32.mrb[23].mxu1 }
 0x241   : > { %v6666_v0 = vpop.eup %4919  ;;  %v1426_v38 = vpop.permute.xlu0 %1425  ;;  %4939 = vtanh.f32 %v1578_v5  ;;  %v1739_v49 = vadd.f32 %v1738_v63, %v1421_v31  ;;  %4389 = vmatpush1.bf16.msra.mxu1 %v4388_v47 }
 0x242   : > { %v1581_v9 = vpop.f32.mrb[24].mxu0  ;;  %v6668_v20 = vpop.eup %4921  ;;  %4941 = vtanh.f32 %v1737_v62 }
 0x243   : > { %v1582_v43 = vadd.f32 %v1581_v9, %v1426_v38  ;;  %v1583_v34 = vpop.f32.mrb[25].mxu0  ;;  %v6670_v12 = vpop.eup %4923  ;;  %4943 = vtanh.f32 %v1739_v49  ;;  %v4360_v57 = vpack.c.bf16 %v6668_v20, %v6660_v42 }
 0x244   : > { %v1742_v24 = vpop.f32.mrb[24].mxu1  ;;  %v1584_v28 = vadd.f32 %v1583_v34, %v1426_v38  ;;  %v6672_v1 = vpop.eup %4925  ;;  %4945 = vtanh.f32 %v1731_v60  ;;  %v4358_v27 = vpack.c.bf16 %v6670_v12, %v6664_v55 }
 0x245   : > { %7534 = vst [vmem:[#allocation7_spill] sm:$0xff] %v6672_v1  ;;  %v1744_v15 = vpop.f32.mrb[25].mxu1  ;;  %v6676_v2 = vpop.eup %4927  ;;  %4947 = vtanh.f32 %v1582_v43  ;;  %v1743_v63 = vadd.f32 %v1742_v24, %v1426_v38 }
 0x246   : > { %7535 = vst [vmem:[#allocation8_spill] sm:$0xff] %v6676_v2  ;;  %v1431_v3 = vpop.permute.xlu1 %1430  ;;  %v1745_v31 = vadd.f32 %v1744_v15, %v1426_v38  ;;  %v1587_v29 = vpop.f32.mrb[26].mxu0  ;;  %4949 = vtanh.f32 %v1584_v28  ;;  %4359 = vmatprep.subr.bf16.mxu0 %v4358_v27  ;;  %v4390_v22 = vpack.c.bf16 %v6676_v2, %v6666_v0 }
 0x247   : > { %v6680_v11 = vpop.eup %4929  ;;  %v1588_v59 = vadd.f32 %v1587_v29, %v1431_v3  ;;  %v1589_v4 = vpop.f32.mrb[27].mxu0  ;;  %4361 = vmatpush1.bf16.msra.mxu0 %v4360_v57 }
 0x248   : > { %7536 = vst [vmem:[#allocation9_spill] sm:$0xff] %v6680_v11  ;;  %v6684_v35 = vpop.eup %4931  ;;  %4951 = vtanh.f32 %v1745_v31  ;;  %v1748_v5 = vpop.f32.mrb[26].mxu1  ;;  %v1590_v47 = vadd.f32 %v1589_v4, %v1431_v3  ;;  %v4392_v60 = vpack.c.bf16 %v6672_v1, %v6680_v11  ;;  %4391 = vmatprep.subr.bf16.mxu1 %v4390_v22 }
 0x249   : > { %7537 = vst [vmem:[#allocation10_spill] sm:$0xff] %v6684_v35  ;;  %v6688_v62 = vpop.eup %4933  ;;  %4953 = vtanh.f32 %v1588_v59  ;;  %v1749_v49 = vadd.f32 %v1748_v5, %v1431_v3  ;;  %v1750_v9 = vpop.f32.mrb[27].mxu1 }
 0x24a   : > { %7538 = vst [vmem:[#allocation11_spill] sm:$0xff] %v6688_v62  ;;  %v6690_v43 = vpop.eup %4935  ;;  %v1436_v34 = vpop.permute.xlu0 %1435  ;;  %4955 = vtanh.f32 %v1590_v47  ;;  %v1751_v28 = vadd.f32 %v1750_v9, %v1431_v3  ;;  %4393 = vmatpush1.bf16.msra.mxu1 %v4392_v60 }
 0x24b   : > { %7539 = vst [vmem:[#allocation12_spill] sm:$0xff] %v6690_v43  ;;  %v1593_v15 = vpop.f32.mrb[28].mxu0  ;;  %v6692_v27 = vpop.eup %4937  ;;  %4957 = vtanh.f32 %v1749_v49 }
 0x24c   : > { %7540 = vst [vmem:[#allocation13_spill] sm:$0xff] %v6692_v27  ;;  %v1594_v31 = vadd.f32 %v1593_v15, %v1436_v34  ;;  %v1595_v29 = vpop.f32.mrb[29].mxu0  ;;  %v6694_v57 = vpop.eup %4939  ;;  %4959 = vtanh.f32 %v1751_v28  ;;  %v4364_v49 = vpack.c.bf16 %v6692_v27, %v6684_v35 }
 0x24d   : > { %7541 = vst [vmem:[#allocation14_spill] sm:$0xff] %v6694_v57  ;;  %v1754_v38 = vpop.f32.mrb[28].mxu1  ;;  %v1596_v24 = vadd.f32 %v1595_v29, %v1436_v34  ;;  %v6696_v59 = vpop.eup %4941  ;;  %4961 = vtanh.f32 %v1743_v63  ;;  %v4362_v22 = vpack.c.bf16 %v6694_v57, %v6688_v62 }
 0x24e   : > { %7542 = vst [vmem:[#allocation15_spill] sm:$0xff] %v6696_v59  ;;  %v1756_v4 = vpop.f32.mrb[29].mxu1  ;;  %v6700_v3 = vpop.eup %4943  ;;  %4963 = vtanh.f32 %v1594_v31  ;;  %v1755_v62 = vadd.f32 %v1754_v38, %v1436_v34 }
 0x24f   : > { %7543 = vst [vmem:[#allocation16_spill] sm:$0xff] %v6700_v3  ;;  %v1441_v5 = vpop.permute.xlu1 %1440  ;;  %v1757_v47 = vadd.f32 %v1756_v4, %v1436_v34  ;;  %v1599_v60 = vpop.f32.mrb[30].mxu0  ;;  %4965 = vtanh.f32 %v1596_v24  ;;  %4363 = vmatprep.subr.bf16.mxu0 %v4362_v22  ;;  %v4394_v63 = vpack.c.bf16 %v6700_v3, %v6690_v43 }
 0x250   : > { %v6704_v9 = vpop.eup %4945  ;;  %v1600_v28 = vadd.f32 %v1599_v60, %v1441_v5  ;;  %v1601_v15 = vpop.f32.mrb[31].mxu0  ;;  %4365 = vmatpush1.bf16.msra.mxu0 %v4364_v49 }
 0x251   : > { %7544 = vst [vmem:[#allocation17_spill] sm:$0xff] %v6704_v9  ;;  %v6708_v29 = vpop.eup %4947  ;;  %4967 = vtanh.f32 %v1757_v47  ;;  %v1760_v10 = vpop.f32.mrb[30].mxu1  ;;  %v1602_v57 = vadd.f32 %v1601_v15, %v1441_v5  ;;  %v4396_v31 = vpack.c.bf16 %v6696_v59, %v6704_v9  ;;  %4395 = vmatprep.subr.bf16.mxu1 %v4394_v63 }
 0x252   : > { %7545 = vst [vmem:[#allocation18_spill] sm:$0xff] %v6708_v29  ;;  %v6712_v4 = vpop.eup %4949  ;;  %4969 = vtanh.f32 %v1600_v28  ;;  %v1761_v24 = vadd.f32 %v1760_v10, %v1441_v5  ;;  %v1762_v60 = vpop.f32.mrb[31].mxu1 }
 0x253   : > { %7546 = vst [vmem:[#allocation19_spill] sm:$0xff] %v6712_v4  ;;  %v6714_v22 = vpop.eup %4951  ;;  %4971 = vtanh.f32 %v1602_v57  ;;  %v1763_v3 = vadd.f32 %v1762_v60, %v1441_v5  ;;  %4397 = vmatpush1.bf16.msra.mxu1 %v4396_v31 }
 0x254   : > { %7547 = vst [vmem:[#allocation20_spill] sm:$0xff] %v6714_v22  ;;  %v6716_v43 = vpop.eup %4953  ;;  %4973 = vtanh.f32 %v1761_v24 }
 0x255   : > { %7548 = vst [vmem:[#allocation21_spill] sm:$0xff] %v6716_v43  ;;  %v6718_v47 = vpop.eup %4955  ;;  %4975 = vtanh.f32 %v1763_v3  ;;  %v4368_v38 = vpack.c.bf16 %v6716_v43, %v6708_v29 }
 0x256   : > { %7549 = vst [vmem:[#allocation22_spill] sm:$0xff] %v6718_v47  ;;  %v6720_v49 = vpop.eup %4957  ;;  %4977 = vtanh.f32 %v1755_v62  ;;  %v4366_v34 = vpack.c.bf16 %v6718_v47, %v6712_v4 }
 0x257   : > { %7550 = vst [vmem:[#allocation23_spill] sm:$0xff] %v6720_v49  ;;  %v6724_v10 = vpop.eup %4959 }
 0x258   : > { %7551 = vst [vmem:[#allocation24_spill] sm:$0xff] %v6724_v10  ;;  %v6728_v57 = vpop.eup %4961  ;;  %4367 = vmatprep.subr.bf16.mxu0 %v4366_v34  ;;  %v4398_v5 = vpack.c.bf16 %v6724_v10, %v6714_v22  ;;  %v1893_v10 = vld [vmem:[%s7455_s5] sm:$0xff] }
 0x259   : > { %7552 = vst [vmem:[#allocation25_spill] sm:$0xff] %v6728_v57  ;;  %v6732_v28 = vpop.eup %4963  ;;  %4369 = vmatpush1.bf16.msra.mxu0 %v4368_v38  ;;  %v4400_v62 = vpack.c.bf16 %v6720_v49, %v6728_v57 }
 0x25a   : > { %7553 = vst [vmem:[#allocation26_spill] sm:$0xff] %v6732_v28  ;;  %v6736_v3 = vpop.eup %4965  ;;  %4399 = vmatprep.subr.bf16.mxu1 %v4398_v5 }
 0x25b   : > { %7554 = vst [vmem:[#allocation27_spill] sm:$0xff] %v6736_v3  ;;  %v6738_v15 = vpop.eup %4967  ;;  %4401 = vmatpush1.bf16.msra.mxu1 %v4400_v62 }
 0x25c   : > { %7555 = vst [vmem:[#allocation28_spill] sm:$0xff] %v6738_v15  ;;  %v6740_v63 = vpop.eup %4969 }
 0x25d   : > { %7556 = vst [vmem:[#allocation29_spill] sm:$0xff] %v6740_v63  ;;  %v6742_v31 = vpop.eup %4971  ;;  %v4372_v38 = vpack.c.bf16 %v6740_v63, %v6732_v28 }
 0x25e   : > { %7557 = vst [vmem:[#allocation30_spill] sm:$0xff] %v6742_v31  ;;  %v6744_v24 = vpop.eup %4973  ;;  %v4370_v60 = vpack.c.bf16 %v6742_v31, %v6736_v3  ;;  %v1933_v31 = vpop.permute.xlu1 %1932 }
 0x25f   : > { %7558 = vst [vmem:[#allocation31_spill] sm:$0xff] %v6744_v24  ;;  %v6748_v34 = vpop.eup %4975 }
 0x260   : > { %7559 = vst [vmem:[#allocation32_spill] sm:$0xff] %v6748_v34  ;;  %v6752_v57 = vpop.eup %4977  ;;  %4371 = vmatprep.subr.bf16.mxu0 %v4370_v60  ;;  %v4402_v5 = vpack.c.bf16 %v6748_v34, %v6738_v15  ;;  %v1894_v60 = vld [vmem:[%s7455_s5 + $0x8] sm:$0xff] }
 0x261   : > { %7560 = vst [vmem:[#allocation33_spill] sm:$0xff] %v6752_v57  ;;  %4373 = vmatpush1.bf16.msra.mxu0 %v4372_v38  ;;  %v4404_v62 = vpack.c.bf16 %v6744_v24, %v6752_v57  ;;  %v1895_v38 = vld [vmem:[%s7455_s5 + $0x10] sm:$0xff] }
 0x262   : > { %4403 = vmatprep.subr.bf16.mxu1 %v4402_v5  ;;  %v1896_v5 = vld [vmem:[%s7455_s5 + $0x18] sm:$0xff] }
 0x263   : > { %4405 = vmatpush1.bf16.msra.mxu1 %v4404_v62  ;;  %v1898_v62 = vld [vmem:[%s7455_s5 + $0x28] sm:$0xff] }
 0x264   : > { %2070 = vmatmul.mubr.f32.vlgmr.msra.gmra.mrb[32].mxu0 %v1893_v10 }
 0x265   : > { %2075 = vmatprep.mubr.f32.mxu0 %v7533_v54 }
 0x266   : > { %2231 = vmatmul.mubr.f32.vlgmr.msra.gmra.mrb[32].mxu1 %v1893_v10  ;;  %v1897_v10 = vld [vmem:[%s7455_s5 + $0x20] sm:$0xff] }
 0x267   : > { %2236 = vmatprep.mubr.f32.mxu1 %v7533_v54 }
 0x268   : > { %2076 = vmatmul.mubr.f32.gmra.mrb[34].mxu0 %v1894_v60 }
 0x269   : > { %2081 = vmatprep.mubr.f32.mxu0 %v7533_v54 }
 0x26a   : > { %2237 = vmatmul.mubr.f32.gmra.mrb[34].mxu1 %v1894_v60  ;;  %v1899_v60 = vld [vmem:[%s7455_s5 + $0x30] sm:$0xff] }
 0x26b   : > { %2242 = vmatprep.mubr.f32.mxu1 %v7533_v54 }
 0x26c   : > { %2082 = vmatmul.mubr.f32.gmra.mrb[36].mxu0 %v1895_v38 }
 0x26d   : > { %2087 = vmatprep.mubr.f32.mxu0 %v7533_v54 }
 0x26e   : > { %2243 = vmatmul.mubr.f32.gmra.mrb[36].mxu1 %v1895_v38  ;;  %v1900_v38 = vld [vmem:[%s7455_s5 + $0x38] sm:$0xff] }
 0x26f   : > { %2248 = vmatprep.mubr.f32.mxu1 %v7533_v54 }
 0x270   : > { %2088 = vmatmul.mubr.f32.gmra.mrb[38].mxu0 %v1896_v5 }
 0x271   : > { %2093 = vmatprep.mubr.f32.mxu0 %v7533_v54 }
 0x272   : > { %2249 = vmatmul.mubr.f32.gmra.mrb[38].mxu1 %v1896_v5  ;;  %v1901_v5 = vld [vmem:[%s7455_s5 + $0x40] sm:$0xff] }
 0x273   : > { %2254 = vmatprep.mubr.f32.mxu1 %v7533_v54 }
 0x274   : > { %2094 = vmatmul.mubr.f32.gmra.mrb[40].mxu0 %v1897_v10 }
 0x275   : > { %2099 = vmatprep.mubr.f32.mxu0 %v7533_v54 }
 0x276   : > { %2255 = vmatmul.mubr.f32.gmra.mrb[40].mxu1 %v1897_v10  ;;  %v1902_v10 = vld [vmem:[%s7455_s5 + $0x48] sm:$0xff] }
 0x277   : > { %2260 = vmatprep.mubr.f32.mxu1 %v7533_v54 }
 0x278   : > { %2100 = vmatmul.mubr.f32.gmra.mrb[42].mxu0 %v1898_v62 }
 0x279   : > { %2105 = vmatprep.mubr.f32.mxu0 %v7533_v54 }
 0x27a   : > { %2261 = vmatmul.mubr.f32.gmra.mrb[42].mxu1 %v1898_v62  ;;  %v1903_v62 = vld [vmem:[%s7455_s5 + $0x50] sm:$0xff] }
 0x27b   : > { %2266 = vmatprep.mubr.f32.mxu1 %v7533_v54 }
 0x27c   : > { %2106 = vmatmul.mubr.f32.gmra.mrb[44].mxu0 %v1899_v60 }
 0x27d   : > { %2111 = vmatprep.mubr.f32.mxu0 %v7533_v54 }
 0x27e   : > { %2267 = vmatmul.mubr.f32.gmra.mrb[44].mxu1 %v1899_v60  ;;  %v1904_v60 = vld [vmem:[%s7455_s5 + $0x58] sm:$0xff] }
 0x27f   : > { %2272 = vmatprep.mubr.f32.mxu1 %v7533_v54 }
 0x280   : > { %2112 = vmatmul.mubr.f32.gmra.mrb[46].mxu0 %v1900_v38 }
 0x281   : > { %2117 = vmatprep.mubr.f32.mxu0 %v7533_v54 }
 0x282   : > { %2273 = vmatmul.mubr.f32.gmra.mrb[46].mxu1 %v1900_v38  ;;  %v1905_v38 = vld [vmem:[%s7455_s5 + $0x60] sm:$0xff] }
 0x283   : > { %2278 = vmatprep.mubr.f32.mxu1 %v7533_v54 }
 0x284   : > { %2118 = vmatmul.mubr.f32.gmra.mrb[48].mxu0 %v1901_v5 }
 0x285   : > { %2123 = vmatprep.mubr.f32.mxu0 %v7533_v54 }
 0x286   : > { %2279 = vmatmul.mubr.f32.gmra.mrb[48].mxu1 %v1901_v5  ;;  %v1906_v5 = vld [vmem:[%s7455_s5 + $0x68] sm:$0xff] }
 0x287   : > { %2284 = vmatprep.mubr.f32.mxu1 %v7533_v54 }
 0x288   : > { %2124 = vmatmul.mubr.f32.gmra.mrb[50].mxu0 %v1902_v10 }
 0x289   : > { %2129 = vmatprep.mubr.f32.mxu0 %v7533_v54 }
 0x28a   : > { %2285 = vmatmul.mubr.f32.gmra.mrb[50].mxu1 %v1902_v10  ;;  %v1907_v10 = vld [vmem:[%s7455_s5 + $0x70] sm:$0xff] }
 0x28b   : > { %2290 = vmatprep.mubr.f32.mxu1 %v7533_v54 }
 0x28c   : > { %2130 = vmatmul.mubr.f32.gmra.mrb[52].mxu0 %v1903_v62 }
 0x28d   : > { %2135 = vmatprep.mubr.f32.mxu0 %v7533_v54 }
 0x28e   : > { %2291 = vmatmul.mubr.f32.gmra.mrb[52].mxu1 %v1903_v62  ;;  %v1908_v62 = vld [vmem:[%s7455_s5 + $0x78] sm:$0xff] }
 0x28f   : > { %2296 = vmatprep.mubr.f32.mxu1 %v7533_v54 }
 0x290   : > { %2136 = vmatmul.mubr.f32.gmra.mrb[54].mxu0 %v1904_v60 }
 0x291   : > { %2141 = vmatprep.mubr.f32.mxu0 %v7533_v54 }
 0x292   : > { %2297 = vmatmul.mubr.f32.gmra.mrb[54].mxu1 %v1904_v60  ;;  %v1928_v60 = vpop.permute.xlu0 %1927 }
 0x293   : > { %2302 = vmatprep.mubr.f32.mxu1 %v7533_v54 }
 0x294   : > { %2142 = vmatmul.mubr.f32.gmra.mrb[56].mxu0 %v1905_v38 }
 0x295   : > { %2147 = vmatprep.mubr.f32.mxu0 %v7533_v54 }
 0x296   : > { %2303 = vmatmul.mubr.f32.gmra.mrb[56].mxu1 %v1905_v38 }
 0x297   : > { %2308 = vmatprep.mubr.f32.mxu1 %v7533_v54 }
 0x298   : > { %2148 = vmatmul.mubr.f32.gmra.mrb[58].mxu0 %v1906_v5 }
 0x299   : > { %2153 = vmatprep.mubr.f32.mxu0 %v7533_v54 }
 0x29a   : > { %2309 = vmatmul.mubr.f32.gmra.mrb[58].mxu1 %v1906_v5 }
 0x29b   : > { %2314 = vmatprep.mubr.f32.mxu1 %v7533_v54 }
 0x29c   : > { %2154 = vmatmul.mubr.f32.gmra.mrb[60].mxu0 %v1907_v10 }
 0x29d   : > { %2159 = vmatprep.mubr.f32.mxu0 %v7533_v54 }
 0x29e   : > { %2315 = vmatmul.mubr.f32.gmra.mrb[60].mxu1 %v1907_v10 }
 0x29f   : > { %2320 = vmatprep.mubr.f32.mxu1 %v7533_v54 }
 0x2a0   : > { %2160 = vmatmul.mubr.f32.gmra.mrb[62].mxu0 %v1908_v62 }
 0x2a1   : > { %2567 = vmatprep.mubr.f32.mxu0 %v7533_v54 }
 0x2a2   : > { %2321 = vmatmul.mubr.f32.gmra.mrb[62].mxu1 %v1908_v62 }
 0x2a3   : > { %2728 = vmatprep.mubr.f32.mxu1 %v7533_v54 }
 0x337   : > { %v2071_v38 = vpop.f32.mrb[32].mxu0 }
 0x338   : > { %v2072_v5 = vadd.f32 %v2071_v38, %v1928_v60  ;;  %v2073_v57 = vpop.f32.mrb[33].mxu0  ;;  %v1938_v38 = vpop.permute.xlu0 %1937 }
 0x339   : > { %v2232_v34 = vpop.f32.mrb[32].mxu1  ;;  %v2074_v15 = vadd.f32 %v2073_v57, %v1928_v60 }
 0x33a   : > { %4979 = vtanh.f32 %v2072_v5  ;;  %v2233_v24 = vadd.f32 %v2232_v34, %v1928_v60  ;;  %v2234_v28 = vpop.f32.mrb[33].mxu1 }
 0x33b   : > { %4981 = vtanh.f32 %v2074_v15  ;;  %v2235_v10 = vadd.f32 %v2234_v28, %v1928_v60  ;;  %v2077_v3 = vpop.f32.mrb[34].mxu0  ;;  %v1943_v60 = vpop.permute.xlu1 %1942 }
 0x33c   : > { %4983 = vtanh.f32 %v2233_v24  ;;  %v2078_v63 = vadd.f32 %v2077_v3, %v1933_v31  ;;  %v2079_v22 = vpop.f32.mrb[35].mxu0 }
 0x33d   : > { %4985 = vtanh.f32 %v2235_v10  ;;  %v2238_v62 = vpop.f32.mrb[34].mxu1  ;;  %v2080_v49 = vadd.f32 %v2079_v22, %v1933_v31 }
 0x33e   : > { %4987 = vtanh.f32 %v2078_v63  ;;  %v2239_v29 = vadd.f32 %v2238_v62, %v1933_v31  ;;  %v2240_v47 = vpop.f32.mrb[35].mxu1 }
 0x33f   : > { %4989 = vtanh.f32 %v2080_v49  ;;  %v2241_v4 = vadd.f32 %v2240_v47, %v1933_v31  ;;  %v2083_v57 = vpop.f32.mrb[36].mxu0  ;;  %v1953_v11 = vpop.permute.xlu1 %1952 }
 0x340   : > { %4991 = vtanh.f32 %v2239_v29  ;;  %v2084_v34 = vadd.f32 %v2083_v57, %v1938_v38  ;;  %v2085_v5 = vpop.f32.mrb[37].mxu0 }
 0x341   : > { %4993 = vtanh.f32 %v2241_v4  ;;  %v2244_v15 = vpop.f32.mrb[36].mxu1  ;;  %v2086_v28 = vadd.f32 %v2085_v5, %v1938_v38 }
 0x342   : > { %4995 = vtanh.f32 %v2084_v34  ;;  %v2245_v24 = vadd.f32 %v2244_v15, %v1938_v38  ;;  %v2246_v3 = vpop.f32.mrb[37].mxu1  ;;  %v1948_v34 = vpop.permute.xlu0 %1947 }
 0x343   : > { %4997 = vtanh.f32 %v2086_v28  ;;  %v2247_v10 = vadd.f32 %v2246_v3, %v1938_v38  ;;  %v2089_v22 = vpop.f32.mrb[38].mxu0 }
 0x344   : > { %v4980_v63 = vpop.eup %4979  ;;  %4999 = vtanh.f32 %v2245_v24  ;;  %v2090_v62 = vadd.f32 %v2089_v22, %v1943_v60  ;;  %v2091_v43 = vpop.f32.mrb[39].mxu0 }
 0x345   : > { %v4982_v49 = vpop.eup %4981  ;;  %5001 = vtanh.f32 %v2247_v10  ;;  %v2250_v47 = vpop.f32.mrb[38].mxu1  ;;  %v2092_v29 = vadd.f32 %v2091_v43, %v1943_v60 }
 0x346   : > { %v4984_v31 = vpop.eup %4983  ;;  %5003 = vtanh.f32 %v2090_v62  ;;  %v2251_v4 = vadd.f32 %v2250_v47, %v1943_v60  ;;  %v2252_v57 = vpop.f32.mrb[39].mxu1 }
 0x347   : > { %v4986_v5 = vpop.eup %4985  ;;  %5005 = vtanh.f32 %v2092_v29  ;;  %v2253_v15 = vadd.f32 %v2252_v57, %v1943_v60  ;;  %v2095_v9 = vpop.f32.mrb[40].mxu0 }
 0x348   : > { %v4988_v28 = vpop.eup %4987  ;;  %5007 = vtanh.f32 %v2251_v4  ;;  %v2096_v38 = vadd.f32 %v2095_v9, %v1948_v34  ;;  %v2097_v3 = vpop.f32.mrb[41].mxu0 }
 0x349   : > { %v4990_v24 = vpop.eup %4989  ;;  %5009 = vtanh.f32 %v2253_v15  ;;  %v2256_v22 = vpop.f32.mrb[40].mxu1  ;;  %v2098_v59 = vadd.f32 %v2097_v3, %v1948_v34  ;;  %v4408_v10 = vpack.c.bf16 %v4988_v28, %v4980_v63 }
 0x34a   : > { %v4992_v27 = vpop.eup %4991  ;;  %5011 = vtanh.f32 %v2096_v38  ;;  %v2257_v43 = vadd.f32 %v2256_v22, %v1948_v34  ;;  %v2258_v62 = vpop.f32.mrb[41].mxu1  ;;  %v4406_v47 = vpack.c.bf16 %v4990_v24, %v4982_v49 }
 0x34b   : > { %v4994_v35 = vpop.eup %4993  ;;  %5013 = vtanh.f32 %v2098_v59  ;;  %v2259_v29 = vadd.f32 %v2258_v62, %v1948_v34  ;;  %v2101_v60 = vpop.f32.mrb[42].mxu0  ;;  %v4440_v57 = vpack.c.bf16 %v4992_v27, %v4984_v31 }
 0x34c   : > { %v4996_v2 = vpop.eup %4995  ;;  %5015 = vtanh.f32 %v2257_v43  ;;  %v2102_v9 = vadd.f32 %v2101_v60, %v1953_v11  ;;  %v2103_v4 = vpop.f32.mrb[43].mxu0  ;;  %4407 = vmatprep.subr.bf16.mxu0 %v4406_v47  ;;  %v4438_v15 = vpack.c.bf16 %v4994_v35, %v4986_v5 }
 0x34d   : > { %v4998_v1 = vpop.eup %4997  ;;  %5017 = vtanh.f32 %v2259_v29  ;;  %v2262_v63 = vpop.f32.mrb[42].mxu1  ;;  %v2104_v28 = vadd.f32 %v2103_v4, %v1953_v11  ;;  %4409 = vmatpush1.bf16.msra.mxu0 %v4408_v10 }
 0x34e   : > { %v5000_v38 = vpop.eup %4999  ;;  %5019 = vtanh.f32 %v2102_v9  ;;  %v2263_v49 = vadd.f32 %v2262_v63, %v1953_v11  ;;  %v2264_v3 = vpop.f32.mrb[43].mxu1  ;;  %4439 = vmatprep.subr.bf16.mxu1 %v4438_v15 }
 0x34f   : > { %v5002_v59 = vpop.eup %5001  ;;  %v1958_v34 = vpop.permute.xlu0 %1957  ;;  %5021 = vtanh.f32 %v2104_v28  ;;  %v2265_v27 = vadd.f32 %v2264_v3, %v1953_v11  ;;  %4441 = vmatpush1.bf16.msra.mxu1 %v4440_v57 }
 0x350   : > { %v2107_v31 = vpop.f32.mrb[44].mxu0  ;;  %v5004_v24 = vpop.eup %5003  ;;  %5023 = vtanh.f32 %v2263_v49 }
 0x351   : > { %v2108_v22 = vadd.f32 %v2107_v31, %v1958_v34  ;;  %v2109_v35 = vpop.f32.mrb[45].mxu0  ;;  %v5006_v5 = vpop.eup %5005  ;;  %5025 = vtanh.f32 %v2265_v27  ;;  %v4412_v10 = vpack.c.bf16 %v5004_v24, %v4996_v2 }
 0x352   : > { %v2268_v43 = vpop.f32.mrb[44].mxu1  ;;  %v2110_v62 = vadd.f32 %v2109_v35, %v1958_v34  ;;  %v5008_v47 = vpop.eup %5007  ;;  %v4410_v9 = vpack.c.bf16 %v5006_v5, %v4998_v1 }
 0x353   : > { %5027 = vtanh.f32 %v2108_v22  ;;  %v2269_v29 = vadd.f32 %v2268_v43, %v1958_v34  ;;  %v2270_v60 = vpop.f32.mrb[45].mxu1  ;;  %v5010_v4 = vpop.eup %5009  ;;  %v4444_v63 = vpack.c.bf16 %v5008_v47, %v5000_v38 }
 0x354   : > { %v1963_v15 = vpop.permute.xlu1 %1962  ;;  %5029 = vtanh.f32 %v2110_v62  ;;  %v2271_v11 = vadd.f32 %v2270_v60, %v1958_v34  ;;  %v2113_v57 = vpop.f32.mrb[46].mxu0  ;;  %4411 = vmatprep.subr.bf16.mxu0 %v4410_v9  ;;  %v4442_v27 = vpack.c.bf16 %v5010_v4, %v5002_v59 }
 0x355   : > { %v5012_v28 = vpop.eup %5011  ;;  %5031 = vtanh.f32 %v2269_v29  ;;  %v2114_v49 = vadd.f32 %v2113_v57, %v1963_v15  ;;  %v2115_v3 = vpop.f32.mrb[47].mxu0  ;;  %4413 = vmatpush1.bf16.msra.mxu0 %v4412_v10 }
 0x356   : > { %v5014_v31 = vpop.eup %5013  ;;  %5033 = vtanh.f32 %v2271_v11  ;;  %v2274_v2 = vpop.f32.mrb[46].mxu1  ;;  %v2116_v24 = vadd.f32 %v2115_v3, %v1963_v15  ;;  %4443 = vmatprep.subr.bf16.mxu1 %v4442_v27 }
 0x357   : > { %v5016_v22 = vpop.eup %5015  ;;  %5035 = vtanh.f32 %v2114_v49  ;;  %v2275_v1 = vadd.f32 %v2274_v2, %v1963_v15  ;;  %v2276_v35 = vpop.f32.mrb[47].mxu1  ;;  %4445 = vmatpush1.bf16.msra.mxu1 %v4444_v63 }
 0x358   : > { %v5018_v5 = vpop.eup %5017  ;;  %v1968_v34 = vpop.permute.xlu0 %1967  ;;  %5037 = vtanh.f32 %v2116_v24  ;;  %v2277_v38 = vadd.f32 %v2276_v35, %v1963_v15 }
 0x359   : > { %v2119_v43 = vpop.f32.mrb[48].mxu0  ;;  %v5020_v62 = vpop.eup %5019  ;;  %5039 = vtanh.f32 %v2275_v1 }
 0x35a   : > { %v2120_v47 = vadd.f32 %v2119_v43, %v1968_v34  ;;  %v2121_v59 = vpop.f32.mrb[49].mxu0  ;;  %v5022_v29 = vpop.eup %5021  ;;  %5041 = vtanh.f32 %v2277_v38  ;;  %v4416_v10 = vpack.c.bf16 %v5020_v62, %v5012_v28 }
 0x35b   : > { %v2280_v60 = vpop.f32.mrb[48].mxu1  ;;  %v2122_v9 = vadd.f32 %v2121_v59, %v1968_v34  ;;  %v5024_v4 = vpop.eup %5023  ;;  %v4414_v49 = vpack.c.bf16 %v5022_v29, %v5014_v31 }
 0x35c   : > { %5043 = vtanh.f32 %v2120_v47  ;;  %v2281_v11 = vadd.f32 %v2280_v60, %v1968_v34  ;;  %v2282_v57 = vpop.f32.mrb[49].mxu1  ;;  %v5026_v3 = vpop.eup %5025  ;;  %v4448_v2 = vpack.c.bf16 %v5024_v4, %v5016_v22 }
 0x35d   : > { %v1973_v27 = vpop.permute.xlu1 %1972  ;;  %5045 = vtanh.f32 %v2122_v9  ;;  %v2283_v15 = vadd.f32 %v2282_v57, %v1968_v34  ;;  %v2125_v63 = vpop.f32.mrb[50].mxu0  ;;  %4415 = vmatprep.subr.bf16.mxu0 %v4414_v49  ;;  %v4446_v38 = vpack.c.bf16 %v5026_v3, %v5018_v5 }
 0x35e   : > { %v5028_v24 = vpop.eup %5027  ;;  %5047 = vtanh.f32 %v2281_v11  ;;  %v2126_v1 = vadd.f32 %v2125_v63, %v1973_v27  ;;  %v2127_v35 = vpop.f32.mrb[51].mxu0  ;;  %4417 = vmatpush1.bf16.msra.mxu0 %v4416_v10 }
 0x35f   : > { %v5030_v43 = vpop.eup %5029  ;;  %5049 = vtanh.f32 %v2283_v15  ;;  %v2286_v28 = vpop.f32.mrb[50].mxu1  ;;  %v2128_v62 = vadd.f32 %v2127_v35, %v1973_v27  ;;  %4447 = vmatprep.subr.bf16.mxu1 %v4446_v38 }
 0x360   : > { %v5032_v47 = vpop.eup %5031  ;;  %5051 = vtanh.f32 %v2126_v1  ;;  %v2287_v31 = vadd.f32 %v2286_v28, %v1973_v27  ;;  %v2288_v59 = vpop.f32.mrb[51].mxu1  ;;  %4449 = vmatpush1.bf16.msra.mxu1 %v4448_v2 }
 0x361   : > { %v5034_v29 = vpop.eup %5033  ;;  %v1978_v34 = vpop.permute.xlu0 %1977  ;;  %5053 = vtanh.f32 %v2128_v62  ;;  %v2289_v22 = vadd.f32 %v2288_v59, %v1973_v27 }
 0x362   : > { %v2131_v60 = vpop.f32.mrb[52].mxu0  ;;  %v5036_v9 = vpop.eup %5035  ;;  %5055 = vtanh.f32 %v2287_v31 }
 0x363   : > { %v2132_v4 = vadd.f32 %v2131_v60, %v1978_v34  ;;  %v2133_v5 = vpop.f32.mrb[53].mxu0  ;;  %v5038_v11 = vpop.eup %5037  ;;  %5057 = vtanh.f32 %v2289_v22  ;;  %v4420_v10 = vpack.c.bf16 %v5036_v9, %v5028_v24 }
 0x364   : > { %v2292_v57 = vpop.f32.mrb[52].mxu1  ;;  %v2134_v49 = vadd.f32 %v2133_v5, %v1978_v34  ;;  %v5040_v3 = vpop.eup %5039  ;;  %v4418_v1 = vpack.c.bf16 %v5038_v11, %v5030_v43 }
 0x365   : > { %5059 = vtanh.f32 %v2132_v4  ;;  %v2293_v15 = vadd.f32 %v2292_v57, %v1978_v34  ;;  %v2294_v63 = vpop.f32.mrb[53].mxu1  ;;  %v5042_v35 = vpop.eup %5041  ;;  %v4452_v28 = vpack.c.bf16 %v5040_v3, %v5032_v47 }
 0x366   : > { %v1983_v38 = vpop.permute.xlu1 %1982  ;;  %5061 = vtanh.f32 %v2134_v49  ;;  %v2295_v27 = vadd.f32 %v2294_v63, %v1978_v34  ;;  %v2137_v2 = vpop.f32.mrb[54].mxu0  ;;  %4419 = vmatprep.subr.bf16.mxu0 %v4418_v1  ;;  %v4450_v22 = vpack.c.bf16 %v5042_v35, %v5034_v29 }
 0x367   : > { %v5044_v62 = vpop.eup %5043  ;;  %5063 = vtanh.f32 %v2293_v15  ;;  %v2138_v31 = vadd.f32 %v2137_v2, %v1983_v38  ;;  %v2139_v59 = vpop.f32.mrb[55].mxu0  ;;  %4421 = vmatpush1.bf16.msra.mxu0 %v4420_v10 }
 0x368   : > { %v5046_v60 = vpop.eup %5045  ;;  %5065 = vtanh.f32 %v2295_v27  ;;  %v2298_v24 = vpop.f32.mrb[54].mxu1  ;;  %v2140_v9 = vadd.f32 %v2139_v59, %v1983_v38  ;;  %4451 = vmatprep.subr.bf16.mxu1 %v4450_v22 }
 0x369   : > { %v5048_v4 = vpop.eup %5047  ;;  %5067 = vtanh.f32 %v2138_v31  ;;  %v2299_v43 = vadd.f32 %v2298_v24, %v1983_v38  ;;  %v2300_v5 = vpop.f32.mrb[55].mxu1  ;;  %4453 = vmatpush1.bf16.msra.mxu1 %v4452_v28 }
 0x36a   : > { %v5050_v11 = vpop.eup %5049  ;;  %v1988_v34 = vpop.permute.xlu0 %1987  ;;  %5069 = vtanh.f32 %v2140_v9  ;;  %v2301_v47 = vadd.f32 %v2300_v5, %v1983_v38 }
 0x36b   : > { %v2143_v57 = vpop.f32.mrb[56].mxu0  ;;  %v5052_v49 = vpop.eup %5051  ;;  %5071 = vtanh.f32 %v2299_v43 }
 0x36c   : > { %v2144_v3 = vadd.f32 %v2143_v57, %v1988_v34  ;;  %v2145_v29 = vpop.f32.mrb[57].mxu0  ;;  %v5054_v15 = vpop.eup %5053  ;;  %5073 = vtanh.f32 %v2301_v47  ;;  %v4424_v10 = vpack.c.bf16 %v5052_v49, %v5044_v62 }
 0x36d   : > { %v2304_v63 = vpop.f32.mrb[56].mxu1  ;;  %v2146_v1 = vadd.f32 %v2145_v29, %v1988_v34  ;;  %v5056_v35 = vpop.eup %5055  ;;  %v4422_v31 = vpack.c.bf16 %v5054_v15, %v5046_v60 }
 0x36e   : > { %5075 = vtanh.f32 %v2144_v3  ;;  %v2305_v27 = vadd.f32 %v2304_v63, %v1988_v34  ;;  %v2306_v2 = vpop.f32.mrb[57].mxu1  ;;  %v5058_v59 = vpop.eup %5057  ;;  %v4456_v24 = vpack.c.bf16 %v5056_v35, %v5048_v4 }
 0x36f   : > { %v1993_v22 = vpop.permute.xlu1 %1992  ;;  %5077 = vtanh.f32 %v2146_v1  ;;  %v2307_v38 = vadd.f32 %v2306_v2, %v1988_v34  ;;  %v2149_v28 = vpop.f32.mrb[58].mxu0  ;;  %4423 = vmatprep.subr.bf16.mxu0 %v4422_v31  ;;  %v4454_v47 = vpack.c.bf16 %v5058_v59, %v5050_v11 }
 0x370   : > { %v5060_v9 = vpop.eup %5059  ;;  %5079 = vtanh.f32 %v2305_v27  ;;  %v2150_v43 = vadd.f32 %v2149_v28, %v1993_v22  ;;  %v2151_v5 = vpop.f32.mrb[59].mxu0  ;;  %4425 = vmatpush1.bf16.msra.mxu0 %v4424_v10 }
 0x371   : > { %v5062_v57 = vpop.eup %5061  ;;  %5081 = vtanh.f32 %v2307_v38  ;;  %v2310_v62 = vpop.f32.mrb[58].mxu1  ;;  %v2152_v49 = vadd.f32 %v2151_v5, %v1993_v22  ;;  %4455 = vmatprep.subr.bf16.mxu1 %v4454_v47 }
 0x372   : > { %v5064_v3 = vpop.eup %5063  ;;  %5083 = vtanh.f32 %v2150_v43  ;;  %v2311_v60 = vadd.f32 %v2310_v62, %v1993_v22  ;;  %v2312_v29 = vpop.f32.mrb[59].mxu1  ;;  %4457 = vmatpush1.bf16.msra.mxu1 %v4456_v24 }
 0x373   : > { %v5066_v15 = vpop.eup %5065  ;;  %v1998_v34 = vpop.permute.xlu0 %1997  ;;  %5085 = vtanh.f32 %v2152_v49  ;;  %v2313_v4 = vadd.f32 %v2312_v29, %v1993_v22 }
 0x374   : > { %v2155_v63 = vpop.f32.mrb[60].mxu0  ;;  %v5068_v1 = vpop.eup %5067  ;;  %5087 = vtanh.f32 %v2311_v60 }
 0x375   : > { %v2156_v35 = vadd.f32 %v2155_v63, %v1998_v34  ;;  %v2157_v11 = vpop.f32.mrb[61].mxu0  ;;  %v5070_v27 = vpop.eup %5069  ;;  %5089 = vtanh.f32 %v2313_v4  ;;  %v4428_v10 = vpack.c.bf16 %v5068_v1, %v5060_v9 }
 0x376   : > { %v2316_v2 = vpop.f32.mrb[60].mxu1  ;;  %v2158_v31 = vadd.f32 %v2157_v11, %v1998_v34  ;;  %v5072_v59 = vpop.eup %5071  ;;  %v4426_v43 = vpack.c.bf16 %v5070_v27, %v5062_v57 }
 0x377   : > { %5091 = vtanh.f32 %v2156_v35  ;;  %v2317_v38 = vadd.f32 %v2316_v2, %v1998_v34  ;;  %v2318_v28 = vpop.f32.mrb[61].mxu1  ;;  %v5074_v5 = vpop.eup %5073  ;;  %v4460_v62 = vpack.c.bf16 %v5072_v59, %v5064_v3 }
 0x378   : > { %v2003_v47 = vpop.permute.xlu1 %2002  ;;  %5093 = vtanh.f32 %v2158_v31  ;;  %v2319_v22 = vadd.f32 %v2318_v28, %v1998_v34  ;;  %v2161_v24 = vpop.f32.mrb[62].mxu0  ;;  %4427 = vmatprep.subr.bf16.mxu0 %v4426_v43  ;;  %v4458_v4 = vpack.c.bf16 %v5074_v5, %v5066_v15 }
 0x379   : > { %v5076_v49 = vpop.eup %5075  ;;  %5095 = vtanh.f32 %v2317_v38  ;;  %v2162_v60 = vadd.f32 %v2161_v24, %v2003_v47  ;;  %v2163_v29 = vpop.f32.mrb[63].mxu0  ;;  %4429 = vmatpush1.bf16.msra.mxu0 %v4428_v10 }
 0x37a   : > { %v5078_v63 = vpop.eup %5077  ;;  %5097 = vtanh.f32 %v2319_v22  ;;  %v2322_v9 = vpop.f32.mrb[62].mxu1  ;;  %v2164_v1 = vadd.f32 %v2163_v29, %v2003_v47  ;;  %4459 = vmatprep.subr.bf16.mxu1 %v4458_v4 }
 0x37b   : > { %v5080_v35 = vpop.eup %5079  ;;  %5099 = vtanh.f32 %v2162_v60  ;;  %v2323_v57 = vadd.f32 %v2322_v9, %v2003_v47  ;;  %v2324_v11 = vpop.f32.mrb[63].mxu1  ;;  %4461 = vmatpush1.bf16.msra.mxu1 %v4460_v62 }
 0x37c   : > { %v5082_v27 = vpop.eup %5081  ;;  %5101 = vtanh.f32 %v2164_v1  ;;  %v2325_v34 = vadd.f32 %v2324_v11, %v2003_v47  ;;  %v2391_v1 = vld [vmem:[%s7457_s7] sm:$0xff]  ;;  %v2394_v11 = vld [vmem:[%s7457_s7 + $0x18] sm:$0xff] }
 0x37d   : > { %v5084_v3 = vpop.eup %5083  ;;  %5103 = vtanh.f32 %v2323_v57  ;;  %v2393_v57 = vld [vmem:[%s7457_s7 + $0x10] sm:$0xff] }
 0x37e   : > { %v5086_v2 = vpop.eup %5085  ;;  %5105 = vtanh.f32 %v2325_v34  ;;  %v4432_v31 = vpack.c.bf16 %v5084_v3, %v5076_v49  ;;  %v2396_v34 = vld [vmem:[%s7457_s7 + $0x28] sm:$0xff]  ;;  %v2397_v3 = vld [vmem:[%s7457_s7 + $0x30] sm:$0xff] }
 0x37f   : > { %v5088_v15 = vpop.eup %5087  ;;  %v4430_v59 = vpack.c.bf16 %v5086_v2, %v5078_v63  ;;  %v2398_v2 = vld [vmem:[%s7457_s7 + $0x38] sm:$0xff] }
 0x380   : > { %v5090_v38 = vpop.eup %5089  ;;  %v4464_v28 = vpack.c.bf16 %v5088_v15, %v5080_v35  ;;  %v2392_v35 = vld [vmem:[%s7457_s7 + $0x8] sm:$0xff] }
 0x381   : > { %v5092_v43 = vpop.eup %5091  ;;  %4431 = vmatprep.subr.bf16.mxu0 %v4430_v59  ;;  %v4462_v10 = vpack.c.bf16 %v5090_v38, %v5082_v27  ;;  %v2395_v27 = vld [vmem:[%s7457_s7 + $0x20] sm:$0xff]  ;;  %v2400_v15 = vld [vmem:[%s7457_s7 + $0x48] sm:$0xff]  ;;  %v2401_v59 = vld [vmem:[%s7457_s7 + $0x50] sm:$0xff] }
 0x382   : > { %v5094_v5 = vpop.eup %5093  ;;  %4433 = vmatpush1.bf16.msra.mxu0 %v4432_v31  ;;  %v2399_v31 = vld [vmem:[%s7457_s7 + $0x40] sm:$0xff]  ;;  %v2402_v38 = vld [vmem:[%s7457_s7 + $0x58] sm:$0xff] }
 0x383   : > { %v5096_v22 = vpop.eup %5095  ;;  %4463 = vmatprep.subr.bf16.mxu1 %v4462_v10  ;;  %v2405_v10 = vld [vmem:[%s7457_s7 + $0x70] sm:$0xff] }
 0x384   : > { %v5098_v24 = vpop.eup %5097  ;;  %4465 = vmatpush1.bf16.msra.mxu1 %v4464_v28  ;;  %v2403_v28 = vld [vmem:[%s7457_s7 + $0x60] sm:$0xff] }
 0x385   : > { %v5100_v47 = vpop.eup %5099 }
 0x386   : > { %v5102_v62 = vpop.eup %5101  ;;  %v4436_v60 = vpack.c.bf16 %v5100_v47, %v5092_v43  ;;  %v2404_v43 = vld [vmem:[%s7457_s7 + $0x68] sm:$0xff] }
 0x387   : > { %v5104_v29 = vpop.eup %5103  ;;  %v4434_v4 = vpack.c.bf16 %v5102_v62, %v5094_v5  ;;  %v2406_v5 = vld [vmem:[%s7457_s7 + $0x78] sm:$0xff] }
 0x388   : > { %v5106_v9 = vpop.eup %5105  ;;  %v4468_v49 = vpack.c.bf16 %v5104_v29, %v5096_v22  ;;  %v2426_v22 = vpop.permute.xlu0 %2425 }
 0x389   : > { %4435 = vmatprep.subr.bf16.mxu0 %v4434_v4  ;;  %v4466_v63 = vpack.c.bf16 %v5106_v9, %v5098_v24 }
 0x38a   : > { %4437 = vmatpush1.bf16.msra.mxu0 %v4436_v60 }
 0x38b   : > { %4467 = vmatprep.subr.bf16.mxu1 %v4466_v63 }
 0x38c   : > { %4469 = vmatpush1.bf16.msra.mxu1 %v4468_v49  ;;  %v2431_v49 = vpop.permute.xlu1 %2430 }
 0x38d   : > { %2568 = vmatmul.mubr.f32.vlgmr.msra.gmra.mrb[64].mxu0 %v2391_v1 }
 0x38e   : > { %2573 = vmatprep.mubr.f32.mxu0 %v7533_v54 }
 0x38f   : > { %2729 = vmatmul.mubr.f32.vlgmr.msra.gmra.mrb[64].mxu1 %v2391_v1 }
 0x390   : > { %2734 = vmatprep.mubr.f32.mxu1 %v7533_v54 }
 0x391   : > { %2574 = vmatmul.mubr.f32.gmra.mrb[66].mxu0 %v2392_v35 }
 0x392   : > { %2579 = vmatprep.mubr.f32.mxu0 %v7533_v54 }
 0x393   : > { %2735 = vmatmul.mubr.f32.gmra.mrb[66].mxu1 %v2392_v35 }
 0x394   : > { %2740 = vmatprep.mubr.f32.mxu1 %v7533_v54 }
 0x395   : > { %2580 = vmatmul.mubr.f32.gmra.mrb[68].mxu0 %v2393_v57 }
 0x396   : > { %2585 = vmatprep.mubr.f32.mxu0 %v7533_v54 }
 0x397   : > { %2741 = vmatmul.mubr.f32.gmra.mrb[68].mxu1 %v2393_v57 }
 0x398   : > { %2746 = vmatprep.mubr.f32.mxu1 %v7533_v54 }
 0x399   : > { %2586 = vmatmul.mubr.f32.gmra.mrb[70].mxu0 %v2394_v11 }
 0x39a   : > { %2591 = vmatprep.mubr.f32.mxu0 %v7533_v54 }
 0x39b   : > { %2747 = vmatmul.mubr.f32.gmra.mrb[70].mxu1 %v2394_v11 }
 0x39c   : > { %2752 = vmatprep.mubr.f32.mxu1 %v7533_v54 }
 0x39d   : > { %2592 = vmatmul.mubr.f32.gmra.mrb[72].mxu0 %v2395_v27 }
 0x39e   : > { %2597 = vmatprep.mubr.f32.mxu0 %v7533_v54 }
 0x39f   : > { %2753 = vmatmul.mubr.f32.gmra.mrb[72].mxu1 %v2395_v27 }
 0x3a0   : > { %2758 = vmatprep.mubr.f32.mxu1 %v7533_v54 }
 0x3a1   : > { %2598 = vmatmul.mubr.f32.gmra.mrb[74].mxu0 %v2396_v34 }
 0x3a2   : > { %2603 = vmatprep.mubr.f32.mxu0 %v7533_v54 }
 0x3a3   : > { %2759 = vmatmul.mubr.f32.gmra.mrb[74].mxu1 %v2396_v34 }
 0x3a4   : > { %2764 = vmatprep.mubr.f32.mxu1 %v7533_v54 }
 0x3a5   : > { %2604 = vmatmul.mubr.f32.gmra.mrb[76].mxu0 %v2397_v3 }
 0x3a6   : > { %2609 = vmatprep.mubr.f32.mxu0 %v7533_v54 }
 0x3a7   : > { %2765 = vmatmul.mubr.f32.gmra.mrb[76].mxu1 %v2397_v3 }
 0x3a8   : > { %2770 = vmatprep.mubr.f32.mxu1 %v7533_v54 }
 0x3a9   : > { %2610 = vmatmul.mubr.f32.gmra.mrb[78].mxu0 %v2398_v2 }
 0x3aa   : > { %2615 = vmatprep.mubr.f32.mxu0 %v7533_v54 }
 0x3ab   : > { %2771 = vmatmul.mubr.f32.gmra.mrb[78].mxu1 %v2398_v2  ;;  %v2436_v2 = vpop.permute.xlu0 %2435 }
 0x3ac   : > { %2776 = vmatprep.mubr.f32.mxu1 %v7533_v54 }
 0x3ad   : > { %2616 = vmatmul.mubr.f32.gmra.mrb[80].mxu0 %v2399_v31 }
 0x3ae   : > { %2621 = vmatprep.mubr.f32.mxu0 %v7533_v54 }
 0x3af   : > { %2777 = vmatmul.mubr.f32.gmra.mrb[80].mxu1 %v2399_v31 }
 0x3b0   : > { %2782 = vmatprep.mubr.f32.mxu1 %v7533_v54 }
 0x3b1   : > { %2622 = vmatmul.mubr.f32.gmra.mrb[82].mxu0 %v2400_v15 }
 0x3b2   : > { %2627 = vmatprep.mubr.f32.mxu0 %v7533_v54 }
 0x3b3   : > { %2783 = vmatmul.mubr.f32.gmra.mrb[82].mxu1 %v2400_v15 }
 0x3b4   : > { %2788 = vmatprep.mubr.f32.mxu1 %v7533_v54 }
 0x3b5   : > { %2628 = vmatmul.mubr.f32.gmra.mrb[84].mxu0 %v2401_v59 }
 0x3b6   : > { %2633 = vmatprep.mubr.f32.mxu0 %v7533_v54 }
 0x3b7   : > { %2789 = vmatmul.mubr.f32.gmra.mrb[84].mxu1 %v2401_v59 }
 0x3b8   : > { %2794 = vmatprep.mubr.f32.mxu1 %v7533_v54 }
 0x3b9   : > { %2634 = vmatmul.mubr.f32.gmra.mrb[86].mxu0 %v2402_v38 }
 0x3ba   : > { %2639 = vmatprep.mubr.f32.mxu0 %v7533_v54 }
 0x3bb   : > { %2795 = vmatmul.mubr.f32.gmra.mrb[86].mxu1 %v2402_v38 }
 0x3bc   : > { %2800 = vmatprep.mubr.f32.mxu1 %v7533_v54 }
 0x3bd   : > { %2640 = vmatmul.mubr.f32.gmra.mrb[88].mxu0 %v2403_v28 }
 0x3be   : > { %2645 = vmatprep.mubr.f32.mxu0 %v7533_v54 }
 0x3bf   : > { %2801 = vmatmul.mubr.f32.gmra.mrb[88].mxu1 %v2403_v28 }
 0x3c0   : > { %2806 = vmatprep.mubr.f32.mxu1 %v7533_v54 }
 0x3c1   : > { %2646 = vmatmul.mubr.f32.gmra.mrb[90].mxu0 %v2404_v43 }
 0x3c2   : > { %2651 = vmatprep.mubr.f32.mxu0 %v7533_v54 }
 0x3c3   : > { %2807 = vmatmul.mubr.f32.gmra.mrb[90].mxu1 %v2404_v43 }
 0x3c4   : > { %2812 = vmatprep.mubr.f32.mxu1 %v7533_v54 }
 0x3c5   : > { %2652 = vmatmul.mubr.f32.gmra.mrb[92].mxu0 %v2405_v10 }
 0x3c6   : > { %2657 = vmatprep.mubr.f32.mxu0 %v7533_v54 }
 0x3c7   : > { %2813 = vmatmul.mubr.f32.gmra.mrb[92].mxu1 %v2405_v10 }
 0x3c8   : > { %2818 = vmatprep.mubr.f32.mxu1 %v7533_v54 }
 0x3c9   : > { %2658 = vmatmul.mubr.f32.gmra.mrb[94].mxu0 %v2406_v5 }
 0x3ca   : > { %3129 = vmatprep.mubr.f32.mxu0 %v7533_v54 }
 0x3cb   : > { %2819 = vmatmul.mubr.f32.gmra.mrb[94].mxu1 %v2406_v5 }
 0x3cc   : > { %3290 = vmatprep.mubr.f32.mxu1 %v7533_v54 }
 0x460   : > { %v2569_v24 = vpop.f32.mrb[64].mxu0 }
 0x461   : > { %v2570_v47 = vadd.f32 %v2569_v24, %v2426_v22  ;;  %v2571_v62 = vpop.f32.mrb[65].mxu0 }
 0x462   : > { %v2730_v60 = vpop.f32.mrb[64].mxu1  ;;  %v2572_v29 = vadd.f32 %v2571_v62, %v2426_v22 }
 0x463   : > { %5107 = vtanh.f32 %v2570_v47  ;;  %v2731_v4 = vadd.f32 %v2730_v60, %v2426_v22  ;;  %v2732_v9 = vpop.f32.mrb[65].mxu1 }
 0x464   : > { %5109 = vtanh.f32 %v2572_v29  ;;  %v2733_v63 = vadd.f32 %v2732_v9, %v2426_v22  ;;  %v2575_v1 = vpop.f32.mrb[66].mxu0  ;;  %v2441_v22 = vpop.permute.xlu1 %2440 }
 0x465   : > { %5111 = vtanh.f32 %v2731_v4  ;;  %v2576_v35 = vadd.f32 %v2575_v1, %v2431_v49  ;;  %v2577_v57 = vpop.f32.mrb[67].mxu0 }
 0x466   : > { %5113 = vtanh.f32 %v2733_v63  ;;  %v2736_v11 = vpop.f32.mrb[66].mxu1  ;;  %v2578_v27 = vadd.f32 %v2577_v57, %v2431_v49 }
 0x467   : > { %5115 = vtanh.f32 %v2576_v35  ;;  %v2737_v34 = vadd.f32 %v2736_v11, %v2431_v49  ;;  %v2738_v3 = vpop.f32.mrb[67].mxu1  ;;  %v2446_v11 = vpop.permute.xlu0 %2445 }
 0x468   : > { %5117 = vtanh.f32 %v2578_v27  ;;  %v2739_v31 = vadd.f32 %v2738_v3, %v2431_v49  ;;  %v2581_v15 = vpop.f32.mrb[68].mxu0 }
 0x469   : > { %5119 = vtanh.f32 %v2737_v34  ;;  %v2582_v59 = vadd.f32 %v2581_v15, %v2436_v2  ;;  %v2583_v38 = vpop.f32.mrb[69].mxu0 }
 0x46a   : > { %5121 = vtanh.f32 %v2739_v31  ;;  %v2742_v28 = vpop.f32.mrb[68].mxu1  ;;  %v2584_v43 = vadd.f32 %v2583_v38, %v2436_v2 }
 0x46b   : > { %5123 = vtanh.f32 %v2582_v59  ;;  %v2743_v10 = vadd.f32 %v2742_v28, %v2436_v2  ;;  %v2744_v5 = vpop.f32.mrb[69].mxu1 }
 0x46c   : > { %5125 = vtanh.f32 %v2584_v43  ;;  %v2745_v24 = vadd.f32 %v2744_v5, %v2436_v2  ;;  %v2587_v47 = vpop.f32.mrb[70].mxu0 }
 0x46d   : > { %v5108_v62 = vpop.eup %5107  ;;  %5127 = vtanh.f32 %v2743_v10  ;;  %v2588_v60 = vadd.f32 %v2587_v47, %v2441_v22  ;;  %v2589_v29 = vpop.f32.mrb[71].mxu0 }
 0x46e   : > { %v5110_v4 = vpop.eup %5109  ;;  %5129 = vtanh.f32 %v2745_v24  ;;  %v2748_v9 = vpop.f32.mrb[70].mxu1  ;;  %v2590_v49 = vadd.f32 %v2589_v29, %v2441_v22  ;;  %v6919_v28 = vadd.f32 %v5108_v62, %v6572_v52 }
 0x46f   : > { %v5112_v63 = vpop.eup %5111  ;;  %5131 = vtanh.f32 %v2588_v60  ;;  %v2749_v1 = vadd.f32 %v2748_v9, %v2441_v22  ;;  %v2750_v35 = vpop.f32.mrb[71].mxu1 }
 0x470   : > { %v5114_v57 = vpop.eup %5113  ;;  %5133 = vtanh.f32 %v2590_v49  ;;  %v2751_v27 = vadd.f32 %v2750_v35, %v2441_v22  ;;  %v2593_v34 = vpop.f32.mrb[72].mxu0  ;;  %v6925_v22 = vadd.f32 %v5110_v4, %v6565_v16 }
 0x471   : > { %v5116_v3 = vpop.eup %5115  ;;  %5135 = vtanh.f32 %v2749_v1  ;;  %v2594_v2 = vadd.f32 %v2593_v34, %v2446_v11  ;;  %v2595_v31 = vpop.f32.mrb[73].mxu0  ;;  %v6931_v52 = vadd.f32 %v5114_v57, %v6578_v18 }
 0x472   : > { %v5118_v15 = vpop.eup %5117  ;;  %5137 = vtanh.f32 %v2751_v27  ;;  %v2754_v59 = vpop.f32.mrb[72].mxu1  ;;  %v2596_v38 = vadd.f32 %v2595_v31, %v2446_v11  ;;  %v6922_v43 = vadd.f32 %v5116_v3, %v6563_v8 }
 0x473   : > { %v5120_v10 = vpop.eup %5119  ;;  %5139 = vtanh.f32 %v2594_v2  ;;  %v2755_v5 = vadd.f32 %v2754_v59, %v2446_v11  ;;  %v2756_v24 = vpop.f32.mrb[73].mxu1  ;;  %v6928_v47 = vadd.f32 %v5118_v15, %v6570_v45 }
 0x474   : > { %v5122_v60 = vpop.eup %5121  ;;  %v2451_v29 = vpop.permute.xlu1 %2450  ;;  %5141 = vtanh.f32 %v2596_v38  ;;  %v2757_v9 = vadd.f32 %v2756_v24, %v2446_v11  ;;  %v6934_v8 = vadd.f32 %v5120_v10, %v6574_v46  ;;  %v4472_v18 = vpack.c.bf16 %v6922_v43, %v6919_v28 }
 0x475   : > { %v2599_v49 = vpop.f32.mrb[74].mxu0  ;;  %v5124_v62 = vpop.eup %5123  ;;  %5143 = vtanh.f32 %v2755_v5  ;;  %v4470_v16 = vpack.c.bf16 %v6928_v47, %v6925_v22  ;;  %v6939_v45 = vadd.f32 %v5122_v60, %v6580_v17  ;;  %v6944_v46 = vadd.f32 %v5112_v63, %v6584_v23 }
 0x476   : > { %v2600_v1 = vadd.f32 %v2599_v49, %v2451_v29  ;;  %v2601_v35 = vpop.f32.mrb[75].mxu0  ;;  %v5126_v4 = vpop.eup %5125  ;;  %5145 = vtanh.f32 %v2757_v9  ;;  %v6951_v9 = vadd.f32 %v5124_v62, %v6588_v41 }
 0x477   : > { %v2760_v11 = vpop.f32.mrb[74].mxu1  ;;  %v2602_v27 = vadd.f32 %v2601_v35, %v2451_v29  ;;  %v5128_v57 = vpop.eup %5127  ;;  %4471 = vmatprep.subr.bf16.mxu0 %v4470_v16  ;;  %v4502_v2 = vpack.c.bf16 %v6939_v45, %v6931_v52  ;;  %v4504_v38 = vpack.c.bf16 %v6934_v8, %v6944_v46  ;;  %v6957_v16 = vadd.f32 %v5126_v4, %v6592_v50 }
 0x478   : > { %5147 = vtanh.f32 %v2600_v1  ;;  %v2761_v34 = vadd.f32 %v2760_v11, %v2451_v29  ;;  %v2762_v3 = vpop.f32.mrb[75].mxu1  ;;  %v5130_v17 = vpop.eup %5129  ;;  %4473 = vmatpush1.bf16.msra.mxu0 %v4472_v18 }
 0x479   : > { %v2456_v31 = vpop.permute.xlu0 %2455  ;;  %5149 = vtanh.f32 %v2602_v27  ;;  %v2763_v15 = vadd.f32 %v2762_v3, %v2451_v29  ;;  %v2605_v59 = vpop.f32.mrb[76].mxu0  ;;  %4503 = vmatprep.subr.bf16.mxu1 %v4502_v2  ;;  %v6963_v41 = vadd.f32 %v5130_v17, %v6594_v26 }
 0x47a   : > { %v5132_v10 = vpop.eup %5131  ;;  %5151 = vtanh.f32 %v2761_v34  ;;  %v2606_v23 = vadd.f32 %v2605_v59, %v2456_v31  ;;  %v2607_v63 = vpop.f32.mrb[77].mxu0  ;;  %4505 = vmatpush1.bf16.msra.mxu1 %v4504_v38 }
 0x47b   : > { %v5134_v5 = vpop.eup %5133  ;;  %5153 = vtanh.f32 %v2763_v15  ;;  %v2766_v24 = vpop.f32.mrb[76].mxu1  ;;  %v2608_v60 = vadd.f32 %v2607_v63, %v2456_v31  ;;  %v6954_v29 = vadd.f32 %v5132_v10, %v6596_v6 }
 0x47c   : > { %v5136_v49 = vpop.eup %5135  ;;  %5155 = vtanh.f32 %v2606_v23  ;;  %v2767_v1 = vadd.f32 %v2766_v24, %v2456_v31  ;;  %v2768_v35 = vpop.f32.mrb[77].mxu1  ;;  %v6960_v11 = vadd.f32 %v5134_v5, %v6598_v19 }
 0x47d   : > { %v5138_v27 = vpop.eup %5137  ;;  %v2461_v18 = vpop.permute.xlu1 %2460  ;;  %5157 = vtanh.f32 %v2608_v60  ;;  %v2769_v34 = vadd.f32 %v2768_v35, %v2456_v31  ;;  %v6966_v6 = vadd.f32 %v5136_v49, %v6600_v53  ;;  %v4476_v26 = vpack.c.bf16 %v6954_v29, %v6951_v9 }
 0x47e   : > { %v2611_v3 = vpop.f32.mrb[78].mxu0  ;;  %v5140_v62 = vpop.eup %5139  ;;  %5159 = vtanh.f32 %v2767_v1  ;;  %v4474_v50 = vpack.c.bf16 %v6960_v11, %v6957_v16  ;;  %v6971_v19 = vadd.f32 %v5138_v27, %v6604_v7  ;;  %v6976_v53 = vadd.f32 %v5128_v57, %v6608_v56 }
 0x47f   : > { %v2612_v2 = vadd.f32 %v2611_v3, %v2461_v18  ;;  %v2613_v15 = vpop.f32.mrb[79].mxu0  ;;  %v5142_v4 = vpop.eup %5141  ;;  %5161 = vtanh.f32 %v2769_v34  ;;  %v6983_v34 = vadd.f32 %v5140_v62, %v6612_v21 }
 0x480   : > { %v2772_v31 = vpop.f32.mrb[78].mxu1  ;;  %v2614_v59 = vadd.f32 %v2613_v15, %v2461_v18  ;;  %v5144_v17 = vpop.eup %5143  ;;  %4475 = vmatprep.subr.bf16.mxu0 %v4474_v50  ;;  %v4506_v23 = vpack.c.bf16 %v6971_v19, %v6963_v41  ;;  %v4508_v60 = vpack.c.bf16 %v6966_v6, %v6976_v53  ;;  %v6989_v50 = vadd.f32 %v5142_v4, %v6616_v30 }
 0x481   : > { %5163 = vtanh.f32 %v2612_v2  ;;  %v2773_v38 = vadd.f32 %v2772_v31, %v2461_v18  ;;  %v2774_v10 = vpop.f32.mrb[79].mxu1  ;;  %v5146_v7 = vpop.eup %5145  ;;  %4477 = vmatpush1.bf16.msra.mxu0 %v4476_v26 }
 0x482   : > { %v2466_v63 = vpop.permute.xlu0 %2465  ;;  %5165 = vtanh.f32 %v2614_v59  ;;  %v2775_v5 = vadd.f32 %v2774_v10, %v2461_v18  ;;  %v2617_v24 = vpop.f32.mrb[80].mxu0  ;;  %4507 = vmatprep.subr.bf16.mxu1 %v4506_v23  ;;  %v6995_v21 = vadd.f32 %v5146_v7, %v6618_v48 }
 0x483   : > { %v5148_v49 = vpop.eup %5147  ;;  %5167 = vtanh.f32 %v2773_v38  ;;  %v2618_v56 = vadd.f32 %v2617_v24, %v2466_v63  ;;  %v2619_v57 = vpop.f32.mrb[81].mxu0  ;;  %4509 = vmatpush1.bf16.msra.mxu1 %v4508_v60 }
 0x484   : > { %v5150_v1 = vpop.eup %5149  ;;  %5169 = vtanh.f32 %v2775_v5  ;;  %v2778_v35 = vpop.f32.mrb[80].mxu1  ;;  %v2620_v27 = vadd.f32 %v2619_v57, %v2466_v63  ;;  %v6986_v18 = vadd.f32 %v5148_v49, %v6620_v36 }
 0x485   : > { %v5152_v3 = vpop.eup %5151  ;;  %5171 = vtanh.f32 %v2618_v56  ;;  %v2779_v2 = vadd.f32 %v2778_v35, %v2466_v63  ;;  %v2780_v15 = vpop.f32.mrb[81].mxu1  ;;  %v6992_v31 = vadd.f32 %v5150_v1, %v6622_v33 }
 0x486   : > { %v5154_v59 = vpop.eup %5153  ;;  %v2471_v26 = vpop.permute.xlu1 %2470  ;;  %5173 = vtanh.f32 %v2620_v27  ;;  %v2781_v38 = vadd.f32 %v2780_v15, %v2466_v63  ;;  %v6998_v36 = vadd.f32 %v5152_v3, %v6624_v37  ;;  %v4480_v48 = vpack.c.bf16 %v6986_v18, %v6983_v34 }
 0x487   : > { %v2623_v10 = vpop.f32.mrb[82].mxu0  ;;  %v5156_v62 = vpop.eup %5155  ;;  %5175 = vtanh.f32 %v2779_v2  ;;  %v4478_v30 = vpack.c.bf16 %v6992_v31, %v6989_v50  ;;  %v7003_v33 = vadd.f32 %v5154_v59, %v6628_v39  ;;  %v7008_v37 = vadd.f32 %v5144_v17, %v6632_v32 }
 0x488   : > { %v2624_v23 = vadd.f32 %v2623_v10, %v2471_v26  ;;  %v2625_v5 = vpop.f32.mrb[83].mxu0  ;;  %v5158_v4 = vpop.eup %5157  ;;  %5177 = vtanh.f32 %v2781_v38  ;;  %v7015_v38 = vadd.f32 %v5156_v62, %v6636_v51 }
 0x489   : > { %v2784_v63 = vpop.f32.mrb[82].mxu1  ;;  %v2626_v24 = vadd.f32 %v2625_v5, %v2471_v26  ;;  %v5160_v7 = vpop.eup %5159  ;;  %4479 = vmatprep.subr.bf16.mxu0 %v4478_v30  ;;  %v4510_v56 = vpack.c.bf16 %v7003_v33, %v6995_v21  ;;  %v4512_v27 = vpack.c.bf16 %v6998_v36, %v7008_v37  ;;  %v7021_v30 = vadd.f32 %v5158_v4, %v6640_v40 }
 0x48a   : > { %5179 = vtanh.f32 %v2624_v23  ;;  %v2785_v60 = vadd.f32 %v2784_v63, %v2471_v26  ;;  %v2786_v49 = vpop.f32.mrb[83].mxu1  ;;  %v5162_v39 = vpop.eup %5161  ;;  %4481 = vmatpush1.bf16.msra.mxu0 %v4480_v48 }
 0x48b   : > { %v2476_v57 = vpop.permute.xlu0 %2475  ;;  %5181 = vtanh.f32 %v2626_v24  ;;  %v2787_v1 = vadd.f32 %v2786_v49, %v2471_v26  ;;  %v2629_v35 = vpop.f32.mrb[84].mxu0  ;;  %4511 = vmatprep.subr.bf16.mxu1 %v4510_v56  ;;  %v7027_v51 = vadd.f32 %v5162_v39, %v6642_v58 }
 0x48c   : > { %v5164_v3 = vpop.eup %5163  ;;  %5183 = vtanh.f32 %v2785_v60  ;;  %v2630_v32 = vadd.f32 %v2629_v35, %v2476_v57  ;;  %v2631_v17 = vpop.f32.mrb[85].mxu0  ;;  %4513 = vmatpush1.bf16.msra.mxu1 %v4512_v27 }
 0x48d   : > { %v5166_v2 = vpop.eup %5165  ;;  %5185 = vtanh.f32 %v2787_v1  ;;  %v2790_v15 = vpop.f32.mrb[84].mxu1  ;;  %v2632_v59 = vadd.f32 %v2631_v17, %v2476_v57  ;;  %v7018_v26 = vadd.f32 %v5164_v3, %v6644_v44 }
 0x48e   : > { %v5168_v10 = vpop.eup %5167  ;;  %5187 = vtanh.f32 %v2630_v32  ;;  %v2791_v23 = vadd.f32 %v2790_v15, %v2476_v57  ;;  %v2792_v5 = vpop.f32.mrb[85].mxu1  ;;  %v7024_v63 = vadd.f32 %v5166_v2, %v6646_v25 }
 0x48f   : > { %v5170_v24 = vpop.eup %5169  ;;  %v2481_v48 = vpop.permute.xlu1 %2480  ;;  %5189 = vtanh.f32 %v2632_v59  ;;  %v2793_v60 = vadd.f32 %v2792_v5, %v2476_v57  ;;  %v7030_v44 = vadd.f32 %v5168_v10, %v6648_v14  ;;  %v4484_v58 = vpack.c.bf16 %v7018_v26, %v7015_v38 }
 0x490   : > { %v2635_v49 = vpop.f32.mrb[86].mxu0  ;;  %v5172_v62 = vpop.eup %5171  ;;  %5191 = vtanh.f32 %v2791_v23  ;;  %v4482_v40 = vpack.c.bf16 %v7024_v63, %v7021_v30  ;;  %v7035_v25 = vadd.f32 %v5170_v24, %v6652_v61  ;;  %v7040_v14 = vadd.f32 %v5160_v7, %v6656_v13 }
 0x491   : > { %v2636_v56 = vadd.f32 %v2635_v49, %v2481_v48  ;;  %v2637_v1 = vpop.f32.mrb[87].mxu0  ;;  %v5174_v4 = vpop.eup %5173  ;;  %5193 = vtanh.f32 %v2793_v60  ;;  %v7047_v60 = vadd.f32 %v5172_v62, %v6660_v42 }
 0x492   : > { %v2796_v57 = vpop.f32.mrb[86].mxu1  ;;  %v2638_v35 = vadd.f32 %v2637_v1, %v2481_v48  ;;  %v5176_v39 = vpop.eup %5175  ;;  %4483 = vmatprep.subr.bf16.mxu0 %v4482_v40  ;;  %v4514_v32 = vpack.c.bf16 %v7035_v25, %v7027_v51  ;;  %v4516_v59 = vpack.c.bf16 %v7030_v44, %v7040_v14  ;;  %v7053_v40 = vadd.f32 %v5174_v4, %v6664_v55 }
 0x493   : > { %5195 = vtanh.f32 %v2636_v56  ;;  %v2797_v27 = vadd.f32 %v2796_v57, %v2481_v48  ;;  %v2798_v3 = vpop.f32.mrb[87].mxu1  ;;  %v5178_v61 = vpop.eup %5177  ;;  %4485 = vmatpush1.bf16.msra.mxu0 %v4484_v58 }
 0x494   : > { %v2486_v17 = vpop.permute.xlu0 %2485  ;;  %5197 = vtanh.f32 %v2638_v35  ;;  %v2799_v2 = vadd.f32 %v2798_v3, %v2481_v48  ;;  %v2641_v15 = vpop.f32.mrb[88].mxu0  ;;  %4515 = vmatprep.subr.bf16.mxu1 %v4514_v32  ;;  %v7059_v42 = vadd.f32 %v5178_v61, %v6666_v0  ;;  %v7566_v61 = vld [vmem:[#allocation9_spill] sm:$0xff] }
 0x495   : > { %v5180_v10 = vpop.eup %5179  ;;  %5199 = vtanh.f32 %v2797_v27  ;;  %v2642_v13 = vadd.f32 %v2641_v15, %v2486_v17  ;;  %v2643_v7 = vpop.f32.mrb[89].mxu0  ;;  %4517 = vmatpush1.bf16.msra.mxu1 %v4516_v59 }
 0x496   : > { %v5182_v23 = vpop.eup %5181  ;;  %5201 = vtanh.f32 %v2799_v2  ;;  %v2802_v5 = vpop.f32.mrb[88].mxu1  ;;  %v2644_v24 = vadd.f32 %v2643_v7, %v2486_v17  ;;  %v7050_v48 = vadd.f32 %v5180_v10, %v6668_v20  ;;  %7561 = vst [vmem:[#allocation34_spill] sm:$0xff] %v7059_v42  ;;  %v7562_v20 = vld [vmem:[#allocation7_spill] sm:$0xff] }
 0x497   : > { %v5184_v49 = vpop.eup %5183  ;;  %5203 = vtanh.f32 %v2642_v13  ;;  %v2803_v56 = vadd.f32 %v2802_v5, %v2486_v17  ;;  %v2804_v1 = vpop.f32.mrb[89].mxu1  ;;  %v7056_v57 = vadd.f32 %v5182_v23, %v6670_v12  ;;  %v7564_v12 = vld [vmem:[#allocation8_spill] sm:$0xff]  ;;  %v7072_v13 = vadd.f32 %v5176_v39, %v7566_v61 }
 0x498   : > { %v5186_v35 = vpop.eup %5185  ;;  %v2491_v58 = vpop.permute.xlu1 %2490  ;;  %5205 = vtanh.f32 %v2644_v24  ;;  %v2805_v27 = vadd.f32 %v2804_v1, %v2486_v17  ;;  %v7062_v62 = vadd.f32 %v5184_v49, %v7562_v20  ;;  %v4488_v0 = vpack.c.bf16 %v7050_v48, %v7047_v60 }
 0x499   : > { %v2647_v3 = vpop.f32.mrb[90].mxu0  ;;  %v5188_v32 = vpop.eup %5187  ;;  %5207 = vtanh.f32 %v2803_v56  ;;  %v4486_v55 = vpack.c.bf16 %v7056_v57, %v7053_v40  ;;  %v7067_v4 = vadd.f32 %v5186_v35, %v7564_v12  ;;  %v7567_v12 = vld [vmem:[#allocation10_spill] sm:$0xff] }
 0x49a   : > { %7563 = vst [vmem:[#allocation7_spill] sm:$0xff] %v7062_v62  ;;  %v2648_v2 = vadd.f32 %v2647_v3, %v2491_v58  ;;  %v2649_v15 = vpop.f32.mrb[91].mxu0  ;;  %v5190_v59 = vpop.eup %5189  ;;  %5209 = vtanh.f32 %v2805_v27  ;;  %v4520_v27 = vpack.c.bf16 %v7062_v62, %v7072_v13 }
 0x49b   : > { %7565 = vst [vmem:[#allocation8_spill] sm:$0xff] %v7067_v4  ;;  %v2808_v17 = vpop.f32.mrb[90].mxu1  ;;  %v2650_v10 = vadd.f32 %v2649_v15, %v2491_v58  ;;  %v5192_v7 = vpop.eup %5191  ;;  %4487 = vmatprep.subr.bf16.mxu0 %v4486_v55  ;;  %v4518_v24 = vpack.c.bf16 %v7067_v4, %v7059_v42  ;;  %v7571_v4 = vld [vmem:[#allocation11_spill] sm:$0xff] }
 0x49c   : > { %5211 = vtanh.f32 %v2648_v2  ;;  %v2809_v23 = vadd.f32 %v2808_v17, %v2491_v58  ;;  %v2810_v5 = vpop.f32.mrb[91].mxu1  ;;  %v5194_v49 = vpop.eup %5193  ;;  %4489 = vmatpush1.bf16.msra.mxu0 %v4488_v0  ;;  %v7079_v17 = vadd.f32 %v5188_v32, %v7567_v12  ;;  %v7575_v32 = vld [vmem:[#allocation12_spill] sm:$0xff] }
 0x49d   : > { %v2496_v56 = vpop.permute.xlu0 %2495  ;;  %5213 = vtanh.f32 %v2650_v10  ;;  %v2811_v1 = vadd.f32 %v2810_v5, %v2491_v58  ;;  %v2653_v35 = vpop.f32.mrb[92].mxu0  ;;  %4519 = vmatprep.subr.bf16.mxu1 %v4518_v24  ;;  %v7569_v10 = vld [vmem:[#allocation13_spill] sm:$0xff]  ;;  %v7573_v24 = vld [vmem:[#allocation14_spill] sm:$0xff]  ;;  %v7091_v12 = vadd.f32 %v5194_v49, %v7575_v32 }
 0x49e   : > { %v5196_v3 = vpop.eup %5195  ;;  %5215 = vtanh.f32 %v2809_v23  ;;  %v2654_v39 = vadd.f32 %v2653_v35, %v2496_v56  ;;  %v2655_v20 = vpop.f32.mrb[93].mxu0  ;;  %4521 = vmatpush1.bf16.msra.mxu1 %v4520_v27  ;;  %7568 = vst [vmem:[#allocation9_spill] sm:$0xff] %v7079_v17  ;;  %v7085_v23 = vadd.f32 %v5190_v59, %v7571_v4  ;;  %v7579_v59 = vld [vmem:[#allocation16_spill] sm:$0xff] }
 0x49f   : > { %v5198_v2 = vpop.eup %5197  ;;  %5217 = vtanh.f32 %v2811_v1  ;;  %v2814_v15 = vpop.f32.mrb[92].mxu1  ;;  %v2656_v55 = vadd.f32 %v2655_v20, %v2496_v56  ;;  %v7082_v58 = vadd.f32 %v5196_v3, %v7569_v10  ;;  %7576 = vst [vmem:[#allocation14_spill] sm:$0xff] %v7091_v12  ;;  %v7577_v3 = vld [vmem:[#allocation15_spill] sm:$0xff] }
 0x4a0   : > { %v5200_v0 = vpop.eup %5199  ;;  %5219 = vtanh.f32 %v2654_v39  ;;  %v2815_v61 = vadd.f32 %v2814_v15, %v2496_v56  ;;  %v2816_v5 = vpop.f32.mrb[93].mxu1  ;;  %7572 = vst [vmem:[#allocation13_spill] sm:$0xff] %v7085_v23  ;;  %v7088_v35 = vadd.f32 %v5198_v2, %v7573_v24 }
 0x4a1   : > { %7570 = vst [vmem:[#allocation10_spill] sm:$0xff] %v7082_v58  ;;  %v5202_v1 = vpop.eup %5201  ;;  %v2501_v62 = vpop.permute.xlu1 %2500  ;;  %5221 = vtanh.f32 %v2656_v55  ;;  %v2817_v27 = vadd.f32 %v2816_v5, %v2496_v56  ;;  %v7094_v10 = vadd.f32 %v5200_v0, %v7577_v3  ;;  %v4492_v49 = vpack.c.bf16 %v7082_v58, %v7079_v17  ;;  %v7581_v5 = vld [vmem:[#allocation17_spill] sm:$0xff] }
 0x4a2   : > { %7574 = vst [vmem:[#allocation11_spill] sm:$0xff] %v7088_v35  ;;  %v2659_v20 = vpop.f32.mrb[94].mxu0  ;;  %v5204_v39 = vpop.eup %5203  ;;  %5223 = vtanh.f32 %v2815_v61  ;;  %v4490_v4 = vpack.c.bf16 %v7088_v35, %v7085_v23  ;;  %v7099_v2 = vadd.f32 %v5202_v1, %v7579_v59  ;;  %v7104_v0 = vadd.f32 %v5192_v7, %v7581_v5  ;;  %v7585_v5 = vld [vmem:[#allocation19_spill] sm:$0xff] }
 0x4a3   : > { %7578 = vst [vmem:[#allocation12_spill] sm:$0xff] %v7094_v10  ;;  %v2660_v15 = vadd.f32 %v2659_v20, %v2501_v62  ;;  %v2661_v42 = vpop.f32.mrb[95].mxu0  ;;  %v5206_v24 = vpop.eup %5205  ;;  %5225 = vtanh.f32 %v2817_v27 }
 0x4a4   : > { %7580 = vst [vmem:[#allocation15_spill] sm:$0xff] %v7099_v2  ;;  %v2820_v56 = vpop.f32.mrb[94].mxu1  ;;  %v2662_v55 = vadd.f32 %v2661_v42, %v2501_v62  ;;  %7582 = vst [vmem:[#allocation16_spill] sm:$0xff] %v7104_v0  ;;  %v5208_v32 = vpop.eup %5207  ;;  %4491 = vmatprep.subr.bf16.mxu0 %v4490_v4  ;;  %v4522_v3 = vpack.c.bf16 %v7099_v2, %v7091_v12  ;;  %v4524_v42 = vpack.c.bf16 %v7094_v10, %v7104_v0  ;;  %v7587_v2 = vld [vmem:[#allocation22_spill] sm:$0xff]  ;;  %v7591_v10 = vld [vmem:[#allocation23_spill] sm:$0xff] }
 0x4a5   : > { %5227 = vtanh.f32 %v2660_v15  ;;  %v2821_v61 = vadd.f32 %v2820_v56, %v2501_v62  ;;  %v2822_v20 = vpop.f32.mrb[95].mxu1  ;;  %v5210_v1 = vpop.eup %5209  ;;  %4493 = vmatpush1.bf16.msra.mxu0 %v4492_v49  ;;  %v7583_v15 = vld [vmem:[#allocation21_spill] sm:$0xff]  ;;  %v7114_v35 = vadd.f32 %v5206_v24, %v7585_v5  ;;  %v7589_v49 = vld [vmem:[#allocation18_spill] sm:$0xff] }
 0x4a6   : > { %5229 = vtanh.f32 %v2662_v55  ;;  %v2823_v59 = vadd.f32 %v2822_v20, %v2501_v62  ;;  %v5212_v27 = vpop.eup %5211  ;;  %4523 = vmatprep.subr.bf16.mxu1 %v4522_v3  ;;  %v7120_v20 = vadd.f32 %v5204_v39, %v7589_v49 }
 0x4a7   : > { %5231 = vtanh.f32 %v2821_v61  ;;  %v5214_v7 = vpop.eup %5213  ;;  %4525 = vmatpush1.bf16.msra.mxu1 %v4524_v42  ;;  %v7111_v56 = vadd.f32 %v5212_v27, %v7583_v15  ;;  %7586 = vst [vmem:[#allocation21_spill] sm:$0xff] %v7114_v35  ;;  %v7593_v42 = vld [vmem:[#allocation20_spill] sm:$0xff] }
 0x4a8   : > { %5233 = vtanh.f32 %v2823_v59  ;;  %v5216_v4 = vpop.eup %5215  ;;  %v7117_v55 = vadd.f32 %v5214_v7, %v7587_v2  ;;  %7590 = vst [vmem:[#allocation22_spill] sm:$0xff] %v7120_v20  ;;  %v7128_v27 = vadd.f32 %v5210_v1, %v7593_v42  ;;  %v7595_v15 = vld [vmem:[#allocation24_spill] sm:$0xff]  ;;  %v7597_v7 = vld [vmem:[#allocation25_spill] sm:$0xff] }
 0x4a9   : > { %7584 = vst [vmem:[#allocation17_spill] sm:$0xff] %v7111_v56  ;;  %v5218_v62 = vpop.eup %5217  ;;  %v7123_v61 = vadd.f32 %v5216_v4, %v7591_v10  ;;  %v4496_v2 = vpack.c.bf16 %v7111_v56, %v7120_v20  ;;  %v7136_v39 = vadd.f32 %v5208_v32, %v7597_v7  ;;  %v7601_v32 = vld [vmem:[#allocation27_spill] sm:$0xff] }
 0x4aa   : > { %7588 = vst [vmem:[#allocation19_spill] sm:$0xff] %v7117_v55  ;;  %v5220_v3 = vpop.eup %5219  ;;  %v4494_v59 = vpack.c.bf16 %v7117_v55, %v7114_v35  ;;  %7594 = vst [vmem:[#allocation23_spill] sm:$0xff] %v7128_v27  ;;  %v7131_v24 = vadd.f32 %v5218_v62, %v7595_v15  ;;  %v7599_v15 = vld [vmem:[#allocation29_spill] sm:$0xff]  ;;  %v7607_v20 = vld [vmem:[#allocation31_spill] sm:$0xff] }
 0x4ab   : > { %7592 = vst [vmem:[#allocation18_spill] sm:$0xff] %v7123_v61  ;;  %v5222_v5 = vpop.eup %5221  ;;  %7598 = vst [vmem:[#allocation24_spill] sm:$0xff] %v7136_v39  ;;  %v4528_v1 = vpack.c.bf16 %v7123_v61, %v7136_v39 }
 0x4ac   : > { %7596 = vst [vmem:[#allocation20_spill] sm:$0xff] %v7131_v24  ;;  %v5224_v49 = vpop.eup %5223  ;;  %4495 = vmatprep.subr.bf16.mxu0 %v4494_v59  ;;  %v4526_v10 = vpack.c.bf16 %v7131_v24, %v7128_v27  ;;  %v7146_v7 = vadd.f32 %v5222_v5, %v7601_v32  ;;  %v7603_v59 = vld [vmem:[#allocation30_spill] sm:$0xff] }
 0x4ad   : > { %v5226_v4 = vpop.eup %5225  ;;  %4497 = vmatpush1.bf16.msra.mxu0 %v4496_v2  ;;  %v7605_v27 = vld [vmem:[#allocation26_spill] sm:$0xff] }
 0x4ae   : > { %4527 = vmatprep.subr.bf16.mxu1 %v4526_v10  ;;  %7602 = vst [vmem:[#allocation29_spill] sm:$0xff] %v7146_v7  ;;  %v7152_v2 = vadd.f32 %v5220_v3, %v7605_v27  ;;  %v2953_v3 = vld [vmem:[%s7459_s9] sm:$0xff]  ;;  %v2954_v27 = vld [vmem:[%s7459_s9 + $0x8] sm:$0xff] }
 0x4af   : > { %v5228_v42 = vpop.eup %5227  ;;  %4529 = vmatpush1.bf16.msra.mxu1 %v4528_v1  ;;  %v7609_v1 = vld [vmem:[#allocation28_spill] sm:$0xff] }
 0x4b0   : > { %v5230_v62 = vpop.eup %5229  ;;  %v7143_v55 = vadd.f32 %v5228_v42, %v7599_v15  ;;  %7606 = vst [vmem:[#allocation30_spill] sm:$0xff] %v7152_v2  ;;  %v7160_v42 = vadd.f32 %v5226_v4, %v7609_v1  ;;  %v7611_v15 = vld [vmem:[#allocation32_spill] sm:$0xff]  ;;  %v2957_v4 = vld [vmem:[%s7459_s9 + $0x20] sm:$0xff] }
 0x4b1   : > { %v5232_v35 = vpop.eup %5231  ;;  %v7149_v56 = vadd.f32 %v5230_v62, %v7603_v59  ;;  %v7613_v62 = vld [vmem:[#allocation33_spill] sm:$0xff]  ;;  %v2958_v59 = vld [vmem:[%s7459_s9 + $0x28] sm:$0xff]  ;;  %v2960_v1 = vld [vmem:[%s7459_s9 + $0x38] sm:$0xff] }
 0x4b2   : > { %7600 = vst [vmem:[#allocation25_spill] sm:$0xff] %v7143_v55  ;;  %v5234_v24 = vpop.eup %5233  ;;  %v7155_v61 = vadd.f32 %v5232_v35, %v7607_v20  ;;  %7610 = vst [vmem:[#allocation31_spill] sm:$0xff] %v7160_v42  ;;  %v4500_v5 = vpack.c.bf16 %v7143_v55, %v7152_v2  ;;  %v7168_v32 = vadd.f32 %v5224_v49, %v7613_v62  ;;  %v2956_v49 = vld [vmem:[%s7459_s9 + $0x18] sm:$0xff]  ;;  %v2963_v62 = vld [vmem:[%s7459_s9 + $0x50] sm:$0xff] }
 0x4b3   : > { %7604 = vst [vmem:[#allocation27_spill] sm:$0xff] %v7149_v56  ;;  %v4498_v10 = vpack.c.bf16 %v7149_v56, %v7146_v7  ;;  %v7163_v39 = vadd.f32 %v5234_v24, %v7611_v15  ;;  %v2955_v24 = vld [vmem:[%s7459_s9 + $0x10] sm:$0xff]  ;;  %v2961_v15 = vld [vmem:[%s7459_s9 + $0x40] sm:$0xff] }
 0x4b4   : > { %7608 = vst [vmem:[#allocation26_spill] sm:$0xff] %v7155_v61  ;;  %7614 = vst [vmem:[#allocation32_spill] sm:$0xff] %v7168_v32  ;;  %v4532_v20 = vpack.c.bf16 %v7155_v61, %v7168_v32 }
 0x4b5   : > { %7612 = vst [vmem:[#allocation28_spill] sm:$0xff] %v7163_v39  ;;  %4499 = vmatprep.subr.bf16.mxu0 %v4498_v10  ;;  %v4530_v35 = vpack.c.bf16 %v7163_v39, %v7160_v42  ;;  %v2959_v10 = vld [vmem:[%s7459_s9 + $0x30] sm:$0xff] }
 0x4b6   : > { %4501 = vmatpush1.bf16.msra.mxu0 %v4500_v5  ;;  %v2962_v5 = vld [vmem:[%s7459_s9 + $0x48] sm:$0xff] }
 0x4b7   : > { %4531 = vmatprep.subr.bf16.mxu1 %v4530_v35  ;;  %v2964_v35 = vld [vmem:[%s7459_s9 + $0x58] sm:$0xff] }
 0x4b8   : > { %4533 = vmatpush1.bf16.msra.mxu1 %v4532_v20  ;;  %v2965_v20 = vld [vmem:[%s7459_s9 + $0x60] sm:$0xff] }
 0x4b9   : > { %3130 = vmatmul.mubr.f32.vlgmr.msra.gmra.mrb[96].mxu0 %v2953_v3 }
 0x4ba   : > { %3135 = vmatprep.mubr.f32.mxu0 %v7533_v54 }
 0x4bb   : > { %3291 = vmatmul.mubr.f32.vlgmr.msra.gmra.mrb[96].mxu1 %v2953_v3  ;;  %v2966_v3 = vld [vmem:[%s7459_s9 + $0x68] sm:$0xff] }
 0x4bc   : > { %3296 = vmatprep.mubr.f32.mxu1 %v7533_v54 }
 0x4bd   : > { %3136 = vmatmul.mubr.f32.gmra.mrb[98].mxu0 %v2954_v27 }
 0x4be   : > { %3141 = vmatprep.mubr.f32.mxu0 %v7533_v54 }
 0x4bf   : > { %3297 = vmatmul.mubr.f32.gmra.mrb[98].mxu1 %v2954_v27  ;;  %v2967_v27 = vld [vmem:[%s7459_s9 + $0x70] sm:$0xff] }
 0x4c0   : > { %3302 = vmatprep.mubr.f32.mxu1 %v7533_v54 }
 0x4c1   : > { %3142 = vmatmul.mubr.f32.gmra.mrb[100].mxu0 %v2955_v24 }
 0x4c2   : > { %3147 = vmatprep.mubr.f32.mxu0 %v7533_v54 }
 0x4c3   : > { %3303 = vmatmul.mubr.f32.gmra.mrb[100].mxu1 %v2955_v24  ;;  %v2968_v24 = vld [vmem:[%s7459_s9 + $0x78] sm:$0xff] }
 0x4c4   : > { %3308 = vmatprep.mubr.f32.mxu1 %v7533_v54 }
 0x4c5   : > { %3148 = vmatmul.mubr.f32.gmra.mrb[102].mxu0 %v2956_v49 }
 0x4c6   : > { %3153 = vmatprep.mubr.f32.mxu0 %v7533_v54 }
 0x4c7   : > { %3309 = vmatmul.mubr.f32.gmra.mrb[102].mxu1 %v2956_v49  ;;  %v2988_v49 = vpop.permute.xlu0 %2987 }
 0x4c8   : > { %3314 = vmatprep.mubr.f32.mxu1 %v7533_v54 }
 0x4c9   : > { %3154 = vmatmul.mubr.f32.gmra.mrb[104].mxu0 %v2957_v4 }
 0x4ca   : > { %3159 = vmatprep.mubr.f32.mxu0 %v7533_v54 }
 0x4cb   : > { %3315 = vmatmul.mubr.f32.gmra.mrb[104].mxu1 %v2957_v4 }
 0x4cc   : > { %3320 = vmatprep.mubr.f32.mxu1 %v7533_v54 }
 0x4cd   : > { %3160 = vmatmul.mubr.f32.gmra.mrb[106].mxu0 %v2958_v59 }
 0x4ce   : > { %3165 = vmatprep.mubr.f32.mxu0 %v7533_v54 }
 0x4cf   : > { %3321 = vmatmul.mubr.f32.gmra.mrb[106].mxu1 %v2958_v59 }
 0x4d0   : > { %3326 = vmatprep.mubr.f32.mxu1 %v7533_v54 }
 0x4d1   : > { %3166 = vmatmul.mubr.f32.gmra.mrb[108].mxu0 %v2959_v10 }
 0x4d2   : > { %3171 = vmatprep.mubr.f32.mxu0 %v7533_v54 }
 0x4d3   : > { %3327 = vmatmul.mubr.f32.gmra.mrb[108].mxu1 %v2959_v10 }
 0x4d4   : > { %3332 = vmatprep.mubr.f32.mxu1 %v7533_v54 }
 0x4d5   : > { %3172 = vmatmul.mubr.f32.gmra.mrb[110].mxu0 %v2960_v1 }
 0x4d6   : > { %3177 = vmatprep.mubr.f32.mxu0 %v7533_v54 }
 0x4d7   : > { %3333 = vmatmul.mubr.f32.gmra.mrb[110].mxu1 %v2960_v1 }
 0x4d8   : > { %3338 = vmatprep.mubr.f32.mxu1 %v7533_v54 }
 0x4d9   : > { %3178 = vmatmul.mubr.f32.gmra.mrb[112].mxu0 %v2961_v15 }
 0x4da   : > { %3183 = vmatprep.mubr.f32.mxu0 %v7533_v54 }
 0x4db   : > { %3339 = vmatmul.mubr.f32.gmra.mrb[112].mxu1 %v2961_v15 }
 0x4dc   : > { %3344 = vmatprep.mubr.f32.mxu1 %v7533_v54 }
 0x4dd   : > { %3184 = vmatmul.mubr.f32.gmra.mrb[114].mxu0 %v2962_v5 }
 0x4de   : > { %3189 = vmatprep.mubr.f32.mxu0 %v7533_v54 }
 0x4df   : > { %3345 = vmatmul.mubr.f32.gmra.mrb[114].mxu1 %v2962_v5 }
 0x4e0   : > { %3350 = vmatprep.mubr.f32.mxu1 %v7533_v54 }
 0x4e1   : > { %3190 = vmatmul.mubr.f32.gmra.mrb[116].mxu0 %v2963_v62 }
 0x4e2   : > { %3195 = vmatprep.mubr.f32.mxu0 %v7533_v54 }
 0x4e3   : > { %3351 = vmatmul.mubr.f32.gmra.mrb[116].mxu1 %v2963_v62 }
 0x4e4   : > { %3356 = vmatprep.mubr.f32.mxu1 %v7533_v54 }
 0x4e5   : > { %3196 = vmatmul.mubr.f32.gmra.mrb[118].mxu0 %v2964_v35 }
 0x4e6   : > { %3201 = vmatprep.mubr.f32.mxu0 %v7533_v54 }
 0x4e7   : > { %3357 = vmatmul.mubr.f32.gmra.mrb[118].mxu1 %v2964_v35  ;;  %v2993_v35 = vpop.permute.xlu1 %2992 }
 0x4e8   : > { %3362 = vmatprep.mubr.f32.mxu1 %v7533_v54 }
 0x4e9   : > { %3202 = vmatmul.mubr.f32.gmra.mrb[120].mxu0 %v2965_v20 }
 0x4ea   : > { %3207 = vmatprep.mubr.f32.mxu0 %v7533_v54 }
 0x4eb   : > { %3363 = vmatmul.mubr.f32.gmra.mrb[120].mxu1 %v2965_v20 }
 0x4ec   : > { %3368 = vmatprep.mubr.f32.mxu1 %v7533_v54 }
 0x4ed   : > { %3208 = vmatmul.mubr.f32.gmra.mrb[122].mxu0 %v2966_v3 }
 0x4ee   : > { %3213 = vmatprep.mubr.f32.mxu0 %v7533_v54 }
 0x4ef   : > { %3369 = vmatmul.mubr.f32.gmra.mrb[122].mxu1 %v2966_v3 }
 0x4f0   : > { %3374 = vmatprep.mubr.f32.mxu1 %v7533_v54 }
 0x4f1   : > { %3214 = vmatmul.mubr.f32.gmra.mrb[124].mxu0 %v2967_v27 }
 0x4f2   : > { %3219 = vmatprep.mubr.f32.mxu0 %v7533_v54 }
 0x4f3   : > { %3375 = vmatmul.mubr.f32.gmra.mrb[124].mxu1 %v2967_v27 }
 0x4f4   : > { %3380 = vmatprep.mubr.f32.mxu1 %v7533_v54 }
 0x4f5   : > { %3220 = vmatmul.mubr.f32.gmra.mrb[126].mxu0 %v2968_v24 }
 0x4f6   : > { %3627 = vmatprep.mubr.f32.mxu0 %v7533_v54 }
 0x4f7   : > { %3381 = vmatmul.mubr.f32.gmra.mrb[126].mxu1 %v2968_v24 }
 0x4f8   : > { %3788 = vmatprep.mubr.f32.mxu1 %v7533_v54 }
 0x58c   : > { %v3131_v4 = vpop.f32.mrb[96].mxu0 }
 0x58d   : > { %v3132_v59 = vadd.f32 %v3131_v4, %v2988_v49  ;;  %v3133_v10 = vpop.f32.mrb[97].mxu0  ;;  %v2998_v4 = vpop.permute.xlu0 %2997 }
 0x58e   : > { %v3292_v1 = vpop.f32.mrb[96].mxu1  ;;  %v3134_v15 = vadd.f32 %v3133_v10, %v2988_v49 }
 0x58f   : > { %5235 = vtanh.f32 %v3132_v59  ;;  %v3293_v5 = vadd.f32 %v3292_v1, %v2988_v49  ;;  %v3294_v62 = vpop.f32.mrb[97].mxu1 }
 0x590   : > { %5237 = vtanh.f32 %v3134_v15  ;;  %v3295_v20 = vadd.f32 %v3294_v62, %v2988_v49  ;;  %v3137_v3 = vpop.f32.mrb[98].mxu0 }
 0x591   : > { %5239 = vtanh.f32 %v3293_v5  ;;  %v3138_v27 = vadd.f32 %v3137_v3, %v2993_v35  ;;  %v3139_v39 = vpop.f32.mrb[99].mxu0  ;;  %v3003_v3 = vpop.permute.xlu1 %3002 }
 0x592   : > { %5241 = vtanh.f32 %v3295_v20  ;;  %v3298_v24 = vpop.f32.mrb[98].mxu1  ;;  %v3140_v42 = vadd.f32 %v3139_v39, %v2993_v35 }
 0x593   : > { %5243 = vtanh.f32 %v3138_v27  ;;  %v3299_v61 = vadd.f32 %v3298_v24, %v2993_v35  ;;  %v3300_v32 = vpop.f32.mrb[99].mxu1 }
 0x594   : > { %5245 = vtanh.f32 %v3140_v42  ;;  %v3301_v56 = vadd.f32 %v3300_v32, %v2993_v35  ;;  %v3143_v10 = vpop.f32.mrb[100].mxu0 }
 0x595   : > { %5247 = vtanh.f32 %v3299_v61  ;;  %v3144_v59 = vadd.f32 %v3143_v10, %v2998_v4  ;;  %v3145_v1 = vpop.f32.mrb[101].mxu0  ;;  %v3013_v58 = vpop.permute.xlu1 %3012 }
 0x596   : > { %5249 = vtanh.f32 %v3301_v56  ;;  %v3304_v15 = vpop.f32.mrb[100].mxu1  ;;  %v3146_v49 = vadd.f32 %v3145_v1, %v2998_v4 }
 0x597   : > { %5251 = vtanh.f32 %v3144_v59  ;;  %v3305_v5 = vadd.f32 %v3304_v15, %v2998_v4  ;;  %v3306_v62 = vpop.f32.mrb[101].mxu1  ;;  %v3008_v59 = vpop.permute.xlu0 %3007 }
 0x598   : > { %5253 = vtanh.f32 %v3146_v49  ;;  %v3307_v20 = vadd.f32 %v3306_v62, %v2998_v4  ;;  %v3149_v39 = vpop.f32.mrb[102].mxu0 }
 0x599   : > { %v5236_v27 = vpop.eup %5235  ;;  %5255 = vtanh.f32 %v3305_v5  ;;  %v3150_v24 = vadd.f32 %v3149_v39, %v3003_v3  ;;  %v3151_v7 = vpop.f32.mrb[103].mxu0 }
 0x59a   : > { %v5238_v42 = vpop.eup %5237  ;;  %5257 = vtanh.f32 %v3307_v20  ;;  %v3310_v32 = vpop.f32.mrb[102].mxu1  ;;  %v3152_v61 = vadd.f32 %v3151_v7, %v3003_v3 }
 0x59b   : > { %v5240_v35 = vpop.eup %5239  ;;  %5259 = vtanh.f32 %v3150_v24  ;;  %v3311_v56 = vadd.f32 %v3310_v32, %v3003_v3  ;;  %v3312_v10 = vpop.f32.mrb[103].mxu1 }
 0x59c   : > { %v5242_v1 = vpop.eup %5241  ;;  %5261 = vtanh.f32 %v3152_v61  ;;  %v3313_v15 = vadd.f32 %v3312_v10, %v3003_v3  ;;  %v3155_v55 = vpop.f32.mrb[104].mxu0 }
 0x59d   : > { %v5244_v49 = vpop.eup %5243  ;;  %5263 = vtanh.f32 %v3311_v56  ;;  %v3156_v4 = vadd.f32 %v3155_v55, %v3008_v59  ;;  %v3157_v62 = vpop.f32.mrb[105].mxu0 }
 0x59e   : > { %v5246_v5 = vpop.eup %5245  ;;  %5265 = vtanh.f32 %v3313_v15  ;;  %v3316_v39 = vpop.f32.mrb[104].mxu1  ;;  %v3158_v2 = vadd.f32 %v3157_v62, %v3008_v59  ;;  %v4536_v20 = vpack.c.bf16 %v5244_v49, %v5236_v27 }
 0x59f   : > { %v5248_v12 = vpop.eup %5247  ;;  %5267 = vtanh.f32 %v3156_v4  ;;  %v3317_v7 = vadd.f32 %v3316_v39, %v3008_v59  ;;  %v3318_v24 = vpop.f32.mrb[105].mxu1  ;;  %v4534_v32 = vpack.c.bf16 %v5246_v5, %v5238_v42 }
 0x5a0   : > { %v5250_v0 = vpop.eup %5249  ;;  %5269 = vtanh.f32 %v3158_v2  ;;  %v3319_v61 = vadd.f32 %v3318_v24, %v3008_v59  ;;  %v3161_v3 = vpop.f32.mrb[106].mxu0  ;;  %v4568_v10 = vpack.c.bf16 %v5248_v12, %v5240_v35 }
 0x5a1   : > { %v5252_v17 = vpop.eup %5251  ;;  %5271 = vtanh.f32 %v3317_v7  ;;  %v3162_v55 = vadd.f32 %v3161_v3, %v3013_v58  ;;  %v3163_v56 = vpop.f32.mrb[107].mxu0  ;;  %4535 = vmatprep.subr.bf16.mxu0 %v4534_v32  ;;  %v4566_v15 = vpack.c.bf16 %v5250_v0, %v5242_v1 }
 0x5a2   : > { %v5254_v23 = vpop.eup %5253  ;;  %5273 = vtanh.f32 %v3319_v61  ;;  %v3322_v27 = vpop.f32.mrb[106].mxu1  ;;  %v3164_v49 = vadd.f32 %v3163_v56, %v3013_v58  ;;  %4537 = vmatpush1.bf16.msra.mxu0 %v4536_v20 }
 0x5a3   : > { %v5256_v4 = vpop.eup %5255  ;;  %5275 = vtanh.f32 %v3162_v55  ;;  %v3323_v42 = vadd.f32 %v3322_v27, %v3013_v58  ;;  %v3324_v62 = vpop.f32.mrb[107].mxu1  ;;  %4567 = vmatprep.subr.bf16.mxu1 %v4566_v15 }
 0x5a4   : > { %v5258_v2 = vpop.eup %5257  ;;  %v3018_v59 = vpop.permute.xlu0 %3017  ;;  %5277 = vtanh.f32 %v3164_v49  ;;  %v3325_v12 = vadd.f32 %v3324_v62, %v3013_v58  ;;  %4569 = vmatpush1.bf16.msra.mxu1 %v4568_v10 }
 0x5a5   : > { %v3167_v35 = vpop.f32.mrb[108].mxu0  ;;  %v5260_v5 = vpop.eup %5259  ;;  %5279 = vtanh.f32 %v3323_v42 }
 0x5a6   : > { %v3168_v39 = vadd.f32 %v3167_v35, %v3018_v59  ;;  %v3169_v0 = vpop.f32.mrb[109].mxu0  ;;  %v5262_v1 = vpop.eup %5261  ;;  %5281 = vtanh.f32 %v3325_v12  ;;  %v4540_v20 = vpack.c.bf16 %v5260_v5, %v5252_v17 }
 0x5a7   : > { %v3328_v7 = vpop.f32.mrb[108].mxu1  ;;  %v3170_v24 = vadd.f32 %v3169_v0, %v3018_v59  ;;  %v5264_v32 = vpop.eup %5263  ;;  %v4538_v55 = vpack.c.bf16 %v5262_v1, %v5254_v23 }
 0x5a8   : > { %5283 = vtanh.f32 %v3168_v39  ;;  %v3329_v61 = vadd.f32 %v3328_v7, %v3018_v59  ;;  %v3330_v3 = vpop.f32.mrb[109].mxu1  ;;  %v5266_v56 = vpop.eup %5265  ;;  %v4572_v27 = vpack.c.bf16 %v5264_v32, %v5256_v4 }
 0x5a9   : > { %v3023_v15 = vpop.permute.xlu1 %3022  ;;  %5285 = vtanh.f32 %v3170_v24  ;;  %v3331_v58 = vadd.f32 %v3330_v3, %v3018_v59  ;;  %v3173_v10 = vpop.f32.mrb[110].mxu0  ;;  %4539 = vmatprep.subr.bf16.mxu0 %v4538_v55  ;;  %v4570_v12 = vpack.c.bf16 %v5266_v56, %v5258_v2 }
 0x5aa   : > { %v5268_v49 = vpop.eup %5267  ;;  %5287 = vtanh.f32 %v3329_v61  ;;  %v3174_v42 = vadd.f32 %v3173_v10, %v3023_v15  ;;  %v3175_v62 = vpop.f32.mrb[111].mxu0  ;;  %4541 = vmatpush1.bf16.msra.mxu0 %v4540_v20 }
 0x5ab   : > { %v5270_v35 = vpop.eup %5269  ;;  %5289 = vtanh.f32 %v3331_v58  ;;  %v3334_v17 = vpop.f32.mrb[110].mxu1  ;;  %v3176_v5 = vadd.f32 %v3175_v62, %v3023_v15  ;;  %4571 = vmatprep.subr.bf16.mxu1 %v4570_v12 }
 0x5ac   : > { %v5272_v39 = vpop.eup %5271  ;;  %5291 = vtanh.f32 %v3174_v42  ;;  %v3335_v23 = vadd.f32 %v3334_v17, %v3023_v15  ;;  %v3336_v0 = vpop.f32.mrb[111].mxu1  ;;  %4573 = vmatpush1.bf16.msra.mxu1 %v4572_v27 }
 0x5ad   : > { %v5274_v1 = vpop.eup %5273  ;;  %v3028_v59 = vpop.permute.xlu0 %3027  ;;  %5293 = vtanh.f32 %v3176_v5  ;;  %v3337_v4 = vadd.f32 %v3336_v0, %v3023_v15 }
 0x5ae   : > { %v3179_v7 = vpop.f32.mrb[112].mxu0  ;;  %v5276_v24 = vpop.eup %5275  ;;  %5295 = vtanh.f32 %v3335_v23 }
 0x5af   : > { %v3180_v32 = vadd.f32 %v3179_v7, %v3028_v59  ;;  %v3181_v2 = vpop.f32.mrb[113].mxu0  ;;  %v5278_v61 = vpop.eup %5277  ;;  %5297 = vtanh.f32 %v3337_v4  ;;  %v4544_v20 = vpack.c.bf16 %v5276_v24, %v5268_v49 }
 0x5b0   : > { %v3340_v3 = vpop.f32.mrb[112].mxu1  ;;  %v3182_v55 = vadd.f32 %v3181_v2, %v3028_v59  ;;  %v5280_v56 = vpop.eup %5279  ;;  %v4542_v42 = vpack.c.bf16 %v5278_v61, %v5270_v35 }
 0x5b1   : > { %5299 = vtanh.f32 %v3180_v32  ;;  %v3341_v58 = vadd.f32 %v3340_v3, %v3028_v59  ;;  %v3342_v10 = vpop.f32.mrb[113].mxu1  ;;  %v5282_v62 = vpop.eup %5281  ;;  %v4576_v17 = vpack.c.bf16 %v5280_v56, %v5272_v39 }
 0x5b2   : > { %v3033_v12 = vpop.permute.xlu1 %3032  ;;  %5301 = vtanh.f32 %v3182_v55  ;;  %v3343_v15 = vadd.f32 %v3342_v10, %v3028_v59  ;;  %v3185_v27 = vpop.f32.mrb[114].mxu0  ;;  %4543 = vmatprep.subr.bf16.mxu0 %v4542_v42  ;;  %v4574_v4 = vpack.c.bf16 %v5282_v62, %v5274_v1 }
 0x5b3   : > { %v5284_v5 = vpop.eup %5283  ;;  %5303 = vtanh.f32 %v3341_v58  ;;  %v3186_v23 = vadd.f32 %v3185_v27, %v3033_v12  ;;  %v3187_v0 = vpop.f32.mrb[115].mxu0  ;;  %4545 = vmatpush1.bf16.msra.mxu0 %v4544_v20 }
 0x5b4   : > { %v5286_v7 = vpop.eup %5285  ;;  %5305 = vtanh.f32 %v3343_v15  ;;  %v3346_v49 = vpop.f32.mrb[114].mxu1  ;;  %v3188_v24 = vadd.f32 %v3187_v0, %v3033_v12  ;;  %4575 = vmatprep.subr.bf16.mxu1 %v4574_v4 }
 0x5b5   : > { %v5288_v32 = vpop.eup %5287  ;;  %5307 = vtanh.f32 %v3186_v23  ;;  %v3347_v35 = vadd.f32 %v3346_v49, %v3033_v12  ;;  %v3348_v2 = vpop.f32.mrb[115].mxu1  ;;  %4577 = vmatpush1.bf16.msra.mxu1 %v4576_v17 }
 0x5b6   : > { %v5290_v61 = vpop.eup %5289  ;;  %v3038_v59 = vpop.permute.xlu0 %3037  ;;  %5309 = vtanh.f32 %v3188_v24  ;;  %v3349_v39 = vadd.f32 %v3348_v2, %v3033_v12 }
 0x5b7   : > { %v3191_v3 = vpop.f32.mrb[116].mxu0  ;;  %v5292_v55 = vpop.eup %5291  ;;  %5311 = vtanh.f32 %v3347_v35 }
 0x5b8   : > { %v3192_v56 = vadd.f32 %v3191_v3, %v3038_v59  ;;  %v3193_v1 = vpop.f32.mrb[117].mxu0  ;;  %v5294_v58 = vpop.eup %5293  ;;  %5313 = vtanh.f32 %v3349_v39  ;;  %v4548_v20 = vpack.c.bf16 %v5292_v55, %v5284_v5 }
 0x5b9   : > { %v3352_v10 = vpop.f32.mrb[116].mxu1  ;;  %v3194_v42 = vadd.f32 %v3193_v1, %v3038_v59  ;;  %v5296_v62 = vpop.eup %5295  ;;  %v4546_v23 = vpack.c.bf16 %v5294_v58, %v5286_v7 }
 0x5ba   : > { %5315 = vtanh.f32 %v3192_v56  ;;  %v3353_v15 = vadd.f32 %v3352_v10, %v3038_v59  ;;  %v3354_v27 = vpop.f32.mrb[117].mxu1  ;;  %v5298_v0 = vpop.eup %5297  ;;  %v4580_v49 = vpack.c.bf16 %v5296_v62, %v5288_v32 }
 0x5bb   : > { %v3043_v4 = vpop.permute.xlu1 %3042  ;;  %5317 = vtanh.f32 %v3194_v42  ;;  %v3355_v12 = vadd.f32 %v3354_v27, %v3038_v59  ;;  %v3197_v17 = vpop.f32.mrb[118].mxu0  ;;  %4547 = vmatprep.subr.bf16.mxu0 %v4546_v23  ;;  %v4578_v39 = vpack.c.bf16 %v5298_v0, %v5290_v61 }
 0x5bc   : > { %v5300_v24 = vpop.eup %5299  ;;  %5319 = vtanh.f32 %v3353_v15  ;;  %v3198_v35 = vadd.f32 %v3197_v17, %v3043_v4  ;;  %v3199_v2 = vpop.f32.mrb[119].mxu0  ;;  %4549 = vmatpush1.bf16.msra.mxu0 %v4548_v20 }
 0x5bd   : > { %v5302_v3 = vpop.eup %5301  ;;  %5321 = vtanh.f32 %v3355_v12  ;;  %v3358_v5 = vpop.f32.mrb[118].mxu1  ;;  %v3200_v55 = vadd.f32 %v3199_v2, %v3043_v4  ;;  %4579 = vmatprep.subr.bf16.mxu1 %v4578_v39 }
 0x5be   : > { %v5304_v56 = vpop.eup %5303  ;;  %5323 = vtanh.f32 %v3198_v35  ;;  %v3359_v7 = vadd.f32 %v3358_v5, %v3043_v4  ;;  %v3360_v1 = vpop.f32.mrb[119].mxu1  ;;  %4581 = vmatpush1.bf16.msra.mxu1 %v4580_v49 }
 0x5bf   : > { %v5306_v58 = vpop.eup %5305  ;;  %v3048_v59 = vpop.permute.xlu0 %3047  ;;  %5325 = vtanh.f32 %v3200_v55  ;;  %v3361_v32 = vadd.f32 %v3360_v1, %v3043_v4 }
 0x5c0   : > { %v3203_v10 = vpop.f32.mrb[120].mxu0  ;;  %v5308_v42 = vpop.eup %5307  ;;  %5327 = vtanh.f32 %v3359_v7 }
 0x5c1   : > { %v3204_v62 = vadd.f32 %v3203_v10, %v3048_v59  ;;  %v3205_v61 = vpop.f32.mrb[121].mxu0  ;;  %v5310_v15 = vpop.eup %5309  ;;  %5329 = vtanh.f32 %v3361_v32  ;;  %v4552_v20 = vpack.c.bf16 %v5308_v42, %v5300_v24 }
 0x5c2   : > { %v3364_v27 = vpop.f32.mrb[120].mxu1  ;;  %v3206_v23 = vadd.f32 %v3205_v61, %v3048_v59  ;;  %v5312_v0 = vpop.eup %5311  ;;  %v4550_v35 = vpack.c.bf16 %v5310_v15, %v5302_v3 }
 0x5c3   : > { %5331 = vtanh.f32 %v3204_v62  ;;  %v3365_v12 = vadd.f32 %v3364_v27, %v3048_v59  ;;  %v3366_v17 = vpop.f32.mrb[121].mxu1  ;;  %v5314_v2 = vpop.eup %5313  ;;  %v4584_v5 = vpack.c.bf16 %v5312_v0, %v5304_v56 }
 0x5c4   : > { %v3053_v39 = vpop.permute.xlu1 %3052  ;;  %5333 = vtanh.f32 %v3206_v23  ;;  %v3367_v4 = vadd.f32 %v3366_v17, %v3048_v59  ;;  %v3209_v49 = vpop.f32.mrb[122].mxu0  ;;  %4551 = vmatprep.subr.bf16.mxu0 %v4550_v35  ;;  %v4582_v32 = vpack.c.bf16 %v5314_v2, %v5306_v58 }
 0x5c5   : > { %v5316_v55 = vpop.eup %5315  ;;  %5335 = vtanh.f32 %v3365_v12  ;;  %v3210_v7 = vadd.f32 %v3209_v49, %v3053_v39  ;;  %v3211_v1 = vpop.f32.mrb[123].mxu0  ;;  %4553 = vmatpush1.bf16.msra.mxu0 %v4552_v20 }
 0x5c6   : > { %v5318_v10 = vpop.eup %5317  ;;  %5337 = vtanh.f32 %v3367_v4  ;;  %v3370_v24 = vpop.f32.mrb[122].mxu1  ;;  %v3212_v42 = vadd.f32 %v3211_v1, %v3053_v39  ;;  %4583 = vmatprep.subr.bf16.mxu1 %v4582_v32 }
 0x5c7   : > { %v5320_v62 = vpop.eup %5319  ;;  %5339 = vtanh.f32 %v3210_v7  ;;  %v3371_v3 = vadd.f32 %v3370_v24, %v3053_v39  ;;  %v3372_v61 = vpop.f32.mrb[123].mxu1  ;;  %4585 = vmatpush1.bf16.msra.mxu1 %v4584_v5 }
 0x5c8   : > { %v5322_v15 = vpop.eup %5321  ;;  %v3058_v59 = vpop.permute.xlu0 %3057  ;;  %5341 = vtanh.f32 %v3212_v42  ;;  %v3373_v56 = vadd.f32 %v3372_v61, %v3053_v39 }
 0x5c9   : > { %v3215_v27 = vpop.f32.mrb[124].mxu0  ;;  %v5324_v23 = vpop.eup %5323  ;;  %5343 = vtanh.f32 %v3371_v3 }
 0x5ca   : > { %v3216_v0 = vadd.f32 %v3215_v27, %v3058_v59  ;;  %v3217_v58 = vpop.f32.mrb[125].mxu0  ;;  %v5326_v12 = vpop.eup %5325  ;;  %5345 = vtanh.f32 %v3373_v56  ;;  %v4556_v20 = vpack.c.bf16 %v5324_v23, %v5316_v55 }
 0x5cb   : > { %v3376_v17 = vpop.f32.mrb[124].mxu1  ;;  %v3218_v35 = vadd.f32 %v3217_v58, %v3058_v59  ;;  %v5328_v2 = vpop.eup %5327  ;;  %v4554_v7 = vpack.c.bf16 %v5326_v12, %v5318_v10 }
 0x5cc   : > { %5347 = vtanh.f32 %v3216_v0  ;;  %v3377_v4 = vadd.f32 %v3376_v17, %v3058_v59  ;;  %v3378_v49 = vpop.f32.mrb[125].mxu1  ;;  %v5330_v1 = vpop.eup %5329  ;;  %v4588_v24 = vpack.c.bf16 %v5328_v2, %v5320_v62 }
 0x5cd   : > { %v3063_v32 = vpop.permute.xlu1 %3062  ;;  %5349 = vtanh.f32 %v3218_v35  ;;  %v3379_v39 = vadd.f32 %v3378_v49, %v3058_v59  ;;  %v3221_v5 = vpop.f32.mrb[126].mxu0  ;;  %4555 = vmatprep.subr.bf16.mxu0 %v4554_v7  ;;  %v4586_v56 = vpack.c.bf16 %v5330_v1, %v5322_v15 }
 0x5ce   : > { %v5332_v42 = vpop.eup %5331  ;;  %5351 = vtanh.f32 %v3377_v4  ;;  %v3222_v3 = vadd.f32 %v3221_v5, %v3063_v32  ;;  %v3223_v61 = vpop.f32.mrb[127].mxu0  ;;  %4557 = vmatpush1.bf16.msra.mxu0 %v4556_v20 }
 0x5cf   : > { %v5334_v27 = vpop.eup %5333  ;;  %5353 = vtanh.f32 %v3379_v39  ;;  %v3382_v55 = vpop.f32.mrb[126].mxu1  ;;  %v3224_v23 = vadd.f32 %v3223_v61, %v3063_v32  ;;  %4587 = vmatprep.subr.bf16.mxu1 %v4586_v56 }
 0x5d0   : > { %v5336_v0 = vpop.eup %5335  ;;  %5355 = vtanh.f32 %v3222_v3  ;;  %v3383_v10 = vadd.f32 %v3382_v55, %v3063_v32  ;;  %v3384_v58 = vpop.f32.mrb[127].mxu1  ;;  %4589 = vmatpush1.bf16.msra.mxu1 %v4588_v24 }
 0x5d1   : > { %v5338_v12 = vpop.eup %5337  ;;  %5357 = vtanh.f32 %v3224_v23  ;;  %v3385_v59 = vadd.f32 %v3384_v58, %v3063_v32  ;;  %v3451_v23 = vld [vmem:[%s7461_s11] sm:$0xff]  ;;  %v3454_v58 = vld [vmem:[%s7461_s11 + $0x18] sm:$0xff] }
 0x5d2   : > { %v5340_v62 = vpop.eup %5339  ;;  %5359 = vtanh.f32 %v3383_v10  ;;  %v3453_v10 = vld [vmem:[%s7461_s11 + $0x10] sm:$0xff] }
 0x5d3   : > { %v5342_v17 = vpop.eup %5341  ;;  %5361 = vtanh.f32 %v3385_v59  ;;  %v4560_v35 = vpack.c.bf16 %v5340_v62, %v5332_v42  ;;  %v3456_v59 = vld [vmem:[%s7461_s11 + $0x28] sm:$0xff]  ;;  %v3457_v62 = vld [vmem:[%s7461_s11 + $0x30] sm:$0xff] }
 0x5d4   : > { %v5344_v15 = vpop.eup %5343  ;;  %v4558_v2 = vpack.c.bf16 %v5342_v17, %v5334_v27  ;;  %v3458_v17 = vld [vmem:[%s7461_s11 + $0x38] sm:$0xff] }
 0x5d5   : > { %v5346_v4 = vpop.eup %5345  ;;  %v4592_v49 = vpack.c.bf16 %v5344_v15, %v5336_v0  ;;  %v3452_v0 = vld [vmem:[%s7461_s11 + $0x8] sm:$0xff] }
 0x5d6   : > { %v5348_v7 = vpop.eup %5347  ;;  %4559 = vmatprep.subr.bf16.mxu0 %v4558_v2  ;;  %v4590_v20 = vpack.c.bf16 %v5346_v4, %v5338_v12  ;;  %v3455_v12 = vld [vmem:[%s7461_s11 + $0x20] sm:$0xff]  ;;  %v3460_v15 = vld [vmem:[%s7461_s11 + $0x48] sm:$0xff]  ;;  %v3461_v2 = vld [vmem:[%s7461_s11 + $0x50] sm:$0xff] }
 0x5d7   : > { %v5350_v1 = vpop.eup %5349  ;;  %4561 = vmatpush1.bf16.msra.mxu0 %v4560_v35  ;;  %v3459_v35 = vld [vmem:[%s7461_s11 + $0x40] sm:$0xff]  ;;  %v3462_v4 = vld [vmem:[%s7461_s11 + $0x58] sm:$0xff] }
 0x5d8   : > { %v5352_v39 = vpop.eup %5351  ;;  %4591 = vmatprep.subr.bf16.mxu1 %v4590_v20  ;;  %v3465_v20 = vld [vmem:[%s7461_s11 + $0x70] sm:$0xff] }
 0x5d9   : > { %v5354_v5 = vpop.eup %5353  ;;  %4593 = vmatpush1.bf16.msra.mxu1 %v4592_v49  ;;  %v3463_v49 = vld [vmem:[%s7461_s11 + $0x60] sm:$0xff] }
 0x5da   : > { %v5356_v32 = vpop.eup %5355 }
 0x5db   : > { %v5358_v24 = vpop.eup %5357  ;;  %v4564_v3 = vpack.c.bf16 %v5356_v32, %v5348_v7  ;;  %v3464_v7 = vld [vmem:[%s7461_s11 + $0x68] sm:$0xff] }
 0x5dc   : > { %v5360_v61 = vpop.eup %5359  ;;  %v4562_v56 = vpack.c.bf16 %v5358_v24, %v5350_v1  ;;  %v3466_v1 = vld [vmem:[%s7461_s11 + $0x78] sm:$0xff] }
 0x5dd   : > { %v5362_v55 = vpop.eup %5361  ;;  %v4596_v42 = vpack.c.bf16 %v5360_v61, %v5352_v39  ;;  %v3486_v39 = vpop.permute.xlu0 %3485 }
 0x5de   : > { %4563 = vmatprep.subr.bf16.mxu0 %v4562_v56  ;;  %v4594_v27 = vpack.c.bf16 %v5362_v55, %v5354_v5 }
 0x5df   : > { %4565 = vmatpush1.bf16.msra.mxu0 %v4564_v3 }
 0x5e0   : > { %4595 = vmatprep.subr.bf16.mxu1 %v4594_v27 }
 0x5e1   : > { %4597 = vmatpush1.bf16.msra.mxu1 %v4596_v42  ;;  %v3491_v42 = vpop.permute.xlu1 %3490 }
 0x5e2   : > { %3628 = vmatmul.mubr.f32.vlgmr.msra.gmra.mrb[128].mxu0 %v3451_v23 }
 0x5e3   : > { %3633 = vmatprep.mubr.f32.mxu0 %v7533_v54 }
 0x5e4   : > { %3789 = vmatmul.mubr.f32.vlgmr.msra.gmra.mrb[128].mxu1 %v3451_v23 }
 0x5e5   : > { %3794 = vmatprep.mubr.f32.mxu1 %v7533_v54 }
 0x5e6   : > { %3634 = vmatmul.mubr.f32.gmra.mrb[130].mxu0 %v3452_v0 }
 0x5e7   : > { %3639 = vmatprep.mubr.f32.mxu0 %v7533_v54 }
 0x5e8   : > { %3795 = vmatmul.mubr.f32.gmra.mrb[130].mxu1 %v3452_v0 }
 0x5e9   : > { %3800 = vmatprep.mubr.f32.mxu1 %v7533_v54 }
 0x5ea   : > { %3640 = vmatmul.mubr.f32.gmra.mrb[132].mxu0 %v3453_v10 }
 0x5eb   : > { %3645 = vmatprep.mubr.f32.mxu0 %v7533_v54 }
 0x5ec   : > { %3801 = vmatmul.mubr.f32.gmra.mrb[132].mxu1 %v3453_v10 }
 0x5ed   : > { %3806 = vmatprep.mubr.f32.mxu1 %v7533_v54 }
 0x5ee   : > { %3646 = vmatmul.mubr.f32.gmra.mrb[134].mxu0 %v3454_v58 }
 0x5ef   : > { %3651 = vmatprep.mubr.f32.mxu0 %v7533_v54 }
 0x5f0   : > { %3807 = vmatmul.mubr.f32.gmra.mrb[134].mxu1 %v3454_v58 }
 0x5f1   : > { %3812 = vmatprep.mubr.f32.mxu1 %v7533_v54 }
 0x5f2   : > { %3652 = vmatmul.mubr.f32.gmra.mrb[136].mxu0 %v3455_v12 }
 0x5f3   : > { %3657 = vmatprep.mubr.f32.mxu0 %v7533_v54 }
 0x5f4   : > { %3813 = vmatmul.mubr.f32.gmra.mrb[136].mxu1 %v3455_v12 }
 0x5f5   : > { %3818 = vmatprep.mubr.f32.mxu1 %v7533_v54 }
 0x5f6   : > { %3658 = vmatmul.mubr.f32.gmra.mrb[138].mxu0 %v3456_v59 }
 0x5f7   : > { %3663 = vmatprep.mubr.f32.mxu0 %v7533_v54 }
 0x5f8   : > { %3819 = vmatmul.mubr.f32.gmra.mrb[138].mxu1 %v3456_v59 }
 0x5f9   : > { %3824 = vmatprep.mubr.f32.mxu1 %v7533_v54 }
 0x5fa   : > { %3664 = vmatmul.mubr.f32.gmra.mrb[140].mxu0 %v3457_v62 }
 0x5fb   : > { %3669 = vmatprep.mubr.f32.mxu0 %v7533_v54 }
 0x5fc   : > { %3825 = vmatmul.mubr.f32.gmra.mrb[140].mxu1 %v3457_v62  ;;  %v3496_v62 = vpop.permute.xlu0 %3495 }
 0x5fd   : > { %3830 = vmatprep.mubr.f32.mxu1 %v7533_v54 }
 0x5fe   : > { %3670 = vmatmul.mubr.f32.gmra.mrb[142].mxu0 %v3458_v17 }
 0x5ff   : > { %3675 = vmatprep.mubr.f32.mxu0 %v7533_v54 }
 0x600   : > { %3831 = vmatmul.mubr.f32.gmra.mrb[142].mxu1 %v3458_v17 }
 0x601   : > { %3836 = vmatprep.mubr.f32.mxu1 %v7533_v54 }
 0x602   : > { %3676 = vmatmul.mubr.f32.gmra.mrb[144].mxu0 %v3459_v35 }
 0x603   : > { %3681 = vmatprep.mubr.f32.mxu0 %v7533_v54 }
 0x604   : > { %3837 = vmatmul.mubr.f32.gmra.mrb[144].mxu1 %v3459_v35 }
 0x605   : > { %3842 = vmatprep.mubr.f32.mxu1 %v7533_v54 }
 0x606   : > { %3682 = vmatmul.mubr.f32.gmra.mrb[146].mxu0 %v3460_v15 }
 0x607   : > { %3687 = vmatprep.mubr.f32.mxu0 %v7533_v54 }
 0x608   : > { %3843 = vmatmul.mubr.f32.gmra.mrb[146].mxu1 %v3460_v15 }
 0x609   : > { %3848 = vmatprep.mubr.f32.mxu1 %v7533_v54 }
 0x60a   : > { %3688 = vmatmul.mubr.f32.gmra.mrb[148].mxu0 %v3461_v2 }
 0x60b   : > { %3693 = vmatprep.mubr.f32.mxu0 %v7533_v54 }
 0x60c   : > { %3849 = vmatmul.mubr.f32.gmra.mrb[148].mxu1 %v3461_v2 }
 0x60d   : > { %3854 = vmatprep.mubr.f32.mxu1 %v7533_v54 }
 0x60e   : > { %3694 = vmatmul.mubr.f32.gmra.mrb[150].mxu0 %v3462_v4 }
 0x60f   : > { %3699 = vmatprep.mubr.f32.mxu0 %v7533_v54 }
 0x610   : > { %3855 = vmatmul.mubr.f32.gmra.mrb[150].mxu1 %v3462_v4 }
 0x611   : > { %3860 = vmatprep.mubr.f32.mxu1 %v7533_v54 }
 0x612   : > { %3700 = vmatmul.mubr.f32.gmra.mrb[152].mxu0 %v3463_v49 }
 0x613   : > { %3705 = vmatprep.mubr.f32.mxu0 %v7533_v54 }
 0x614   : > { %3861 = vmatmul.mubr.f32.gmra.mrb[152].mxu1 %v3463_v49 }
 0x615   : > { %3866 = vmatprep.mubr.f32.mxu1 %v7533_v54 }
 0x616   : > { %3706 = vmatmul.mubr.f32.gmra.mrb[154].mxu0 %v3464_v7 }
 0x617   : > { %3711 = vmatprep.mubr.f32.mxu0 %v7533_v54 }
 0x618   : > { %3867 = vmatmul.mubr.f32.gmra.mrb[154].mxu1 %v3464_v7 }
 0x619   : > { %3872 = vmatprep.mubr.f32.mxu1 %v7533_v54 }
 0x61a   : > { %3712 = vmatmul.mubr.f32.gmra.mrb[156].mxu0 %v3465_v20 }
 0x61b   : > { %3717 = vmatprep.mubr.f32.mxu0 %v7533_v54 }
 0x61c   : > { %3873 = vmatmul.mubr.f32.gmra.mrb[156].mxu1 %v3465_v20 }
 0x61d   : > { %3878 = vmatprep.mubr.f32.mxu1 %v7533_v54 }
 0x61e   : > { %3718 = vmatmul.mubr.f32.gmra.mrb[158].mxu0 %v3466_v1 }
 0x61f   : > { %4078 = vmatprep.mubr.f32.mxu0 %v7533_v54 }
 0x620   : > { %3879 = vmatmul.mubr.f32.gmra.mrb[158].mxu1 %v3466_v1  ;;  %v3501_v1 = vpop.permute.xlu1 %3500 }
 0x621   : > { %4149 = vmatprep.mubr.f32.mxu1 %v7533_v54 }
 0x6b5   : > { %v3629_v5 = vpop.f32.mrb[128].mxu0 }
 0x6b6   : > { %v3630_v32 = vadd.f32 %v3629_v5, %v3486_v39  ;;  %v3631_v24 = vpop.f32.mrb[129].mxu0 }
 0x6b7   : > { %v3790_v3 = vpop.f32.mrb[128].mxu1  ;;  %v3632_v61 = vadd.f32 %v3631_v24, %v3486_v39 }
 0x6b8   : > { %5363 = vtanh.f32 %v3630_v32  ;;  %v3791_v56 = vadd.f32 %v3790_v3, %v3486_v39  ;;  %v3792_v55 = vpop.f32.mrb[129].mxu1 }
 0x6b9   : > { %5365 = vtanh.f32 %v3632_v61  ;;  %v3793_v27 = vadd.f32 %v3792_v55, %v3486_v39  ;;  %v3635_v23 = vpop.f32.mrb[130].mxu0 }
 0x6ba   : > { %5367 = vtanh.f32 %v3791_v56  ;;  %v3636_v0 = vadd.f32 %v3635_v23, %v3491_v42  ;;  %v3637_v10 = vpop.f32.mrb[131].mxu0 }
 0x6bb   : > { %5369 = vtanh.f32 %v3793_v27  ;;  %v3796_v58 = vpop.f32.mrb[130].mxu1  ;;  %v3638_v12 = vadd.f32 %v3637_v10, %v3491_v42  ;;  %v3506_v10 = vpop.permute.xlu0 %3505 }
 0x6bc   : > { %5371 = vtanh.f32 %v3636_v0  ;;  %v3797_v54 = vadd.f32 %v3796_v58, %v3491_v42  ;;  %v3798_v59 = vpop.f32.mrb[131].mxu1 }
 0x6bd   : > { %5373 = vtanh.f32 %v3638_v12  ;;  %v3799_v17 = vadd.f32 %v3798_v59, %v3491_v42  ;;  %v3641_v35 = vpop.f32.mrb[132].mxu0 }
 0x6be   : > { %5375 = vtanh.f32 %v3797_v54  ;;  %v3642_v15 = vadd.f32 %v3641_v35, %v3496_v62  ;;  %v3643_v2 = vpop.f32.mrb[133].mxu0 }
 0x6bf   : > { %5377 = vtanh.f32 %v3799_v17  ;;  %v3802_v4 = vpop.f32.mrb[132].mxu1  ;;  %v3644_v49 = vadd.f32 %v3643_v2, %v3496_v62 }
 0x6c0   : > { %5379 = vtanh.f32 %v3642_v15  ;;  %v3803_v7 = vadd.f32 %v3802_v4, %v3496_v62  ;;  %v3804_v20 = vpop.f32.mrb[133].mxu1 }
 0x6c1   : > { %5381 = vtanh.f32 %v3644_v49  ;;  %v3805_v39 = vadd.f32 %v3804_v20, %v3496_v62  ;;  %v3647_v5 = vpop.f32.mrb[134].mxu0 }
 0x6c2   : > { %v5364_v32 = vpop.eup %5363  ;;  %5383 = vtanh.f32 %v3803_v7  ;;  %v3648_v24 = vadd.f32 %v3647_v5, %v3501_v1  ;;  %v3649_v3 = vpop.f32.mrb[135].mxu0 }
 0x6c3   : > { %v5366_v61 = vpop.eup %5365  ;;  %5385 = vtanh.f32 %v3805_v39  ;;  %v3808_v56 = vpop.f32.mrb[134].mxu1  ;;  %v3650_v55 = vadd.f32 %v3649_v3, %v3501_v1  ;;  %v3949_v35 = vadd.f32 %v5364_v32, %v6919_v28 }
 0x6c4   : > { %v5368_v42 = vpop.eup %5367  ;;  %5387 = vtanh.f32 %v3648_v24  ;;  %v3809_v27 = vadd.f32 %v3808_v56, %v3501_v1  ;;  %v3810_v23 = vpop.f32.mrb[135].mxu1  ;;  %v3950_v17 = vadd.f32 %v5366_v61, %v6925_v22 }
 0x6c5   : > { %v5370_v0 = vpop.eup %5369  ;;  %5389 = vtanh.f32 %v3650_v55  ;;  %v3811_v58 = vadd.f32 %v3810_v23, %v3501_v1  ;;  %v3653_v12 = vpop.f32.mrb[136].mxu0  ;;  %v3951_v7 = vadd.f32 %v5368_v42, %v6944_v46 }
 0x6c6   : > { %v5372_v54 = vpop.eup %5371  ;;  %5391 = vtanh.f32 %v3809_v27  ;;  %v3654_v59 = vadd.f32 %v3653_v12, %v3506_v10  ;;  %v3655_v62 = vpop.f32.mrb[137].mxu0  ;;  %v3952_v24 = vadd.f32 %v5370_v0, %v6931_v52 }
 0x6c7   : > { %v5374_v15 = vpop.eup %5373  ;;  %5393 = vtanh.f32 %v3811_v58  ;;  %v3814_v2 = vpop.f32.mrb[136].mxu1  ;;  %v3656_v4 = vadd.f32 %v3655_v62, %v3506_v10  ;;  %v3953_v49 = vadd.f32 %v5372_v54, %v6922_v43 }
 0x6c8   : > { %v5376_v20 = vpop.eup %5375  ;;  %5395 = vtanh.f32 %v3654_v59  ;;  %v3815_v1 = vadd.f32 %v3814_v2, %v3506_v10  ;;  %v3816_v39 = vpop.f32.mrb[137].mxu1  ;;  %v3954_v5 = vadd.f32 %v5374_v15, %v6928_v47 }
 0x6c9   : > { %v5378_v3 = vpop.eup %5377  ;;  %v3511_v22 = vpop.permute.xlu1 %3510  ;;  %5397 = vtanh.f32 %v3656_v4  ;;  %v3817_v28 = vadd.f32 %v3816_v39, %v3506_v10  ;;  %v4600_v61 = vpack.c.bf16 %v3953_v49, %v3949_v35  ;;  %v3955_v56 = vadd.f32 %v5376_v20, %v6934_v8 }
 0x6ca   : > { %v3659_v32 = vpop.f32.mrb[138].mxu0  ;;  %v5380_v55 = vpop.eup %5379  ;;  %5399 = vtanh.f32 %v3815_v1  ;;  %v4598_v42 = vpack.c.bf16 %v3954_v5, %v3950_v17  ;;  %v3956_v27 = vadd.f32 %v5378_v3, %v6939_v45 }
 0x6cb   : > { %v3660_v43 = vadd.f32 %v3659_v32, %v3511_v22  ;;  %v3661_v46 = vpop.f32.mrb[139].mxu0  ;;  %v5382_v23 = vpop.eup %5381  ;;  %5401 = vtanh.f32 %v3817_v28  ;;  %v4632_v52 = vpack.c.bf16 %v3955_v56, %v3951_v7  ;;  %v3957_v4 = vadd.f32 %v5380_v55, %v6951_v9 }
 0x6cc   : > { %v3820_v47 = vpop.f32.mrb[138].mxu1  ;;  %v3662_v58 = vadd.f32 %v3661_v46, %v3511_v22  ;;  %v5384_v0 = vpop.eup %5383  ;;  %4599 = vmatprep.subr.bf16.mxu0 %v4598_v42  ;;  %v4630_v54 = vpack.c.bf16 %v3956_v27, %v3952_v24  ;;  %v3958_v2 = vadd.f32 %v5382_v23, %v6957_v16 }
 0x6cd   : > { %5403 = vtanh.f32 %v3660_v43  ;;  %v3821_v12 = vadd.f32 %v3820_v47, %v3511_v22  ;;  %v3822_v10 = vpop.f32.mrb[139].mxu1  ;;  %v5386_v59 = vpop.eup %5385  ;;  %4601 = vmatpush1.bf16.msra.mxu0 %v4600_v61  ;;  %v3959_v39 = vadd.f32 %v5384_v0, %v6976_v53 }
 0x6ce   : > { %v3516_v8 = vpop.permute.xlu0 %3515  ;;  %5405 = vtanh.f32 %v3662_v58  ;;  %v3823_v62 = vadd.f32 %v3822_v10, %v3511_v22  ;;  %v3665_v35 = vpop.f32.mrb[140].mxu0  ;;  %4631 = vmatprep.subr.bf16.mxu1 %v4630_v54  ;;  %v3960_v28 = vadd.f32 %v5386_v59, %v6963_v41 }
 0x6cf   : > { %v5388_v17 = vpop.eup %5387  ;;  %5407 = vtanh.f32 %v3821_v12  ;;  %v3666_v45 = vadd.f32 %v3665_v35, %v3516_v8  ;;  %v3667_v15 = vpop.f32.mrb[141].mxu0  ;;  %4633 = vmatpush1.bf16.msra.mxu1 %v4632_v52 }
 0x6d0   : > { %v5390_v49 = vpop.eup %5389  ;;  %5409 = vtanh.f32 %v3823_v62  ;;  %v3826_v7 = vpop.f32.mrb[140].mxu1  ;;  %v3668_v20 = vadd.f32 %v3667_v15, %v3516_v8  ;;  %v3961_v1 = vadd.f32 %v5388_v17, %v6954_v29 }
 0x6d1   : > { %v5392_v5 = vpop.eup %5391  ;;  %5411 = vtanh.f32 %v3666_v45  ;;  %v3827_v24 = vadd.f32 %v3826_v7, %v3516_v8  ;;  %v3828_v3 = vpop.f32.mrb[141].mxu1  ;;  %v3962_v22 = vadd.f32 %v5390_v49, %v6960_v11 }
 0x6d2   : > { %v5394_v16 = vpop.eup %5393  ;;  %v3521_v32 = vpop.permute.xlu1 %3520  ;;  %5413 = vtanh.f32 %v3668_v20  ;;  %v3829_v9 = vadd.f32 %v3828_v3, %v3516_v8  ;;  %v4604_v56 = vpack.c.bf16 %v3961_v1, %v3957_v4  ;;  %v3963_v55 = vadd.f32 %v5392_v5, %v6966_v6 }
 0x6d3   : > { %v3671_v61 = vpop.f32.mrb[142].mxu0  ;;  %v5396_v43 = vpop.eup %5395  ;;  %5415 = vtanh.f32 %v3827_v24  ;;  %v4602_v46 = vpack.c.bf16 %v3962_v22, %v3958_v2  ;;  %v3964_v42 = vadd.f32 %v5394_v16, %v6971_v19 }
 0x6d4   : > { %v3672_v29 = vadd.f32 %v3671_v61, %v3521_v32  ;;  %v3673_v53 = vpop.f32.mrb[143].mxu0  ;;  %v5398_v27 = vpop.eup %5397  ;;  %5417 = vtanh.f32 %v3829_v9  ;;  %v4636_v41 = vpack.c.bf16 %v3963_v55, %v3959_v39  ;;  %v3965_v35 = vadd.f32 %v5396_v43, %v6983_v34 }
 0x6d5   : > { %v3832_v11 = vpop.f32.mrb[142].mxu1  ;;  %v3674_v23 = vadd.f32 %v3673_v53, %v3521_v32  ;;  %v5400_v47 = vpop.eup %5399  ;;  %4603 = vmatprep.subr.bf16.mxu0 %v4602_v46  ;;  %v4634_v0 = vpack.c.bf16 %v3964_v42, %v3960_v28  ;;  %v3966_v62 = vadd.f32 %v5398_v27, %v6989_v50 }
 0x6d6   : > { %5419 = vtanh.f32 %v3672_v29  ;;  %v3833_v58 = vadd.f32 %v3832_v11, %v3521_v32  ;;  %v3834_v52 = vpop.f32.mrb[143].mxu1  ;;  %v5402_v12 = vpop.eup %5401  ;;  %4605 = vmatpush1.bf16.msra.mxu0 %v4604_v56  ;;  %v3967_v4 = vadd.f32 %v5400_v47, %v7008_v37 }
 0x6d7   : > { %v3526_v6 = vpop.permute.xlu0 %3525  ;;  %5421 = vtanh.f32 %v3674_v23  ;;  %v3835_v10 = vadd.f32 %v3834_v52, %v3521_v32  ;;  %v3677_v54 = vpop.f32.mrb[144].mxu0  ;;  %4635 = vmatprep.subr.bf16.mxu1 %v4634_v0  ;;  %v3968_v39 = vadd.f32 %v5402_v12, %v6995_v21 }
 0x6d8   : > { %v5404_v59 = vpop.eup %5403  ;;  %5423 = vtanh.f32 %v3833_v58  ;;  %v3678_v19 = vadd.f32 %v3677_v54, %v3526_v6  ;;  %v3679_v8 = vpop.f32.mrb[145].mxu0  ;;  %4637 = vmatpush1.bf16.msra.mxu1 %v4636_v41 }
 0x6d9   : > { %v5406_v17 = vpop.eup %5405  ;;  %5425 = vtanh.f32 %v3835_v10  ;;  %v3838_v45 = vpop.f32.mrb[144].mxu1  ;;  %v3680_v15 = vadd.f32 %v3679_v8, %v3526_v6  ;;  %v3969_v2 = vadd.f32 %v5404_v59, %v6986_v18 }
 0x6da   : > { %v5408_v49 = vpop.eup %5407  ;;  %5427 = vtanh.f32 %v3678_v19  ;;  %v3839_v7 = vadd.f32 %v3838_v45, %v3526_v6  ;;  %v3840_v20 = vpop.f32.mrb[145].mxu1  ;;  %v3970_v1 = vadd.f32 %v5406_v17, %v6992_v31 }
 0x6db   : > { %v5410_v50 = vpop.eup %5409  ;;  %v3531_v5 = vpop.permute.xlu1 %3530  ;;  %5429 = vtanh.f32 %v3680_v15  ;;  %v3841_v34 = vadd.f32 %v3840_v20, %v3526_v6  ;;  %v4608_v3 = vpack.c.bf16 %v3969_v2, %v3965_v35  ;;  %v3971_v22 = vadd.f32 %v5408_v49, %v6998_v36 }
 0x6dc   : > { %v3683_v24 = vpop.f32.mrb[146].mxu0  ;;  %v5412_v28 = vpop.eup %5411  ;;  %5431 = vtanh.f32 %v3839_v7  ;;  %v4606_v16 = vpack.c.bf16 %v3970_v1, %v3966_v62  ;;  %v3972_v32 = vadd.f32 %v5410_v50, %v7003_v33 }
 0x6dd   : > { %v3684_v18 = vadd.f32 %v3683_v24, %v3531_v5  ;;  %v3685_v37 = vpop.f32.mrb[147].mxu0  ;;  %v5414_v9 = vpop.eup %5413  ;;  %5433 = vtanh.f32 %v3841_v34  ;;  %v4640_v21 = vpack.c.bf16 %v3971_v22, %v3967_v4  ;;  %v3973_v41 = vadd.f32 %v5412_v28, %v7015_v38 }
 0x6de   : > { %v3844_v31 = vpop.f32.mrb[146].mxu1  ;;  %v3686_v61 = vadd.f32 %v3685_v37, %v3531_v5  ;;  %v5416_v56 = vpop.eup %5415  ;;  %4607 = vmatprep.subr.bf16.mxu0 %v4606_v16  ;;  %v4638_v29 = vpack.c.bf16 %v3972_v32, %v3968_v39  ;;  %v3974_v23 = vadd.f32 %v5414_v9, %v7021_v30 }
 0x6df   : > { %5435 = vtanh.f32 %v3684_v18  ;;  %v3845_v55 = vadd.f32 %v3844_v31, %v3531_v5  ;;  %v3846_v43 = vpop.f32.mrb[147].mxu1  ;;  %v5418_v53 = vpop.eup %5417  ;;  %4609 = vmatpush1.bf16.msra.mxu0 %v4608_v3  ;;  %v3975_v12 = vadd.f32 %v5416_v56, %v7040_v14 }
 0x6e0   : > { %v3536_v36 = vpop.permute.xlu0 %3535  ;;  %5437 = vtanh.f32 %v3686_v61  ;;  %v3847_v46 = vadd.f32 %v3846_v43, %v3531_v5  ;;  %v3689_v42 = vpop.f32.mrb[148].mxu0  ;;  %4639 = vmatprep.subr.bf16.mxu1 %v4638_v29  ;;  %v3976_v19 = vadd.f32 %v5418_v53, %v7027_v51 }
 0x6e1   : > { %v5420_v27 = vpop.eup %5419  ;;  %5439 = vtanh.f32 %v3845_v55  ;;  %v3690_v33 = vadd.f32 %v3689_v42, %v3536_v36  ;;  %v3691_v11 = vpop.f32.mrb[149].mxu0  ;;  %4641 = vmatpush1.bf16.msra.mxu1 %v4640_v21  ;;  %v7615_v55 = vld [vmem:[#allocation34_spill] sm:$0xff] }
 0x6e2   : > { %v5422_v47 = vpop.eup %5421  ;;  %5441 = vtanh.f32 %v3847_v46  ;;  %v3850_v58 = vpop.f32.mrb[148].mxu1  ;;  %v3692_v52 = vadd.f32 %v3691_v11, %v3536_v36  ;;  %v3977_v0 = vadd.f32 %v5420_v27, %v7018_v26  ;;  %v7616_v46 = vld [vmem:[#allocation7_spill] sm:$0xff]  ;;  %v7617_v11 = vld [vmem:[#allocation8_spill] sm:$0xff] }
 0x6e3   : > { %v5424_v6 = vpop.eup %5423  ;;  %5443 = vtanh.f32 %v3690_v33  ;;  %v3851_v10 = vadd.f32 %v3850_v58, %v3536_v36  ;;  %v3852_v54 = vpop.f32.mrb[149].mxu1  ;;  %v3978_v59 = vadd.f32 %v5422_v47, %v7024_v63 }
 0x6e4   : > { %v5426_v30 = vpop.eup %5425  ;;  %v3541_v8 = vpop.permute.xlu1 %3540  ;;  %5445 = vtanh.f32 %v3692_v52  ;;  %v3853_v38 = vadd.f32 %v3852_v54, %v3536_v36  ;;  %v4612_v35 = vpack.c.bf16 %v3977_v0, %v3973_v41  ;;  %v3979_v17 = vadd.f32 %v5424_v6, %v7030_v44 }
 0x6e5   : > { %v3695_v62 = vpop.f32.mrb[150].mxu0  ;;  %v5428_v45 = vpop.eup %5427  ;;  %5447 = vtanh.f32 %v3851_v10  ;;  %v4610_v15 = vpack.c.bf16 %v3978_v59, %v3974_v23  ;;  %v3980_v2 = vadd.f32 %v5426_v30, %v7035_v25 }
 0x6e6   : > { %v3696_v26 = vadd.f32 %v3695_v62, %v3541_v8  ;;  %v3697_v14 = vpop.f32.mrb[151].mxu0  ;;  %v5430_v4 = vpop.eup %5429  ;;  %5449 = vtanh.f32 %v3853_v38  ;;  %v4644_v51 = vpack.c.bf16 %v3979_v17, %v3975_v12  ;;  %v3981_v28 = vadd.f32 %v5428_v45, %v7047_v60  ;;  %v7618_v62 = vld [vmem:[#allocation13_spill] sm:$0xff] }
 0x6e7   : > { %v3856_v63 = vpop.f32.mrb[150].mxu1  ;;  %v3698_v49 = vadd.f32 %v3697_v14, %v3541_v8  ;;  %v5432_v7 = vpop.eup %5431  ;;  %4611 = vmatprep.subr.bf16.mxu0 %v4610_v15  ;;  %v4642_v39 = vpack.c.bf16 %v3980_v2, %v3976_v19  ;;  %v3982_v22 = vadd.f32 %v5430_v4, %v7053_v40  ;;  %v7619_v17 = vld [vmem:[#allocation9_spill] sm:$0xff]  ;;  %v7620_v2 = vld [vmem:[#allocation10_spill] sm:$0xff] }
 0x6e8   : > { %5451 = vtanh.f32 %v3696_v26  ;;  %v3857_v20 = vadd.f32 %v3856_v63, %v3541_v8  ;;  %v3858_v1 = vpop.f32.mrb[151].mxu1  ;;  %v5434_v50 = vpop.eup %5433  ;;  %4613 = vmatpush1.bf16.msra.mxu0 %v4612_v35  ;;  %v3983_v9 = vadd.f32 %v5432_v7, %v7072_v13  ;;  %v7621_v63 = vld [vmem:[#allocation16_spill] sm:$0xff] }
 0x6e9   : > { %v3546_v44 = vpop.permute.xlu0 %3545  ;;  %5453 = vtanh.f32 %v3698_v49  ;;  %v3859_v5 = vadd.f32 %v3858_v1, %v3541_v8  ;;  %v3701_v34 = vpop.f32.mrb[152].mxu0  ;;  %4643 = vmatprep.subr.bf16.mxu1 %v4642_v39  ;;  %v3984_v43 = vadd.f32 %v5434_v50, %v7615_v55  ;;  %v7622_v1 = vld [vmem:[#allocation11_spill] sm:$0xff]  ;;  %v7623_v50 = vld [vmem:[#allocation14_spill] sm:$0xff] }
 0x6ea   : > { %v5436_v24 = vpop.eup %5435  ;;  %5455 = vtanh.f32 %v3857_v20  ;;  %v3702_v25 = vadd.f32 %v3701_v34, %v3546_v44  ;;  %v3703_v3 = vpop.f32.mrb[153].mxu0  ;;  %4645 = vmatpush1.bf16.msra.mxu1 %v4644_v51 }
 0x6eb   : > { %v5438_v18 = vpop.eup %5437  ;;  %5457 = vtanh.f32 %v3859_v5  ;;  %v3862_v37 = vpop.f32.mrb[152].mxu1  ;;  %v3704_v16 = vadd.f32 %v3703_v3, %v3546_v44  ;;  %v3985_v32 = vadd.f32 %v5436_v24, %v7050_v48 }
 0x6ec   : > { %v5440_v31 = vpop.eup %5439  ;;  %5459 = vtanh.f32 %v3702_v25  ;;  %v3863_v61 = vadd.f32 %v3862_v37, %v3546_v44  ;;  %v3864_v21 = vpop.f32.mrb[153].mxu1  ;;  %v3986_v56 = vadd.f32 %v5438_v18, %v7056_v57 }
 0x6ed   : > { %v5442_v40 = vpop.eup %5441  ;;  %v3551_v29 = vpop.permute.xlu1 %3550  ;;  %5461 = vtanh.f32 %v3704_v16  ;;  %v3865_v60 = vadd.f32 %v3864_v21, %v3546_v44  ;;  %v4616_v36 = vpack.c.bf16 %v3985_v32, %v3981_v28  ;;  %v3987_v42 = vadd.f32 %v5440_v31, %v7616_v46 }
 0x6ee   : > { %v3707_v53 = vpop.f32.mrb[154].mxu0  ;;  %v5444_v27 = vpop.eup %5443  ;;  %5463 = vtanh.f32 %v3863_v61  ;;  %v4614_v33 = vpack.c.bf16 %v3986_v56, %v3982_v22  ;;  %v3988_v23 = vadd.f32 %v5442_v40, %v7617_v11  ;;  %v7624_v22 = vld [vmem:[#allocation12_spill] sm:$0xff] }
 0x6ef   : > { %v3708_v48 = vadd.f32 %v3707_v53, %v3551_v29  ;;  %v3709_v13 = vpop.f32.mrb[155].mxu0  ;;  %v5446_v41 = vpop.eup %5445  ;;  %5465 = vtanh.f32 %v3865_v60  ;;  %v4648_v58 = vpack.c.bf16 %v3987_v42, %v3983_v9  ;;  %v3989_v45 = vadd.f32 %v5444_v27, %v7619_v17  ;;  %v7625_v9 = vld [vmem:[#allocation15_spill] sm:$0xff]  ;;  %v7626_v27 = vld [vmem:[#allocation22_spill] sm:$0xff] }
 0x6f0   : > { %v3868_v57 = vpop.f32.mrb[154].mxu1  ;;  %v3710_v47 = vadd.f32 %v3709_v13, %v3551_v29  ;;  %v5448_v52 = vpop.eup %5447  ;;  %4615 = vmatprep.subr.bf16.mxu0 %v4614_v33  ;;  %v4646_v6 = vpack.c.bf16 %v3988_v23, %v3984_v43  ;;  %v3990_v35 = vadd.f32 %v5446_v41, %v7618_v62  ;;  %v7627_v13 = vld [vmem:[#allocation17_spill] sm:$0xff] }
 0x6f1   : > { %5467 = vtanh.f32 %v3708_v48  ;;  %v3869_v0 = vadd.f32 %v3868_v57, %v3551_v29  ;;  %v3870_v12 = vpop.f32.mrb[155].mxu1  ;;  %v5450_v10 = vpop.eup %5449  ;;  %4617 = vmatpush1.bf16.msra.mxu0 %v4616_v36  ;;  %v3991_v49 = vadd.f32 %v5448_v52, %v7621_v63  ;;  %v7628_v23 = vld [vmem:[#allocation21_spill] sm:$0xff]  ;;  %v7629_v57 = vld [vmem:[#allocation19_spill] sm:$0xff] }
 0x6f2   : > { %v3556_v54 = vpop.permute.xlu0 %3555  ;;  %5469 = vtanh.f32 %v3710_v47  ;;  %v3871_v59 = vadd.f32 %v3870_v12, %v3551_v29  ;;  %v3713_v19 = vpop.f32.mrb[156].mxu0  ;;  %4647 = vmatprep.subr.bf16.mxu1 %v4646_v6  ;;  %v3992_v44 = vadd.f32 %v5450_v10, %v7623_v50  ;;  %v7631_v6 = vld [vmem:[#allocation18_spill] sm:$0xff]  ;;  %v7635_v63 = vld [vmem:[#allocation25_spill] sm:$0xff] }
 0x6f3   : > { %v5452_v30 = vpop.eup %5451  ;;  %5471 = vtanh.f32 %v3869_v0  ;;  %v3714_v8 = vadd.f32 %v3713_v19, %v3556_v54  ;;  %v3715_v38 = vpop.f32.mrb[157].mxu0  ;;  %4649 = vmatpush1.bf16.msra.mxu1 %v4648_v58  ;;  %v7630_v0 = vld [vmem:[#allocation24_spill] sm:$0xff]  ;;  %v7632_v19 = vld [vmem:[#allocation23_spill] sm:$0xff] }
 0x6f4   : > { %v5454_v26 = vpop.eup %5453  ;;  %5473 = vtanh.f32 %v3871_v59  ;;  %v3874_v14 = vpop.f32.mrb[156].mxu1  ;;  %v3716_v15 = vadd.f32 %v3715_v38, %v3556_v54  ;;  %v3993_v4 = vadd.f32 %v5452_v30, %v7620_v2  ;;  %v7634_v2 = vld [vmem:[#allocation30_spill] sm:$0xff] }
 0x6f5   : > { %v5456_v51 = vpop.eup %5455  ;;  %5475 = vtanh.f32 %v3714_v8  ;;  %v3875_v7 = vadd.f32 %v3874_v14, %v3556_v54  ;;  %v3876_v20 = vpop.f32.mrb[157].mxu1  ;;  %v3994_v39 = vadd.f32 %v5454_v26, %v7622_v1  ;;  %v7633_v8 = vld [vmem:[#allocation20_spill] sm:$0xff]  ;;  %v7637_v1 = vld [vmem:[#allocation27_spill] sm:$0xff] }
 0x6f6   : > { %v5458_v5 = vpop.eup %5457  ;;  %v3561_v34 = vpop.permute.xlu1 %3560  ;;  %5477 = vtanh.f32 %v3716_v15  ;;  %v3877_v24 = vadd.f32 %v3876_v20, %v3556_v54  ;;  %v4620_v3 = vpack.c.bf16 %v3993_v4, %v3989_v45  ;;  %v3995_v28 = vadd.f32 %v5456_v51, %v7624_v22  ;;  %v7640_v22 = vld [vmem:[#allocation31_spill] sm:$0xff] }
 0x6f7   : > { %v3719_v25 = vpop.f32.mrb[158].mxu0  ;;  %v5460_v18 = vpop.eup %5459  ;;  %5479 = vtanh.f32 %v3875_v7  ;;  %v4618_v32 = vpack.c.bf16 %v3994_v39, %v3990_v35  ;;  %v3996_v31 = vadd.f32 %v5458_v5, %v7625_v9  ;;  %v7636_v7 = vld [vmem:[#allocation29_spill] sm:$0xff]  ;;  %v7638_v5 = vld [vmem:[#allocation32_spill] sm:$0xff] }
 0x6f8   : > { %v3720_v37 = vadd.f32 %v3719_v25, %v3561_v34  ;;  %v3721_v16 = vpop.f32.mrb[159].mxu0  ;;  %v5462_v61 = vpop.eup %5461  ;;  %5481 = vtanh.f32 %v3877_v24  ;;  %v4652_v55 = vpack.c.bf16 %v3995_v28, %v3991_v49  ;;  %v3997_v48 = vadd.f32 %v5460_v18, %v7626_v27  ;;  %v7639_v24 = vld [vmem:[#allocation26_spill] sm:$0xff]  ;;  %v7641_v18 = vld [vmem:[#allocation28_spill] sm:$0xff]  ;;  %v4013_v9 = vld [vmem:[%s7463_s13] sm:$0x1] }
 0x6f9   : > { %v3880_v21 = vpop.f32.mrb[158].mxu1  ;;  %v3722_v56 = vadd.f32 %v3721_v16, %v3561_v34  ;;  %v5464_v43 = vpop.eup %5463  ;;  %4619 = vmatprep.subr.bf16.mxu0 %v4618_v32  ;;  %v4650_v60 = vpack.c.bf16 %v3996_v31, %v3992_v44  ;;  %v3998_v41 = vadd.f32 %v5462_v61, %v7628_v23  ;;  %v5558_v31 = vmov 1966171168  }
 0x6fa   : > { %5483 = vtanh.f32 %v3720_v37  ;;  %v3881_v40 = vadd.f32 %v3880_v21, %v3561_v34  ;;  %v3882_v29 = vpop.f32.mrb[159].mxu1  ;;  %v5466_v53 = vpop.eup %5465  ;;  %4621 = vmatpush1.bf16.msra.mxu0 %v4620_v3  ;;  %v3999_v12 = vadd.f32 %v5464_v43, %v7630_v0  ;;  %v4163_v61 = vunpack.c.l.s4 %v5558_v31 }
 0x6fb   : > { %5485 = vtanh.f32 %v3722_v56  ;;  %v3883_v36 = vadd.f32 %v3882_v29, %v3561_v34  ;;  %v5468_v46 = vpop.eup %5467  ;;  %4651 = vmatprep.subr.bf16.mxu1 %v4650_v60  ;;  %v4000_v30 = vadd.f32 %v5466_v53, %v7632_v19 }
 0x6fc   : > { %5487 = vtanh.f32 %v3881_v40  ;;  %v5470_v42 = vpop.eup %5469  ;;  %4653 = vmatpush1.bf16.msra.mxu1 %v4652_v55  ;;  %v4001_v33 = vadd.f32 %v5468_v46, %v7627_v13  ;;  %v4164_v21 = vunpack.c.0.s8 %v4163_v61  ;;  %v7642_v55 = vld [vmem:[#allocation6_spill] sm:$0xff] }
 0x6fd   : > { %5489 = vtanh.f32 %v3883_v36  ;;  %v5472_v11 = vpop.eup %5471  ;;  %v4002_v47 = vadd.f32 %v5470_v42, %v7629_v57 }
 0x6fe   : > { %v5474_v58 = vpop.eup %5473  ;;  %v4624_v52 = vpack.c.bf16 %v4001_v33, %v3997_v48  ;;  %v4003_v10 = vadd.f32 %v5472_v11, %v7631_v6  ;;  %v4167_v43 = vsub.s32 %v4164_v21, %v7642_v55  ;;  %v7643_v48 = vlaneseq }
 0x6ff   : > { %v5476_v54 = vpop.eup %5475  ;;  %v4622_v59 = vpack.c.bf16 %v4002_v47, %v3998_v41  ;;  %v4004_v38 = vadd.f32 %v5474_v58, %v7633_v8 }
 0x700   : > { %v5478_v62 = vpop.eup %5477  ;;  %v4656_v35 = vpack.c.bf16 %v4003_v10, %v3999_v12  ;;  %v4005_v4 = vadd.f32 %v5476_v54, %v7634_v2  ;;  %vm4187_vm2 = vcmp.lt.s32.totalorder %v7643_v48, 512 }
 0x701   : > { %v5480_v17 = vpop.eup %5479  ;;  %4623 = vmatprep.subr.bf16.mxu0 %v4622_v59  ;;  %v4654_v45 = vpack.c.bf16 %v4004_v38, %v4000_v30  ;;  %v4006_v20 = vadd.f32 %v5478_v62, %v7636_v7 }
 0x702   : > { %v5482_v26 = vpop.eup %5481  ;;  %4625 = vmatpush1.bf16.msra.mxu0 %v4624_v52  ;;  %v4007_v34 = vadd.f32 %v5480_v17, %v7638_v5 }
 0x703   : > { %4655 = vmatprep.subr.bf16.mxu1 %v4654_v45  ;;  %v4008_v28 = vadd.f32 %v5482_v26, %v7640_v22 }
 0x704   : > { %v5484_v14 = vpop.eup %5483  ;;  %4657 = vmatpush1.bf16.msra.mxu1 %v4656_v35 }
 0x705   : > { %v5486_v15 = vpop.eup %5485  ;;  %v4009_v49 = vadd.f32 %v5484_v14, %v7635_v63 }
 0x706   : > { %v5488_v51 = vpop.eup %5487  ;;  %v4010_v39 = vadd.f32 %v5486_v15, %v7637_v1 }
 0x707   : > { %v5490_v50 = vpop.eup %5489  ;;  %v4628_v44 = vpack.c.bf16 %v4009_v49, %v4005_v4  ;;  %v4011_v25 = vadd.f32 %v5488_v51, %v7639_v24 }
 0x708   : > { %v4626_v3 = vpack.c.bf16 %v4010_v39, %v4006_v20  ;;  %v4012_v37 = vadd.f32 %v5490_v50, %v7641_v18 }
 0x709   : > { %v4660_v16 = vpack.c.bf16 %v4011_v25, %v4007_v34 }
 0x70a   : > { %4627 = vmatprep.subr.bf16.mxu0 %v4626_v3  ;;  %v4658_v32 = vpack.c.bf16 %v4012_v37, %v4008_v28 }
 0x70b   : > { %4629 = vmatpush1.bf16.msra.mxu0 %v4628_v44 }
 0x70c   : > { %4659 = vmatprep.subr.bf16.mxu1 %v4658_v32 }
 0x70d   : > { %4661 = vmatpush1.bf16.msra.mxu1 %v4660_v16 }
 0x70e   : > { %4079 = vmatmul.mubr.f32.vlgmr.msra.gmra.mrb[160].mxu0 %v4013_v9 }
 0x710   : > { %4150 = vmatmul.mubr.f32.vlgmr.msra.gmra.mrb[160].mxu1 %v4013_v9 }
 0x7e1   : > { %v4080_v56 = vpop.f32.mrb[160].mxu0 }
 0x7e2   : > { %v4082_v40 = vpop.f32.mrb[161].mxu0 }
 0x7e3   : > { %v4151_v29 = vpop.f32.mrb[160].mxu1  ;;  %v4160_v60 = vcombine.low %v4080_v56, %v4082_v40 }
 0x7e4   : > { %v4153_v53 = vpop.f32.mrb[161].mxu1 }
 0x7e5   : > { %v4168_v36 = vrot.slane %v4160_v60, %v4167_v43  ;;  %v4161_v46 = vcombine.low %v4151_v29, %v4153_v53 }
 0x7e7   : > { %v4175_v42 = vrot.slane %v4161_v46, %v4167_v43 }
 0x7e9   : > { %v4176_v27 = vcombine.low %v4168_v36, %v4175_v42 }
 0x7eb   : > { %v4183_v13 = vrot.slane %v4176_v27, %v4167_v43 }
 0x7ed   : > { %4189 = vst.msk [vmem:[%s461_s27] sm:$0xf] %vm4187_vm2, %v4183_v13 }
 0x7ee   : > { %5504 = shalt.err (!%p5501_p3)
}
 0x7ef   : > { %s5505_s21 = scalar_lea.hbm %s7408_s20, 64  ;;  %s5509_s25 = scalar_lea.hbm %s7464_s14, 128 }
 0x7f0   : > { %p5506_p4 = scmp.ne.s32.totalorder %s7408_s20, %s5505_s21  ;;  %p5510_p9 = scmp.lt.u32.totalorder %s7408_s20, %s7464_s14 }
 0x7f1   : > { %p5511_p10 = scmp.lt.u32.totalorder %s5509_s25, %s5505_s21  ;;  %p5513_p12 = scmp.lt.u32.totalorder %s5505_s21, %s7408_s20 }
 0x7f2   : > { %p5507_p7 = pnand %p5506_p4, %p5673_p5 }
 0x7f3   : > { %p5512_p11 = por %p5511_p10, %p5510_p9 }
 0x7f4   : > { %p5508_p8 = pneg %p5507_p7 }
 0x7f5   : > { %p5514_p13 = por %p5513_p12, %p5512_p11 }
 0x7f7   : > { %p5515_p0 = pnand %p5514_p13, %p5508_p8 }
 0x7f9   : > { %5518 = shalt.err (!%p5515_p0)
}
 0x7fa   : > { %4662 = dma.vmem_to_hbm [thread:$0]  (%p5673_p5), %s7410_s28, 64, %s7408_s20, %s4191_s2  }
 0x7fb PF: > { %p4668_p1 = scmp.ge.s32.totalorder %s5553_s16, 2  ;;  %s4217_s0 = sand.u32 1, %s5541_s29  }
 0x7fc   : > { %s4218_s22 = scalar_lea.sflag [#allocation3], %s4217_s0 }
 0x7fd   : > { %p4665_p2 = pnand %p4668_p1, %p5677_p6 }
 0x7ff   : > { %5536 = dma.done.wait (!%p4665_p2), %s4218_s22, 64  }
 0x800   : > { %5538 = vsyncadd (!%p4665_p2), %s4218_s22, 4294967232  ;;  %s7644_s1 = sld [smem:[#allocation5_spill]]  ;;  %p24_p3 = scmp.ge.s32.totalorder %s5660_s19, 4  }
 0x801   : > { %s7645_s29 = smov %s5545_s30  ;;  %s7646_s30 = smov %s5549_s15 }
 0x802   : > { %s7648_s16 = smov %s5660_s19  ;;  %26 = sbr.rel (!%p24_p3) target bundleno = 7 (0x7), region = 112 }
 0x806   : > { %s7647_s15 = smov %s7644_s1 }
 0x809   :  { %4223 = vsyncpa [#allocation3], 1 }
 0x80a   :  { %4225 = vsyncpa [#allocation3 + $0x1], 1 }

// kernel: tpu_custom_call.1
= control target key start
LH: loop header
LB: loop body
LE: loop exit
PB: predicated region body
PF: predicated region fallthrough
CT: control target
= control target key end

     0   :  { %s7450_s0 = inlined_call_operand.vmem [shape: f32[2,1024], index: 0, kind: input, shape index: {}]   ;;  %s7451_s1 = inlined_call_operand.vmem [shape: f32[128,2], index: 1, kind: input, shape index: {}]   ;;  %s7452_s2 = inlined_call_operand.vmem [shape: f32[128,1], index: 2, kind: input, shape index: {}]   ;;  %s7453_s3 = inlined_call_operand.vmem [shape: f32[128,128], index: 3, kind: input, shape index: {}]   ;;  %s7454_s4 = inlined_call_operand.vmem [shape: f32[128,1], index: 4, kind: input, shape index: {}]   ;;  %s7455_s5 = inlined_call_operand.vmem [shape: f32[128,128], index: 5, kind: input, shape index: {}]   ;;  %s7456_s6 = inlined_call_operand.vmem [shape: f32[128,1], index: 6, kind: input, shape index: {}]   ;;  %s7457_s7 = inlined_call_operand.vmem [shape: f32[128,128], index: 7, kind: input, shape index: {}]   ;;  %s7458_s8 = inlined_call_operand.vmem [shape: f32[128,1], index: 8, kind: input, shape index: {}]   ;;  %s7459_s9 = inlined_call_operand.vmem [shape: f32[128,128], index: 9, kind: input, shape index: {}]   ;;  %s7460_s10 = inlined_call_operand.vmem [shape: f32[128,1], index: 10, kind: input, shape index: {}]   ;;  %s7461_s11 = inlined_call_operand.vmem [shape: f32[128,128], index: 11, kind: input, shape index: {}]   ;;  %s7462_s12 = inlined_call_operand.vmem [shape: f32[128,1], index: 12, kind: input, shape index: {}]   ;;  %s7463_s13 = inlined_call_operand.vmem [shape: f32[1,128], index: 13, kind: input, shape index: {}]   ;;  %s7464_s14 = inlined_call_operand.hbm [shape: f32[1,1024], index: 14, kind: output, shape index: {}]  }
   0x1   :  { %7523 = sst [smem:[#allocation35_spill]] %s7450_s0 }
   0x2   :  { %7524 = sst [smem:[#allocation36_spill]] %s7451_s1 }
   0x3   :  { %7525 = sst [smem:[#allocation37_spill]] %s7452_s2 }
   0x4   :  { %19 = vsyncpa [#allocation3], 0 }
   0x5   :  { %21 = vsyncpa [#allocation3 + $0x1], 0  ;;  %s5635_s29 = smov 0   ;;  %s5637_s30 = smov 0  }
   0x6   :  { %s5639_s15 = smov 0   ;;  %s5641_s16 = smov 0  }
   0x7 LB: > { %s5656_s17 = sadd.s32 4294967295, %s5553_s16   ;;  %s4264_s18 = sadd.s32 4294967294, %s5553_s16   ;;  %s5553_s16 = sphi %s5641_s16, %s7648_s16   ;;  %s5549_s15 = sphi %s5639_s15, %s7647_s15   ;;  %s5545_s30 = sphi %s5637_s30, %s7646_s30   ;;  %s5541_s29 = sphi %s5635_s29, %s7645_s29  }
   0x8   : > { %s5660_s19 = sadd.s32 1, %s5553_s16   ;;  %s333_s20 = sadd.s32 1, %s5549_s15 }
   0x9   : > { %s330_s21 = ssub.s32 %s5553_s16, %s5660_s19  ;;  %p343_p0 = scmp.ne.s32.totalorder %s5549_s15, %s5545_s30 }
   0xa   : > { %p331_p1 = scmp.eq.s32.totalorder %s330_s21, 0  ;;  %p344_p2 = scmp.eq.s32.totalorder %s5656_s17, 1 }
   0xb   : > { %p349_p3 = scmp.ne.s32.totalorder %s5545_s30, %s5541_s29  ;;  %p350_p4 = scmp.eq.s32.totalorder %s4264_s18, 1 }
   0xc   : > { %s5671_s22 = scalar_select %p331_p1, %s5549_s15, %s333_s20  }
   0xd   : > { %p5673_p5 = por %p344_p2, %p343_p0  ;;  %p5677_p6 = por %p350_p4, %p349_p3 }
   0xe   : > { %7526 = sst [smem:[#allocation5_spill]] %s5671_s22  ;;  %p4267_p7 = scmp.ge.s32.totalorder %s5553_s16, 1 }
   0xf   : > { %p416_p8 = scmp.lt.s32.totalorder %s5553_s16, 3 }
  0x11   : > { %p417_p9 = pnand %p4267_p7, %p416_p8 }
  0x13   : > { %420 = sbr.rel (%p417_p9) target bundleno = 2043 (0x7fb), region = 76 }
  0x1a   : > { %s7529_s1 = sld [smem:[#allocation36_spill]]  ;;  %v5555_v2 = vmov 1   ;;  %v5556_v7 = vmov 0   ;;  %s7530_s2 = sld [smem:[#allocation37_spill]]  ;;  %v1347_v25 = vld [vmem:[%s7454_s4] sm:$0xff]  ;;  %v1349_v26 = vld [vmem:[%s7454_s4 + $0x10] sm:$0xff] }
  0x1b   : > { %4707 = vset.pattern.permute.xlu0 %v5555_v2  ;;  %4705 = vset.pattern.permute.xlu1 %v5555_v2  ;;  %v1351_v28 = vld [vmem:[%s7454_s4 + $0x20] sm:$0xff]  ;;  %v1353_v29 = vld [vmem:[%s7454_s4 + $0x30] sm:$0xff]  ;;  %v1348_v58 = vld [vmem:[%s7454_s4 + $0x8] sm:$0xff]  ;;  %s4269_s25 = sshll.u32 %s5656_s17, 2  ;;  %s7532_s0 = sld [smem:[#allocation35_spill]] }
  0x1c   : > { %v1355_v31 = vld [vmem:[%s7454_s4 + $0x40] sm:$0xff]  ;;  %v1357_v32 = vld [vmem:[%s7454_s4 + $0x50] sm:$0xff]  ;;  %v1350_v61 = vld [vmem:[%s7454_s4 + $0x18] sm:$0xff]  ;;  %p463_p10 = scmp.lt.s32.totalorder %s4269_s25, 7  ;;  %s459_s21 = sand.u32 1, %s5545_s30  }
  0x1d   : > { %v1359_v34 = vld [vmem:[%s7454_s4 + $0x60] sm:$0xff]  ;;  %v1361_v35 = vld [vmem:[%s7454_s4 + $0x70] sm:$0xff] }
  0x1e   : > { %v1909_v37 = vld [vmem:[%s7456_s6] sm:$0xff]  ;;  %v1911_v38 = vld [vmem:[%s7456_s6 + $0x10] sm:$0xff]  ;;  %s7650_s25 = smov (!%p463_p10, %s4269_s25), 7 }
  0x1f   : > { %v1913_v39 = vld [vmem:[%s7456_s6 + $0x20] sm:$0xff]  ;;  %v1915_v41 = vld [vmem:[%s7456_s6 + $0x30] sm:$0xff]  ;;  %s4270_s18 = sshll.u32 %s7650_s25, 1 }
  0x20   : > { %v757_v0 = vld [vmem:[%s7529_s1 + $0x10] sm:$0xff]  ;;  %v755_v1 = vld [vmem:[%s7529_s1] sm:$0xff]  ;;  %v756_v4 = vld [vmem:[%s7529_s1 + $0x8] sm:$0xff] }
  0x21   : > { %924 = vperm.xlu0 %4707, %v757_v0   ;;  %916 = vperm.xlu1 %4705, %v755_v1   ;;  %v759_v3 = vld [vmem:[%s7529_s1 + $0x20] sm:$0xff]  ;;  %v761_v5 = vld [vmem:[%s7529_s1 + $0x30] sm:$0xff]  ;;  %v758_v6 = vld [vmem:[%s7529_s1 + $0x18] sm:$0xff]  ;;  %s466_s26 = scalar_lea.vmem %s7532_s0, %s4270_s18 }
  0x22   : > { %v763_v8 = vld [vmem:[%s7529_s1 + $0x40] sm:$0xff]  ;;  %v765_v9 = vld [vmem:[%s7529_s1 + $0x50] sm:$0xff]  ;;  %v760_v13 = vld [vmem:[%s7529_s1 + $0x28] sm:$0xff] }
  0x23   : > { %v1107_v10 = vld [vmem:[%s7530_s2] sm:$0xff]  ;;  %v5724_v12 = vld [vmem:[%s7529_s1 + $0x70] sm:$0xff]  ;;  %v1108_v15 = vld [vmem:[%s7530_s2 + $0x8] sm:$0xff] }
  0x24   : > { %v5717_v11 = vld [vmem:[%s7529_s1 + $0x60] sm:$0xff]  ;;  %v1109_v14 = vld [vmem:[%s7530_s2 + $0x10] sm:$0xff]  ;;  %v1110_v16 = vld [vmem:[%s7530_s2 + $0x18] sm:$0xff] }
  0x25   : > { %932 = vperm.xlu0 %4707, %v759_v3   ;;  %920 = vperm.xlu1 %4705, %v756_v4   ;;  %v762_v17 = vld [vmem:[%s7529_s1 + $0x38] sm:$0xff]  ;;  %v1112_v18 = vld [vmem:[%s7530_s2 + $0x28] sm:$0xff]  ;;  %v1111_v20 = vld [vmem:[%s7530_s2 + $0x20] sm:$0xff] }
  0x26   : > { %v1114_v19 = vld [vmem:[%s7530_s2 + $0x38] sm:$0xff]  ;;  %v1116_v21 = vld [vmem:[%s7530_s2 + $0x48] sm:$0xff]  ;;  %v1113_v27 = vld [vmem:[%s7530_s2 + $0x30] sm:$0xff] }
  0x27   : > { %v1118_v22 = vld [vmem:[%s7530_s2 + $0x58] sm:$0xff]  ;;  %v764_v23 = vld [vmem:[%s7529_s1 + $0x48] sm:$0xff]  ;;  %v1115_v33 = vld [vmem:[%s7530_s2 + $0x40] sm:$0xff] }
  0x28   : > { %v1120_v24 = vld [vmem:[%s7530_s2 + $0x68] sm:$0xff]  ;;  %v766_v30 = vld [vmem:[%s7529_s1 + $0x58] sm:$0xff]  ;;  %v1117_v40 = vld [vmem:[%s7530_s2 + $0x50] sm:$0xff] }
  0x29   : > { %940 = vperm.xlu0 %4707, %v761_v5   ;;  %4706 = vset.pattern.permute.xlu1 %v5556_v7  ;;  %v768_v36 = vld [vmem:[%s7529_s1 + $0x68] sm:$0xff]  ;;  %v1917_v42 = vld [vmem:[%s7456_s6 + $0x40] sm:$0xff]  ;;  %v770_v43 = vld [vmem:[%s7529_s1 + $0x78] sm:$0xff]  ;;  %s4268_s1 = sshll.u32 %s459_s21, 2 }
  0x2a   : > { %788 = vperm.xlu1 %4706, %v758_v6   ;;  %v1919_v44 = vld [vmem:[%s7456_s6 + $0x50] sm:$0xff]  ;;  %v1921_v45 = vld [vmem:[%s7456_s6 + $0x60] sm:$0xff]  ;;  %v1122_v54 = vld [vmem:[%s7530_s2 + $0x78] sm:$0xff]  ;;  %s461_s27 = scalar_lea.vmem [#allocation2], %s4268_s1 }
  0x2b   : > { %v1119_v46 = vld [vmem:[%s7530_s2 + $0x60] sm:$0xff]  ;;  %v1923_v47 = vld [vmem:[%s7456_s6 + $0x70] sm:$0xff]  ;;  %s4205_s28 = sshll.u32 %s461_s27, 4  ;;  %s7410_s28 = int_to_ptr.vmem [resolvable:$true] %s4205_s28 }
  0x2c   : > { %v1121_v50 = vld [vmem:[%s7530_s2 + $0x70] sm:$0xff]  ;;  %v2407_v51 = vld [vmem:[%s7458_s8] sm:$0xff]  ;;  %s4191_s2 = scalar_lea.sflag [#allocation3], %s459_s21  ;;  %s5491_s22 = scalar_lea.vmem %s7410_s28, 64 }
  0x2d   : > { %948 = vperm.xlu0 %4707, %v763_v8   ;;  %v2409_v55 = vld [vmem:[%s7458_s8 + $0x10] sm:$0xff]  ;;  %v2411_v59 = vld [vmem:[%s7458_s8 + $0x20] sm:$0xff]  ;;  %p5492_p11 = scmp.ne.s32.totalorder %s7410_s28, %s5491_s22 }
  0x2e   : > { %4708 = vset.pattern.permute.xlu1 %v5555_v2  ;;  %v2413_v63 = vld [vmem:[%s7458_s8 + $0x30] sm:$0xff] }
  0x2f   : > { %928 = vperm.xlu1 %4708, %v758_v6   ;;  %v1354_v6 = vld [vmem:[%s7454_s4 + $0x38] sm:$0xff]  ;;  %p5493_p12 = pnand %p5492_p11, %p5673_p5 }
  0x31   : > { %956 = vperm.xlu0 %4707, %v765_v9   ;;  %p5494_p13 = pneg %p5493_p12 }
  0x33   : > { %4709 = vset.pattern.permute.xlu1 %v5556_v7 }
  0x34   : > { %1125 = vperm.xlu1 %4709, %v1107_v10  }
  0x35   : > { %964 = vperm.xlu0 %4707, %v5717_v11  }
  0x38   : > { %793 = vperm.xlu1 %4709, %v759_v3   ;;  %v2415_v3 = vld [vmem:[%s7458_s8 + $0x40] sm:$0xff] }
  0x39   : > { %972 = vperm.xlu0 %4707, %v5724_v12  }
  0x3c   : > { %798 = vperm.xlu1 %4709, %v760_v13  }
  0x3d   : > { %4720 = vset.pattern.permute.xlu0 %v5556_v7 }
  0x3e   : > { %773 = vperm.xlu0 %4720, %v755_v1   ;;  %v1352_v1 = vld [vmem:[%s7454_s4 + $0x28] sm:$0xff] }
  0x40   : > { %4710 = vset.pattern.permute.xlu1 %v5555_v2 }
  0x41   : > { %936 = vperm.xlu1 %4710, %v760_v13   ;;  %v2419_v13 = vld [vmem:[%s7458_s8 + $0x60] sm:$0xff] }
  0x42   : > { %778 = vperm.xlu0 %4720, %v756_v4  }
  0x45   : > { %4711 = vset.pattern.permute.xlu1 %v5556_v7 }
  0x46   : > { %783 = vperm.xlu0 %4720, %v757_v0   ;;  %1135 = vperm.xlu1 %4711, %v1109_v14  }
  0x4a   : > { %1130 = vperm.xlu0 %4720, %v1108_v15   ;;  %803 = vperm.xlu1 %4711, %v761_v5   ;;  %v7465_v5 = vlaneseq }
  0x4c   : > { %v5911_v10 = vshrl.u32 %v7465_v5, 7 }
  0x4e   : > { %1140 = vperm.xlu0 %4720, %v1110_v16   ;;  %808 = vperm.xlu1 %4711, %v762_v17   ;;  %7531 = vst [vmem:[#allocation6_spill] sm:$0xff] %v5911_v10  ;;  %v556_v14 = vsub.s32 0, %v5911_v10  ;;  %v1358_v16 = vld [vmem:[%s7454_s4 + $0x58] sm:$0xff]  ;;  %vm505_vm0 = vcmp.eq.s32.totalorder %v5911_v10, 1  ;;  %vm489_vm1 = vcmp.eq.s32.totalorder %v5911_v10, 0 }
  0x52   : > { %1150 = vperm.xlu0 %4720, %v1112_v18   ;;  %4712 = vset.pattern.permute.xlu1 %v5555_v2  ;;  %v4271_v18 = vld [vmem:[%s466_s26 + $0x1] ss:$2 sm:$0xf] }
  0x53   : > { %944 = vperm.xlu1 %4712, %v762_v17   ;;  %v7466_v17 = vmov 0.0  }
  0x54   : > { %1507 = vmatprep.mubr.f32.mxu0 %v7466_v17  ;;  %1668 = vmatprep.mubr.f32.mxu1 %v7466_v17 }
  0x56   : > { %1160 = vperm.xlu0 %4720, %v1114_v19   ;;  %v560_v19 = vsub.s32 1, %v5911_v10 }
  0x57   : > { %4713 = vset.pattern.permute.xlu1 %v5556_v7 }
  0x58   : > { %1145 = vperm.xlu1 %4713, %v1111_v20   ;;  %v564_v20 = vsub.s32 2, %v5911_v10 }
  0x5a   : > { %1170 = vperm.xlu0 %4720, %v1116_v21   ;;  %v568_v21 = vsub.s32 3, %v5911_v10 }
  0x5c   : > { %813 = vperm.xlu1 %4713, %v763_v8   ;;  %v2417_v8 = vld [vmem:[%s7458_s8 + $0x50] sm:$0xff] }
  0x5e   : > { %1180 = vperm.xlu0 %4720, %v1118_v22   ;;  %v469_v22 = vld [vmem:[%s466_s26] ss:$2 sm:$0xf]  ;;  %s4277_s26 = sshll.u32 %s5656_s17, 6  ;;  %s5559_s17 = smov [#allocation2]  }
  0x5f   : > { %s7408_s20 = scalar_lea.hbm %s7464_s14, %s4277_s26  ;;  %s5495_s1 = sshll.u32 %s5559_s17, 4  ;;  %s5496_s1 = int_to_ptr.vmem [resolvable:$false] %s5495_s1 }
  0x60   : > { %818 = vperm.xlu1 %4713, %v764_v23   ;;  %s5497_s0 = scalar_lea.vmem %s5496_s1, 128  ;;  %p5498_p0 = scmp.lt.s32.totalorder %s7410_s28, %s5496_s1 }
  0x61   : > { %p5499_p1 = scmp.lt.s32.totalorder %s5497_s0, %s5491_s22 }
  0x62   : > { %1190 = vperm.xlu0 %4720, %v1120_v24  }
  0x63   : > { %p5500_p2 = por %p5499_p1, %p5498_p0 }
  0x64   : > { %4714 = vset.pattern.permute.xlu1 %v5555_v2 }
  0x65   : > { %952 = vperm.xlu1 %4714, %v764_v23   ;;  %v2421_v23 = vld [vmem:[%s7458_s8 + $0x70] sm:$0xff]  ;;  %p5501_p3 = pnand %p5500_p2, %p5494_p13 }
  0x66   : > { %1365 = vperm.xlu0 %4720, %v1347_v25   ;;  %v5940_v25 = vrot.slane %v4271_v18, %v556_v14 }
  0x69   : > { %4715 = vset.pattern.permute.xlu1 %v5556_v7 }
  0x6a   : > { %1375 = vperm.xlu0 %4720, %v1349_v26   ;;  %1155 = vperm.xlu1 %4715, %v1113_v27   ;;  %v1360_v27 = vld [vmem:[%s7454_s4 + $0x68] sm:$0xff] }
  0x6e   : > { %1385 = vperm.xlu0 %4720, %v1351_v28   ;;  %823 = vperm.xlu1 %4715, %v765_v9   ;;  %v5947_v28 = vrot.slane %v4271_v18, %v560_v19 }
  0x72   : > { %1395 = vperm.xlu0 %4720, %v1353_v29   ;;  %828 = vperm.xlu1 %4715, %v766_v30   ;;  %v5949_v29 = vrot.slane %v4271_v18, %v564_v20 }
  0x76   : > { %1405 = vperm.xlu0 %4720, %v1355_v31   ;;  %4716 = vset.pattern.permute.xlu1 %v5555_v2  ;;  %v5953_v31 = vrot.slane %v469_v22, %v560_v19 }
  0x77   : > { %960 = vperm.xlu1 %4716, %v766_v30   ;;  %v5951_v30 = vrot.slane %v4271_v18, %v568_v21 }
  0x7a   : > { %1415 = vperm.xlu0 %4720, %v1357_v32   ;;  %v2969_v32 = vld [vmem:[%s7460_s10] sm:$0xff] }
  0x7b   : > { %4717 = vset.pattern.permute.xlu1 %v5556_v7 }
  0x7c   : > { %1165 = vperm.xlu1 %4717, %v1115_v33   ;;  %v5958_v33 = vrot.slane %v469_v22, %v568_v21 }
  0x7e   : > { %1425 = vperm.xlu0 %4720, %v1359_v34  }
  0x80   : > { %833 = vperm.xlu1 %4717, %v5717_v11   ;;  %v1356_v11 = vld [vmem:[%s7454_s4 + $0x48] sm:$0xff] }
  0x82   : > { %1435 = vperm.xlu0 %4720, %v1361_v35  }
  0x84   : > { %838 = vperm.xlu1 %4717, %v768_v36  }
  0x86   : > { %1927 = vperm.xlu0 %4720, %v1909_v37   ;;  %v5968_v37 = vrot.slane %v469_v22, %v564_v20 }
  0x88   : > { %4718 = vset.pattern.permute.xlu1 %v5555_v2 }
  0x89   : > { %968 = vperm.xlu1 %4718, %v768_v36   ;;  %v5966_v36 = vrot.slane %v469_v22, %v556_v14 }
  0x8a   : > { %1937 = vperm.xlu0 %4720, %v1911_v38  }
  0x8d   : > { %4719 = vset.pattern.permute.xlu1 %v5556_v7 }
  0x8e   : > { %1947 = vperm.xlu0 %4720, %v1913_v39   ;;  %1175 = vperm.xlu1 %4719, %v1117_v40   ;;  %v1362_v40 = vld [vmem:[%s7454_s4 + $0x78] sm:$0xff] }
  0x92   : > { %1957 = vperm.xlu0 %4720, %v1915_v41   ;;  %843 = vperm.xlu1 %4719, %v5724_v12  }
  0x96   : > { %1967 = vperm.xlu0 %4720, %v1917_v42   ;;  %848 = vperm.xlu1 %4719, %v770_v43  }
  0x9a   : > { %1977 = vperm.xlu0 %4720, %v1919_v44   ;;  %4721 = vset.pattern.permute.xlu1 %v5555_v2 }
  0x9b   : > { %976 = vperm.xlu1 %4721, %v770_v43  }
  0x9e   : > { %1987 = vperm.xlu0 %4720, %v1921_v45  }
  0x9f   : > { %4722 = vset.pattern.permute.xlu1 %v5556_v7 }
  0xa0   : > { %1185 = vperm.xlu1 %4722, %v1119_v46   ;;  %v5847_v48 = vpop.permute.xlu1 %916  ;;  %v5849_v49 = vpop.permute.xlu0 %924 }
  0xa1   : > { %v5964_v35 = vmul.f32 %v5847_v48, %v5940_v25  ;;  %v980_v41 = vmul.f32 %v5847_v48, %v5947_v28  ;;  %v5979_v42 = vmul.f32 %v5847_v48, %v5949_v29  ;;  %v982_v43 = vmul.f32 %v5847_v48, %v5951_v30  ;;  %v2971_v48 = vld [vmem:[%s7460_s10 + $0x10] sm:$0xff] }
  0xa2   : > { %1997 = vperm.xlu0 %4720, %v1923_v47   ;;  %v987_v45 = vmul.f32 %v5849_v49, %v5940_v25  ;;  %v988_v46 = vmul.f32 %v5849_v49, %v5947_v28  ;;  %v989_v47 = vmul.f32 %v5849_v49, %v5949_v29 }
  0xa4   : > { %1195 = vperm.xlu1 %4722, %v1121_v50   ;;  %v5857_v52 = vpop.permute.xlu1 %920  ;;  %v5859_v53 = vpop.permute.xlu0 %932 }
  0xa6   : > { %2425 = vperm.xlu0 %4720, %v2407_v51   ;;  %v990_v51 = vmul.f32 %v5849_v49, %v5951_v30 }
  0xa8   : > { %1200 = vperm.xlu1 %4722, %v1122_v54   ;;  %v5867_v56 = vpop.permute.xlu0 %940  ;;  %v6000_v54 = vmul.f32 %v5857_v52, %v5940_v25 }
  0xa9   : > { %v5869_v57 = vpop.permute.xlu1 %788  ;;  %v6035_v14 = vmul.f32 %v5867_v56, %v5940_v25 }
  0xaa   : > { %2435 = vperm.xlu0 %4720, %v2409_v55   ;;  %v984_v55 = vmul.f32 %v5857_v52, %v5947_v28  ;;  %v863_v20 = vmul.f32 %v5869_v57, %v5966_v36  ;;  %v864_v21 = vmul.f32 %v5869_v57, %v5953_v31 }
  0xac   : > { %1370 = vperm.xlu1 %4722, %v1348_v58   ;;  %v5877_v60 = vpop.permute.xlu0 %948 }
  0xae   : > { %2445 = vperm.xlu0 %4720, %v2411_v59   ;;  %v5883_v62 = vpop.permute.xlu1 %928  ;;  %v6006_v59 = vmul.f32 %v5857_v52, %v5949_v29 }
  0xb0   : > { %1380 = vperm.xlu1 %4722, %v1350_v61   ;;  %v5888_v0 = vpop.permute.xlu0 %956  ;;  %v986_v61 = vmul.f32 %v5857_v52, %v5951_v30  ;;  %v6029_v52 = vmul.f32 %v5859_v53, %v5951_v30 }
  0xb2   : > { %2455 = vperm.xlu0 %4720, %v2413_v63   ;;  %v6012_v63 = vmul.f32 %v5859_v53, %v5940_v25 }
  0xb3   : > { %v5893_v2 = vpop.permute.xlu1 %1125 }
  0xb4   : > { %1390 = vperm.xlu1 %4722, %v1352_v1   ;;  %v5898_v4 = vpop.permute.xlu0 %964 }
  0xb6   : > { %2465 = vperm.xlu0 %4720, %v2415_v3   ;;  %v1910_v3 = vld [vmem:[%s7456_s6 + $0x8] sm:$0xff] }
  0xb7   : > { %v5903_v7 = vpop.permute.xlu1 %793 }
  0xb8   : > { %1400 = vperm.xlu1 %4722, %v1354_v6   ;;  %v5908_v9 = vpop.permute.xlu0 %972  ;;  %v996_v6 = vmul.f32 %v5859_v53, %v5947_v28 }
  0xba   : > { %2475 = vperm.xlu0 %4720, %v2417_v8   ;;  %v6025_v8 = vmul.f32 %v5859_v53, %v5949_v29  ;;  %v2973_v53 = vld [vmem:[%s7460_s10 + $0x20] sm:$0xff] }
  0xbb   : > { %v5919_v12 = vpop.permute.xlu1 %798 }
  0xbc   : > { %1410 = vperm.xlu1 %4722, %v1356_v11  }
  0xbd   : > { %v5925_v15 = vpop.permute.xlu0 %773 }
  0xbe   : > { %2485 = vperm.xlu0 %4720, %v2419_v13   ;;  %v852_v34 = vmul.f32 %v5925_v15, %v5953_v31  ;;  %v854_v44 = vmul.f32 %v5925_v15, %v5958_v33 }
  0xc0   : > { %1420 = vperm.xlu1 %4722, %v1358_v16   ;;  %v5938_v24 = vpop.permute.xlu1 %936  ;;  %v1044_v58 = vadd.f32 %v980_v41, %v852_v34  ;;  %v1046_v11 = vadd.f32 %v982_v43, %v854_v44  ;;  %v6039_v16 = vmul.f32 %v5867_v56, %v5947_v28  ;;  %v1912_v43 = vld [vmem:[%s7456_s6 + $0x18] sm:$0xff]  ;;  %v866_v44 = vmul.f32 %v5869_v57, %v5958_v33 }
  0xc1   : > { %v5942_v26 = vpop.permute.xlu0 %778 }
  0xc2   : > { %2495 = vperm.xlu0 %4720, %v2421_v23   ;;  %v856_v50 = vmul.f32 %v5942_v26, %v5953_v31  ;;  %v858_v49 = vmul.f32 %v5942_v26, %v5958_v33  ;;  %v1204_v23 = vadd.f32 %v5893_v2, %v1044_v58  ;;  %v992_v58 = vmul.f32 %v5883_v62, %v5947_v28 }
  0xc4   : > { %1430 = vperm.xlu1 %4722, %v1360_v27   ;;  %v1048_v19 = vadd.f32 %v984_v55, %v856_v50  ;;  %v865_v27 = vmul.f32 %v5869_v57, %v5968_v37  ;;  %v1050_v34 = vadd.f32 %v986_v61, %v858_v49  ;;  %v991_v50 = vmul.f32 %v5883_v62, %v5940_v25  ;;  %v2975_v57 = vld [vmem:[%s7460_s10 + $0x30] sm:$0xff] }
  0xc5   : > { %v784_v38 = vpop.permute.xlu0 %783  ;;  %v5970_v39 = vpop.permute.xlu1 %1135  ;;  %v1206_v55 = vadd.f32 %v5893_v2, %v1046_v11  ;;  %v993_v61 = vmul.f32 %v5883_v62, %v5949_v29  ;;  %4723 = vtanh.f32 %v1204_v23 }
  0xc6   : > { %2987 = vperm.xlu0 %4720, %v2969_v32   ;;  %v859_v18 = vmul.f32 %v784_v38, %v5966_v36  ;;  %v860_v22 = vmul.f32 %v784_v38, %v5953_v31  ;;  %v861_v32 = vmul.f32 %v784_v38, %v5968_v37  ;;  %v1055_v17 = vadd.f32 %v991_v50, %v863_v20 }
  0xc8   : > { %1440 = vperm.xlu1 %4722, %v1362_v40   ;;  %v1051_v49 = vadd.f32 %v987_v45, %v859_v18  ;;  %v1052_v11 = vadd.f32 %v988_v46, %v860_v22  ;;  %v855_v45 = vmul.f32 %v5942_v26, %v5966_v36  ;;  %v1053_v18 = vadd.f32 %v989_v47, %v861_v32  ;;  %v2977_v32 = vld [vmem:[%s7460_s10 + $0x40] sm:$0xff] }
  0xc9   : > { %v6016_v1 = vpop.permute.xlu1 %803  ;;  %v6031_v13 = vpop.permute.xlu0 %1130  ;;  %v869_v22 = vmul.f32 %v5903_v7, %v5968_v37  ;;  %v1056_v47 = vadd.f32 %v992_v58, %v864_v21  ;;  %v1916_v58 = vld [vmem:[%s7456_s6 + $0x38] sm:$0xff] }
  0xca   : > { %2997 = vperm.xlu0 %4720, %v2971_v48   ;;  %v1208_v40 = vadd.f32 %v6031_v13, %v1048_v19  ;;  %v862_v48 = vmul.f32 %v784_v38, %v5958_v33  ;;  %v994_v19 = vmul.f32 %v5883_v62, %v5951_v30  ;;  %v867_v38 = vmul.f32 %v5903_v7, %v5966_v36 }
  0xcb   : > { %v857_v62 = vmul.f32 %v5942_v26, %v5968_v37  ;;  %v1211_v23 = vadd.f32 %v5970_v39, %v1051_v49  ;;  %v870_v26 = vmul.f32 %v5903_v7, %v5958_v33  ;;  %v1213_v50 = vadd.f32 %v5970_v39, %v1053_v18 }
  0xcc   : > { %1932 = vperm.xlu1 %4722, %v1910_v3   ;;  %v1210_v3 = vadd.f32 %v6031_v13, %v1050_v34  ;;  %4725 = vtanh.f32 %v1208_v40  ;;  %v1914_v34 = vld [vmem:[%s7456_s6 + $0x28] sm:$0xff]  ;;  %v1054_v5 = vadd.f32 %v990_v51, %v862_v48  ;;  %v1212_v51 = vadd.f32 %v5970_v39, %v1052_v11 }
  0xcd   : > { %v6055_v41 = vpop.permute.xlu1 %808  ;;  %4727 = vtanh.f32 %v1206_v55  ;;  %v1141_v20 = vpop.permute.xlu0 %1140  ;;  %v1057_v40 = vadd.f32 %v993_v61, %v865_v27  ;;  %v1047_v48 = vadd.f32 %v6000_v54, %v855_v45  ;;  %v6101_v55 = vadd.f32 %v6012_v63, %v867_v38 }
  0xce   : > { %3007 = vperm.xlu0 %4720, %v2973_v53   ;;  %v868_v53 = vmul.f32 %v5903_v7, %v5953_v31  ;;  %4729 = vtanh.f32 %v1210_v3  ;;  %v851_v7 = vmul.f32 %v5925_v15, %v5966_v36  ;;  %v853_v27 = vmul.f32 %v5925_v15, %v5968_v37  ;;  %v2979_v15 = vld [vmem:[%s7460_s10 + $0x50] sm:$0xff] }
  0xcf   : > { %v1049_v61 = vadd.f32 %v6006_v59, %v857_v62  ;;  %v999_v54 = vmul.f32 %v5938_v24, %v5940_v25  ;;  %4731 = vtanh.f32 %v1211_v23  ;;  %v1207_v63 = vadd.f32 %v6031_v13, %v1047_v48  ;;  %v4724_v38 = vpop.eup %4723 }
  0xd0   : > { %1942 = vperm.xlu1 %4722, %v1912_v43   ;;  %v1058_v43 = vadd.f32 %v994_v19, %v866_v44  ;;  %v1060_v21 = vadd.f32 %v996_v6, %v868_v53  ;;  %v1214_v44 = vadd.f32 %v5970_v39, %v1054_v5  ;;  %v6118_v49 = vadd.f32 %v6025_v8, %v869_v22  ;;  %v1918_v19 = vld [vmem:[%s7456_s6 + $0x48] sm:$0xff] }
  0xd1   : > { %v1000_v5 = vmul.f32 %v5938_v24, %v5947_v28  ;;  %4733 = vtanh.f32 %v1212_v51  ;;  %v1209_v39 = vadd.f32 %v6031_v13, %v1049_v61  ;;  %v1062_v59 = vadd.f32 %v6029_v52, %v870_v26  ;;  %v6136_v53 = vpop.permute.xlu0 %1150 }
  0xd2   : > { %3017 = vperm.xlu0 %4720, %v2975_v57   ;;  %v6087_v46 = vpop.permute.xlu1 %944  ;;  %v871_v3 = vmul.f32 %v5919_v12, %v5966_v36  ;;  %v872_v8 = vmul.f32 %v5919_v12, %v5953_v31  ;;  %4735 = vtanh.f32 %v1213_v50  ;;  %v1215_v57 = vadd.f32 %v1141_v20, %v1055_v17  ;;  %v1920_v50 = vld [vmem:[%s7456_s6 + $0x58] sm:$0xff] }
  0xd3   : > { %v1043_v11 = vadd.f32 %v5964_v35, %v851_v7  ;;  %v1045_v13 = vadd.f32 %v5979_v42, %v853_v27  ;;  %4737 = vtanh.f32 %v1214_v44  ;;  %v1216_v52 = vadd.f32 %v1141_v20, %v1056_v47  ;;  %v2981_v35 = vld [vmem:[%s7460_s10 + $0x60] sm:$0xff] }
  0xd4   : > { %1952 = vperm.xlu1 %4722, %v1914_v34   ;;  %v1001_v18 = vmul.f32 %v5938_v24, %v5949_v29  ;;  %4739 = vtanh.f32 %v1207_v63  ;;  %v1217_v17 = vadd.f32 %v1141_v20, %v1057_v40  ;;  %v1063_v34 = vadd.f32 %v999_v54, %v871_v3 }
  0xd5   : > { %4741 = vtanh.f32 %v1209_v39  ;;  %v1218_v42 = vadd.f32 %v1141_v20, %v1058_v43  ;;  %v1064_v23 = vadd.f32 %v1000_v5, %v872_v8  ;;  %v873_v26 = vmul.f32 %v5919_v12, %v5968_v37 }
  0xd6   : > { %3027 = vperm.xlu0 %4720, %v2977_v32   ;;  %v4726_v45 = vpop.eup %4725  ;;  %v1002_v51 = vmul.f32 %v5938_v24, %v5951_v30  ;;  %4743 = vtanh.f32 %v1215_v57  ;;  %v1223_v40 = vadd.f32 %v6136_v53, %v1063_v34  ;;  %v874_v20 = vmul.f32 %v5919_v12, %v5958_v33  ;;  %v2983_v12 = vld [vmem:[%s7460_s10 + $0x70] sm:$0xff] }
  0xd7   : > { %v6115_v6 = vpop.permute.xlu1 %1145  ;;  %v4728_v22 = vpop.eup %4727  ;;  %v4278_v47 = vpack.c.bf16 %v4726_v45, %v4724_v38  ;;  %4745 = vtanh.f32 %v1216_v52  ;;  %v1224_v43 = vadd.f32 %v6136_v53, %v1064_v23  ;;  %v1007_v24 = vmul.f32 %v6087_v46, %v5940_v25  ;;  %v3467_v52 = vld [vmem:[%s7462_s12] sm:$0xff] }
  0xd8   : > { %1962 = vperm.xlu1 %4722, %v1916_v58   ;;  %v4730_v32 = vpop.eup %4729  ;;  %v1203_v58 = vadd.f32 %v5893_v2, %v1043_v11  ;;  %4747 = vtanh.f32 %v1217_v17  ;;  %v1220_v7 = vadd.f32 %v6115_v6, %v1060_v21  ;;  %v1205_v44 = vadd.f32 %v5893_v2, %v1045_v13  ;;  %v1922_v2 = vld [vmem:[%s7456_s6 + $0x68] sm:$0xff] }
  0xd9   : > { %4279 = vmatprep.subr.bf16.mxu0 %v4278_v47  ;;  %v4310_v48 = vpack.c.bf16 %v4730_v32, %v4728_v22  ;;  %4749 = vtanh.f32 %v1218_v42  ;;  %v1065_v61 = vadd.f32 %v1001_v18, %v873_v26  ;;  %v1008_v54 = vmul.f32 %v6087_v46, %v5947_v28  ;;  %v6168_v63 = vpop.eup %4731 }
  0xda   : > { %3037 = vperm.xlu0 %4720, %v2979_v15   ;;  %v879_v21 = vmul.f32 %v6055_v41, %v5966_v36  ;;  %v1066_v15 = vadd.f32 %v1002_v51, %v874_v20  ;;  %4751 = vtanh.f32 %v1223_v40  ;;  %v1009_v5 = vmul.f32 %v6087_v46, %v5949_v29 }
  0xdb   : > { %v6140_v62 = vpop.permute.xlu1 %813  ;;  %4311 = vmatprep.subr.bf16.mxu1 %v4310_v48  ;;  %v6177_v39 = vpop.eup %4733  ;;  %v880_v3 = vmul.f32 %v6055_v41, %v5953_v31  ;;  %4753 = vtanh.f32 %v1224_v43  ;;  %v1010_v8 = vmul.f32 %v6087_v46, %v5951_v30  ;;  %v1222_v57 = vadd.f32 %v6115_v6, %v1062_v59 }
  0xdc   : > { %1972 = vperm.xlu1 %4722, %v1918_v19   ;;  %v6184_v19 = vpop.eup %4735  ;;  %v881_v38 = vmul.f32 %v6055_v41, %v5968_v37  ;;  %v1226_v11 = vadd.f32 %v6136_v53, %v1066_v15  ;;  %v1071_v13 = vadd.f32 %v1007_v24, %v879_v21  ;;  %4755 = vtanh.f32 %v1220_v7  ;;  %v1161_v59 = vpop.permute.xlu0 %1160 }
  0xdd   : > { %v6192_v45 = vpop.eup %4737  ;;  %v882_v46 = vmul.f32 %v6055_v41, %v5958_v33  ;;  %v1072_v18 = vadd.f32 %v1008_v54, %v880_v3  ;;  %v1219_v17 = vadd.f32 %v6115_v6, %v6101_v55  ;;  %4757 = vtanh.f32 %v1203_v58  ;;  %v1924_v41 = vld [vmem:[%s7456_s6 + $0x78] sm:$0xff] }
  0xde   : > { %3047 = vperm.xlu0 %4720, %v2981_v35   ;;  %v6200_v35 = vpop.eup %4739  ;;  %v875_v22 = vmul.f32 %v6016_v1, %v5966_v36  ;;  %v1073_v42 = vadd.f32 %v1009_v5, %v881_v38  ;;  %v1221_v23 = vadd.f32 %v6115_v6, %v6118_v49  ;;  %4759 = vtanh.f32 %v1205_v44  ;;  %v2408_v44 = vld [vmem:[%s7458_s8 + $0x8] sm:$0xff]  ;;  %v3471_v5 = vld [vmem:[%s7462_s12 + $0x20] sm:$0xff] }
  0xdf   : > { %v6160_v27 = vpop.permute.xlu1 %818  ;;  %v6209_v47 = vpop.eup %4741  ;;  %v876_v55 = vmul.f32 %v6016_v1, %v5953_v31  ;;  %v1225_v32 = vadd.f32 %v6136_v53, %v1065_v61  ;;  %v1074_v26 = vadd.f32 %v1010_v8, %v882_v46  ;;  %4761 = vtanh.f32 %v1222_v57 }
  0xe0   : > { %1982 = vperm.xlu1 %4722, %v1920_v50   ;;  %v6214_v51 = vpop.eup %4743  ;;  %v1005_v6 = vmul.f32 %v5867_v56, %v5949_v29  ;;  %v877_v49 = vmul.f32 %v6016_v1, %v5968_v37  ;;  %4763 = vtanh.f32 %v1226_v11  ;;  %v1231_v40 = vadd.f32 %v1161_v59, %v1071_v13  ;;  %v3469_v50 = vld [vmem:[%s7462_s12 + $0x10] sm:$0xff] }
  0xe1   : > { %v4746_v20 = vpop.eup %4745  ;;  %v1006_v53 = vmul.f32 %v5867_v56, %v5951_v30  ;;  %v878_v43 = vmul.f32 %v6016_v1, %v5958_v33  ;;  %v1232_v48 = vadd.f32 %v1161_v59, %v1072_v18  ;;  %4765 = vtanh.f32 %v1219_v17 }
  0xe2   : > { %3057 = vperm.xlu0 %4720, %v2983_v12   ;;  %v6227_v58 = vpop.eup %4747  ;;  %v1233_v24 = vadd.f32 %v1161_v59, %v1073_v42  ;;  %4767 = vtanh.f32 %v1221_v23  ;;  %v1067_v12 = vadd.f32 %v6035_v14, %v875_v22  ;;  %v1234_v56 = vadd.f32 %v1161_v59, %v1074_v26  ;;  %v3473_v42 = vld [vmem:[%s7462_s12 + $0x30] sm:$0xff] }
  0xe3   : > { %v4750_v61 = vpop.eup %4749  ;;  %4769 = vtanh.f32 %v1225_v32  ;;  %v1068_v54 = vadd.f32 %v6039_v16, %v876_v55  ;;  %v1069_v21 = vadd.f32 %v1005_v6, %v877_v49  ;;  %v2410_v16 = vld [vmem:[%s7458_s8 + $0x18] sm:$0xff]  ;;  %v4282_v13 = vpack.c.bf16 %v4746_v20, %v6177_v39  ;;  %v3475_v20 = vld [vmem:[%s7462_s12 + $0x40] sm:$0xff] }
  0xe4   : > { %1992 = vperm.xlu1 %4722, %v1922_v2   ;;  %v6198_v34 = vpop.permute.xlu1 %952  ;;  %v6234_v1 = vpop.eup %4751  ;;  %4771 = vtanh.f32 %v1231_v40  ;;  %v1070_v2 = vadd.f32 %v1006_v53, %v878_v43  ;;  %v4314_v18 = vpack.c.bf16 %v4750_v61, %v6192_v45  ;;  %v4284_v39 = vpack.c.bf16 %v6214_v51, %v6168_v63 }
  0xe5   : > { %v4754_v14 = vpop.eup %4753  ;;  %4773 = vtanh.f32 %v1232_v48  ;;  %v4316_v55 = vpack.c.bf16 %v6227_v58, %v6184_v19  ;;  %v1016_v32 = vmul.f32 %v6198_v34, %v5947_v28  ;;  %v887_v51 = vmul.f32 %v6160_v27, %v5966_v36 }
  0xe6   : > { %3485 = vperm.xlu0 %4720, %v3467_v52   ;;  %v4756_v8 = vpop.eup %4755  ;;  %4775 = vtanh.f32 %v1233_v24  ;;  %v1017_v6 = vmul.f32 %v6198_v34, %v5949_v29  ;;  %v1018_v19 = vmul.f32 %v6198_v34, %v5951_v30  ;;  %v889_v43 = vmul.f32 %v6160_v27, %v5968_v37  ;;  %v2414_v24 = vld [vmem:[%s7458_s8 + $0x38] sm:$0xff] }
  0xe7   : > { %v4758_v11 = vpop.eup %4757  ;;  %4777 = vtanh.f32 %v1234_v56  ;;  %v4286_v63 = vpack.c.bf16 %v4754_v14, %v4756_v8  ;;  %v884_v14 = vmul.f32 %v6140_v62, %v5953_v31 }
  0xe8   : > { %2002 = vperm.xlu1 %4722, %v1924_v41   ;;  %v4760_v46 = vpop.eup %4759  ;;  %v4280_v59 = vpack.c.bf16 %v6200_v35, %v4758_v11  ;;  %v1015_v35 = vmul.f32 %v6198_v34, %v5940_v25  ;;  %v2412_v41 = vld [vmem:[%s7458_s8 + $0x28] sm:$0xff]  ;;  %v890_v34 = vmul.f32 %v6160_v27, %v5958_v33 }
  0xe9   : > { %v1156_v7 = vpop.permute.xlu1 %1155  ;;  %v4762_v17 = vpop.eup %4761  ;;  %v4312_v22 = vpack.c.bf16 %v6209_v47, %v4760_v46  ;;  %v1014_v46 = vmul.f32 %v5877_v60, %v5951_v30 }
  0xea   : > { %3495 = vperm.xlu0 %4720, %v3469_v50   ;;  %v1227_v15 = vadd.f32 %v1156_v7, %v1067_v12  ;;  %v1228_v3 = vadd.f32 %v1156_v7, %v1068_v54  ;;  %v1229_v57 = vadd.f32 %v1156_v7, %v1069_v21  ;;  %v1230_v52 = vadd.f32 %v1156_v7, %v1070_v2  ;;  %v4764_v23 = vpop.eup %4763 }
  0xeb   : > { %4281 = vmatpush1.bf16.msra.mxu0 %v4280_v59  ;;  %v4766_v47 = vpop.eup %4765  ;;  %4313 = vmatpush1.bf16.msra.mxu1 %v4312_v22  ;;  %v4318_v49 = vpack.c.bf16 %v4764_v23, %v4762_v17  ;;  %v888_v50 = vmul.f32 %v6160_v27, %v5953_v31  ;;  %v1079_v48 = vadd.f32 %v1015_v35, %v887_v51  ;;  %v1171_v27 = vpop.permute.xlu0 %1170  ;;  %v2418_v51 = vld [vmem:[%s7458_s8 + $0x58] sm:$0xff] }
  0xec   : > { %2430 = vperm.xlu1 %4722, %v2408_v44   ;;  %4779 = vtanh.f32 %v1227_v15  ;;  %4283 = vmatprep.subr.bf16.mxu0 %v4282_v13  ;;  %v4768_v26 = vpop.eup %4767  ;;  %v4288_v58 = vpack.c.bf16 %v6234_v1, %v4766_v47  ;;  %v1011_v54 = vmul.f32 %v5877_v60, %v5940_v25  ;;  %v883_v1 = vmul.f32 %v6140_v62, %v5966_v36  ;;  %v2416_v13 = vld [vmem:[%s7458_s8 + $0x48] sm:$0xff] }
  0xed   : > { %v6239_v38 = vpop.permute.xlu1 %823  ;;  %4781 = vtanh.f32 %v1228_v3  ;;  %4315 = vmatprep.subr.bf16.mxu1 %v4314_v18  ;;  %v4770_v40 = vpop.eup %4769  ;;  %v1080_v12 = vadd.f32 %v1016_v32, %v888_v50  ;;  %v1081_v21 = vadd.f32 %v1017_v6, %v889_v43  ;;  %v1082_v2 = vadd.f32 %v1018_v19, %v890_v34  ;;  %v3477_v3 = vld [vmem:[%s7462_s12 + $0x50] sm:$0xff]  ;;  %v2422_v34 = vld [vmem:[%s7458_s8 + $0x78] sm:$0xff] }
  0xee   : > { %3505 = vperm.xlu0 %4720, %v3471_v5   ;;  %4783 = vtanh.f32 %v1229_v57  ;;  %v4772_v53 = vpop.eup %4771  ;;  %v4320_v44 = vpack.c.bf16 %v4770_v40, %v4768_v26  ;;  %v1012_v5 = vmul.f32 %v5877_v60, %v5947_v28  ;;  %v1013_v57 = vmul.f32 %v5877_v60, %v5949_v29  ;;  %v3479_v60 = vld [vmem:[%s7462_s12 + $0x60] sm:$0xff] }
  0xef   : > { %4785 = vtanh.f32 %v1230_v52  ;;  %4285 = vmatpush1.bf16.msra.mxu0 %v4284_v39  ;;  %v4774_v7 = vpop.eup %4773  ;;  %4317 = vmatpush1.bf16.msra.mxu1 %v4316_v55  ;;  %v1239_v11 = vadd.f32 %v1171_v27, %v1079_v48  ;;  %v886_v59 = vmul.f32 %v6140_v62, %v5958_v33  ;;  %v1240_v18 = vadd.f32 %v1171_v27, %v1080_v12 }
  0xf0   : > { %2440 = vperm.xlu1 %4722, %v2410_v16   ;;  %4287 = vmatprep.subr.bf16.mxu0 %v4286_v63  ;;  %v4776_v56 = vpop.eup %4775  ;;  %v885_v16 = vmul.f32 %v6140_v62, %v5968_v37  ;;  %v1075_v35 = vadd.f32 %v1011_v54, %v883_v1  ;;  %v1242_v47 = vadd.f32 %v1171_v27, %v1082_v2 }
  0xf1   : > { %v6255_v45 = vpop.permute.xlu1 %828  ;;  %4319 = vmatprep.subr.bf16.mxu1 %v4318_v49  ;;  %v4778_v15 = vpop.eup %4777  ;;  %v1076_v32 = vadd.f32 %v1012_v5, %v884_v14  ;;  %4787 = vtanh.f32 %v1239_v11  ;;  %v1078_v6 = vadd.f32 %v1014_v46, %v886_v59  ;;  %v891_v2 = vmul.f32 %v6239_v38, %v5966_v36 }
  0xf2   : > { %3515 = vperm.xlu0 %4720, %v3473_v42   ;;  %v1241_v42 = vadd.f32 %v1171_v27, %v1081_v21  ;;  %v1077_v63 = vadd.f32 %v1013_v57, %v885_v16  ;;  %4789 = vtanh.f32 %v1240_v18  ;;  %v896_v12 = vmul.f32 %v6255_v45, %v5953_v31  ;;  %v1181_v16 = vpop.permute.xlu0 %1180 }
  0xf3   : > { %4289 = vmatpush1.bf16.msra.mxu0 %v4288_v58  ;;  %4321 = vmatpush1.bf16.msra.mxu1 %v4320_v44  ;;  %v897_v54 = vmul.f32 %v6255_v45, %v5968_v37  ;;  %v1020_v46 = vmul.f32 %v5888_v0, %v5947_v28 }
  0xf4   : > { %2450 = vperm.xlu1 %4722, %v2412_v41   ;;  %4791 = vtanh.f32 %v1241_v42  ;;  %v894_v42 = vmul.f32 %v6239_v38, %v5958_v33 }
  0xf5   : > { %4793 = vtanh.f32 %v1242_v47 }
  0xf6   : > { %v6283_v61 = vpop.permute.xlu1 %960  ;;  %3525 = vperm.xlu0 %4720, %v3475_v20   ;;  %v4780_v8 = vpop.eup %4779  ;;  %v3481_v20 = vld [vmem:[%s7462_s12 + $0x70] sm:$0xff] }
  0xf7   : > { %v4782_v52 = vpop.eup %4781  ;;  %v4292_v17 = vpack.c.bf16 %v4772_v53, %v4780_v8  ;;  %v2420_v53 = vld [vmem:[%s7458_s8 + $0x68] sm:$0xff]  ;;  %v1023_v43 = vmul.f32 %v6283_v61, %v5940_v25  ;;  %v1024_v58 = vmul.f32 %v6283_v61, %v5947_v28  ;;  %v1026_v44 = vmul.f32 %v6283_v61, %v5951_v30 }
  0xf8   : > { %2460 = vperm.xlu1 %4722, %v2414_v24   ;;  %v4784_v22 = vpop.eup %4783  ;;  %v4290_v23 = vpack.c.bf16 %v4774_v7, %v4782_v52  ;;  %v895_v24 = vmul.f32 %v6255_v45, %v5966_v36  ;;  %v1025_v7 = vmul.f32 %v6283_v61, %v5949_v29  ;;  %v2970_v8 = vld [vmem:[%s7460_s10 + $0x8] sm:$0xff]  ;;  %v1019_v52 = vmul.f32 %v5888_v0, %v5940_v25 }
  0xf9   : > { %v4786_v41 = vpop.eup %4785  ;;  %v4324_v55 = vpack.c.bf16 %v4776_v56, %v4784_v22  ;;  %v1088_v5 = vadd.f32 %v1024_v58, %v896_v12  ;;  %v1022_v22 = vmul.f32 %v5888_v0, %v5951_v30 }
  0xfa   : > { %3535 = vperm.xlu0 %4720, %v3477_v3   ;;  %4291 = vmatprep.subr.bf16.mxu0 %v4290_v23  ;;  %v4322_v62 = vpack.c.bf16 %v4778_v15, %v4786_v41  ;;  %v1087_v1 = vadd.f32 %v1023_v43, %v895_v24  ;;  %v898_v15 = vmul.f32 %v6255_v45, %v5958_v33 }
  0xfb   : > { %v1166_v39 = vpop.permute.xlu1 %1165  ;;  %4293 = vmatpush1.bf16.msra.mxu0 %v4292_v17  ;;  %v4788_v56 = vpop.eup %4787  ;;  %v892_v3 = vmul.f32 %v6239_v38, %v5953_v31  ;;  %v1089_v61 = vadd.f32 %v1025_v7, %v897_v54  ;;  %v893_v45 = vmul.f32 %v6239_v38, %v5968_v37  ;;  %v1021_v17 = vmul.f32 %v5888_v0, %v5949_v29  ;;  %v2974_v7 = vld [vmem:[%s7460_s10 + $0x28] sm:$0xff] }
  0xfc   : > { %2470 = vperm.xlu1 %4722, %v2416_v13   ;;  %v1235_v26 = vadd.f32 %v1166_v39, %v1075_v35  ;;  %v1236_v49 = vadd.f32 %v1166_v39, %v1076_v32  ;;  %4323 = vmatprep.subr.bf16.mxu1 %v4322_v62  ;;  %v1237_v40 = vadd.f32 %v1166_v39, %v1077_v63  ;;  %v4790_v21 = vpop.eup %4789 }
  0xfd   : > { %4325 = vmatpush1.bf16.msra.mxu1 %v4324_v55  ;;  %v1238_v19 = vadd.f32 %v1166_v39, %v1078_v6  ;;  %v1090_v11 = vadd.f32 %v1026_v44, %v898_v15  ;;  %v1247_v59 = vadd.f32 %v1181_v16, %v1087_v1  ;;  %v1248_v23 = vadd.f32 %v1181_v16, %v1088_v5 }
  0xfe   : > { %3545 = vperm.xlu0 %4720, %v3479_v60   ;;  %4795 = vtanh.f32 %v1235_v26  ;;  %v4792_v14 = vpop.eup %4791  ;;  %v1249_v35 = vadd.f32 %v1181_v16, %v1089_v61  ;;  %v1083_v55 = vadd.f32 %v1019_v52, %v891_v2  ;;  %v1084_v32 = vadd.f32 %v1020_v46, %v892_v3  ;;  %v2972_v60 = vld [vmem:[%s7460_s10 + $0x18] sm:$0xff]  ;;  %v2978_v46 = vld [vmem:[%s7460_s10 + $0x48] sm:$0xff] }
  0xff   : > { %v6313_v50 = vpop.permute.xlu1 %833  ;;  %4797 = vtanh.f32 %v1236_v49  ;;  %v4794_v57 = vpop.eup %4793  ;;  %v1250_v63 = vadd.f32 %v1181_v16, %v1090_v11  ;;  %v1085_v0 = vadd.f32 %v1021_v17, %v893_v45  ;;  %v1027_v61 = vmul.f32 %v5898_v4, %v5940_v25 }
 0x100   : > { %2480 = vperm.xlu1 %4722, %v2418_v51   ;;  %4799 = vtanh.f32 %v1237_v40  ;;  %v1030_v45 = vmul.f32 %v5898_v4, %v5951_v30  ;;  %v899_v11 = vmul.f32 %v6313_v50, %v5966_v36  ;;  %v901_v17 = vmul.f32 %v6313_v50, %v5968_v37 }
 0x101   : > { %4801 = vtanh.f32 %v1238_v19  ;;  %v1086_v19 = vadd.f32 %v1022_v22, %v894_v42 }
 0x102   : > { %3555 = vperm.xlu0 %4720, %v3481_v20   ;;  %4803 = vtanh.f32 %v1247_v59 }
 0x103   : > { %v6323_v48 = vpop.permute.xlu1 %838  ;;  %4805 = vtanh.f32 %v1248_v23 }
 0x104   : > { %2490 = vperm.xlu1 %4722, %v2420_v53   ;;  %4807 = vtanh.f32 %v1249_v35  ;;  %v903_v53 = vmul.f32 %v6323_v48, %v5966_v36  ;;  %v906_v1 = vmul.f32 %v6323_v48, %v5958_v33 }
 0x105   : > { %4809 = vtanh.f32 %v1250_v63  ;;  %v1091_v63 = vadd.f32 %v1027_v61, %v899_v11 }
 0x108   : > { %2500 = vperm.xlu1 %4722, %v2422_v34   ;;  %v969_v27 = vpop.permute.xlu1 %968  ;;  %v4796_v13 = vpop.eup %4795  ;;  %v904_v34 = vmul.f32 %v6323_v48, %v5953_v31 }
 0x109   : > { %v4798_v18 = vpop.eup %4797  ;;  %v4296_v41 = vpack.c.bf16 %v4788_v56, %v4796_v13  ;;  %v1031_v38 = vmul.f32 %v969_v27, %v5940_v25  ;;  %v1032_v40 = vmul.f32 %v969_v27, %v5947_v28  ;;  %v1033_v43 = vmul.f32 %v969_v27, %v5949_v29 }
 0x10a   : > { %v4800_v39 = vpop.eup %4799  ;;  %v4294_v26 = vpack.c.bf16 %v4790_v21, %v4798_v18  ;;  %v1034_v12 = vmul.f32 %v969_v27, %v5951_v30  ;;  %v905_v56 = vmul.f32 %v6323_v48, %v5968_v37  ;;  %v2976_v27 = vld [vmem:[%s7460_s10 + $0x38] sm:$0xff]  ;;  %v1028_v48 = vmul.f32 %v5898_v4, %v5947_v28 }
 0x10b   : > { %v4802_v62 = vpop.eup %4801  ;;  %v4328_v51 = vpack.c.bf16 %v4792_v14, %v4800_v39  ;;  %v1095_v54 = vadd.f32 %v1031_v38, %v903_v53  ;;  %v1096_v21 = vadd.f32 %v1032_v40, %v904_v34  ;;  %v1191_v14 = vpop.permute.xlu0 %1190  ;;  %v900_v13 = vmul.f32 %v6313_v50, %v5953_v31 }
 0x10c   : > { %2992 = vperm.xlu1 %4722, %v2970_v8   ;;  %v4326_v6 = vpack.c.bf16 %v4794_v57, %v4802_v62  ;;  %4295 = vmatprep.subr.bf16.mxu0 %v4294_v26  ;;  %v1097_v15 = vadd.f32 %v1033_v43, %v905_v56  ;;  %v1098_v2 = vadd.f32 %v1034_v12, %v906_v1  ;;  %v4804_v16 = vpop.eup %4803 }
 0x10d   : > { %v1176_v47 = vpop.permute.xlu1 %1175  ;;  %4297 = vmatpush1.bf16.msra.mxu0 %v4296_v41  ;;  %v1255_v3 = vadd.f32 %v1191_v14, %v1095_v54  ;;  %v1029_v8 = vmul.f32 %v5898_v4, %v5949_v29  ;;  %v1256_v57 = vadd.f32 %v1191_v14, %v1096_v21  ;;  %v4806_v59 = vpop.eup %4805  ;;  %v1035_v18 = vmul.f32 %v5908_v9, %v5940_v25  ;;  %v2982_v21 = vld [vmem:[%s7460_s10 + $0x68] sm:$0xff] }
 0x10e   : > { %v1243_v49 = vadd.f32 %v1176_v47, %v1083_v55  ;;  %v1244_v20 = vadd.f32 %v1176_v47, %v1084_v32  ;;  %4327 = vmatprep.subr.bf16.mxu1 %v4326_v6  ;;  %v1245_v58 = vadd.f32 %v1176_v47, %v1085_v0  ;;  %v1246_v44 = vadd.f32 %v1176_v47, %v1086_v19  ;;  %v4808_v23 = vpop.eup %4807 }
 0x10f   : > { %4329 = vmatpush1.bf16.msra.mxu1 %v4328_v51  ;;  %v1257_v52 = vadd.f32 %v1191_v14, %v1097_v15  ;;  %v902_v4 = vmul.f32 %v6313_v50, %v5958_v33  ;;  %v1258_v22 = vadd.f32 %v1191_v14, %v1098_v2  ;;  %v4810_v47 = vpop.eup %4809  ;;  %v1036_v55 = vmul.f32 %v5908_v9, %v5947_v28  ;;  %v2980_v51 = vld [vmem:[%s7460_s10 + $0x58] sm:$0xff] }
 0x110   : > { %3002 = vperm.xlu1 %4722, %v2972_v60   ;;  %4811 = vtanh.f32 %v1243_v49  ;;  %v1037_v32 = vmul.f32 %v5908_v9, %v5949_v29  ;;  %v1038_v50 = vmul.f32 %v5908_v9, %v5951_v30  ;;  %v1092_v26 = vadd.f32 %v1028_v48, %v900_v13 }
 0x111   : > { %v844_v24 = vpop.permute.xlu1 %843  ;;  %4813 = vtanh.f32 %v1244_v20  ;;  %v1093_v6 = vadd.f32 %v1029_v8, %v901_v17  ;;  %v1094_v49 = vadd.f32 %v1030_v45, %v902_v4 }
 0x112   : > { %4815 = vtanh.f32 %v1245_v58  ;;  %v907_v39 = vmul.f32 %v844_v24, %v5966_v36  ;;  %v908_v35 = vmul.f32 %v844_v24, %v5953_v31  ;;  %v909_v41 = vmul.f32 %v844_v24, %v5968_v37 }
 0x113   : > { %4817 = vtanh.f32 %v1246_v44  ;;  %v910_v62 = vmul.f32 %v844_v24, %v5958_v33 }
 0x114   : > { %3012 = vperm.xlu1 %4722, %v2974_v7   ;;  %4819 = vtanh.f32 %v1255_v3  ;;  %v1099_v20 = vadd.f32 %v1035_v18, %v907_v39  ;;  %v1100_v53 = vadd.f32 %v1036_v55, %v908_v35  ;;  %v1101_v43 = vadd.f32 %v1037_v32, %v909_v41 }
 0x115   : > { %v6379_v5 = vpop.permute.xlu1 %848  ;;  %4821 = vtanh.f32 %v1256_v57  ;;  %v1102_v1 = vadd.f32 %v1038_v50, %v910_v62  ;;  %v3470_v50 = vld [vmem:[%s7462_s12 + $0x18] sm:$0xff] }
 0x116   : > { %4823 = vtanh.f32 %v1257_v52  ;;  %v911_v44 = vmul.f32 %v6379_v5, %v5966_v36  ;;  %v912_v2 = vmul.f32 %v6379_v5, %v5953_v31  ;;  %v913_v3 = vmul.f32 %v6379_v5, %v5968_v37  ;;  %v2984_v52 = vld [vmem:[%s7460_s10 + $0x78] sm:$0xff] }
 0x117   : > { %4825 = vtanh.f32 %v1258_v22  ;;  %v914_v11 = vmul.f32 %v6379_v5, %v5958_v33 }
 0x118   : > { %3022 = vperm.xlu1 %4722, %v2976_v27  }
 0x11a   : > { %v977_v42 = vpop.permute.xlu1 %976  ;;  %v4812_v60 = vpop.eup %4811 }
 0x11b   : > { %v4814_v0 = vpop.eup %4813  ;;  %v4300_v38 = vpack.c.bf16 %v4804_v16, %v4812_v60  ;;  %v1039_v15 = vmul.f32 %v977_v42, %v5940_v25  ;;  %v1040_v27 = vmul.f32 %v977_v42, %v5947_v28  ;;  %v1041_v14 = vmul.f32 %v977_v42, %v5949_v29 }
 0x11c   : > { %3032 = vperm.xlu1 %4722, %v2978_v46   ;;  %v4816_v40 = vpop.eup %4815  ;;  %v4298_v19 = vpack.c.bf16 %v4806_v59, %v4814_v0  ;;  %v1042_v61 = vmul.f32 %v977_v42, %v5951_v30 }
 0x11d   : > { %v4818_v58 = vpop.eup %4817  ;;  %v4332_v7 = vpack.c.bf16 %v4808_v23, %v4816_v40  ;;  %v1103_v59 = vadd.f32 %v1039_v15, %v911_v44  ;;  %v1104_v18 = vadd.f32 %v1040_v27, %v912_v2  ;;  %v1105_v17 = vadd.f32 %v1041_v14, %v913_v3  ;;  %v1331_v44 = vld [vmem:[%s7453_s3] sm:$0xff]  ;;  %v1333_v15 = vld [vmem:[%s7453_s3 + $0x10] sm:$0xff]  ;;  %v3480_v27 = vld [vmem:[%s7462_s12 + $0x68] sm:$0xff] }
 0x11e   : > { %4299 = vmatprep.subr.bf16.mxu0 %v4298_v19  ;;  %v4330_v56 = vpack.c.bf16 %v4810_v47, %v4818_v58  ;;  %v4820_v45 = vpop.eup %4819  ;;  %v1106_v42 = vadd.f32 %v1042_v61, %v914_v11  ;;  %v3468_v47 = vld [vmem:[%s7462_s12 + $0x8] sm:$0xff]  ;;  %v1334_v14 = vld [vmem:[%s7453_s3 + $0x18] sm:$0xff]  ;;  %v1335_v3 = vld [vmem:[%s7453_s3 + $0x20] sm:$0xff] }
 0x11f   : > { %v1186_v9 = vpop.permute.xlu1 %1185  ;;  %4301 = vmatpush1.bf16.msra.mxu0 %v4300_v38  ;;  %v4822_v46 = vpop.eup %4821  ;;  %v3482_v2 = vld [vmem:[%s7462_s12 + $0x78] sm:$0xff]  ;;  %v1336_v61 = vld [vmem:[%s7453_s3 + $0x28] sm:$0xff] }
 0x120   : > { %v1251_v24 = vadd.f32 %v1186_v9, %v1091_v63  ;;  %v1252_v34 = vadd.f32 %v1186_v9, %v1092_v26  ;;  %v1253_v12 = vadd.f32 %v1186_v9, %v1093_v6  ;;  %3042 = vperm.xlu1 %4722, %v2980_v51   ;;  %v1254_v54 = vadd.f32 %v1186_v9, %v1094_v49  ;;  %v4824_v4 = vpop.eup %4823  ;;  %v3472_v49 = vld [vmem:[%s7462_s12 + $0x28] sm:$0xff]  ;;  %v1342_v11 = vld [vmem:[%s7453_s3 + $0x58] sm:$0xff] }
 0x121   : > { %4331 = vmatprep.subr.bf16.mxu1 %v4330_v56  ;;  %v4826_v23 = vpop.eup %4825  ;;  %v3476_v56 = vld [vmem:[%s7462_s12 + $0x48] sm:$0xff] }
 0x122   : > { %4827 = vtanh.f32 %v1251_v24  ;;  %4333 = vmatpush1.bf16.msra.mxu1 %v4332_v7 }
 0x123   : > { %4829 = vtanh.f32 %v1252_v34  ;;  %v1196_v48 = vpop.permute.xlu1 %1195 }
 0x124   : > { %4831 = vtanh.f32 %v1253_v12  ;;  %v1259_v8 = vadd.f32 %v1196_v48, %v1099_v20  ;;  %v1260_v57 = vadd.f32 %v1196_v48, %v1100_v53  ;;  %v1261_v16 = vadd.f32 %v1196_v48, %v1101_v43  ;;  %3052 = vperm.xlu1 %4722, %v2982_v21   ;;  %v3474_v53 = vld [vmem:[%s7462_s12 + $0x38] sm:$0xff] }
 0x125   : > { %4833 = vtanh.f32 %v1254_v54  ;;  %v1262_v13 = vadd.f32 %v1196_v48, %v1102_v1  ;;  %v7533_v54 = vmov 0.0   ;;  %v1332_v1 = vld [vmem:[%s7453_s3 + $0x8] sm:$0xff]  ;;  %v3478_v21 = vld [vmem:[%s7462_s12 + $0x58] sm:$0xff]  ;;  %v1337_v48 = vld [vmem:[%s7453_s3 + $0x30] sm:$0xff] }
 0x126   : > { %4835 = vtanh.f32 %v1259_v8  ;;  %v1338_v8 = vld [vmem:[%s7453_s3 + $0x38] sm:$0xff] }
 0x127   : > { %4837 = vtanh.f32 %v1260_v57  ;;  %v1201_v22 = vpop.permute.xlu1 %1200  ;;  %v1339_v57 = vld [vmem:[%s7453_s3 + $0x40] sm:$0xff] }
 0x128   : > { %4839 = vtanh.f32 %v1261_v16  ;;  %v1263_v39 = vadd.f32 %v1201_v22, %v1103_v59  ;;  %v1264_v35 = vadd.f32 %v1201_v22, %v1104_v18  ;;  %v1265_v5 = vadd.f32 %v1201_v22, %v1105_v17  ;;  %3062 = vperm.xlu1 %4722, %v2984_v52   ;;  %v1340_v16 = vld [vmem:[%s7453_s3 + $0x48] sm:$0xff]  ;;  %v1346_v59 = vld [vmem:[%s7453_s3 + $0x78] sm:$0xff]  ;;  %v1366_v18 = vpop.permute.xlu0 %1365 }
 0x129   : > { %4841 = vtanh.f32 %v1262_v13  ;;  %v1266_v41 = vadd.f32 %v1201_v22, %v1106_v42  ;;  %v1343_v13 = vld [vmem:[%s7453_s3 + $0x60] sm:$0xff]  ;;  %v1344_v52 = vld [vmem:[%s7453_s3 + $0x68] sm:$0xff] }
 0x12a   : > { %4843 = vtanh.f32 %v1263_v39 }
 0x12b   : > { %4845 = vtanh.f32 %v1264_v35 }
 0x12c   : > { %v4828_v55 = vpop.eup %4827  ;;  %4847 = vtanh.f32 %v1265_v5  ;;  %3490 = vperm.xlu1 %4722, %v3468_v47   ;;  %v1371_v5 = vpop.permute.xlu1 %1370 }
 0x12d   : > { %v4830_v32 = vpop.eup %4829  ;;  %4849 = vtanh.f32 %v1266_v41  ;;  %v4304_v60 = vpack.c.bf16 %v4820_v45, %v4828_v55  ;;  %v1341_v45 = vld [vmem:[%s7453_s3 + $0x50] sm:$0xff] }
 0x12e   : > { %v4832_v62 = vpop.eup %4831  ;;  %v4302_v63 = vpack.c.bf16 %v4822_v46, %v4830_v32  ;;  %v1345_v46 = vld [vmem:[%s7453_s3 + $0x70] sm:$0xff] }
 0x12f   : > { %v4834_v26 = vpop.eup %4833  ;;  %v4336_v51 = vpack.c.bf16 %v4824_v4, %v4832_v62 }
 0x130   : > { %v4836_v0 = vpop.eup %4835  ;;  %4303 = vmatprep.subr.bf16.mxu0 %v4302_v63  ;;  %v4334_v38 = vpack.c.bf16 %v4826_v23, %v4834_v26  ;;  %3500 = vperm.xlu1 %4722, %v3470_v50   ;;  %v1376_v26 = vpop.permute.xlu0 %1375 }
 0x131   : > { %v4838_v6 = vpop.eup %4837  ;;  %4305 = vmatpush1.bf16.msra.mxu0 %v4304_v60 }
 0x132   : > { %v4840_v40 = vpop.eup %4839  ;;  %4335 = vmatprep.subr.bf16.mxu1 %v4334_v38 }
 0x133   : > { %v4842_v19 = vpop.eup %4841  ;;  %4337 = vmatpush1.bf16.msra.mxu1 %v4336_v51 }
 0x134   : > { %v4844_v9 = vpop.eup %4843  ;;  %3510 = vperm.xlu1 %4722, %v3472_v49  }
 0x135   : > { %v4846_v20 = vpop.eup %4845  ;;  %v4308_v43 = vpack.c.bf16 %v4844_v9, %v4836_v0  ;;  %v575_v9 = vsel %vm505_vm0, %v5947_v28, 0.0 }
 0x136   : > { %v4848_v58 = vpop.eup %4847  ;;  %v4306_v7 = vpack.c.bf16 %v4846_v20, %v4838_v6  ;;  %v1381_v20 = vpop.permute.xlu1 %1380 }
 0x137   : > { %v4850_v24 = vpop.eup %4849  ;;  %v4340_v34 = vpack.c.bf16 %v4848_v58, %v4840_v40  ;;  %v574_v58 = vsel %vm505_vm0, %v5940_v25, 0.0  ;;  %v576_v25 = vsel %vm505_vm0, %v5949_v29, 0.0 }
 0x138   : > { %4307 = vmatprep.subr.bf16.mxu0 %v4306_v7  ;;  %v4338_v12 = vpack.c.bf16 %v4850_v24, %v4842_v19  ;;  %3520 = vperm.xlu1 %4722, %v3474_v53  }
 0x139   : > { %4309 = vmatpush1.bf16.msra.mxu0 %v4308_v43 }
 0x13a   : > { %4339 = vmatprep.subr.bf16.mxu1 %v4338_v12  ;;  %v577_v12 = vsel %vm505_vm0, %v5951_v30, 0.0  ;;  %v691_v30 = vsel %vm489_vm1, %v5966_v36, %v574_v58  ;;  %v693_v36 = vsel %vm489_vm1, %v5968_v37, %v576_v25 }
 0x13b   : > { %4341 = vmatpush1.bf16.msra.mxu1 %v4340_v34 }
 0x13c   : > { %1508 = vmatmul.mubr.f32.vlgmr.msra.gmra.mrb[0].mxu0 %v1331_v44  ;;  %3530 = vperm.xlu1 %4722, %v3476_v56  }
 0x13d   : > { %1513 = vmatprep.mubr.f32.mxu0 %v7533_v54 }
 0x13e   : > { %1669 = vmatmul.mubr.f32.vlgmr.msra.gmra.mrb[0].mxu1 %v1331_v44 }
 0x13f   : > { %1674 = vmatprep.mubr.f32.mxu1 %v7533_v54 }
 0x140   : > { %1514 = vmatmul.mubr.f32.gmra.mrb[2].mxu0 %v1332_v1  ;;  %3540 = vperm.xlu1 %4722, %v3478_v21  }
 0x141   : > { %1519 = vmatprep.mubr.f32.mxu0 %v7533_v54 }
 0x142   : > { %1675 = vmatmul.mubr.f32.gmra.mrb[2].mxu1 %v1332_v1  ;;  %v692_v1 = vsel %vm489_vm1, %v5953_v31, %v575_v9  ;;  %v694_v31 = vsel %vm489_vm1, %v5958_v33, %v577_v12 }
 0x143   : > { %1680 = vmatprep.mubr.f32.mxu1 %v7533_v54 }
 0x144   : > { %1520 = vmatmul.mubr.f32.gmra.mrb[4].mxu0 %v1333_v15  ;;  %3550 = vperm.xlu1 %4722, %v3480_v27  }
 0x145   : > { %1525 = vmatprep.mubr.f32.mxu0 %v7533_v54 }
 0x146   : > { %1681 = vmatmul.mubr.f32.gmra.mrb[4].mxu1 %v1333_v15 }
 0x147   : > { %1686 = vmatprep.mubr.f32.mxu1 %v7533_v54 }
 0x148   : > { %1526 = vmatmul.mubr.f32.gmra.mrb[6].mxu0 %v1334_v14  ;;  %3560 = vperm.xlu1 %4722, %v3482_v2  }
 0x149   : > { %1531 = vmatprep.mubr.f32.mxu0 %v7533_v54 }
 0x14a   : > { %1687 = vmatmul.mubr.f32.gmra.mrb[6].mxu1 %v1334_v14 }
 0x14b   : > { %1692 = vmatprep.mubr.f32.mxu1 %v7533_v54 }
 0x14c   : > { %1532 = vmatmul.mubr.f32.gmra.mrb[8].mxu0 %v1335_v3 }
 0x14d   : > { %1537 = vmatprep.mubr.f32.mxu0 %v7533_v54 }
 0x14e   : > { %1693 = vmatmul.mubr.f32.gmra.mrb[8].mxu1 %v1335_v3  ;;  %v1386_v3 = vpop.permute.xlu0 %1385 }
 0x14f   : > { %1698 = vmatprep.mubr.f32.mxu1 %v7533_v54 }
 0x150   : > { %1538 = vmatmul.mubr.f32.gmra.mrb[10].mxu0 %v1336_v61 }
 0x151   : > { %1543 = vmatprep.mubr.f32.mxu0 %v7533_v54 }
 0x152   : > { %1699 = vmatmul.mubr.f32.gmra.mrb[10].mxu1 %v1336_v61 }
 0x153   : > { %1704 = vmatprep.mubr.f32.mxu1 %v7533_v54 }
 0x154   : > { %1544 = vmatmul.mubr.f32.gmra.mrb[12].mxu0 %v1337_v48 }
 0x155   : > { %1549 = vmatprep.mubr.f32.mxu0 %v7533_v54 }
 0x156   : > { %1705 = vmatmul.mubr.f32.gmra.mrb[12].mxu1 %v1337_v48 }
 0x157   : > { %1710 = vmatprep.mubr.f32.mxu1 %v7533_v54 }
 0x158   : > { %1550 = vmatmul.mubr.f32.gmra.mrb[14].mxu0 %v1338_v8 }
 0x159   : > { %1555 = vmatprep.mubr.f32.mxu0 %v7533_v54 }
 0x15a   : > { %1711 = vmatmul.mubr.f32.gmra.mrb[14].mxu1 %v1338_v8 }
 0x15b   : > { %1716 = vmatprep.mubr.f32.mxu1 %v7533_v54 }
 0x15c   : > { %1556 = vmatmul.mubr.f32.gmra.mrb[16].mxu0 %v1339_v57 }
 0x15d   : > { %1561 = vmatprep.mubr.f32.mxu0 %v7533_v54 }
 0x15e   : > { %1717 = vmatmul.mubr.f32.gmra.mrb[16].mxu1 %v1339_v57 }
 0x15f   : > { %1722 = vmatprep.mubr.f32.mxu1 %v7533_v54 }
 0x160   : > { %1562 = vmatmul.mubr.f32.gmra.mrb[18].mxu0 %v1340_v16 }
 0x161   : > { %1567 = vmatprep.mubr.f32.mxu0 %v7533_v54 }
 0x162   : > { %1723 = vmatmul.mubr.f32.gmra.mrb[18].mxu1 %v1340_v16 }
 0x163   : > { %1728 = vmatprep.mubr.f32.mxu1 %v7533_v54 }
 0x164   : > { %1568 = vmatmul.mubr.f32.gmra.mrb[20].mxu0 %v1341_v45 }
 0x165   : > { %1573 = vmatprep.mubr.f32.mxu0 %v7533_v54 }
 0x166   : > { %1729 = vmatmul.mubr.f32.gmra.mrb[20].mxu1 %v1341_v45 }
 0x167   : > { %1734 = vmatprep.mubr.f32.mxu1 %v7533_v54 }
 0x168   : > { %1574 = vmatmul.mubr.f32.gmra.mrb[22].mxu0 %v1342_v11 }
 0x169   : > { %1579 = vmatprep.mubr.f32.mxu0 %v7533_v54 }
 0x16a   : > { %1735 = vmatmul.mubr.f32.gmra.mrb[22].mxu1 %v1342_v11 }
 0x16b   : > { %1740 = vmatprep.mubr.f32.mxu1 %v7533_v54 }
 0x16c   : > { %1580 = vmatmul.mubr.f32.gmra.mrb[24].mxu0 %v1343_v13 }
 0x16d   : > { %1585 = vmatprep.mubr.f32.mxu0 %v7533_v54 }
 0x16e   : > { %1741 = vmatmul.mubr.f32.gmra.mrb[24].mxu1 %v1343_v13 }
 0x16f   : > { %1746 = vmatprep.mubr.f32.mxu1 %v7533_v54 }
 0x170   : > { %1586 = vmatmul.mubr.f32.gmra.mrb[26].mxu0 %v1344_v52 }
 0x171   : > { %1591 = vmatprep.mubr.f32.mxu0 %v7533_v54 }
 0x172   : > { %1747 = vmatmul.mubr.f32.gmra.mrb[26].mxu1 %v1344_v52 }
 0x173   : > { %1752 = vmatprep.mubr.f32.mxu1 %v7533_v54 }
 0x174   : > { %1592 = vmatmul.mubr.f32.gmra.mrb[28].mxu0 %v1345_v46 }
 0x175   : > { %1597 = vmatprep.mubr.f32.mxu0 %v7533_v54 }
 0x176   : > { %1753 = vmatmul.mubr.f32.gmra.mrb[28].mxu1 %v1345_v46 }
 0x177   : > { %1758 = vmatprep.mubr.f32.mxu1 %v7533_v54 }
 0x178   : > { %1598 = vmatmul.mubr.f32.gmra.mrb[30].mxu0 %v1346_v59 }
 0x179   : > { %2069 = vmatprep.mubr.f32.mxu0 %v7533_v54 }
 0x17a   : > { %1759 = vmatmul.mubr.f32.gmra.mrb[30].mxu1 %v1346_v59 }
 0x17b   : > { %2230 = vmatprep.mubr.f32.mxu1 %v7533_v54 }
 0x20f   : > { %v1509_v17 = vpop.f32.mrb[0].mxu0 }
 0x210   : > { %v1510_v4 = vadd.f32 %v1509_v17, %v1366_v18  ;;  %v1511_v22 = vpop.f32.mrb[1].mxu0 }
 0x211   : > { %v1670_v42 = vpop.f32.mrb[0].mxu1  ;;  %v1512_v23 = vadd.f32 %v1511_v22, %v1366_v18 }
 0x212   : > { %4851 = vtanh.f32 %v1510_v4  ;;  %v1671_v39 = vadd.f32 %v1670_v42, %v1366_v18  ;;  %v1672_v35 = vpop.f32.mrb[1].mxu1  ;;  %v1391_v4 = vpop.permute.xlu1 %1390 }
 0x213   : > { %4853 = vtanh.f32 %v1512_v23  ;;  %v1673_v41 = vadd.f32 %v1672_v35, %v1366_v18  ;;  %v1515_v47 = vpop.f32.mrb[2].mxu0 }
 0x214   : > { %4855 = vtanh.f32 %v1671_v39  ;;  %v1516_v55 = vadd.f32 %v1515_v47, %v1371_v5  ;;  %v1517_v32 = vpop.f32.mrb[3].mxu0 }
 0x215   : > { %4857 = vtanh.f32 %v1673_v41  ;;  %v1676_v50 = vpop.f32.mrb[2].mxu1  ;;  %v1518_v60 = vadd.f32 %v1517_v32, %v1371_v5 }
 0x216   : > { %4859 = vtanh.f32 %v1516_v55  ;;  %v1677_v62 = vadd.f32 %v1676_v50, %v1371_v5  ;;  %v1678_v63 = vpop.f32.mrb[3].mxu1 }
 0x217   : > { %4861 = vtanh.f32 %v1518_v60  ;;  %v1679_v51 = vadd.f32 %v1678_v63, %v1371_v5  ;;  %v1521_v0 = vpop.f32.mrb[4].mxu0 }
 0x218   : > { %4863 = vtanh.f32 %v1677_v62  ;;  %v1522_v38 = vadd.f32 %v1521_v0, %v1376_v26  ;;  %v1523_v6 = vpop.f32.mrb[5].mxu0 }
 0x219   : > { %4865 = vtanh.f32 %v1679_v51  ;;  %v1682_v49 = vpop.f32.mrb[4].mxu1  ;;  %v1524_v40 = vadd.f32 %v1523_v6, %v1376_v26  ;;  %v1396_v51 = vpop.permute.xlu0 %1395 }
 0x21a   : > { %v1684_v19 = vpop.f32.mrb[5].mxu1  ;;  %4867 = vtanh.f32 %v1522_v38  ;;  %v1683_v15 = vadd.f32 %v1682_v49, %v1376_v26 }
 0x21b   : > { %v1685_v53 = vadd.f32 %v1684_v19, %v1376_v26  ;;  %v1527_v43 = vpop.f32.mrb[6].mxu0  ;;  %4869 = vtanh.f32 %v1524_v40 }
 0x21c   : > { %v4852_v7 = vpop.eup %4851  ;;  %v1528_v24 = vadd.f32 %v1527_v43, %v1381_v20  ;;  %v1529_v34 = vpop.f32.mrb[7].mxu0 }
 0x21d   : > { %v4854_v44 = vpop.eup %4853  ;;  %4871 = vtanh.f32 %v1685_v53  ;;  %v1688_v56 = vpop.f32.mrb[6].mxu1  ;;  %v1530_v28 = vadd.f32 %v1529_v34, %v1381_v20  ;;  %v6572_v52 = vadd.f32 %v4852_v7, %v691_v30 }
 0x21e   : > { %v4856_v21 = vpop.eup %4855  ;;  %4873 = vtanh.f32 %v1528_v24  ;;  %v1689_v27 = vadd.f32 %v1688_v56, %v1381_v20  ;;  %v1690_v14 = vpop.f32.mrb[7].mxu1  ;;  %v6565_v16 = vadd.f32 %v4854_v44, %v692_v1 }
 0x21f   : > { %v4858_v2 = vpop.eup %4857  ;;  %4875 = vtanh.f32 %v1530_v28  ;;  %v1691_v61 = vadd.f32 %v1690_v14, %v1381_v20  ;;  %v1533_v48 = vpop.f32.mrb[8].mxu0  ;;  %v6584_v23 = vadd.f32 %v4856_v21, %v693_v36 }
 0x220   : > { %v6563_v8 = vpop.eup %4859  ;;  %4877 = vtanh.f32 %v1689_v27  ;;  %v1534_v29 = vadd.f32 %v1533_v48, %v1386_v3  ;;  %v1535_v57 = vpop.f32.mrb[9].mxu0  ;;  %v6578_v18 = vadd.f32 %v4858_v2, %v694_v31 }
 0x221   : > { %v6570_v45 = vpop.eup %4861  ;;  %4879 = vtanh.f32 %v1691_v61  ;;  %v1694_v11 = vpop.f32.mrb[8].mxu1  ;;  %v1536_v13 = vadd.f32 %v1535_v57, %v1386_v3  ;;  %v4344_v42 = vpack.c.bf16 %v6563_v8, %v6572_v52 }
 0x222   : > { %v6574_v46 = vpop.eup %4863  ;;  %4881 = vtanh.f32 %v1683_v15  ;;  %v1696_v33 = vpop.f32.mrb[9].mxu1  ;;  %v4342_v59 = vpack.c.bf16 %v6570_v45, %v6565_v16  ;;  %v1695_v60 = vadd.f32 %v1694_v11, %v1386_v3 }
 0x223   : > { %v6580_v17 = vpop.eup %4865  ;;  %4883 = vtanh.f32 %v1534_v29  ;;  %v1697_v37 = vadd.f32 %v1696_v33, %v1386_v3  ;;  %v1539_v22 = vpop.f32.mrb[10].mxu0  ;;  %v4376_v32 = vpack.c.bf16 %v6574_v46, %v6584_v23 }
 0x224   : > { %4885 = vtanh.f32 %v1536_v13  ;;  %v1540_v39 = vadd.f32 %v1539_v22, %v1391_v4  ;;  %v1541_v35 = vpop.f32.mrb[11].mxu0  ;;  %4343 = vmatprep.subr.bf16.mxu0 %v4342_v59  ;;  %v4374_v5 = vpack.c.bf16 %v6580_v17, %v6578_v18  ;;  %v6588_v41 = vpop.eup %4867 }
 0x225   : > { %4887 = vtanh.f32 %v1697_v37  ;;  %v1700_v47 = vpop.f32.mrb[10].mxu1  ;;  %v1542_v55 = vadd.f32 %v1541_v35, %v1391_v4  ;;  %4345 = vmatpush1.bf16.msra.mxu0 %v4344_v42  ;;  %v6592_v50 = vpop.eup %4869 }
 0x226   : > { %4889 = vtanh.f32 %v1540_v39  ;;  %v1701_v62 = vadd.f32 %v1700_v47, %v1391_v4  ;;  %v1702_v63 = vpop.f32.mrb[11].mxu1  ;;  %4375 = vmatprep.subr.bf16.mxu1 %v4374_v5  ;;  %v1401_v24 = vpop.permute.xlu1 %1400 }
 0x227   : > { %v6594_v26 = vpop.eup %4871  ;;  %4891 = vtanh.f32 %v1542_v55  ;;  %v1703_v0 = vadd.f32 %v1702_v63, %v1391_v4  ;;  %4377 = vmatpush1.bf16.msra.mxu1 %v4376_v32  ;;  %v1545_v38 = vpop.f32.mrb[12].mxu0 }
 0x228   : > { %v6596_v6 = vpop.eup %4873  ;;  %4893 = vtanh.f32 %v1701_v62  ;;  %v1546_v49 = vadd.f32 %v1545_v38, %v1396_v51  ;;  %v1547_v40 = vpop.f32.mrb[13].mxu0 }
 0x229   : > { %v6598_v19 = vpop.eup %4875  ;;  %4895 = vtanh.f32 %v1703_v0  ;;  %v1706_v9 = vpop.f32.mrb[12].mxu1  ;;  %v1548_v20 = vadd.f32 %v1547_v40, %v1396_v51  ;;  %v4348_v44 = vpack.c.bf16 %v6596_v6, %v6588_v41 }
 0x22a   : > { %v6600_v53 = vpop.eup %4877  ;;  %4897 = vtanh.f32 %v1695_v60  ;;  %v1708_v43 = vpop.f32.mrb[13].mxu1  ;;  %v4346_v58 = vpack.c.bf16 %v6598_v19, %v6592_v50  ;;  %v1707_v2 = vadd.f32 %v1706_v9, %v1396_v51 }
 0x22b   : > { %v6604_v7 = vpop.eup %4879  ;;  %4899 = vtanh.f32 %v1546_v49  ;;  %v1709_v34 = vadd.f32 %v1708_v43, %v1396_v51  ;;  %v1551_v12 = vpop.f32.mrb[14].mxu0 }
 0x22c   : > { %v6608_v56 = vpop.eup %4881  ;;  %4901 = vtanh.f32 %v1548_v20  ;;  %v1552_v28 = vadd.f32 %v1551_v12, %v1401_v24  ;;  %v1553_v1 = vpop.f32.mrb[15].mxu0  ;;  %4347 = vmatprep.subr.bf16.mxu0 %v4346_v58  ;;  %v4378_v25 = vpack.c.bf16 %v6604_v7, %v6594_v26 }
 0x22d   : > { %v6612_v21 = vpop.eup %4883  ;;  %4903 = vtanh.f32 %v1709_v34  ;;  %v1712_v15 = vpop.f32.mrb[14].mxu1  ;;  %v1554_v27 = vadd.f32 %v1553_v1, %v1401_v24  ;;  %4349 = vmatpush1.bf16.msra.mxu0 %v4348_v44  ;;  %v4380_v14 = vpack.c.bf16 %v6600_v53, %v6608_v56 }
 0x22e   : > { %v6616_v30 = vpop.eup %4885  ;;  %4905 = vtanh.f32 %v1552_v28  ;;  %v1713_v3 = vadd.f32 %v1712_v15, %v1401_v24  ;;  %v1714_v61 = vpop.f32.mrb[15].mxu1  ;;  %4379 = vmatprep.subr.bf16.mxu1 %v4378_v25 }
 0x22f   : > { %v6618_v48 = vpop.eup %4887  ;;  %v1406_v31 = vpop.permute.xlu0 %1405  ;;  %4907 = vtanh.f32 %v1554_v27  ;;  %v1715_v29 = vadd.f32 %v1714_v61, %v1401_v24  ;;  %4381 = vmatpush1.bf16.msra.mxu1 %v4380_v14 }
 0x230   : > { %v1557_v57 = vpop.f32.mrb[16].mxu0  ;;  %v6620_v36 = vpop.eup %4889  ;;  %4909 = vtanh.f32 %v1713_v3 }
 0x231   : > { %v1558_v11 = vadd.f32 %v1557_v57, %v1406_v31  ;;  %v1559_v13 = vpop.f32.mrb[17].mxu0  ;;  %v6622_v33 = vpop.eup %4891  ;;  %4911 = vtanh.f32 %v1715_v29  ;;  %v4352_v55 = vpack.c.bf16 %v6620_v36, %v6612_v21 }
 0x232   : > { %v1718_v59 = vpop.f32.mrb[16].mxu1  ;;  %v1560_v4 = vadd.f32 %v1559_v13, %v1406_v31  ;;  %v6624_v37 = vpop.eup %4893  ;;  %4913 = vtanh.f32 %v1707_v2  ;;  %v4350_v42 = vpack.c.bf16 %v6622_v33, %v6616_v30 }
 0x233   : > { %v1720_v22 = vpop.f32.mrb[17].mxu1  ;;  %v6628_v39 = vpop.eup %4895  ;;  %4915 = vtanh.f32 %v1558_v11  ;;  %v1719_v9 = vadd.f32 %v1718_v59, %v1406_v31 }
 0x234   : > { %v1411_v35 = vpop.permute.xlu1 %1410  ;;  %v1721_v5 = vadd.f32 %v1720_v22, %v1406_v31  ;;  %v1563_v47 = vpop.f32.mrb[18].mxu0  ;;  %4917 = vtanh.f32 %v1560_v4  ;;  %4351 = vmatprep.subr.bf16.mxu0 %v4350_v42  ;;  %v4382_v63 = vpack.c.bf16 %v6628_v39, %v6618_v48 }
 0x235   : > { %v6632_v32 = vpop.eup %4897  ;;  %v1564_v60 = vadd.f32 %v1563_v47, %v1411_v35  ;;  %v1565_v62 = vpop.f32.mrb[19].mxu0  ;;  %4353 = vmatpush1.bf16.msra.mxu0 %v4352_v55 }
 0x236   : > { %v6636_v51 = vpop.eup %4899  ;;  %4919 = vtanh.f32 %v1721_v5  ;;  %v1724_v0 = vpop.f32.mrb[18].mxu1  ;;  %v1566_v38 = vadd.f32 %v1565_v62, %v1411_v35  ;;  %v4384_v49 = vpack.c.bf16 %v6624_v37, %v6632_v32  ;;  %4383 = vmatprep.subr.bf16.mxu1 %v4382_v63 }
 0x237   : > { %v6640_v40 = vpop.eup %4901  ;;  %4921 = vtanh.f32 %v1564_v60  ;;  %v1725_v20 = vadd.f32 %v1724_v0, %v1411_v35  ;;  %v1726_v43 = vpop.f32.mrb[19].mxu1 }
 0x238   : > { %v6642_v58 = vpop.eup %4903  ;;  %v1416_v24 = vpop.permute.xlu0 %1415  ;;  %4923 = vtanh.f32 %v1566_v38  ;;  %v1727_v34 = vadd.f32 %v1726_v43, %v1411_v35  ;;  %4385 = vmatpush1.bf16.msra.mxu1 %v4384_v49 }
 0x239   : > { %v1569_v12 = vpop.f32.mrb[20].mxu0  ;;  %v6644_v44 = vpop.eup %4905  ;;  %4925 = vtanh.f32 %v1725_v20 }
 0x23a   : > { %v1570_v28 = vadd.f32 %v1569_v12, %v1416_v24  ;;  %v1571_v1 = vpop.f32.mrb[21].mxu0  ;;  %v6646_v25 = vpop.eup %4907  ;;  %4927 = vtanh.f32 %v1727_v34  ;;  %v4356_v11 = vpack.c.bf16 %v6644_v44, %v6636_v51 }
 0x23b   : > { %v1730_v15 = vpop.f32.mrb[20].mxu1  ;;  %v1572_v27 = vadd.f32 %v1571_v1, %v1416_v24  ;;  %v6648_v14 = vpop.eup %4909  ;;  %4929 = vtanh.f32 %v1719_v9  ;;  %v4354_v3 = vpack.c.bf16 %v6646_v25, %v6640_v40 }
 0x23c   : > { %v1732_v2 = vpop.f32.mrb[21].mxu1  ;;  %v6652_v61 = vpop.eup %4911  ;;  %4931 = vtanh.f32 %v1570_v28  ;;  %v1731_v60 = vadd.f32 %v1730_v15, %v1416_v24 }
 0x23d   : > { %v1421_v31 = vpop.permute.xlu1 %1420  ;;  %v1733_v29 = vadd.f32 %v1732_v2, %v1416_v24  ;;  %v1575_v57 = vpop.f32.mrb[22].mxu0  ;;  %4933 = vtanh.f32 %v1572_v27  ;;  %4355 = vmatprep.subr.bf16.mxu0 %v4354_v3  ;;  %v4386_v22 = vpack.c.bf16 %v6652_v61, %v6642_v58 }
 0x23e   : > { %v6656_v13 = vpop.eup %4913  ;;  %v1576_v59 = vadd.f32 %v1575_v57, %v1421_v31  ;;  %v1577_v4 = vpop.f32.mrb[23].mxu0  ;;  %4357 = vmatpush1.bf16.msra.mxu0 %v4356_v11 }
 0x23f   : > { %v6660_v42 = vpop.eup %4915  ;;  %4935 = vtanh.f32 %v1733_v29  ;;  %v1736_v35 = vpop.f32.mrb[22].mxu1  ;;  %v1578_v5 = vadd.f32 %v1577_v4, %v1421_v31  ;;  %v4388_v47 = vpack.c.bf16 %v6648_v14, %v6656_v13  ;;  %4387 = vmatprep.subr.bf16.mxu1 %v4386_v22 }
 0x240   : > { %v6664_v55 = vpop.eup %4917  ;;  %4937 = vtanh.f32 %v1576_v59  ;;  %v1737_v62 = vadd.f32 %v1736_v35, %v1421_v31  ;;  %v1738_v63 = vpop.f32.mrb[23].mxu1 }
 0x241   : > { %v6666_v0 = vpop.eup %4919  ;;  %v1426_v38 = vpop.permute.xlu0 %1425  ;;  %4939 = vtanh.f32 %v1578_v5  ;;  %v1739_v49 = vadd.f32 %v1738_v63, %v1421_v31  ;;  %4389 = vmatpush1.bf16.msra.mxu1 %v4388_v47 }
 0x242   : > { %v1581_v9 = vpop.f32.mrb[24].mxu0  ;;  %v6668_v20 = vpop.eup %4921  ;;  %4941 = vtanh.f32 %v1737_v62 }
 0x243   : > { %v1582_v43 = vadd.f32 %v1581_v9, %v1426_v38  ;;  %v1583_v34 = vpop.f32.mrb[25].mxu0  ;;  %v6670_v12 = vpop.eup %4923  ;;  %4943 = vtanh.f32 %v1739_v49  ;;  %v4360_v57 = vpack.c.bf16 %v6668_v20, %v6660_v42 }
 0x244   : > { %v1742_v24 = vpop.f32.mrb[24].mxu1  ;;  %v1584_v28 = vadd.f32 %v1583_v34, %v1426_v38  ;;  %v6672_v1 = vpop.eup %4925  ;;  %4945 = vtanh.f32 %v1731_v60  ;;  %v4358_v27 = vpack.c.bf16 %v6670_v12, %v6664_v55 }
 0x245   : > { %7534 = vst [vmem:[#allocation7_spill] sm:$0xff] %v6672_v1  ;;  %v1744_v15 = vpop.f32.mrb[25].mxu1  ;;  %v6676_v2 = vpop.eup %4927  ;;  %4947 = vtanh.f32 %v1582_v43  ;;  %v1743_v63 = vadd.f32 %v1742_v24, %v1426_v38 }
 0x246   : > { %7535 = vst [vmem:[#allocation8_spill] sm:$0xff] %v6676_v2  ;;  %v1431_v3 = vpop.permute.xlu1 %1430  ;;  %v1745_v31 = vadd.f32 %v1744_v15, %v1426_v38  ;;  %v1587_v29 = vpop.f32.mrb[26].mxu0  ;;  %4949 = vtanh.f32 %v1584_v28  ;;  %4359 = vmatprep.subr.bf16.mxu0 %v4358_v27  ;;  %v4390_v22 = vpack.c.bf16 %v6676_v2, %v6666_v0 }
 0x247   : > { %v6680_v11 = vpop.eup %4929  ;;  %v1588_v59 = vadd.f32 %v1587_v29, %v1431_v3  ;;  %v1589_v4 = vpop.f32.mrb[27].mxu0  ;;  %4361 = vmatpush1.bf16.msra.mxu0 %v4360_v57 }
 0x248   : > { %7536 = vst [vmem:[#allocation9_spill] sm:$0xff] %v6680_v11  ;;  %v6684_v35 = vpop.eup %4931  ;;  %4951 = vtanh.f32 %v1745_v31  ;;  %v1748_v5 = vpop.f32.mrb[26].mxu1  ;;  %v1590_v47 = vadd.f32 %v1589_v4, %v1431_v3  ;;  %v4392_v60 = vpack.c.bf16 %v6672_v1, %v6680_v11  ;;  %4391 = vmatprep.subr.bf16.mxu1 %v4390_v22 }
 0x249   : > { %7537 = vst [vmem:[#allocation10_spill] sm:$0xff] %v6684_v35  ;;  %v6688_v62 = vpop.eup %4933  ;;  %4953 = vtanh.f32 %v1588_v59  ;;  %v1749_v49 = vadd.f32 %v1748_v5, %v1431_v3  ;;  %v1750_v9 = vpop.f32.mrb[27].mxu1 }
 0x24a   : > { %7538 = vst [vmem:[#allocation11_spill] sm:$0xff] %v6688_v62  ;;  %v6690_v43 = vpop.eup %4935  ;;  %v1436_v34 = vpop.permute.xlu0 %1435  ;;  %4955 = vtanh.f32 %v1590_v47  ;;  %v1751_v28 = vadd.f32 %v1750_v9, %v1431_v3  ;;  %4393 = vmatpush1.bf16.msra.mxu1 %v4392_v60 }
 0x24b   : > { %7539 = vst [vmem:[#allocation12_spill] sm:$0xff] %v6690_v43  ;;  %v1593_v15 = vpop.f32.mrb[28].mxu0  ;;  %v6692_v27 = vpop.eup %4937  ;;  %4957 = vtanh.f32 %v1749_v49 }
 0x24c   : > { %7540 = vst [vmem:[#allocation13_spill] sm:$0xff] %v6692_v27  ;;  %v1594_v31 = vadd.f32 %v1593_v15, %v1436_v34  ;;  %v1595_v29 = vpop.f32.mrb[29].mxu0  ;;  %v6694_v57 = vpop.eup %4939  ;;  %4959 = vtanh.f32 %v1751_v28  ;;  %v4364_v49 = vpack.c.bf16 %v6692_v27, %v6684_v35 }
 0x24d   : > { %7541 = vst [vmem:[#allocation14_spill] sm:$0xff] %v6694_v57  ;;  %v1754_v38 = vpop.f32.mrb[28].mxu1  ;;  %v1596_v24 = vadd.f32 %v1595_v29, %v1436_v34  ;;  %v6696_v59 = vpop.eup %4941  ;;  %4961 = vtanh.f32 %v1743_v63  ;;  %v4362_v22 = vpack.c.bf16 %v6694_v57, %v6688_v62 }
 0x24e   : > { %7542 = vst [vmem:[#allocation15_spill] sm:$0xff] %v6696_v59  ;;  %v1756_v4 = vpop.f32.mrb[29].mxu1  ;;  %v6700_v3 = vpop.eup %4943  ;;  %4963 = vtanh.f32 %v1594_v31  ;;  %v1755_v62 = vadd.f32 %v1754_v38, %v1436_v34 }
 0x24f   : > { %7543 = vst [vmem:[#allocation16_spill] sm:$0xff] %v6700_v3  ;;  %v1441_v5 = vpop.permute.xlu1 %1440  ;;  %v1757_v47 = vadd.f32 %v1756_v4, %v1436_v34  ;;  %v1599_v60 = vpop.f32.mrb[30].mxu0  ;;  %4965 = vtanh.f32 %v1596_v24  ;;  %4363 = vmatprep.subr.bf16.mxu0 %v4362_v22  ;;  %v4394_v63 = vpack.c.bf16 %v6700_v3, %v6690_v43 }
 0x250   : > { %v6704_v9 = vpop.eup %4945  ;;  %v1600_v28 = vadd.f32 %v1599_v60, %v1441_v5  ;;  %v1601_v15 = vpop.f32.mrb[31].mxu0  ;;  %4365 = vmatpush1.bf16.msra.mxu0 %v4364_v49 }
 0x251   : > { %7544 = vst [vmem:[#allocation17_spill] sm:$0xff] %v6704_v9  ;;  %v6708_v29 = vpop.eup %4947  ;;  %4967 = vtanh.f32 %v1757_v47  ;;  %v1760_v10 = vpop.f32.mrb[30].mxu1  ;;  %v1602_v57 = vadd.f32 %v1601_v15, %v1441_v5  ;;  %v4396_v31 = vpack.c.bf16 %v6696_v59, %v6704_v9  ;;  %4395 = vmatprep.subr.bf16.mxu1 %v4394_v63 }
 0x252   : > { %7545 = vst [vmem:[#allocation18_spill] sm:$0xff] %v6708_v29  ;;  %v6712_v4 = vpop.eup %4949  ;;  %4969 = vtanh.f32 %v1600_v28  ;;  %v1761_v24 = vadd.f32 %v1760_v10, %v1441_v5  ;;  %v1762_v60 = vpop.f32.mrb[31].mxu1 }
 0x253   : > { %7546 = vst [vmem:[#allocation19_spill] sm:$0xff] %v6712_v4  ;;  %v6714_v22 = vpop.eup %4951  ;;  %4971 = vtanh.f32 %v1602_v57  ;;  %v1763_v3 = vadd.f32 %v1762_v60, %v1441_v5  ;;  %4397 = vmatpush1.bf16.msra.mxu1 %v4396_v31 }
 0x254   : > { %7547 = vst [vmem:[#allocation20_spill] sm:$0xff] %v6714_v22  ;;  %v6716_v43 = vpop.eup %4953  ;;  %4973 = vtanh.f32 %v1761_v24 }
 0x255   : > { %7548 = vst [vmem:[#allocation21_spill] sm:$0xff] %v6716_v43  ;;  %v6718_v47 = vpop.eup %4955  ;;  %4975 = vtanh.f32 %v1763_v3  ;;  %v4368_v38 = vpack.c.bf16 %v6716_v43, %v6708_v29 }
 0x256   : > { %7549 = vst [vmem:[#allocation22_spill] sm:$0xff] %v6718_v47  ;;  %v6720_v49 = vpop.eup %4957  ;;  %4977 = vtanh.f32 %v1755_v62  ;;  %v4366_v34 = vpack.c.bf16 %v6718_v47, %v6712_v4 }
 0x257   : > { %7550 = vst [vmem:[#allocation23_spill] sm:$0xff] %v6720_v49  ;;  %v6724_v10 = vpop.eup %4959 }
 0x258   : > { %7551 = vst [vmem:[#allocation24_spill] sm:$0xff] %v6724_v10  ;;  %v6728_v57 = vpop.eup %4961  ;;  %4367 = vmatprep.subr.bf16.mxu0 %v4366_v34  ;;  %v4398_v5 = vpack.c.bf16 %v6724_v10, %v6714_v22  ;;  %v1893_v10 = vld [vmem:[%s7455_s5] sm:$0xff] }
 0x259   : > { %7552 = vst [vmem:[#allocation25_spill] sm:$0xff] %v6728_v57  ;;  %v6732_v28 = vpop.eup %4963  ;;  %4369 = vmatpush1.bf16.msra.mxu0 %v4368_v38  ;;  %v4400_v62 = vpack.c.bf16 %v6720_v49, %v6728_v57 }
 0x25a   : > { %7553 = vst [vmem:[#allocation26_spill] sm:$0xff] %v6732_v28  ;;  %v6736_v3 = vpop.eup %4965  ;;  %4399 = vmatprep.subr.bf16.mxu1 %v4398_v5 }
 0x25b   : > { %7554 = vst [vmem:[#allocation27_spill] sm:$0xff] %v6736_v3  ;;  %v6738_v15 = vpop.eup %4967  ;;  %4401 = vmatpush1.bf16.msra.mxu1 %v4400_v62 }
 0x25c   : > { %7555 = vst [vmem:[#allocation28_spill] sm:$0xff] %v6738_v15  ;;  %v6740_v63 = vpop.eup %4969 }
 0x25d   : > { %7556 = vst [vmem:[#allocation29_spill] sm:$0xff] %v6740_v63  ;;  %v6742_v31 = vpop.eup %4971  ;;  %v4372_v38 = vpack.c.bf16 %v6740_v63, %v6732_v28 }
 0x25e   : > { %7557 = vst [vmem:[#allocation30_spill] sm:$0xff] %v6742_v31  ;;  %v6744_v24 = vpop.eup %4973  ;;  %v4370_v60 = vpack.c.bf16 %v6742_v31, %v6736_v3  ;;  %v1933_v31 = vpop.permute.xlu1 %1932 }
 0x25f   : > { %7558 = vst [vmem:[#allocation31_spill] sm:$0xff] %v6744_v24  ;;  %v6748_v34 = vpop.eup %4975 }
 0x260   : > { %7559 = vst [vmem:[#allocation32_spill] sm:$0xff] %v6748_v34  ;;  %v6752_v57 = vpop.eup %4977  ;;  %4371 = vmatprep.subr.bf16.mxu0 %v4370_v60  ;;  %v4402_v5 = vpack.c.bf16 %v6748_v34, %v6738_v15  ;;  %v1894_v60 = vld [vmem:[%s7455_s5 + $0x8] sm:$0xff] }
 0x261   : > { %7560 = vst [vmem:[#allocation33_spill] sm:$0xff] %v6752_v57  ;;  %4373 = vmatpush1.bf16.msra.mxu0 %v4372_v38  ;;  %v4404_v62 = vpack.c.bf16 %v6744_v24, %v6752_v57  ;;  %v1895_v38 = vld [vmem:[%s7455_s5 + $0x10] sm:$0xff] }
 0x262   : > { %4403 = vmatprep.subr.bf16.mxu1 %v4402_v5  ;;  %v1896_v5 = vld [vmem:[%s7455_s5 + $0x18] sm:$0xff] }
 0x263   : > { %4405 = vmatpush1.bf16.msra.mxu1 %v4404_v62  ;;  %v1898_v62 = vld [vmem:[%s7455_s5 + $0x28] sm:$0xff] }
 0x264   : > { %2070 = vmatmul.mubr.f32.vlgmr.msra.gmra.mrb[32].mxu0 %v1893_v10 }
 0x265   : > { %2075 = vmatprep.mubr.f32.mxu0 %v7533_v54 }
 0x266   : > { %2231 = vmatmul.mubr.f32.vlgmr.msra.gmra.mrb[32].mxu1 %v1893_v10  ;;  %v1897_v10 = vld [vmem:[%s7455_s5 + $0x20] sm:$0xff] }
 0x267   : > { %2236 = vmatprep.mubr.f32.mxu1 %v7533_v54 }
 0x268   : > { %2076 = vmatmul.mubr.f32.gmra.mrb[34].mxu0 %v1894_v60 }
 0x269   : > { %2081 = vmatprep.mubr.f32.mxu0 %v7533_v54 }
 0x26a   : > { %2237 = vmatmul.mubr.f32.gmra.mrb[34].mxu1 %v1894_v60  ;;  %v1899_v60 = vld [vmem:[%s7455_s5 + $0x30] sm:$0xff] }
 0x26b   : > { %2242 = vmatprep.mubr.f32.mxu1 %v7533_v54 }
 0x26c   : > { %2082 = vmatmul.mubr.f32.gmra.mrb[36].mxu0 %v1895_v38 }
 0x26d   : > { %2087 = vmatprep.mubr.f32.mxu0 %v7533_v54 }
 0x26e   : > { %2243 = vmatmul.mubr.f32.gmra.mrb[36].mxu1 %v1895_v38  ;;  %v1900_v38 = vld [vmem:[%s7455_s5 + $0x38] sm:$0xff] }
 0x26f   : > { %2248 = vmatprep.mubr.f32.mxu1 %v7533_v54 }
 0x270   : > { %2088 = vmatmul.mubr.f32.gmra.mrb[38].mxu0 %v1896_v5 }
 0x271   : > { %2093 = vmatprep.mubr.f32.mxu0 %v7533_v54 }
 0x272   : > { %2249 = vmatmul.mubr.f32.gmra.mrb[38].mxu1 %v1896_v5  ;;  %v1901_v5 = vld [vmem:[%s7455_s5 + $0x40] sm:$0xff] }
 0x273   : > { %2254 = vmatprep.mubr.f32.mxu1 %v7533_v54 }
 0x274   : > { %2094 = vmatmul.mubr.f32.gmra.mrb[40].mxu0 %v1897_v10 }
 0x275   : > { %2099 = vmatprep.mubr.f32.mxu0 %v7533_v54 }
 0x276   : > { %2255 = vmatmul.mubr.f32.gmra.mrb[40].mxu1 %v1897_v10  ;;  %v1902_v10 = vld [vmem:[%s7455_s5 + $0x48] sm:$0xff] }
 0x277   : > { %2260 = vmatprep.mubr.f32.mxu1 %v7533_v54 }
 0x278   : > { %2100 = vmatmul.mubr.f32.gmra.mrb[42].mxu0 %v1898_v62 }
 0x279   : > { %2105 = vmatprep.mubr.f32.mxu0 %v7533_v54 }
 0x27a   : > { %2261 = vmatmul.mubr.f32.gmra.mrb[42].mxu1 %v1898_v62  ;;  %v1903_v62 = vld [vmem:[%s7455_s5 + $0x50] sm:$0xff] }
 0x27b   : > { %2266 = vmatprep.mubr.f32.mxu1 %v7533_v54 }
 0x27c   : > { %2106 = vmatmul.mubr.f32.gmra.mrb[44].mxu0 %v1899_v60 }
 0x27d   : > { %2111 = vmatprep.mubr.f32.mxu0 %v7533_v54 }
 0x27e   : > { %2267 = vmatmul.mubr.f32.gmra.mrb[44].mxu1 %v1899_v60  ;;  %v1904_v60 = vld [vmem:[%s7455_s5 + $0x58] sm:$0xff] }
 0x27f   : > { %2272 = vmatprep.mubr.f32.mxu1 %v7533_v54 }
 0x280   : > { %2112 = vmatmul.mubr.f32.gmra.mrb[46].mxu0 %v1900_v38 }
 0x281   : > { %2117 = vmatprep.mubr.f32.mxu0 %v7533_v54 }
 0x282   : > { %2273 = vmatmul.mubr.f32.gmra.mrb[46].mxu1 %v1900_v38  ;;  %v1905_v38 = vld [vmem:[%s7455_s5 + $0x60] sm:$0xff] }
 0x283   : > { %2278 = vmatprep.mubr.f32.mxu1 %v7533_v54 }
 0x284   : > { %2118 = vmatmul.mubr.f32.gmra.mrb[48].mxu0 %v1901_v5 }
 0x285   : > { %2123 = vmatprep.mubr.f32.mxu0 %v7533_v54 }
 0x286   : > { %2279 = vmatmul.mubr.f32.gmra.mrb[48].mxu1 %v1901_v5  ;;  %v1906_v5 = vld [vmem:[%s7455_s5 + $0x68] sm:$0xff] }
 0x287   : > { %2284 = vmatprep.mubr.f32.mxu1 %v7533_v54 }
 0x288   : > { %2124 = vmatmul.mubr.f32.gmra.mrb[50].mxu0 %v1902_v10 }
 0x289   : > { %2129 = vmatprep.mubr.f32.mxu0 %v7533_v54 }
 0x28a   : > { %2285 = vmatmul.mubr.f32.gmra.mrb[50].mxu1 %v1902_v10  ;;  %v1907_v10 = vld [vmem:[%s7455_s5 + $0x70] sm:$0xff] }
 0x28b   : > { %2290 = vmatprep.mubr.f32.mxu1 %v7533_v54 }
 0x28c   : > { %2130 = vmatmul.mubr.f32.gmra.mrb[52].mxu0 %v1903_v62 }
 0x28d   : > { %2135 = vmatprep.mubr.f32.mxu0 %v7533_v54 }
 0x28e   : > { %2291 = vmatmul.mubr.f32.gmra.mrb[52].mxu1 %v1903_v62  ;;  %v1908_v62 = vld [vmem:[%s7455_s5 + $0x78] sm:$0xff] }
 0x28f   : > { %2296 = vmatprep.mubr.f32.mxu1 %v7533_v54 }
 0x290   : > { %2136 = vmatmul.mubr.f32.gmra.mrb[54].mxu0 %v1904_v60 }
 0x291   : > { %2141 = vmatprep.mubr.f32.mxu0 %v7533_v54 }
 0x292   : > { %2297 = vmatmul.mubr.f32.gmra.mrb[54].mxu1 %v1904_v60  ;;  %v1928_v60 = vpop.permute.xlu0 %1927 }
 0x293   : > { %2302 = vmatprep.mubr.f32.mxu1 %v7533_v54 }
 0x294   : > { %2142 = vmatmul.mubr.f32.gmra.mrb[56].mxu0 %v1905_v38 }
 0x295   : > { %2147 = vmatprep.mubr.f32.mxu0 %v7533_v54 }
 0x296   : > { %2303 = vmatmul.mubr.f32.gmra.mrb[56].mxu1 %v1905_v38 }
 0x297   : > { %2308 = vmatprep.mubr.f32.mxu1 %v7533_v54 }
 0x298   : > { %2148 = vmatmul.mubr.f32.gmra.mrb[58].mxu0 %v1906_v5 }
 0x299   : > { %2153 = vmatprep.mubr.f32.mxu0 %v7533_v54 }
 0x29a   : > { %2309 = vmatmul.mubr.f32.gmra.mrb[58].mxu1 %v1906_v5 }
 0x29b   : > { %2314 = vmatprep.mubr.f32.mxu1 %v7533_v54 }
 0x29c   : > { %2154 = vmatmul.mubr.f32.gmra.mrb[60].mxu0 %v1907_v10 }
 0x29d   : > { %2159 = vmatprep.mubr.f32.mxu0 %v7533_v54 }
 0x29e   : > { %2315 = vmatmul.mubr.f32.gmra.mrb[60].mxu1 %v1907_v10 }
 0x29f   : > { %2320 = vmatprep.mubr.f32.mxu1 %v7533_v54 }
 0x2a0   : > { %2160 = vmatmul.mubr.f32.gmra.mrb[62].mxu0 %v1908_v62 }
 0x2a1   : > { %2567 = vmatprep.mubr.f32.mxu0 %v7533_v54 }
 0x2a2   : > { %2321 = vmatmul.mubr.f32.gmra.mrb[62].mxu1 %v1908_v62 }
 0x2a3   : > { %2728 = vmatprep.mubr.f32.mxu1 %v7533_v54 }
 0x337   : > { %v2071_v38 = vpop.f32.mrb[32].mxu0 }
 0x338   : > { %v2072_v5 = vadd.f32 %v2071_v38, %v1928_v60  ;;  %v2073_v57 = vpop.f32.mrb[33].mxu0  ;;  %v1938_v38 = vpop.permute.xlu0 %1937 }
 0x339   : > { %v2232_v34 = vpop.f32.mrb[32].mxu1  ;;  %v2074_v15 = vadd.f32 %v2073_v57, %v1928_v60 }
 0x33a   : > { %4979 = vtanh.f32 %v2072_v5  ;;  %v2233_v24 = vadd.f32 %v2232_v34, %v1928_v60  ;;  %v2234_v28 = vpop.f32.mrb[33].mxu1 }
 0x33b   : > { %4981 = vtanh.f32 %v2074_v15  ;;  %v2235_v10 = vadd.f32 %v2234_v28, %v1928_v60  ;;  %v2077_v3 = vpop.f32.mrb[34].mxu0  ;;  %v1943_v60 = vpop.permute.xlu1 %1942 }
 0x33c   : > { %4983 = vtanh.f32 %v2233_v24  ;;  %v2078_v63 = vadd.f32 %v2077_v3, %v1933_v31  ;;  %v2079_v22 = vpop.f32.mrb[35].mxu0 }
 0x33d   : > { %4985 = vtanh.f32 %v2235_v10  ;;  %v2238_v62 = vpop.f32.mrb[34].mxu1  ;;  %v2080_v49 = vadd.f32 %v2079_v22, %v1933_v31 }
 0x33e   : > { %4987 = vtanh.f32 %v2078_v63  ;;  %v2239_v29 = vadd.f32 %v2238_v62, %v1933_v31  ;;  %v2240_v47 = vpop.f32.mrb[35].mxu1 }
 0x33f   : > { %4989 = vtanh.f32 %v2080_v49  ;;  %v2241_v4 = vadd.f32 %v2240_v47, %v1933_v31  ;;  %v2083_v57 = vpop.f32.mrb[36].mxu0  ;;  %v1953_v11 = vpop.permute.xlu1 %1952 }
 0x340   : > { %4991 = vtanh.f32 %v2239_v29  ;;  %v2084_v34 = vadd.f32 %v2083_v57, %v1938_v38  ;;  %v2085_v5 = vpop.f32.mrb[37].mxu0 }
 0x341   : > { %4993 = vtanh.f32 %v2241_v4  ;;  %v2244_v15 = vpop.f32.mrb[36].mxu1  ;;  %v2086_v28 = vadd.f32 %v2085_v5, %v1938_v38 }
 0x342   : > { %4995 = vtanh.f32 %v2084_v34  ;;  %v2245_v24 = vadd.f32 %v2244_v15, %v1938_v38  ;;  %v2246_v3 = vpop.f32.mrb[37].mxu1  ;;  %v1948_v34 = vpop.permute.xlu0 %1947 }
 0x343   : > { %4997 = vtanh.f32 %v2086_v28  ;;  %v2247_v10 = vadd.f32 %v2246_v3, %v1938_v38  ;;  %v2089_v22 = vpop.f32.mrb[38].mxu0 }
 0x344   : > { %v4980_v63 = vpop.eup %4979  ;;  %4999 = vtanh.f32 %v2245_v24  ;;  %v2090_v62 = vadd.f32 %v2089_v22, %v1943_v60  ;;  %v2091_v43 = vpop.f32.mrb[39].mxu0 }
 0x345   : > { %v4982_v49 = vpop.eup %4981  ;;  %5001 = vtanh.f32 %v2247_v10  ;;  %v2250_v47 = vpop.f32.mrb[38].mxu1  ;;  %v2092_v29 = vadd.f32 %v2091_v43, %v1943_v60 }
 0x346   : > { %v4984_v31 = vpop.eup %4983  ;;  %5003 = vtanh.f32 %v2090_v62  ;;  %v2251_v4 = vadd.f32 %v2250_v47, %v1943_v60  ;;  %v2252_v57 = vpop.f32.mrb[39].mxu1 }
 0x347   : > { %v4986_v5 = vpop.eup %4985  ;;  %5005 = vtanh.f32 %v2092_v29  ;;  %v2253_v15 = vadd.f32 %v2252_v57, %v1943_v60  ;;  %v2095_v9 = vpop.f32.mrb[40].mxu0 }
 0x348   : > { %v4988_v28 = vpop.eup %4987  ;;  %5007 = vtanh.f32 %v2251_v4  ;;  %v2096_v38 = vadd.f32 %v2095_v9, %v1948_v34  ;;  %v2097_v3 = vpop.f32.mrb[41].mxu0 }
 0x349   : > { %v4990_v24 = vpop.eup %4989  ;;  %5009 = vtanh.f32 %v2253_v15  ;;  %v2256_v22 = vpop.f32.mrb[40].mxu1  ;;  %v2098_v59 = vadd.f32 %v2097_v3, %v1948_v34  ;;  %v4408_v10 = vpack.c.bf16 %v4988_v28, %v4980_v63 }
 0x34a   : > { %v4992_v27 = vpop.eup %4991  ;;  %5011 = vtanh.f32 %v2096_v38  ;;  %v2257_v43 = vadd.f32 %v2256_v22, %v1948_v34  ;;  %v2258_v62 = vpop.f32.mrb[41].mxu1  ;;  %v4406_v47 = vpack.c.bf16 %v4990_v24, %v4982_v49 }
 0x34b   : > { %v4994_v35 = vpop.eup %4993  ;;  %5013 = vtanh.f32 %v2098_v59  ;;  %v2259_v29 = vadd.f32 %v2258_v62, %v1948_v34  ;;  %v2101_v60 = vpop.f32.mrb[42].mxu0  ;;  %v4440_v57 = vpack.c.bf16 %v4992_v27, %v4984_v31 }
 0x34c   : > { %v4996_v2 = vpop.eup %4995  ;;  %5015 = vtanh.f32 %v2257_v43  ;;  %v2102_v9 = vadd.f32 %v2101_v60, %v1953_v11  ;;  %v2103_v4 = vpop.f32.mrb[43].mxu0  ;;  %4407 = vmatprep.subr.bf16.mxu0 %v4406_v47  ;;  %v4438_v15 = vpack.c.bf16 %v4994_v35, %v4986_v5 }
 0x34d   : > { %v4998_v1 = vpop.eup %4997  ;;  %5017 = vtanh.f32 %v2259_v29  ;;  %v2262_v63 = vpop.f32.mrb[42].mxu1  ;;  %v2104_v28 = vadd.f32 %v2103_v4, %v1953_v11  ;;  %4409 = vmatpush1.bf16.msra.mxu0 %v4408_v10 }
 0x34e   : > { %v5000_v38 = vpop.eup %4999  ;;  %5019 = vtanh.f32 %v2102_v9  ;;  %v2263_v49 = vadd.f32 %v2262_v63, %v1953_v11  ;;  %v2264_v3 = vpop.f32.mrb[43].mxu1  ;;  %4439 = vmatprep.subr.bf16.mxu1 %v4438_v15 }
 0x34f   : > { %v5002_v59 = vpop.eup %5001  ;;  %v1958_v34 = vpop.permute.xlu0 %1957  ;;  %5021 = vtanh.f32 %v2104_v28  ;;  %v2265_v27 = vadd.f32 %v2264_v3, %v1953_v11  ;;  %4441 = vmatpush1.bf16.msra.mxu1 %v4440_v57 }
 0x350   : > { %v2107_v31 = vpop.f32.mrb[44].mxu0  ;;  %v5004_v24 = vpop.eup %5003  ;;  %5023 = vtanh.f32 %v2263_v49 }
 0x351   : > { %v2108_v22 = vadd.f32 %v2107_v31, %v1958_v34  ;;  %v2109_v35 = vpop.f32.mrb[45].mxu0  ;;  %v5006_v5 = vpop.eup %5005  ;;  %5025 = vtanh.f32 %v2265_v27  ;;  %v4412_v10 = vpack.c.bf16 %v5004_v24, %v4996_v2 }
 0x352   : > { %v2268_v43 = vpop.f32.mrb[44].mxu1  ;;  %v2110_v62 = vadd.f32 %v2109_v35, %v1958_v34  ;;  %v5008_v47 = vpop.eup %5007  ;;  %v4410_v9 = vpack.c.bf16 %v5006_v5, %v4998_v1 }
 0x353   : > { %5027 = vtanh.f32 %v2108_v22  ;;  %v2269_v29 = vadd.f32 %v2268_v43, %v1958_v34  ;;  %v2270_v60 = vpop.f32.mrb[45].mxu1  ;;  %v5010_v4 = vpop.eup %5009  ;;  %v4444_v63 = vpack.c.bf16 %v5008_v47, %v5000_v38 }
 0x354   : > { %v1963_v15 = vpop.permute.xlu1 %1962  ;;  %5029 = vtanh.f32 %v2110_v62  ;;  %v2271_v11 = vadd.f32 %v2270_v60, %v1958_v34  ;;  %v2113_v57 = vpop.f32.mrb[46].mxu0  ;;  %4411 = vmatprep.subr.bf16.mxu0 %v4410_v9  ;;  %v4442_v27 = vpack.c.bf16 %v5010_v4, %v5002_v59 }
 0x355   : > { %v5012_v28 = vpop.eup %5011  ;;  %5031 = vtanh.f32 %v2269_v29  ;;  %v2114_v49 = vadd.f32 %v2113_v57, %v1963_v15  ;;  %v2115_v3 = vpop.f32.mrb[47].mxu0  ;;  %4413 = vmatpush1.bf16.msra.mxu0 %v4412_v10 }
 0x356   : > { %v5014_v31 = vpop.eup %5013  ;;  %5033 = vtanh.f32 %v2271_v11  ;;  %v2274_v2 = vpop.f32.mrb[46].mxu1  ;;  %v2116_v24 = vadd.f32 %v2115_v3, %v1963_v15  ;;  %4443 = vmatprep.subr.bf16.mxu1 %v4442_v27 }
 0x357   : > { %v5016_v22 = vpop.eup %5015  ;;  %5035 = vtanh.f32 %v2114_v49  ;;  %v2275_v1 = vadd.f32 %v2274_v2, %v1963_v15  ;;  %v2276_v35 = vpop.f32.mrb[47].mxu1  ;;  %4445 = vmatpush1.bf16.msra.mxu1 %v4444_v63 }
 0x358   : > { %v5018_v5 = vpop.eup %5017  ;;  %v1968_v34 = vpop.permute.xlu0 %1967  ;;  %5037 = vtanh.f32 %v2116_v24  ;;  %v2277_v38 = vadd.f32 %v2276_v35, %v1963_v15 }
 0x359   : > { %v2119_v43 = vpop.f32.mrb[48].mxu0  ;;  %v5020_v62 = vpop.eup %5019  ;;  %5039 = vtanh.f32 %v2275_v1 }
 0x35a   : > { %v2120_v47 = vadd.f32 %v2119_v43, %v1968_v34  ;;  %v2121_v59 = vpop.f32.mrb[49].mxu0  ;;  %v5022_v29 = vpop.eup %5021  ;;  %5041 = vtanh.f32 %v2277_v38  ;;  %v4416_v10 = vpack.c.bf16 %v5020_v62, %v5012_v28 }
 0x35b   : > { %v2280_v60 = vpop.f32.mrb[48].mxu1  ;;  %v2122_v9 = vadd.f32 %v2121_v59, %v1968_v34  ;;  %v5024_v4 = vpop.eup %5023  ;;  %v4414_v49 = vpack.c.bf16 %v5022_v29, %v5014_v31 }
 0x35c   : > { %5043 = vtanh.f32 %v2120_v47  ;;  %v2281_v11 = vadd.f32 %v2280_v60, %v1968_v34  ;;  %v2282_v57 = vpop.f32.mrb[49].mxu1  ;;  %v5026_v3 = vpop.eup %5025  ;;  %v4448_v2 = vpack.c.bf16 %v5024_v4, %v5016_v22 }
 0x35d   : > { %v1973_v27 = vpop.permute.xlu1 %1972  ;;  %5045 = vtanh.f32 %v2122_v9  ;;  %v2283_v15 = vadd.f32 %v2282_v57, %v1968_v34  ;;  %v2125_v63 = vpop.f32.mrb[50].mxu0  ;;  %4415 = vmatprep.subr.bf16.mxu0 %v4414_v49  ;;  %v4446_v38 = vpack.c.bf16 %v5026_v3, %v5018_v5 }
 0x35e   : > { %v5028_v24 = vpop.eup %5027  ;;  %5047 = vtanh.f32 %v2281_v11  ;;  %v2126_v1 = vadd.f32 %v2125_v63, %v1973_v27  ;;  %v2127_v35 = vpop.f32.mrb[51].mxu0  ;;  %4417 = vmatpush1.bf16.msra.mxu0 %v4416_v10 }
 0x35f   : > { %v5030_v43 = vpop.eup %5029  ;;  %5049 = vtanh.f32 %v2283_v15  ;;  %v2286_v28 = vpop.f32.mrb[50].mxu1  ;;  %v2128_v62 = vadd.f32 %v2127_v35, %v1973_v27  ;;  %4447 = vmatprep.subr.bf16.mxu1 %v4446_v38 }
 0x360   : > { %v5032_v47 = vpop.eup %5031  ;;  %5051 = vtanh.f32 %v2126_v1  ;;  %v2287_v31 = vadd.f32 %v2286_v28, %v1973_v27  ;;  %v2288_v59 = vpop.f32.mrb[51].mxu1  ;;  %4449 = vmatpush1.bf16.msra.mxu1 %v4448_v2 }
 0x361   : > { %v5034_v29 = vpop.eup %5033  ;;  %v1978_v34 = vpop.permute.xlu0 %1977  ;;  %5053 = vtanh.f32 %v2128_v62  ;;  %v2289_v22 = vadd.f32 %v2288_v59, %v1973_v27 }
 0x362   : > { %v2131_v60 = vpop.f32.mrb[52].mxu0  ;;  %v5036_v9 = vpop.eup %5035  ;;  %5055 = vtanh.f32 %v2287_v31 }
 0x363   : > { %v2132_v4 = vadd.f32 %v2131_v60, %v1978_v34  ;;  %v2133_v5 = vpop.f32.mrb[53].mxu0  ;;  %v5038_v11 = vpop.eup %5037  ;;  %5057 = vtanh.f32 %v2289_v22  ;;  %v4420_v10 = vpack.c.bf16 %v5036_v9, %v5028_v24 }
 0x364   : > { %v2292_v57 = vpop.f32.mrb[52].mxu1  ;;  %v2134_v49 = vadd.f32 %v2133_v5, %v1978_v34  ;;  %v5040_v3 = vpop.eup %5039  ;;  %v4418_v1 = vpack.c.bf16 %v5038_v11, %v5030_v43 }
 0x365   : > { %5059 = vtanh.f32 %v2132_v4  ;;  %v2293_v15 = vadd.f32 %v2292_v57, %v1978_v34  ;;  %v2294_v63 = vpop.f32.mrb[53].mxu1  ;;  %v5042_v35 = vpop.eup %5041  ;;  %v4452_v28 = vpack.c.bf16 %v5040_v3, %v5032_v47 }
 0x366   : > { %v1983_v38 = vpop.permute.xlu1 %1982  ;;  %5061 = vtanh.f32 %v2134_v49  ;;  %v2295_v27 = vadd.f32 %v2294_v63, %v1978_v34  ;;  %v2137_v2 = vpop.f32.mrb[54].mxu0  ;;  %4419 = vmatprep.subr.bf16.mxu0 %v4418_v1  ;;  %v4450_v22 = vpack.c.bf16 %v5042_v35, %v5034_v29 }
 0x367   : > { %v5044_v62 = vpop.eup %5043  ;;  %5063 = vtanh.f32 %v2293_v15  ;;  %v2138_v31 = vadd.f32 %v2137_v2, %v1983_v38  ;;  %v2139_v59 = vpop.f32.mrb[55].mxu0  ;;  %4421 = vmatpush1.bf16.msra.mxu0 %v4420_v10 }
 0x368   : > { %v5046_v60 = vpop.eup %5045  ;;  %5065 = vtanh.f32 %v2295_v27  ;;  %v2298_v24 = vpop.f32.mrb[54].mxu1  ;;  %v2140_v9 = vadd.f32 %v2139_v59, %v1983_v38  ;;  %4451 = vmatprep.subr.bf16.mxu1 %v4450_v22 }
 0x369   : > { %v5048_v4 = vpop.eup %5047  ;;  %5067 = vtanh.f32 %v2138_v31  ;;  %v2299_v43 = vadd.f32 %v2298_v24, %v1983_v38  ;;  %v2300_v5 = vpop.f32.mrb[55].mxu1  ;;  %4453 = vmatpush1.bf16.msra.mxu1 %v4452_v28 }
 0x36a   : > { %v5050_v11 = vpop.eup %5049  ;;  %v1988_v34 = vpop.permute.xlu0 %1987  ;;  %5069 = vtanh.f32 %v2140_v9  ;;  %v2301_v47 = vadd.f32 %v2300_v5, %v1983_v38 }
 0x36b   : > { %v2143_v57 = vpop.f32.mrb[56].mxu0  ;;  %v5052_v49 = vpop.eup %5051  ;;  %5071 = vtanh.f32 %v2299_v43 }
 0x36c   : > { %v2144_v3 = vadd.f32 %v2143_v57, %v1988_v34  ;;  %v2145_v29 = vpop.f32.mrb[57].mxu0  ;;  %v5054_v15 = vpop.eup %5053  ;;  %5073 = vtanh.f32 %v2301_v47  ;;  %v4424_v10 = vpack.c.bf16 %v5052_v49, %v5044_v62 }
 0x36d   : > { %v2304_v63 = vpop.f32.mrb[56].mxu1  ;;  %v2146_v1 = vadd.f32 %v2145_v29, %v1988_v34  ;;  %v5056_v35 = vpop.eup %5055  ;;  %v4422_v31 = vpack.c.bf16 %v5054_v15, %v5046_v60 }
 0x36e   : > { %5075 = vtanh.f32 %v2144_v3  ;;  %v2305_v27 = vadd.f32 %v2304_v63, %v1988_v34  ;;  %v2306_v2 = vpop.f32.mrb[57].mxu1  ;;  %v5058_v59 = vpop.eup %5057  ;;  %v4456_v24 = vpack.c.bf16 %v5056_v35, %v5048_v4 }
 0x36f   : > { %v1993_v22 = vpop.permute.xlu1 %1992  ;;  %5077 = vtanh.f32 %v2146_v1  ;;  %v2307_v38 = vadd.f32 %v2306_v2, %v1988_v34  ;;  %v2149_v28 = vpop.f32.mrb[58].mxu0  ;;  %4423 = vmatprep.subr.bf16.mxu0 %v4422_v31  ;;  %v4454_v47 = vpack.c.bf16 %v5058_v59, %v5050_v11 }
 0x370   : > { %v5060_v9 = vpop.eup %5059  ;;  %5079 = vtanh.f32 %v2305_v27  ;;  %v2150_v43 = vadd.f32 %v2149_v28, %v1993_v22  ;;  %v2151_v5 = vpop.f32.mrb[59].mxu0  ;;  %4425 = vmatpush1.bf16.msra.mxu0 %v4424_v10 }
 0x371   : > { %v5062_v57 = vpop.eup %5061  ;;  %5081 = vtanh.f32 %v2307_v38  ;;  %v2310_v62 = vpop.f32.mrb[58].mxu1  ;;  %v2152_v49 = vadd.f32 %v2151_v5, %v1993_v22  ;;  %4455 = vmatprep.subr.bf16.mxu1 %v4454_v47 }
 0x372   : > { %v5064_v3 = vpop.eup %5063  ;;  %5083 = vtanh.f32 %v2150_v43  ;;  %v2311_v60 = vadd.f32 %v2310_v62, %v1993_v22  ;;  %v2312_v29 = vpop.f32.mrb[59].mxu1  ;;  %4457 = vmatpush1.bf16.msra.mxu1 %v4456_v24 }
 0x373   : > { %v5066_v15 = vpop.eup %5065  ;;  %v1998_v34 = vpop.permute.xlu0 %1997  ;;  %5085 = vtanh.f32 %v2152_v49  ;;  %v2313_v4 = vadd.f32 %v2312_v29, %v1993_v22 }
 0x374   : > { %v2155_v63 = vpop.f32.mrb[60].mxu0  ;;  %v5068_v1 = vpop.eup %5067  ;;  %5087 = vtanh.f32 %v2311_v60 }
 0x375   : > { %v2156_v35 = vadd.f32 %v2155_v63, %v1998_v34  ;;  %v2157_v11 = vpop.f32.mrb[61].mxu0  ;;  %v5070_v27 = vpop.eup %5069  ;;  %5089 = vtanh.f32 %v2313_v4  ;;  %v4428_v10 = vpack.c.bf16 %v5068_v1, %v5060_v9 }
 0x376   : > { %v2316_v2 = vpop.f32.mrb[60].mxu1  ;;  %v2158_v31 = vadd.f32 %v2157_v11, %v1998_v34  ;;  %v5072_v59 = vpop.eup %5071  ;;  %v4426_v43 = vpack.c.bf16 %v5070_v27, %v5062_v57 }
 0x377   : > { %5091 = vtanh.f32 %v2156_v35  ;;  %v2317_v38 = vadd.f32 %v2316_v2, %v1998_v34  ;;  %v2318_v28 = vpop.f32.mrb[61].mxu1  ;;  %v5074_v5 = vpop.eup %5073  ;;  %v4460_v62 = vpack.c.bf16 %v5072_v59, %v5064_v3 }
 0x378   : > { %v2003_v47 = vpop.permute.xlu1 %2002  ;;  %5093 = vtanh.f32 %v2158_v31  ;;  %v2319_v22 = vadd.f32 %v2318_v28, %v1998_v34  ;;  %v2161_v24 = vpop.f32.mrb[62].mxu0  ;;  %4427 = vmatprep.subr.bf16.mxu0 %v4426_v43  ;;  %v4458_v4 = vpack.c.bf16 %v5074_v5, %v5066_v15 }
 0x379   : > { %v5076_v49 = vpop.eup %5075  ;;  %5095 = vtanh.f32 %v2317_v38  ;;  %v2162_v60 = vadd.f32 %v2161_v24, %v2003_v47  ;;  %v2163_v29 = vpop.f32.mrb[63].mxu0  ;;  %4429 = vmatpush1.bf16.msra.mxu0 %v4428_v10 }
 0x37a   : > { %v5078_v63 = vpop.eup %5077  ;;  %5097 = vtanh.f32 %v2319_v22  ;;  %v2322_v9 = vpop.f32.mrb[62].mxu1  ;;  %v2164_v1 = vadd.f32 %v2163_v29, %v2003_v47  ;;  %4459 = vmatprep.subr.bf16.mxu1 %v4458_v4 }
 0x37b   : > { %v5080_v35 = vpop.eup %5079  ;;  %5099 = vtanh.f32 %v2162_v60  ;;  %v2323_v57 = vadd.f32 %v2322_v9, %v2003_v47  ;;  %v2324_v11 = vpop.f32.mrb[63].mxu1  ;;  %4461 = vmatpush1.bf16.msra.mxu1 %v4460_v62 }
 0x37c   : > { %v5082_v27 = vpop.eup %5081  ;;  %5101 = vtanh.f32 %v2164_v1  ;;  %v2325_v34 = vadd.f32 %v2324_v11, %v2003_v47  ;;  %v2391_v1 = vld [vmem:[%s7457_s7] sm:$0xff]  ;;  %v2394_v11 = vld [vmem:[%s7457_s7 + $0x18] sm:$0xff] }
 0x37d   : > { %v5084_v3 = vpop.eup %5083  ;;  %5103 = vtanh.f32 %v2323_v57  ;;  %v2393_v57 = vld [vmem:[%s7457_s7 + $0x10] sm:$0xff] }
 0x37e   : > { %v5086_v2 = vpop.eup %5085  ;;  %5105 = vtanh.f32 %v2325_v34  ;;  %v4432_v31 = vpack.c.bf16 %v5084_v3, %v5076_v49  ;;  %v2396_v34 = vld [vmem:[%s7457_s7 + $0x28] sm:$0xff]  ;;  %v2397_v3 = vld [vmem:[%s7457_s7 + $0x30] sm:$0xff] }
 0x37f   : > { %v5088_v15 = vpop.eup %5087  ;;  %v4430_v59 = vpack.c.bf16 %v5086_v2, %v5078_v63  ;;  %v2398_v2 = vld [vmem:[%s7457_s7 + $0x38] sm:$0xff] }
 0x380   : > { %v5090_v38 = vpop.eup %5089  ;;  %v4464_v28 = vpack.c.bf16 %v5088_v15, %v5080_v35  ;;  %v2392_v35 = vld [vmem:[%s7457_s7 + $0x8] sm:$0xff] }
 0x381   : > { %v5092_v43 = vpop.eup %5091  ;;  %4431 = vmatprep.subr.bf16.mxu0 %v4430_v59  ;;  %v4462_v10 = vpack.c.bf16 %v5090_v38, %v5082_v27  ;;  %v2395_v27 = vld [vmem:[%s7457_s7 + $0x20] sm:$0xff]  ;;  %v2400_v15 = vld [vmem:[%s7457_s7 + $0x48] sm:$0xff]  ;;  %v2401_v59 = vld [vmem:[%s7457_s7 + $0x50] sm:$0xff] }
 0x382   : > { %v5094_v5 = vpop.eup %5093  ;;  %4433 = vmatpush1.bf16.msra.mxu0 %v4432_v31  ;;  %v2399_v31 = vld [vmem:[%s7457_s7 + $0x40] sm:$0xff]  ;;  %v2402_v38 = vld [vmem:[%s7457_s7 + $0x58] sm:$0xff] }
 0x383   : > { %v5096_v22 = vpop.eup %5095  ;;  %4463 = vmatprep.subr.bf16.mxu1 %v4462_v10  ;;  %v2405_v10 = vld [vmem:[%s7457_s7 + $0x70] sm:$0xff] }
 0x384   : > { %v5098_v24 = vpop.eup %5097  ;;  %4465 = vmatpush1.bf16.msra.mxu1 %v4464_v28  ;;  %v2403_v28 = vld [vmem:[%s7457_s7 + $0x60] sm:$0xff] }
 0x385   : > { %v5100_v47 = vpop.eup %5099 }
 0x386   : > { %v5102_v62 = vpop.eup %5101  ;;  %v4436_v60 = vpack.c.bf16 %v5100_v47, %v5092_v43  ;;  %v2404_v43 = vld [vmem:[%s7457_s7 + $0x68] sm:$0xff] }
 0x387   : > { %v5104_v29 = vpop.eup %5103  ;;  %v4434_v4 = vpack.c.bf16 %v5102_v62, %v5094_v5  ;;  %v2406_v5 = vld [vmem:[%s7457_s7 + $0x78] sm:$0xff] }
 0x388   : > { %v5106_v9 = vpop.eup %5105  ;;  %v4468_v49 = vpack.c.bf16 %v5104_v29, %v5096_v22  ;;  %v2426_v22 = vpop.permute.xlu0 %2425 }
 0x389   : > { %4435 = vmatprep.subr.bf16.mxu0 %v4434_v4  ;;  %v4466_v63 = vpack.c.bf16 %v5106_v9, %v5098_v24 }
 0x38a   : > { %4437 = vmatpush1.bf16.msra.mxu0 %v4436_v60 }
 0x38b   : > { %4467 = vmatprep.subr.bf16.mxu1 %v4466_v63 }
 0x38c   : > { %4469 = vmatpush1.bf16.msra.mxu1 %v4468_v49  ;;  %v2431_v49 = vpop.permute.xlu1 %2430 }
 0x38d   : > { %2568 = vmatmul.mubr.f32.vlgmr.msra.gmra.mrb[64].mxu0 %v2391_v1 }
 0x38e   : > { %2573 = vmatprep.mubr.f32.mxu0 %v7533_v54 }
 0x38f   : > { %2729 = vmatmul.mubr.f32.vlgmr.msra.gmra.mrb[64].mxu1 %v2391_v1 }
 0x390   : > { %2734 = vmatprep.mubr.f32.mxu1 %v7533_v54 }
 0x391   : > { %2574 = vmatmul.mubr.f32.gmra.mrb[66].mxu0 %v2392_v35 }
 0x392   : > { %2579 = vmatprep.mubr.f32.mxu0 %v7533_v54 }
 0x393   : > { %2735 = vmatmul.mubr.f32.gmra.mrb[66].mxu1 %v2392_v35 }
 0x394   : > { %2740 = vmatprep.mubr.f32.mxu1 %v7533_v54 }
 0x395   : > { %2580 = vmatmul.mubr.f32.gmra.mrb[68].mxu0 %v2393_v57 }
 0x396   : > { %2585 = vmatprep.mubr.f32.mxu0 %v7533_v54 }
 0x397   : > { %2741 = vmatmul.mubr.f32.gmra.mrb[68].mxu1 %v2393_v57 }
 0x398   : > { %2746 = vmatprep.mubr.f32.mxu1 %v7533_v54 }
 0x399   : > { %2586 = vmatmul.mubr.f32.gmra.mrb[70].mxu0 %v2394_v11 }
 0x39a   : > { %2591 = vmatprep.mubr.f32.mxu0 %v7533_v54 }
 0x39b   : > { %2747 = vmatmul.mubr.f32.gmra.mrb[70].mxu1 %v2394_v11 }
 0x39c   : > { %2752 = vmatprep.mubr.f32.mxu1 %v7533_v54 }
 0x39d   : > { %2592 = vmatmul.mubr.f32.gmra.mrb[72].mxu0 %v2395_v27 }
 0x39e   : > { %2597 = vmatprep.mubr.f32.mxu0 %v7533_v54 }
 0x39f   : > { %2753 = vmatmul.mubr.f32.gmra.mrb[72].mxu1 %v2395_v27 }
 0x3a0   : > { %2758 = vmatprep.mubr.f32.mxu1 %v7533_v54 }
 0x3a1   : > { %2598 = vmatmul.mubr.f32.gmra.mrb[74].mxu0 %v2396_v34 }
 0x3a2   : > { %2603 = vmatprep.mubr.f32.mxu0 %v7533_v54 }
 0x3a3   : > { %2759 = vmatmul.mubr.f32.gmra.mrb[74].mxu1 %v2396_v34 }
 0x3a4   : > { %2764 = vmatprep.mubr.f32.mxu1 %v7533_v54 }
 0x3a5   : > { %2604 = vmatmul.mubr.f32.gmra.mrb[76].mxu0 %v2397_v3 }
 0x3a6   : > { %2609 = vmatprep.mubr.f32.mxu0 %v7533_v54 }
 0x3a7   : > { %2765 = vmatmul.mubr.f32.gmra.mrb[76].mxu1 %v2397_v3 }
 0x3a8   : > { %2770 = vmatprep.mubr.f32.mxu1 %v7533_v54 }
 0x3a9   : > { %2610 = vmatmul.mubr.f32.gmra.mrb[78].mxu0 %v2398_v2 }
 0x3aa   : > { %2615 = vmatprep.mubr.f32.mxu0 %v7533_v54 }
 0x3ab   : > { %2771 = vmatmul.mubr.f32.gmra.mrb[78].mxu1 %v2398_v2  ;;  %v2436_v2 = vpop.permute.xlu0 %2435 }
 0x3ac   : > { %2776 = vmatprep.mubr.f32.mxu1 %v7533_v54 }
 0x3ad   : > { %2616 = vmatmul.mubr.f32.gmra.mrb[80].mxu0 %v2399_v31 }
 0x3ae   : > { %2621 = vmatprep.mubr.f32.mxu0 %v7533_v54 }
 0x3af   : > { %2777 = vmatmul.mubr.f32.gmra.mrb[80].mxu1 %v2399_v31 }
 0x3b0   : > { %2782 = vmatprep.mubr.f32.mxu1 %v7533_v54 }
 0x3b1   : > { %2622 = vmatmul.mubr.f32.gmra.mrb[82].mxu0 %v2400_v15 }
 0x3b2   : > { %2627 = vmatprep.mubr.f32.mxu0 %v7533_v54 }
 0x3b3   : > { %2783 = vmatmul.mubr.f32.gmra.mrb[82].mxu1 %v2400_v15 }
 0x3b4   : > { %2788 = vmatprep.mubr.f32.mxu1 %v7533_v54 }
 0x3b5   : > { %2628 = vmatmul.mubr.f32.gmra.mrb[84].mxu0 %v2401_v59 }
 0x3b6   : > { %2633 = vmatprep.mubr.f32.mxu0 %v7533_v54 }
 0x3b7   : > { %2789 = vmatmul.mubr.f32.gmra.mrb[84].mxu1 %v2401_v59 }
 0x3b8   : > { %2794 = vmatprep.mubr.f32.mxu1 %v7533_v54 }
 0x3b9   : > { %2634 = vmatmul.mubr.f32.gmra.mrb[86].mxu0 %v2402_v38 }
 0x3ba   : > { %2639 = vmatprep.mubr.f32.mxu0 %v7533_v54 }
 0x3bb   : > { %2795 = vmatmul.mubr.f32.gmra.mrb[86].mxu1 %v2402_v38 }
 0x3bc   : > { %2800 = vmatprep.mubr.f32.mxu1 %v7533_v54 }
 0x3bd   : > { %2640 = vmatmul.mubr.f32.gmra.mrb[88].mxu0 %v2403_v28 }
 0x3be   : > { %2645 = vmatprep.mubr.f32.mxu0 %v7533_v54 }
 0x3bf   : > { %2801 = vmatmul.mubr.f32.gmra.mrb[88].mxu1 %v2403_v28 }
 0x3c0   : > { %2806 = vmatprep.mubr.f32.mxu1 %v7533_v54 }
 0x3c1   : > { %2646 = vmatmul.mubr.f32.gmra.mrb[90].mxu0 %v2404_v43 }
 0x3c2   : > { %2651 = vmatprep.mubr.f32.mxu0 %v7533_v54 }
 0x3c3   : > { %2807 = vmatmul.mubr.f32.gmra.mrb[90].mxu1 %v2404_v43 }
 0x3c4   : > { %2812 = vmatprep.mubr.f32.mxu1 %v7533_v54 }
 0x3c5   : > { %2652 = vmatmul.mubr.f32.gmra.mrb[92].mxu0 %v2405_v10 }
 0x3c6   : > { %2657 = vmatprep.mubr.f32.mxu0 %v7533_v54 }
 0x3c7   : > { %2813 = vmatmul.mubr.f32.gmra.mrb[92].mxu1 %v2405_v10 }
 0x3c8   : > { %2818 = vmatprep.mubr.f32.mxu1 %v7533_v54 }
 0x3c9   : > { %2658 = vmatmul.mubr.f32.gmra.mrb[94].mxu0 %v2406_v5 }
 0x3ca   : > { %3129 = vmatprep.mubr.f32.mxu0 %v7533_v54 }
 0x3cb   : > { %2819 = vmatmul.mubr.f32.gmra.mrb[94].mxu1 %v2406_v5 }
 0x3cc   : > { %3290 = vmatprep.mubr.f32.mxu1 %v7533_v54 }
 0x460   : > { %v2569_v24 = vpop.f32.mrb[64].mxu0 }
 0x461   : > { %v2570_v47 = vadd.f32 %v2569_v24, %v2426_v22  ;;  %v2571_v62 = vpop.f32.mrb[65].mxu0 }
 0x462   : > { %v2730_v60 = vpop.f32.mrb[64].mxu1  ;;  %v2572_v29 = vadd.f32 %v2571_v62, %v2426_v22 }
 0x463   : > { %5107 = vtanh.f32 %v2570_v47  ;;  %v2731_v4 = vadd.f32 %v2730_v60, %v2426_v22  ;;  %v2732_v9 = vpop.f32.mrb[65].mxu1 }
 0x464   : > { %5109 = vtanh.f32 %v2572_v29  ;;  %v2733_v63 = vadd.f32 %v2732_v9, %v2426_v22  ;;  %v2575_v1 = vpop.f32.mrb[66].mxu0  ;;  %v2441_v22 = vpop.permute.xlu1 %2440 }
 0x465   : > { %5111 = vtanh.f32 %v2731_v4  ;;  %v2576_v35 = vadd.f32 %v2575_v1, %v2431_v49  ;;  %v2577_v57 = vpop.f32.mrb[67].mxu0 }
 0x466   : > { %5113 = vtanh.f32 %v2733_v63  ;;  %v2736_v11 = vpop.f32.mrb[66].mxu1  ;;  %v2578_v27 = vadd.f32 %v2577_v57, %v2431_v49 }
 0x467   : > { %5115 = vtanh.f32 %v2576_v35  ;;  %v2737_v34 = vadd.f32 %v2736_v11, %v2431_v49  ;;  %v2738_v3 = vpop.f32.mrb[67].mxu1  ;;  %v2446_v11 = vpop.permute.xlu0 %2445 }
 0x468   : > { %5117 = vtanh.f32 %v2578_v27  ;;  %v2739_v31 = vadd.f32 %v2738_v3, %v2431_v49  ;;  %v2581_v15 = vpop.f32.mrb[68].mxu0 }
 0x469   : > { %5119 = vtanh.f32 %v2737_v34  ;;  %v2582_v59 = vadd.f32 %v2581_v15, %v2436_v2  ;;  %v2583_v38 = vpop.f32.mrb[69].mxu0 }
 0x46a   : > { %5121 = vtanh.f32 %v2739_v31  ;;  %v2742_v28 = vpop.f32.mrb[68].mxu1  ;;  %v2584_v43 = vadd.f32 %v2583_v38, %v2436_v2 }
 0x46b   : > { %5123 = vtanh.f32 %v2582_v59  ;;  %v2743_v10 = vadd.f32 %v2742_v28, %v2436_v2  ;;  %v2744_v5 = vpop.f32.mrb[69].mxu1 }
 0x46c   : > { %5125 = vtanh.f32 %v2584_v43  ;;  %v2745_v24 = vadd.f32 %v2744_v5, %v2436_v2  ;;  %v2587_v47 = vpop.f32.mrb[70].mxu0 }
 0x46d   : > { %v5108_v62 = vpop.eup %5107  ;;  %5127 = vtanh.f32 %v2743_v10  ;;  %v2588_v60 = vadd.f32 %v2587_v47, %v2441_v22  ;;  %v2589_v29 = vpop.f32.mrb[71].mxu0 }
 0x46e   : > { %v5110_v4 = vpop.eup %5109  ;;  %5129 = vtanh.f32 %v2745_v24  ;;  %v2748_v9 = vpop.f32.mrb[70].mxu1  ;;  %v2590_v49 = vadd.f32 %v2589_v29, %v2441_v22  ;;  %v6919_v28 = vadd.f32 %v5108_v62, %v6572_v52 }
 0x46f   : > { %v5112_v63 = vpop.eup %5111  ;;  %5131 = vtanh.f32 %v2588_v60  ;;  %v2749_v1 = vadd.f32 %v2748_v9, %v2441_v22  ;;  %v2750_v35 = vpop.f32.mrb[71].mxu1 }
 0x470   : > { %v5114_v57 = vpop.eup %5113  ;;  %5133 = vtanh.f32 %v2590_v49  ;;  %v2751_v27 = vadd.f32 %v2750_v35, %v2441_v22  ;;  %v2593_v34 = vpop.f32.mrb[72].mxu0  ;;  %v6925_v22 = vadd.f32 %v5110_v4, %v6565_v16 }
 0x471   : > { %v5116_v3 = vpop.eup %5115  ;;  %5135 = vtanh.f32 %v2749_v1  ;;  %v2594_v2 = vadd.f32 %v2593_v34, %v2446_v11  ;;  %v2595_v31 = vpop.f32.mrb[73].mxu0  ;;  %v6931_v52 = vadd.f32 %v5114_v57, %v6578_v18 }
 0x472   : > { %v5118_v15 = vpop.eup %5117  ;;  %5137 = vtanh.f32 %v2751_v27  ;;  %v2754_v59 = vpop.f32.mrb[72].mxu1  ;;  %v2596_v38 = vadd.f32 %v2595_v31, %v2446_v11  ;;  %v6922_v43 = vadd.f32 %v5116_v3, %v6563_v8 }
 0x473   : > { %v5120_v10 = vpop.eup %5119  ;;  %5139 = vtanh.f32 %v2594_v2  ;;  %v2755_v5 = vadd.f32 %v2754_v59, %v2446_v11  ;;  %v2756_v24 = vpop.f32.mrb[73].mxu1  ;;  %v6928_v47 = vadd.f32 %v5118_v15, %v6570_v45 }
 0x474   : > { %v5122_v60 = vpop.eup %5121  ;;  %v2451_v29 = vpop.permute.xlu1 %2450  ;;  %5141 = vtanh.f32 %v2596_v38  ;;  %v2757_v9 = vadd.f32 %v2756_v24, %v2446_v11  ;;  %v6934_v8 = vadd.f32 %v5120_v10, %v6574_v46  ;;  %v4472_v18 = vpack.c.bf16 %v6922_v43, %v6919_v28 }
 0x475   : > { %v2599_v49 = vpop.f32.mrb[74].mxu0  ;;  %v5124_v62 = vpop.eup %5123  ;;  %5143 = vtanh.f32 %v2755_v5  ;;  %v4470_v16 = vpack.c.bf16 %v6928_v47, %v6925_v22  ;;  %v6939_v45 = vadd.f32 %v5122_v60, %v6580_v17  ;;  %v6944_v46 = vadd.f32 %v5112_v63, %v6584_v23 }
 0x476   : > { %v2600_v1 = vadd.f32 %v2599_v49, %v2451_v29  ;;  %v2601_v35 = vpop.f32.mrb[75].mxu0  ;;  %v5126_v4 = vpop.eup %5125  ;;  %5145 = vtanh.f32 %v2757_v9  ;;  %v6951_v9 = vadd.f32 %v5124_v62, %v6588_v41 }
 0x477   : > { %v2760_v11 = vpop.f32.mrb[74].mxu1  ;;  %v2602_v27 = vadd.f32 %v2601_v35, %v2451_v29  ;;  %v5128_v57 = vpop.eup %5127  ;;  %4471 = vmatprep.subr.bf16.mxu0 %v4470_v16  ;;  %v4502_v2 = vpack.c.bf16 %v6939_v45, %v6931_v52  ;;  %v4504_v38 = vpack.c.bf16 %v6934_v8, %v6944_v46  ;;  %v6957_v16 = vadd.f32 %v5126_v4, %v6592_v50 }
 0x478   : > { %5147 = vtanh.f32 %v2600_v1  ;;  %v2761_v34 = vadd.f32 %v2760_v11, %v2451_v29  ;;  %v2762_v3 = vpop.f32.mrb[75].mxu1  ;;  %v5130_v17 = vpop.eup %5129  ;;  %4473 = vmatpush1.bf16.msra.mxu0 %v4472_v18 }
 0x479   : > { %v2456_v31 = vpop.permute.xlu0 %2455  ;;  %5149 = vtanh.f32 %v2602_v27  ;;  %v2763_v15 = vadd.f32 %v2762_v3, %v2451_v29  ;;  %v2605_v59 = vpop.f32.mrb[76].mxu0  ;;  %4503 = vmatprep.subr.bf16.mxu1 %v4502_v2  ;;  %v6963_v41 = vadd.f32 %v5130_v17, %v6594_v26 }
 0x47a   : > { %v5132_v10 = vpop.eup %5131  ;;  %5151 = vtanh.f32 %v2761_v34  ;;  %v2606_v23 = vadd.f32 %v2605_v59, %v2456_v31  ;;  %v2607_v63 = vpop.f32.mrb[77].mxu0  ;;  %4505 = vmatpush1.bf16.msra.mxu1 %v4504_v38 }
 0x47b   : > { %v5134_v5 = vpop.eup %5133  ;;  %5153 = vtanh.f32 %v2763_v15  ;;  %v2766_v24 = vpop.f32.mrb[76].mxu1  ;;  %v2608_v60 = vadd.f32 %v2607_v63, %v2456_v31  ;;  %v6954_v29 = vadd.f32 %v5132_v10, %v6596_v6 }
 0x47c   : > { %v5136_v49 = vpop.eup %5135  ;;  %5155 = vtanh.f32 %v2606_v23  ;;  %v2767_v1 = vadd.f32 %v2766_v24, %v2456_v31  ;;  %v2768_v35 = vpop.f32.mrb[77].mxu1  ;;  %v6960_v11 = vadd.f32 %v5134_v5, %v6598_v19 }
 0x47d   : > { %v5138_v27 = vpop.eup %5137  ;;  %v2461_v18 = vpop.permute.xlu1 %2460  ;;  %5157 = vtanh.f32 %v2608_v60  ;;  %v2769_v34 = vadd.f32 %v2768_v35, %v2456_v31  ;;  %v6966_v6 = vadd.f32 %v5136_v49, %v6600_v53  ;;  %v4476_v26 = vpack.c.bf16 %v6954_v29, %v6951_v9 }
 0x47e   : > { %v2611_v3 = vpop.f32.mrb[78].mxu0  ;;  %v5140_v62 = vpop.eup %5139  ;;  %5159 = vtanh.f32 %v2767_v1  ;;  %v4474_v50 = vpack.c.bf16 %v6960_v11, %v6957_v16  ;;  %v6971_v19 = vadd.f32 %v5138_v27, %v6604_v7  ;;  %v6976_v53 = vadd.f32 %v5128_v57, %v6608_v56 }
 0x47f   : > { %v2612_v2 = vadd.f32 %v2611_v3, %v2461_v18  ;;  %v2613_v15 = vpop.f32.mrb[79].mxu0  ;;  %v5142_v4 = vpop.eup %5141  ;;  %5161 = vtanh.f32 %v2769_v34  ;;  %v6983_v34 = vadd.f32 %v5140_v62, %v6612_v21 }
 0x480   : > { %v2772_v31 = vpop.f32.mrb[78].mxu1  ;;  %v2614_v59 = vadd.f32 %v2613_v15, %v2461_v18  ;;  %v5144_v17 = vpop.eup %5143  ;;  %4475 = vmatprep.subr.bf16.mxu0 %v4474_v50  ;;  %v4506_v23 = vpack.c.bf16 %v6971_v19, %v6963_v41  ;;  %v4508_v60 = vpack.c.bf16 %v6966_v6, %v6976_v53  ;;  %v6989_v50 = vadd.f32 %v5142_v4, %v6616_v30 }
 0x481   : > { %5163 = vtanh.f32 %v2612_v2  ;;  %v2773_v38 = vadd.f32 %v2772_v31, %v2461_v18  ;;  %v2774_v10 = vpop.f32.mrb[79].mxu1  ;;  %v5146_v7 = vpop.eup %5145  ;;  %4477 = vmatpush1.bf16.msra.mxu0 %v4476_v26 }
 0x482   : > { %v2466_v63 = vpop.permute.xlu0 %2465  ;;  %5165 = vtanh.f32 %v2614_v59  ;;  %v2775_v5 = vadd.f32 %v2774_v10, %v2461_v18  ;;  %v2617_v24 = vpop.f32.mrb[80].mxu0  ;;  %4507 = vmatprep.subr.bf16.mxu1 %v4506_v23  ;;  %v6995_v21 = vadd.f32 %v5146_v7, %v6618_v48 }
 0x483   : > { %v5148_v49 = vpop.eup %5147  ;;  %5167 = vtanh.f32 %v2773_v38  ;;  %v2618_v56 = vadd.f32 %v2617_v24, %v2466_v63  ;;  %v2619_v57 = vpop.f32.mrb[81].mxu0  ;;  %4509 = vmatpush1.bf16.msra.mxu1 %v4508_v60 }
 0x484   : > { %v5150_v1 = vpop.eup %5149  ;;  %5169 = vtanh.f32 %v2775_v5  ;;  %v2778_v35 = vpop.f32.mrb[80].mxu1  ;;  %v2620_v27 = vadd.f32 %v2619_v57, %v2466_v63  ;;  %v6986_v18 = vadd.f32 %v5148_v49, %v6620_v36 }
 0x485   : > { %v5152_v3 = vpop.eup %5151  ;;  %5171 = vtanh.f32 %v2618_v56  ;;  %v2779_v2 = vadd.f32 %v2778_v35, %v2466_v63  ;;  %v2780_v15 = vpop.f32.mrb[81].mxu1  ;;  %v6992_v31 = vadd.f32 %v5150_v1, %v6622_v33 }
 0x486   : > { %v5154_v59 = vpop.eup %5153  ;;  %v2471_v26 = vpop.permute.xlu1 %2470  ;;  %5173 = vtanh.f32 %v2620_v27  ;;  %v2781_v38 = vadd.f32 %v2780_v15, %v2466_v63  ;;  %v6998_v36 = vadd.f32 %v5152_v3, %v6624_v37  ;;  %v4480_v48 = vpack.c.bf16 %v6986_v18, %v6983_v34 }
 0x487   : > { %v2623_v10 = vpop.f32.mrb[82].mxu0  ;;  %v5156_v62 = vpop.eup %5155  ;;  %5175 = vtanh.f32 %v2779_v2  ;;  %v4478_v30 = vpack.c.bf16 %v6992_v31, %v6989_v50  ;;  %v7003_v33 = vadd.f32 %v5154_v59, %v6628_v39  ;;  %v7008_v37 = vadd.f32 %v5144_v17, %v6632_v32 }
 0x488   : > { %v2624_v23 = vadd.f32 %v2623_v10, %v2471_v26  ;;  %v2625_v5 = vpop.f32.mrb[83].mxu0  ;;  %v5158_v4 = vpop.eup %5157  ;;  %5177 = vtanh.f32 %v2781_v38  ;;  %v7015_v38 = vadd.f32 %v5156_v62, %v6636_v51 }
 0x489   : > { %v2784_v63 = vpop.f32.mrb[82].mxu1  ;;  %v2626_v24 = vadd.f32 %v2625_v5, %v2471_v26  ;;  %v5160_v7 = vpop.eup %5159  ;;  %4479 = vmatprep.subr.bf16.mxu0 %v4478_v30  ;;  %v4510_v56 = vpack.c.bf16 %v7003_v33, %v6995_v21  ;;  %v4512_v27 = vpack.c.bf16 %v6998_v36, %v7008_v37  ;;  %v7021_v30 = vadd.f32 %v5158_v4, %v6640_v40 }
 0x48a   : > { %5179 = vtanh.f32 %v2624_v23  ;;  %v2785_v60 = vadd.f32 %v2784_v63, %v2471_v26  ;;  %v2786_v49 = vpop.f32.mrb[83].mxu1  ;;  %v5162_v39 = vpop.eup %5161  ;;  %4481 = vmatpush1.bf16.msra.mxu0 %v4480_v48 }
 0x48b   : > { %v2476_v57 = vpop.permute.xlu0 %2475  ;;  %5181 = vtanh.f32 %v2626_v24  ;;  %v2787_v1 = vadd.f32 %v2786_v49, %v2471_v26  ;;  %v2629_v35 = vpop.f32.mrb[84].mxu0  ;;  %4511 = vmatprep.subr.bf16.mxu1 %v4510_v56  ;;  %v7027_v51 = vadd.f32 %v5162_v39, %v6642_v58 }
 0x48c   : > { %v5164_v3 = vpop.eup %5163  ;;  %5183 = vtanh.f32 %v2785_v60  ;;  %v2630_v32 = vadd.f32 %v2629_v35, %v2476_v57  ;;  %v2631_v17 = vpop.f32.mrb[85].mxu0  ;;  %4513 = vmatpush1.bf16.msra.mxu1 %v4512_v27 }
 0x48d   : > { %v5166_v2 = vpop.eup %5165  ;;  %5185 = vtanh.f32 %v2787_v1  ;;  %v2790_v15 = vpop.f32.mrb[84].mxu1  ;;  %v2632_v59 = vadd.f32 %v2631_v17, %v2476_v57  ;;  %v7018_v26 = vadd.f32 %v5164_v3, %v6644_v44 }
 0x48e   : > { %v5168_v10 = vpop.eup %5167  ;;  %5187 = vtanh.f32 %v2630_v32  ;;  %v2791_v23 = vadd.f32 %v2790_v15, %v2476_v57  ;;  %v2792_v5 = vpop.f32.mrb[85].mxu1  ;;  %v7024_v63 = vadd.f32 %v5166_v2, %v6646_v25 }
 0x48f   : > { %v5170_v24 = vpop.eup %5169  ;;  %v2481_v48 = vpop.permute.xlu1 %2480  ;;  %5189 = vtanh.f32 %v2632_v59  ;;  %v2793_v60 = vadd.f32 %v2792_v5, %v2476_v57  ;;  %v7030_v44 = vadd.f32 %v5168_v10, %v6648_v14  ;;  %v4484_v58 = vpack.c.bf16 %v7018_v26, %v7015_v38 }
 0x490   : > { %v2635_v49 = vpop.f32.mrb[86].mxu0  ;;  %v5172_v62 = vpop.eup %5171  ;;  %5191 = vtanh.f32 %v2791_v23  ;;  %v4482_v40 = vpack.c.bf16 %v7024_v63, %v7021_v30  ;;  %v7035_v25 = vadd.f32 %v5170_v24, %v6652_v61  ;;  %v7040_v14 = vadd.f32 %v5160_v7, %v6656_v13 }
 0x491   : > { %v2636_v56 = vadd.f32 %v2635_v49, %v2481_v48  ;;  %v2637_v1 = vpop.f32.mrb[87].mxu0  ;;  %v5174_v4 = vpop.eup %5173  ;;  %5193 = vtanh.f32 %v2793_v60  ;;  %v7047_v60 = vadd.f32 %v5172_v62, %v6660_v42 }
 0x492   : > { %v2796_v57 = vpop.f32.mrb[86].mxu1  ;;  %v2638_v35 = vadd.f32 %v2637_v1, %v2481_v48  ;;  %v5176_v39 = vpop.eup %5175  ;;  %4483 = vmatprep.subr.bf16.mxu0 %v4482_v40  ;;  %v4514_v32 = vpack.c.bf16 %v7035_v25, %v7027_v51  ;;  %v4516_v59 = vpack.c.bf16 %v7030_v44, %v7040_v14  ;;  %v7053_v40 = vadd.f32 %v5174_v4, %v6664_v55 }
 0x493   : > { %5195 = vtanh.f32 %v2636_v56  ;;  %v2797_v27 = vadd.f32 %v2796_v57, %v2481_v48  ;;  %v2798_v3 = vpop.f32.mrb[87].mxu1  ;;  %v5178_v61 = vpop.eup %5177  ;;  %4485 = vmatpush1.bf16.msra.mxu0 %v4484_v58 }
 0x494   : > { %v2486_v17 = vpop.permute.xlu0 %2485  ;;  %5197 = vtanh.f32 %v2638_v35  ;;  %v2799_v2 = vadd.f32 %v2798_v3, %v2481_v48  ;;  %v2641_v15 = vpop.f32.mrb[88].mxu0  ;;  %4515 = vmatprep.subr.bf16.mxu1 %v4514_v32  ;;  %v7059_v42 = vadd.f32 %v5178_v61, %v6666_v0  ;;  %v7566_v61 = vld [vmem:[#allocation9_spill] sm:$0xff] }
 0x495   : > { %v5180_v10 = vpop.eup %5179  ;;  %5199 = vtanh.f32 %v2797_v27  ;;  %v2642_v13 = vadd.f32 %v2641_v15, %v2486_v17  ;;  %v2643_v7 = vpop.f32.mrb[89].mxu0  ;;  %4517 = vmatpush1.bf16.msra.mxu1 %v4516_v59 }
 0x496   : > { %v5182_v23 = vpop.eup %5181  ;;  %5201 = vtanh.f32 %v2799_v2  ;;  %v2802_v5 = vpop.f32.mrb[88].mxu1  ;;  %v2644_v24 = vadd.f32 %v2643_v7, %v2486_v17  ;;  %v7050_v48 = vadd.f32 %v5180_v10, %v6668_v20  ;;  %7561 = vst [vmem:[#allocation34_spill] sm:$0xff] %v7059_v42  ;;  %v7562_v20 = vld [vmem:[#allocation7_spill] sm:$0xff] }
 0x497   : > { %v5184_v49 = vpop.eup %5183  ;;  %5203 = vtanh.f32 %v2642_v13  ;;  %v2803_v56 = vadd.f32 %v2802_v5, %v2486_v17  ;;  %v2804_v1 = vpop.f32.mrb[89].mxu1  ;;  %v7056_v57 = vadd.f32 %v5182_v23, %v6670_v12  ;;  %v7564_v12 = vld [vmem:[#allocation8_spill] sm:$0xff]  ;;  %v7072_v13 = vadd.f32 %v5176_v39, %v7566_v61 }
 0x498   : > { %v5186_v35 = vpop.eup %5185  ;;  %v2491_v58 = vpop.permute.xlu1 %2490  ;;  %5205 = vtanh.f32 %v2644_v24  ;;  %v2805_v27 = vadd.f32 %v2804_v1, %v2486_v17  ;;  %v7062_v62 = vadd.f32 %v5184_v49, %v7562_v20  ;;  %v4488_v0 = vpack.c.bf16 %v7050_v48, %v7047_v60 }
 0x499   : > { %v2647_v3 = vpop.f32.mrb[90].mxu0  ;;  %v5188_v32 = vpop.eup %5187  ;;  %5207 = vtanh.f32 %v2803_v56  ;;  %v4486_v55 = vpack.c.bf16 %v7056_v57, %v7053_v40  ;;  %v7067_v4 = vadd.f32 %v5186_v35, %v7564_v12  ;;  %v7567_v12 = vld [vmem:[#allocation10_spill] sm:$0xff] }
 0x49a   : > { %7563 = vst [vmem:[#allocation7_spill] sm:$0xff] %v7062_v62  ;;  %v2648_v2 = vadd.f32 %v2647_v3, %v2491_v58  ;;  %v2649_v15 = vpop.f32.mrb[91].mxu0  ;;  %v5190_v59 = vpop.eup %5189  ;;  %5209 = vtanh.f32 %v2805_v27  ;;  %v4520_v27 = vpack.c.bf16 %v7062_v62, %v7072_v13 }
 0x49b   : > { %7565 = vst [vmem:[#allocation8_spill] sm:$0xff] %v7067_v4  ;;  %v2808_v17 = vpop.f32.mrb[90].mxu1  ;;  %v2650_v10 = vadd.f32 %v2649_v15, %v2491_v58  ;;  %v5192_v7 = vpop.eup %5191  ;;  %4487 = vmatprep.subr.bf16.mxu0 %v4486_v55  ;;  %v4518_v24 = vpack.c.bf16 %v7067_v4, %v7059_v42  ;;  %v7571_v4 = vld [vmem:[#allocation11_spill] sm:$0xff] }
 0x49c   : > { %5211 = vtanh.f32 %v2648_v2  ;;  %v2809_v23 = vadd.f32 %v2808_v17, %v2491_v58  ;;  %v2810_v5 = vpop.f32.mrb[91].mxu1  ;;  %v5194_v49 = vpop.eup %5193  ;;  %4489 = vmatpush1.bf16.msra.mxu0 %v4488_v0  ;;  %v7079_v17 = vadd.f32 %v5188_v32, %v7567_v12  ;;  %v7575_v32 = vld [vmem:[#allocation12_spill] sm:$0xff] }
 0x49d   : > { %v2496_v56 = vpop.permute.xlu0 %2495  ;;  %5213 = vtanh.f32 %v2650_v10  ;;  %v2811_v1 = vadd.f32 %v2810_v5, %v2491_v58  ;;  %v2653_v35 = vpop.f32.mrb[92].mxu0  ;;  %4519 = vmatprep.subr.bf16.mxu1 %v4518_v24  ;;  %v7569_v10 = vld [vmem:[#allocation13_spill] sm:$0xff]  ;;  %v7573_v24 = vld [vmem:[#allocation14_spill] sm:$0xff]  ;;  %v7091_v12 = vadd.f32 %v5194_v49, %v7575_v32 }
 0x49e   : > { %v5196_v3 = vpop.eup %5195  ;;  %5215 = vtanh.f32 %v2809_v23  ;;  %v2654_v39 = vadd.f32 %v2653_v35, %v2496_v56  ;;  %v2655_v20 = vpop.f32.mrb[93].mxu0  ;;  %4521 = vmatpush1.bf16.msra.mxu1 %v4520_v27  ;;  %7568 = vst [vmem:[#allocation9_spill] sm:$0xff] %v7079_v17  ;;  %v7085_v23 = vadd.f32 %v5190_v59, %v7571_v4  ;;  %v7579_v59 = vld [vmem:[#allocation16_spill] sm:$0xff] }
 0x49f   : > { %v5198_v2 = vpop.eup %5197  ;;  %5217 = vtanh.f32 %v2811_v1  ;;  %v2814_v15 = vpop.f32.mrb[92].mxu1  ;;  %v2656_v55 = vadd.f32 %v2655_v20, %v2496_v56  ;;  %v7082_v58 = vadd.f32 %v5196_v3, %v7569_v10  ;;  %7576 = vst [vmem:[#allocation14_spill] sm:$0xff] %v7091_v12  ;;  %v7577_v3 = vld [vmem:[#allocation15_spill] sm:$0xff] }
 0x4a0   : > { %v5200_v0 = vpop.eup %5199  ;;  %5219 = vtanh.f32 %v2654_v39  ;;  %v2815_v61 = vadd.f32 %v2814_v15, %v2496_v56  ;;  %v2816_v5 = vpop.f32.mrb[93].mxu1  ;;  %7572 = vst [vmem:[#allocation13_spill] sm:$0xff] %v7085_v23  ;;  %v7088_v35 = vadd.f32 %v5198_v2, %v7573_v24 }
 0x4a1   : > { %7570 = vst [vmem:[#allocation10_spill] sm:$0xff] %v7082_v58  ;;  %v5202_v1 = vpop.eup %5201  ;;  %v2501_v62 = vpop.permute.xlu1 %2500  ;;  %5221 = vtanh.f32 %v2656_v55  ;;  %v2817_v27 = vadd.f32 %v2816_v5, %v2496_v56  ;;  %v7094_v10 = vadd.f32 %v5200_v0, %v7577_v3  ;;  %v4492_v49 = vpack.c.bf16 %v7082_v58, %v7079_v17  ;;  %v7581_v5 = vld [vmem:[#allocation17_spill] sm:$0xff] }
 0x4a2   : > { %7574 = vst [vmem:[#allocation11_spill] sm:$0xff] %v7088_v35  ;;  %v2659_v20 = vpop.f32.mrb[94].mxu0  ;;  %v5204_v39 = vpop.eup %5203  ;;  %5223 = vtanh.f32 %v2815_v61  ;;  %v4490_v4 = vpack.c.bf16 %v7088_v35, %v7085_v23  ;;  %v7099_v2 = vadd.f32 %v5202_v1, %v7579_v59  ;;  %v7104_v0 = vadd.f32 %v5192_v7, %v7581_v5  ;;  %v7585_v5 = vld [vmem:[#allocation19_spill] sm:$0xff] }
 0x4a3   : > { %7578 = vst [vmem:[#allocation12_spill] sm:$0xff] %v7094_v10  ;;  %v2660_v15 = vadd.f32 %v2659_v20, %v2501_v62  ;;  %v2661_v42 = vpop.f32.mrb[95].mxu0  ;;  %v5206_v24 = vpop.eup %5205  ;;  %5225 = vtanh.f32 %v2817_v27 }
 0x4a4   : > { %7580 = vst [vmem:[#allocation15_spill] sm:$0xff] %v7099_v2  ;;  %v2820_v56 = vpop.f32.mrb[94].mxu1  ;;  %v2662_v55 = vadd.f32 %v2661_v42, %v2501_v62  ;;  %7582 = vst [vmem:[#allocation16_spill] sm:$0xff] %v7104_v0  ;;  %v5208_v32 = vpop.eup %5207  ;;  %4491 = vmatprep.subr.bf16.mxu0 %v4490_v4  ;;  %v4522_v3 = vpack.c.bf16 %v7099_v2, %v7091_v12  ;;  %v4524_v42 = vpack.c.bf16 %v7094_v10, %v7104_v0  ;;  %v7587_v2 = vld [vmem:[#allocation22_spill] sm:$0xff]  ;;  %v7591_v10 = vld [vmem:[#allocation23_spill] sm:$0xff] }
 0x4a5   : > { %5227 = vtanh.f32 %v2660_v15  ;;  %v2821_v61 = vadd.f32 %v2820_v56, %v2501_v62  ;;  %v2822_v20 = vpop.f32.mrb[95].mxu1  ;;  %v5210_v1 = vpop.eup %5209  ;;  %4493 = vmatpush1.bf16.msra.mxu0 %v4492_v49  ;;  %v7583_v15 = vld [vmem:[#allocation21_spill] sm:$0xff]  ;;  %v7114_v35 = vadd.f32 %v5206_v24, %v7585_v5  ;;  %v7589_v49 = vld [vmem:[#allocation18_spill] sm:$0xff] }
 0x4a6   : > { %5229 = vtanh.f32 %v2662_v55  ;;  %v2823_v59 = vadd.f32 %v2822_v20, %v2501_v62  ;;  %v5212_v27 = vpop.eup %5211  ;;  %4523 = vmatprep.subr.bf16.mxu1 %v4522_v3  ;;  %v7120_v20 = vadd.f32 %v5204_v39, %v7589_v49 }
 0x4a7   : > { %5231 = vtanh.f32 %v2821_v61  ;;  %v5214_v7 = vpop.eup %5213  ;;  %4525 = vmatpush1.bf16.msra.mxu1 %v4524_v42  ;;  %v7111_v56 = vadd.f32 %v5212_v27, %v7583_v15  ;;  %7586 = vst [vmem:[#allocation21_spill] sm:$0xff] %v7114_v35  ;;  %v7593_v42 = vld [vmem:[#allocation20_spill] sm:$0xff] }
 0x4a8   : > { %5233 = vtanh.f32 %v2823_v59  ;;  %v5216_v4 = vpop.eup %5215  ;;  %v7117_v55 = vadd.f32 %v5214_v7, %v7587_v2  ;;  %7590 = vst [vmem:[#allocation22_spill] sm:$0xff] %v7120_v20  ;;  %v7128_v27 = vadd.f32 %v5210_v1, %v7593_v42  ;;  %v7595_v15 = vld [vmem:[#allocation24_spill] sm:$0xff]  ;;  %v7597_v7 = vld [vmem:[#allocation25_spill] sm:$0xff] }
 0x4a9   : > { %7584 = vst [vmem:[#allocation17_spill] sm:$0xff] %v7111_v56  ;;  %v5218_v62 = vpop.eup %5217  ;;  %v7123_v61 = vadd.f32 %v5216_v4, %v7591_v10  ;;  %v4496_v2 = vpack.c.bf16 %v7111_v56, %v7120_v20  ;;  %v7136_v39 = vadd.f32 %v5208_v32, %v7597_v7  ;;  %v7601_v32 = vld [vmem:[#allocation27_spill] sm:$0xff] }
 0x4aa   : > { %7588 = vst [vmem:[#allocation19_spill] sm:$0xff] %v7117_v55  ;;  %v5220_v3 = vpop.eup %5219  ;;  %v4494_v59 = vpack.c.bf16 %v7117_v55, %v7114_v35  ;;  %7594 = vst [vmem:[#allocation23_spill] sm:$0xff] %v7128_v27  ;;  %v7131_v24 = vadd.f32 %v5218_v62, %v7595_v15  ;;  %v7599_v15 = vld [vmem:[#allocation29_spill] sm:$0xff]  ;;  %v7607_v20 = vld [vmem:[#allocation31_spill] sm:$0xff] }
 0x4ab   : > { %7592 = vst [vmem:[#allocation18_spill] sm:$0xff] %v7123_v61  ;;  %v5222_v5 = vpop.eup %5221  ;;  %7598 = vst [vmem:[#allocation24_spill] sm:$0xff] %v7136_v39  ;;  %v4528_v1 = vpack.c.bf16 %v7123_v61, %v7136_v39 }
 0x4ac   : > { %7596 = vst [vmem:[#allocation20_spill] sm:$0xff] %v7131_v24  ;;  %v5224_v49 = vpop.eup %5223  ;;  %4495 = vmatprep.subr.bf16.mxu0 %v4494_v59  ;;  %v4526_v10 = vpack.c.bf16 %v7131_v24, %v7128_v27  ;;  %v7146_v7 = vadd.f32 %v5222_v5, %v7601_v32  ;;  %v7603_v59 = vld [vmem:[#allocation30_spill] sm:$0xff] }
 0x4ad   : > { %v5226_v4 = vpop.eup %5225  ;;  %4497 = vmatpush1.bf16.msra.mxu0 %v4496_v2  ;;  %v7605_v27 = vld [vmem:[#allocation26_spill] sm:$0xff] }
 0x4ae   : > { %4527 = vmatprep.subr.bf16.mxu1 %v4526_v10  ;;  %7602 = vst [vmem:[#allocation29_spill] sm:$0xff] %v7146_v7  ;;  %v7152_v2 = vadd.f32 %v5220_v3, %v7605_v27  ;;  %v2953_v3 = vld [vmem:[%s7459_s9] sm:$0xff]  ;;  %v2954_v27 = vld [vmem:[%s7459_s9 + $0x8] sm:$0xff] }
 0x4af   : > { %v5228_v42 = vpop.eup %5227  ;;  %4529 = vmatpush1.bf16.msra.mxu1 %v4528_v1  ;;  %v7609_v1 = vld [vmem:[#allocation28_spill] sm:$0xff] }
 0x4b0   : > { %v5230_v62 = vpop.eup %5229  ;;  %v7143_v55 = vadd.f32 %v5228_v42, %v7599_v15  ;;  %7606 = vst [vmem:[#allocation30_spill] sm:$0xff] %v7152_v2  ;;  %v7160_v42 = vadd.f32 %v5226_v4, %v7609_v1  ;;  %v7611_v15 = vld [vmem:[#allocation32_spill] sm:$0xff]  ;;  %v2957_v4 = vld [vmem:[%s7459_s9 + $0x20] sm:$0xff] }
 0x4b1   : > { %v5232_v35 = vpop.eup %5231  ;;  %v7149_v56 = vadd.f32 %v5230_v62, %v7603_v59  ;;  %v7613_v62 = vld [vmem:[#allocation33_spill] sm:$0xff]  ;;  %v2958_v59 = vld [vmem:[%s7459_s9 + $0x28] sm:$0xff]  ;;  %v2960_v1 = vld [vmem:[%s7459_s9 + $0x38] sm:$0xff] }
 0x4b2   : > { %7600 = vst [vmem:[#allocation25_spill] sm:$0xff] %v7143_v55  ;;  %v5234_v24 = vpop.eup %5233  ;;  %v7155_v61 = vadd.f32 %v5232_v35, %v7607_v20  ;;  %7610 = vst [vmem:[#allocation31_spill] sm:$0xff] %v7160_v42  ;;  %v4500_v5 = vpack.c.bf16 %v7143_v55, %v7152_v2  ;;  %v7168_v32 = vadd.f32 %v5224_v49, %v7613_v62  ;;  %v2956_v49 = vld [vmem:[%s7459_s9 + $0x18] sm:$0xff]  ;;  %v2963_v62 = vld [vmem:[%s7459_s9 + $0x50] sm:$0xff] }
 0x4b3   : > { %7604 = vst [vmem:[#allocation27_spill] sm:$0xff] %v7149_v56  ;;  %v4498_v10 = vpack.c.bf16 %v7149_v56, %v7146_v7  ;;  %v7163_v39 = vadd.f32 %v5234_v24, %v7611_v15  ;;  %v2955_v24 = vld [vmem:[%s7459_s9 + $0x10] sm:$0xff]  ;;  %v2961_v15 = vld [vmem:[%s7459_s9 + $0x40] sm:$0xff] }
 0x4b4   : > { %7608 = vst [vmem:[#allocation26_spill] sm:$0xff] %v7155_v61  ;;  %7614 = vst [vmem:[#allocation32_spill] sm:$0xff] %v7168_v32  ;;  %v4532_v20 = vpack.c.bf16 %v7155_v61, %v7168_v32 }
 0x4b5   : > { %7612 = vst [vmem:[#allocation28_spill] sm:$0xff] %v7163_v39  ;;  %4499 = vmatprep.subr.bf16.mxu0 %v4498_v10  ;;  %v4530_v35 = vpack.c.bf16 %v7163_v39, %v7160_v42  ;;  %v2959_v10 = vld [vmem:[%s7459_s9 + $0x30] sm:$0xff] }
 0x4b6   : > { %4501 = vmatpush1.bf16.msra.mxu0 %v4500_v5  ;;  %v2962_v5 = vld [vmem:[%s7459_s9 + $0x48] sm:$0xff] }
 0x4b7   : > { %4531 = vmatprep.subr.bf16.mxu1 %v4530_v35  ;;  %v2964_v35 = vld [vmem:[%s7459_s9 + $0x58] sm:$0xff] }
 0x4b8   : > { %4533 = vmatpush1.bf16.msra.mxu1 %v4532_v20  ;;  %v2965_v20 = vld [vmem:[%s7459_s9 + $0x60] sm:$0xff] }
 0x4b9   : > { %3130 = vmatmul.mubr.f32.vlgmr.msra.gmra.mrb[96].mxu0 %v2953_v3 }
 0x4ba   : > { %3135 = vmatprep.mubr.f32.mxu0 %v7533_v54 }
 0x4bb   : > { %3291 = vmatmul.mubr.f32.vlgmr.msra.gmra.mrb[96].mxu1 %v2953_v3  ;;  %v2966_v3 = vld [vmem:[%s7459_s9 + $0x68] sm:$0xff] }
 0x4bc   : > { %3296 = vmatprep.mubr.f32.mxu1 %v7533_v54 }
 0x4bd   : > { %3136 = vmatmul.mubr.f32.gmra.mrb[98].mxu0 %v2954_v27 }
 0x4be   : > { %3141 = vmatprep.mubr.f32.mxu0 %v7533_v54 }
 0x4bf   : > { %3297 = vmatmul.mubr.f32.gmra.mrb[98].mxu1 %v2954_v27  ;;  %v2967_v27 = vld [vmem:[%s7459_s9 + $0x70] sm:$0xff] }
 0x4c0   : > { %3302 = vmatprep.mubr.f32.mxu1 %v7533_v54 }
 0x4c1   : > { %3142 = vmatmul.mubr.f32.gmra.mrb[100].mxu0 %v2955_v24 }
 0x4c2   : > { %3147 = vmatprep.mubr.f32.mxu0 %v7533_v54 }
 0x4c3   : > { %3303 = vmatmul.mubr.f32.gmra.mrb[100].mxu1 %v2955_v24  ;;  %v2968_v24 = vld [vmem:[%s7459_s9 + $0x78] sm:$0xff] }
 0x4c4   : > { %3308 = vmatprep.mubr.f32.mxu1 %v7533_v54 }
 0x4c5   : > { %3148 = vmatmul.mubr.f32.gmra.mrb[102].mxu0 %v2956_v49 }
 0x4c6   : > { %3153 = vmatprep.mubr.f32.mxu0 %v7533_v54 }
 0x4c7   : > { %3309 = vmatmul.mubr.f32.gmra.mrb[102].mxu1 %v2956_v49  ;;  %v2988_v49 = vpop.permute.xlu0 %2987 }
 0x4c8   : > { %3314 = vmatprep.mubr.f32.mxu1 %v7533_v54 }
 0x4c9   : > { %3154 = vmatmul.mubr.f32.gmra.mrb[104].mxu0 %v2957_v4 }
 0x4ca   : > { %3159 = vmatprep.mubr.f32.mxu0 %v7533_v54 }
 0x4cb   : > { %3315 = vmatmul.mubr.f32.gmra.mrb[104].mxu1 %v2957_v4 }
 0x4cc   : > { %3320 = vmatprep.mubr.f32.mxu1 %v7533_v54 }
 0x4cd   : > { %3160 = vmatmul.mubr.f32.gmra.mrb[106].mxu0 %v2958_v59 }
 0x4ce   : > { %3165 = vmatprep.mubr.f32.mxu0 %v7533_v54 }
 0x4cf   : > { %3321 = vmatmul.mubr.f32.gmra.mrb[106].mxu1 %v2958_v59 }
 0x4d0   : > { %3326 = vmatprep.mubr.f32.mxu1 %v7533_v54 }
 0x4d1   : > { %3166 = vmatmul.mubr.f32.gmra.mrb[108].mxu0 %v2959_v10 }
 0x4d2   : > { %3171 = vmatprep.mubr.f32.mxu0 %v7533_v54 }
 0x4d3   : > { %3327 = vmatmul.mubr.f32.gmra.mrb[108].mxu1 %v2959_v10 }
 0x4d4   : > { %3332 = vmatprep.mubr.f32.mxu1 %v7533_v54 }
 0x4d5   : > { %3172 = vmatmul.mubr.f32.gmra.mrb[110].mxu0 %v2960_v1 }
 0x4d6   : > { %3177 = vmatprep.mubr.f32.mxu0 %v7533_v54 }
 0x4d7   : > { %3333 = vmatmul.mubr.f32.gmra.mrb[110].mxu1 %v2960_v1 }
 0x4d8   : > { %3338 = vmatprep.mubr.f32.mxu1 %v7533_v54 }
 0x4d9   : > { %3178 = vmatmul.mubr.f32.gmra.mrb[112].mxu0 %v2961_v15 }
 0x4da   : > { %3183 = vmatprep.mubr.f32.mxu0 %v7533_v54 }
 0x4db   : > { %3339 = vmatmul.mubr.f32.gmra.mrb[112].mxu1 %v2961_v15 }
 0x4dc   : > { %3344 = vmatprep.mubr.f32.mxu1 %v7533_v54 }
 0x4dd   : > { %3184 = vmatmul.mubr.f32.gmra.mrb[114].mxu0 %v2962_v5 }
 0x4de   : > { %3189 = vmatprep.mubr.f32.mxu0 %v7533_v54 }
 0x4df   : > { %3345 = vmatmul.mubr.f32.gmra.mrb[114].mxu1 %v2962_v5 }
 0x4e0   : > { %3350 = vmatprep.mubr.f32.mxu1 %v7533_v54 }
 0x4e1   : > { %3190 = vmatmul.mubr.f32.gmra.mrb[116].mxu0 %v2963_v62 }
 0x4e2   : > { %3195 = vmatprep.mubr.f32.mxu0 %v7533_v54 }
 0x4e3   : > { %3351 = vmatmul.mubr.f32.gmra.mrb[116].mxu1 %v2963_v62 }
 0x4e4   : > { %3356 = vmatprep.mubr.f32.mxu1 %v7533_v54 }
 0x4e5   : > { %3196 = vmatmul.mubr.f32.gmra.mrb[118].mxu0 %v2964_v35 }
 0x4e6   : > { %3201 = vmatprep.mubr.f32.mxu0 %v7533_v54 }
 0x4e7   : > { %3357 = vmatmul.mubr.f32.gmra.mrb[118].mxu1 %v2964_v35  ;;  %v2993_v35 = vpop.permute.xlu1 %2992 }
 0x4e8   : > { %3362 = vmatprep.mubr.f32.mxu1 %v7533_v54 }
 0x4e9   : > { %3202 = vmatmul.mubr.f32.gmra.mrb[120].mxu0 %v2965_v20 }
 0x4ea   : > { %3207 = vmatprep.mubr.f32.mxu0 %v7533_v54 }
 0x4eb   : > { %3363 = vmatmul.mubr.f32.gmra.mrb[120].mxu1 %v2965_v20 }
 0x4ec   : > { %3368 = vmatprep.mubr.f32.mxu1 %v7533_v54 }
 0x4ed   : > { %3208 = vmatmul.mubr.f32.gmra.mrb[122].mxu0 %v2966_v3 }
 0x4ee   : > { %3213 = vmatprep.mubr.f32.mxu0 %v7533_v54 }
 0x4ef   : > { %3369 = vmatmul.mubr.f32.gmra.mrb[122].mxu1 %v2966_v3 }
 0x4f0   : > { %3374 = vmatprep.mubr.f32.mxu1 %v7533_v54 }
 0x4f1   : > { %3214 = vmatmul.mubr.f32.gmra.mrb[124].mxu0 %v2967_v27 }
 0x4f2   : > { %3219 = vmatprep.mubr.f32.mxu0 %v7533_v54 }
 0x4f3   : > { %3375 = vmatmul.mubr.f32.gmra.mrb[124].mxu1 %v2967_v27 }
 0x4f4   : > { %3380 = vmatprep.mubr.f32.mxu1 %v7533_v54 }
 0x4f5   : > { %3220 = vmatmul.mubr.f32.gmra.mrb[126].mxu0 %v2968_v24 }
 0x4f6   : > { %3627 = vmatprep.mubr.f32.mxu0 %v7533_v54 }
 0x4f7   : > { %3381 = vmatmul.mubr.f32.gmra.mrb[126].mxu1 %v2968_v24 }
 0x4f8   : > { %3788 = vmatprep.mubr.f32.mxu1 %v7533_v54 }
 0x58c   : > { %v3131_v4 = vpop.f32.mrb[96].mxu0 }
 0x58d   : > { %v3132_v59 = vadd.f32 %v3131_v4, %v2988_v49  ;;  %v3133_v10 = vpop.f32.mrb[97].mxu0  ;;  %v2998_v4 = vpop.permute.xlu0 %2997 }
 0x58e   : > { %v3292_v1 = vpop.f32.mrb[96].mxu1  ;;  %v3134_v15 = vadd.f32 %v3133_v10, %v2988_v49 }
 0x58f   : > { %5235 = vtanh.f32 %v3132_v59  ;;  %v3293_v5 = vadd.f32 %v3292_v1, %v2988_v49  ;;  %v3294_v62 = vpop.f32.mrb[97].mxu1 }
 0x590   : > { %5237 = vtanh.f32 %v3134_v15  ;;  %v3295_v20 = vadd.f32 %v3294_v62, %v2988_v49  ;;  %v3137_v3 = vpop.f32.mrb[98].mxu0 }
 0x591   : > { %5239 = vtanh.f32 %v3293_v5  ;;  %v3138_v27 = vadd.f32 %v3137_v3, %v2993_v35  ;;  %v3139_v39 = vpop.f32.mrb[99].mxu0  ;;  %v3003_v3 = vpop.permute.xlu1 %3002 }
 0x592   : > { %5241 = vtanh.f32 %v3295_v20  ;;  %v3298_v24 = vpop.f32.mrb[98].mxu1  ;;  %v3140_v42 = vadd.f32 %v3139_v39, %v2993_v35 }
 0x593   : > { %5243 = vtanh.f32 %v3138_v27  ;;  %v3299_v61 = vadd.f32 %v3298_v24, %v2993_v35  ;;  %v3300_v32 = vpop.f32.mrb[99].mxu1 }
 0x594   : > { %5245 = vtanh.f32 %v3140_v42  ;;  %v3301_v56 = vadd.f32 %v3300_v32, %v2993_v35  ;;  %v3143_v10 = vpop.f32.mrb[100].mxu0 }
 0x595   : > { %5247 = vtanh.f32 %v3299_v61  ;;  %v3144_v59 = vadd.f32 %v3143_v10, %v2998_v4  ;;  %v3145_v1 = vpop.f32.mrb[101].mxu0  ;;  %v3013_v58 = vpop.permute.xlu1 %3012 }
 0x596   : > { %5249 = vtanh.f32 %v3301_v56  ;;  %v3304_v15 = vpop.f32.mrb[100].mxu1  ;;  %v3146_v49 = vadd.f32 %v3145_v1, %v2998_v4 }
 0x597   : > { %5251 = vtanh.f32 %v3144_v59  ;;  %v3305_v5 = vadd.f32 %v3304_v15, %v2998_v4  ;;  %v3306_v62 = vpop.f32.mrb[101].mxu1  ;;  %v3008_v59 = vpop.permute.xlu0 %3007 }
 0x598   : > { %5253 = vtanh.f32 %v3146_v49  ;;  %v3307_v20 = vadd.f32 %v3306_v62, %v2998_v4  ;;  %v3149_v39 = vpop.f32.mrb[102].mxu0 }
 0x599   : > { %v5236_v27 = vpop.eup %5235  ;;  %5255 = vtanh.f32 %v3305_v5  ;;  %v3150_v24 = vadd.f32 %v3149_v39, %v3003_v3  ;;  %v3151_v7 = vpop.f32.mrb[103].mxu0 }
 0x59a   : > { %v5238_v42 = vpop.eup %5237  ;;  %5257 = vtanh.f32 %v3307_v20  ;;  %v3310_v32 = vpop.f32.mrb[102].mxu1  ;;  %v3152_v61 = vadd.f32 %v3151_v7, %v3003_v3 }
 0x59b   : > { %v5240_v35 = vpop.eup %5239  ;;  %5259 = vtanh.f32 %v3150_v24  ;;  %v3311_v56 = vadd.f32 %v3310_v32, %v3003_v3  ;;  %v3312_v10 = vpop.f32.mrb[103].mxu1 }
 0x59c   : > { %v5242_v1 = vpop.eup %5241  ;;  %5261 = vtanh.f32 %v3152_v61  ;;  %v3313_v15 = vadd.f32 %v3312_v10, %v3003_v3  ;;  %v3155_v55 = vpop.f32.mrb[104].mxu0 }
 0x59d   : > { %v5244_v49 = vpop.eup %5243  ;;  %5263 = vtanh.f32 %v3311_v56  ;;  %v3156_v4 = vadd.f32 %v3155_v55, %v3008_v59  ;;  %v3157_v62 = vpop.f32.mrb[105].mxu0 }
 0x59e   : > { %v5246_v5 = vpop.eup %5245  ;;  %5265 = vtanh.f32 %v3313_v15  ;;  %v3316_v39 = vpop.f32.mrb[104].mxu1  ;;  %v3158_v2 = vadd.f32 %v3157_v62, %v3008_v59  ;;  %v4536_v20 = vpack.c.bf16 %v5244_v49, %v5236_v27 }
 0x59f   : > { %v5248_v12 = vpop.eup %5247  ;;  %5267 = vtanh.f32 %v3156_v4  ;;  %v3317_v7 = vadd.f32 %v3316_v39, %v3008_v59  ;;  %v3318_v24 = vpop.f32.mrb[105].mxu1  ;;  %v4534_v32 = vpack.c.bf16 %v5246_v5, %v5238_v42 }
 0x5a0   : > { %v5250_v0 = vpop.eup %5249  ;;  %5269 = vtanh.f32 %v3158_v2  ;;  %v3319_v61 = vadd.f32 %v3318_v24, %v3008_v59  ;;  %v3161_v3 = vpop.f32.mrb[106].mxu0  ;;  %v4568_v10 = vpack.c.bf16 %v5248_v12, %v5240_v35 }
 0x5a1   : > { %v5252_v17 = vpop.eup %5251  ;;  %5271 = vtanh.f32 %v3317_v7  ;;  %v3162_v55 = vadd.f32 %v3161_v3, %v3013_v58  ;;  %v3163_v56 = vpop.f32.mrb[107].mxu0  ;;  %4535 = vmatprep.subr.bf16.mxu0 %v4534_v32  ;;  %v4566_v15 = vpack.c.bf16 %v5250_v0, %v5242_v1 }
 0x5a2   : > { %v5254_v23 = vpop.eup %5253  ;;  %5273 = vtanh.f32 %v3319_v61  ;;  %v3322_v27 = vpop.f32.mrb[106].mxu1  ;;  %v3164_v49 = vadd.f32 %v3163_v56, %v3013_v58  ;;  %4537 = vmatpush1.bf16.msra.mxu0 %v4536_v20 }
 0x5a3   : > { %v5256_v4 = vpop.eup %5255  ;;  %5275 = vtanh.f32 %v3162_v55  ;;  %v3323_v42 = vadd.f32 %v3322_v27, %v3013_v58  ;;  %v3324_v62 = vpop.f32.mrb[107].mxu1  ;;  %4567 = vmatprep.subr.bf16.mxu1 %v4566_v15 }
 0x5a4   : > { %v5258_v2 = vpop.eup %5257  ;;  %v3018_v59 = vpop.permute.xlu0 %3017  ;;  %5277 = vtanh.f32 %v3164_v49  ;;  %v3325_v12 = vadd.f32 %v3324_v62, %v3013_v58  ;;  %4569 = vmatpush1.bf16.msra.mxu1 %v4568_v10 }
 0x5a5   : > { %v3167_v35 = vpop.f32.mrb[108].mxu0  ;;  %v5260_v5 = vpop.eup %5259  ;;  %5279 = vtanh.f32 %v3323_v42 }
 0x5a6   : > { %v3168_v39 = vadd.f32 %v3167_v35, %v3018_v59  ;;  %v3169_v0 = vpop.f32.mrb[109].mxu0  ;;  %v5262_v1 = vpop.eup %5261  ;;  %5281 = vtanh.f32 %v3325_v12  ;;  %v4540_v20 = vpack.c.bf16 %v5260_v5, %v5252_v17 }
 0x5a7   : > { %v3328_v7 = vpop.f32.mrb[108].mxu1  ;;  %v3170_v24 = vadd.f32 %v3169_v0, %v3018_v59  ;;  %v5264_v32 = vpop.eup %5263  ;;  %v4538_v55 = vpack.c.bf16 %v5262_v1, %v5254_v23 }
 0x5a8   : > { %5283 = vtanh.f32 %v3168_v39  ;;  %v3329_v61 = vadd.f32 %v3328_v7, %v3018_v59  ;;  %v3330_v3 = vpop.f32.mrb[109].mxu1  ;;  %v5266_v56 = vpop.eup %5265  ;;  %v4572_v27 = vpack.c.bf16 %v5264_v32, %v5256_v4 }
 0x5a9   : > { %v3023_v15 = vpop.permute.xlu1 %3022  ;;  %5285 = vtanh.f32 %v3170_v24  ;;  %v3331_v58 = vadd.f32 %v3330_v3, %v3018_v59  ;;  %v3173_v10 = vpop.f32.mrb[110].mxu0  ;;  %4539 = vmatprep.subr.bf16.mxu0 %v4538_v55  ;;  %v4570_v12 = vpack.c.bf16 %v5266_v56, %v5258_v2 }
 0x5aa   : > { %v5268_v49 = vpop.eup %5267  ;;  %5287 = vtanh.f32 %v3329_v61  ;;  %v3174_v42 = vadd.f32 %v3173_v10, %v3023_v15  ;;  %v3175_v62 = vpop.f32.mrb[111].mxu0  ;;  %4541 = vmatpush1.bf16.msra.mxu0 %v4540_v20 }
 0x5ab   : > { %v5270_v35 = vpop.eup %5269  ;;  %5289 = vtanh.f32 %v3331_v58  ;;  %v3334_v17 = vpop.f32.mrb[110].mxu1  ;;  %v3176_v5 = vadd.f32 %v3175_v62, %v3023_v15  ;;  %4571 = vmatprep.subr.bf16.mxu1 %v4570_v12 }
 0x5ac   : > { %v5272_v39 = vpop.eup %5271  ;;  %5291 = vtanh.f32 %v3174_v42  ;;  %v3335_v23 = vadd.f32 %v3334_v17, %v3023_v15  ;;  %v3336_v0 = vpop.f32.mrb[111].mxu1  ;;  %4573 = vmatpush1.bf16.msra.mxu1 %v4572_v27 }
 0x5ad   : > { %v5274_v1 = vpop.eup %5273  ;;  %v3028_v59 = vpop.permute.xlu0 %3027  ;;  %5293 = vtanh.f32 %v3176_v5  ;;  %v3337_v4 = vadd.f32 %v3336_v0, %v3023_v15 }
 0x5ae   : > { %v3179_v7 = vpop.f32.mrb[112].mxu0  ;;  %v5276_v24 = vpop.eup %5275  ;;  %5295 = vtanh.f32 %v3335_v23 }
 0x5af   : > { %v3180_v32 = vadd.f32 %v3179_v7, %v3028_v59  ;;  %v3181_v2 = vpop.f32.mrb[113].mxu0  ;;  %v5278_v61 = vpop.eup %5277  ;;  %5297 = vtanh.f32 %v3337_v4  ;;  %v4544_v20 = vpack.c.bf16 %v5276_v24, %v5268_v49 }
 0x5b0   : > { %v3340_v3 = vpop.f32.mrb[112].mxu1  ;;  %v3182_v55 = vadd.f32 %v3181_v2, %v3028_v59  ;;  %v5280_v56 = vpop.eup %5279  ;;  %v4542_v42 = vpack.c.bf16 %v5278_v61, %v5270_v35 }
 0x5b1   : > { %5299 = vtanh.f32 %v3180_v32  ;;  %v3341_v58 = vadd.f32 %v3340_v3, %v3028_v59  ;;  %v3342_v10 = vpop.f32.mrb[113].mxu1  ;;  %v5282_v62 = vpop.eup %5281  ;;  %v4576_v17 = vpack.c.bf16 %v5280_v56, %v5272_v39 }
 0x5b2   : > { %v3033_v12 = vpop.permute.xlu1 %3032  ;;  %5301 = vtanh.f32 %v3182_v55  ;;  %v3343_v15 = vadd.f32 %v3342_v10, %v3028_v59  ;;  %v3185_v27 = vpop.f32.mrb[114].mxu0  ;;  %4543 = vmatprep.subr.bf16.mxu0 %v4542_v42  ;;  %v4574_v4 = vpack.c.bf16 %v5282_v62, %v5274_v1 }
 0x5b3   : > { %v5284_v5 = vpop.eup %5283  ;;  %5303 = vtanh.f32 %v3341_v58  ;;  %v3186_v23 = vadd.f32 %v3185_v27, %v3033_v12  ;;  %v3187_v0 = vpop.f32.mrb[115].mxu0  ;;  %4545 = vmatpush1.bf16.msra.mxu0 %v4544_v20 }
 0x5b4   : > { %v5286_v7 = vpop.eup %5285  ;;  %5305 = vtanh.f32 %v3343_v15  ;;  %v3346_v49 = vpop.f32.mrb[114].mxu1  ;;  %v3188_v24 = vadd.f32 %v3187_v0, %v3033_v12  ;;  %4575 = vmatprep.subr.bf16.mxu1 %v4574_v4 }
 0x5b5   : > { %v5288_v32 = vpop.eup %5287  ;;  %5307 = vtanh.f32 %v3186_v23  ;;  %v3347_v35 = vadd.f32 %v3346_v49, %v3033_v12  ;;  %v3348_v2 = vpop.f32.mrb[115].mxu1  ;;  %4577 = vmatpush1.bf16.msra.mxu1 %v4576_v17 }
 0x5b6   : > { %v5290_v61 = vpop.eup %5289  ;;  %v3038_v59 = vpop.permute.xlu0 %3037  ;;  %5309 = vtanh.f32 %v3188_v24  ;;  %v3349_v39 = vadd.f32 %v3348_v2, %v3033_v12 }
 0x5b7   : > { %v3191_v3 = vpop.f32.mrb[116].mxu0  ;;  %v5292_v55 = vpop.eup %5291  ;;  %5311 = vtanh.f32 %v3347_v35 }
 0x5b8   : > { %v3192_v56 = vadd.f32 %v3191_v3, %v3038_v59  ;;  %v3193_v1 = vpop.f32.mrb[117].mxu0  ;;  %v5294_v58 = vpop.eup %5293  ;;  %5313 = vtanh.f32 %v3349_v39  ;;  %v4548_v20 = vpack.c.bf16 %v5292_v55, %v5284_v5 }
 0x5b9   : > { %v3352_v10 = vpop.f32.mrb[116].mxu1  ;;  %v3194_v42 = vadd.f32 %v3193_v1, %v3038_v59  ;;  %v5296_v62 = vpop.eup %5295  ;;  %v4546_v23 = vpack.c.bf16 %v5294_v58, %v5286_v7 }
 0x5ba   : > { %5315 = vtanh.f32 %v3192_v56  ;;  %v3353_v15 = vadd.f32 %v3352_v10, %v3038_v59  ;;  %v3354_v27 = vpop.f32.mrb[117].mxu1  ;;  %v5298_v0 = vpop.eup %5297  ;;  %v4580_v49 = vpack.c.bf16 %v5296_v62, %v5288_v32 }
 0x5bb   : > { %v3043_v4 = vpop.permute.xlu1 %3042  ;;  %5317 = vtanh.f32 %v3194_v42  ;;  %v3355_v12 = vadd.f32 %v3354_v27, %v3038_v59  ;;  %v3197_v17 = vpop.f32.mrb[118].mxu0  ;;  %4547 = vmatprep.subr.bf16.mxu0 %v4546_v23  ;;  %v4578_v39 = vpack.c.bf16 %v5298_v0, %v5290_v61 }
 0x5bc   : > { %v5300_v24 = vpop.eup %5299  ;;  %5319 = vtanh.f32 %v3353_v15  ;;  %v3198_v35 = vadd.f32 %v3197_v17, %v3043_v4  ;;  %v3199_v2 = vpop.f32.mrb[119].mxu0  ;;  %4549 = vmatpush1.bf16.msra.mxu0 %v4548_v20 }
 0x5bd   : > { %v5302_v3 = vpop.eup %5301  ;;  %5321 = vtanh.f32 %v3355_v12  ;;  %v3358_v5 = vpop.f32.mrb[118].mxu1  ;;  %v3200_v55 = vadd.f32 %v3199_v2, %v3043_v4  ;;  %4579 = vmatprep.subr.bf16.mxu1 %v4578_v39 }
 0x5be   : > { %v5304_v56 = vpop.eup %5303  ;;  %5323 = vtanh.f32 %v3198_v35  ;;  %v3359_v7 = vadd.f32 %v3358_v5, %v3043_v4  ;;  %v3360_v1 = vpop.f32.mrb[119].mxu1  ;;  %4581 = vmatpush1.bf16.msra.mxu1 %v4580_v49 }
 0x5bf   : > { %v5306_v58 = vpop.eup %5305  ;;  %v3048_v59 = vpop.permute.xlu0 %3047  ;;  %5325 = vtanh.f32 %v3200_v55  ;;  %v3361_v32 = vadd.f32 %v3360_v1, %v3043_v4 }
 0x5c0   : > { %v3203_v10 = vpop.f32.mrb[120].mxu0  ;;  %v5308_v42 = vpop.eup %5307  ;;  %5327 = vtanh.f32 %v3359_v7 }
 0x5c1   : > { %v3204_v62 = vadd.f32 %v3203_v10, %v3048_v59  ;;  %v3205_v61 = vpop.f32.mrb[121].mxu0  ;;  %v5310_v15 = vpop.eup %5309  ;;  %5329 = vtanh.f32 %v3361_v32  ;;  %v4552_v20 = vpack.c.bf16 %v5308_v42, %v5300_v24 }
 0x5c2   : > { %v3364_v27 = vpop.f32.mrb[120].mxu1  ;;  %v3206_v23 = vadd.f32 %v3205_v61, %v3048_v59  ;;  %v5312_v0 = vpop.eup %5311  ;;  %v4550_v35 = vpack.c.bf16 %v5310_v15, %v5302_v3 }
 0x5c3   : > { %5331 = vtanh.f32 %v3204_v62  ;;  %v3365_v12 = vadd.f32 %v3364_v27, %v3048_v59  ;;  %v3366_v17 = vpop.f32.mrb[121].mxu1  ;;  %v5314_v2 = vpop.eup %5313  ;;  %v4584_v5 = vpack.c.bf16 %v5312_v0, %v5304_v56 }
 0x5c4   : > { %v3053_v39 = vpop.permute.xlu1 %3052  ;;  %5333 = vtanh.f32 %v3206_v23  ;;  %v3367_v4 = vadd.f32 %v3366_v17, %v3048_v59  ;;  %v3209_v49 = vpop.f32.mrb[122].mxu0  ;;  %4551 = vmatprep.subr.bf16.mxu0 %v4550_v35  ;;  %v4582_v32 = vpack.c.bf16 %v5314_v2, %v5306_v58 }
 0x5c5   : > { %v5316_v55 = vpop.eup %5315  ;;  %5335 = vtanh.f32 %v3365_v12  ;;  %v3210_v7 = vadd.f32 %v3209_v49, %v3053_v39  ;;  %v3211_v1 = vpop.f32.mrb[123].mxu0  ;;  %4553 = vmatpush1.bf16.msra.mxu0 %v4552_v20 }
 0x5c6   : > { %v5318_v10 = vpop.eup %5317  ;;  %5337 = vtanh.f32 %v3367_v4  ;;  %v3370_v24 = vpop.f32.mrb[122].mxu1  ;;  %v3212_v42 = vadd.f32 %v3211_v1, %v3053_v39  ;;  %4583 = vmatprep.subr.bf16.mxu1 %v4582_v32 }
 0x5c7   : > { %v5320_v62 = vpop.eup %5319  ;;  %5339 = vtanh.f32 %v3210_v7  ;;  %v3371_v3 = vadd.f32 %v3370_v24, %v3053_v39  ;;  %v3372_v61 = vpop.f32.mrb[123].mxu1  ;;  %4585 = vmatpush1.bf16.msra.mxu1 %v4584_v5 }
 0x5c8   : > { %v5322_v15 = vpop.eup %5321  ;;  %v3058_v59 = vpop.permute.xlu0 %3057  ;;  %5341 = vtanh.f32 %v3212_v42  ;;  %v3373_v56 = vadd.f32 %v3372_v61, %v3053_v39 }
 0x5c9   : > { %v3215_v27 = vpop.f32.mrb[124].mxu0  ;;  %v5324_v23 = vpop.eup %5323  ;;  %5343 = vtanh.f32 %v3371_v3 }
 0x5ca   : > { %v3216_v0 = vadd.f32 %v3215_v27, %v3058_v59  ;;  %v3217_v58 = vpop.f32.mrb[125].mxu0  ;;  %v5326_v12 = vpop.eup %5325  ;;  %5345 = vtanh.f32 %v3373_v56  ;;  %v4556_v20 = vpack.c.bf16 %v5324_v23, %v5316_v55 }
 0x5cb   : > { %v3376_v17 = vpop.f32.mrb[124].mxu1  ;;  %v3218_v35 = vadd.f32 %v3217_v58, %v3058_v59  ;;  %v5328_v2 = vpop.eup %5327  ;;  %v4554_v7 = vpack.c.bf16 %v5326_v12, %v5318_v10 }
 0x5cc   : > { %5347 = vtanh.f32 %v3216_v0  ;;  %v3377_v4 = vadd.f32 %v3376_v17, %v3058_v59  ;;  %v3378_v49 = vpop.f32.mrb[125].mxu1  ;;  %v5330_v1 = vpop.eup %5329  ;;  %v4588_v24 = vpack.c.bf16 %v5328_v2, %v5320_v62 }
 0x5cd   : > { %v3063_v32 = vpop.permute.xlu1 %3062  ;;  %5349 = vtanh.f32 %v3218_v35  ;;  %v3379_v39 = vadd.f32 %v3378_v49, %v3058_v59  ;;  %v3221_v5 = vpop.f32.mrb[126].mxu0  ;;  %4555 = vmatprep.subr.bf16.mxu0 %v4554_v7  ;;  %v4586_v56 = vpack.c.bf16 %v5330_v1, %v5322_v15 }
 0x5ce   : > { %v5332_v42 = vpop.eup %5331  ;;  %5351 = vtanh.f32 %v3377_v4  ;;  %v3222_v3 = vadd.f32 %v3221_v5, %v3063_v32  ;;  %v3223_v61 = vpop.f32.mrb[127].mxu0  ;;  %4557 = vmatpush1.bf16.msra.mxu0 %v4556_v20 }
 0x5cf   : > { %v5334_v27 = vpop.eup %5333  ;;  %5353 = vtanh.f32 %v3379_v39  ;;  %v3382_v55 = vpop.f32.mrb[126].mxu1  ;;  %v3224_v23 = vadd.f32 %v3223_v61, %v3063_v32  ;;  %4587 = vmatprep.subr.bf16.mxu1 %v4586_v56 }
 0x5d0   : > { %v5336_v0 = vpop.eup %5335  ;;  %5355 = vtanh.f32 %v3222_v3  ;;  %v3383_v10 = vadd.f32 %v3382_v55, %v3063_v32  ;;  %v3384_v58 = vpop.f32.mrb[127].mxu1  ;;  %4589 = vmatpush1.bf16.msra.mxu1 %v4588_v24 }
 0x5d1   : > { %v5338_v12 = vpop.eup %5337  ;;  %5357 = vtanh.f32 %v3224_v23  ;;  %v3385_v59 = vadd.f32 %v3384_v58, %v3063_v32  ;;  %v3451_v23 = vld [vmem:[%s7461_s11] sm:$0xff]  ;;  %v3454_v58 = vld [vmem:[%s7461_s11 + $0x18] sm:$0xff] }
 0x5d2   : > { %v5340_v62 = vpop.eup %5339  ;;  %5359 = vtanh.f32 %v3383_v10  ;;  %v3453_v10 = vld [vmem:[%s7461_s11 + $0x10] sm:$0xff] }
 0x5d3   : > { %v5342_v17 = vpop.eup %5341  ;;  %5361 = vtanh.f32 %v3385_v59  ;;  %v4560_v35 = vpack.c.bf16 %v5340_v62, %v5332_v42  ;;  %v3456_v59 = vld [vmem:[%s7461_s11 + $0x28] sm:$0xff]  ;;  %v3457_v62 = vld [vmem:[%s7461_s11 + $0x30] sm:$0xff] }
 0x5d4   : > { %v5344_v15 = vpop.eup %5343  ;;  %v4558_v2 = vpack.c.bf16 %v5342_v17, %v5334_v27  ;;  %v3458_v17 = vld [vmem:[%s7461_s11 + $0x38] sm:$0xff] }
 0x5d5   : > { %v5346_v4 = vpop.eup %5345  ;;  %v4592_v49 = vpack.c.bf16 %v5344_v15, %v5336_v0  ;;  %v3452_v0 = vld [vmem:[%s7461_s11 + $0x8] sm:$0xff] }
 0x5d6   : > { %v5348_v7 = vpop.eup %5347  ;;  %4559 = vmatprep.subr.bf16.mxu0 %v4558_v2  ;;  %v4590_v20 = vpack.c.bf16 %v5346_v4, %v5338_v12  ;;  %v3455_v12 = vld [vmem:[%s7461_s11 + $0x20] sm:$0xff]  ;;  %v3460_v15 = vld [vmem:[%s7461_s11 + $0x48] sm:$0xff]  ;;  %v3461_v2 = vld [vmem:[%s7461_s11 + $0x50] sm:$0xff] }
 0x5d7   : > { %v5350_v1 = vpop.eup %5349  ;;  %4561 = vmatpush1.bf16.msra.mxu0 %v4560_v35  ;;  %v3459_v35 = vld [vmem:[%s7461_s11 + $0x40] sm:$0xff]  ;;  %v3462_v4 = vld [vmem:[%s7461_s11 + $0x58] sm:$0xff] }
 0x5d8   : > { %v5352_v39 = vpop.eup %5351  ;;  %4591 = vmatprep.subr.bf16.mxu1 %v4590_v20  ;;  %v3465_v20 = vld [vmem:[%s7461_s11 + $0x70] sm:$0xff] }
 0x5d9   : > { %v5354_v5 = vpop.eup %5353  ;;  %4593 = vmatpush1.bf16.msra.mxu1 %v4592_v49  ;;  %v3463_v49 = vld [vmem:[%s7461_s11 + $0x60] sm:$0xff] }
 0x5da   : > { %v5356_v32 = vpop.eup %5355 }
 0x5db   : > { %v5358_v24 = vpop.eup %5357  ;;  %v4564_v3 = vpack.c.bf16 %v5356_v32, %v5348_v7  ;;  %v3464_v7 = vld [vmem:[%s7461_s11 + $0x68] sm:$0xff] }
 0x5dc   : > { %v5360_v61 = vpop.eup %5359  ;;  %v4562_v56 = vpack.c.bf16 %v5358_v24, %v5350_v1  ;;  %v3466_v1 = vld [vmem:[%s7461_s11 + $0x78] sm:$0xff] }
 0x5dd   : > { %v5362_v55 = vpop.eup %5361  ;;  %v4596_v42 = vpack.c.bf16 %v5360_v61, %v5352_v39  ;;  %v3486_v39 = vpop.permute.xlu0 %3485 }
 0x5de   : > { %4563 = vmatprep.subr.bf16.mxu0 %v4562_v56  ;;  %v4594_v27 = vpack.c.bf16 %v5362_v55, %v5354_v5 }
 0x5df   : > { %4565 = vmatpush1.bf16.msra.mxu0 %v4564_v3 }
 0x5e0   : > { %4595 = vmatprep.subr.bf16.mxu1 %v4594_v27 }
 0x5e1   : > { %4597 = vmatpush1.bf16.msra.mxu1 %v4596_v42  ;;  %v3491_v42 = vpop.permute.xlu1 %3490 }
 0x5e2   : > { %3628 = vmatmul.mubr.f32.vlgmr.msra.gmra.mrb[128].mxu0 %v3451_v23 }
 0x5e3   : > { %3633 = vmatprep.mubr.f32.mxu0 %v7533_v54 }
 0x5e4   : > { %3789 = vmatmul.mubr.f32.vlgmr.msra.gmra.mrb[128].mxu1 %v3451_v23 }
 0x5e5   : > { %3794 = vmatprep.mubr.f32.mxu1 %v7533_v54 }
 0x5e6   : > { %3634 = vmatmul.mubr.f32.gmra.mrb[130].mxu0 %v3452_v0 }
 0x5e7   : > { %3639 = vmatprep.mubr.f32.mxu0 %v7533_v54 }
 0x5e8   : > { %3795 = vmatmul.mubr.f32.gmra.mrb[130].mxu1 %v3452_v0 }
 0x5e9   : > { %3800 = vmatprep.mubr.f32.mxu1 %v7533_v54 }
 0x5ea   : > { %3640 = vmatmul.mubr.f32.gmra.mrb[132].mxu0 %v3453_v10 }
 0x5eb   : > { %3645 = vmatprep.mubr.f32.mxu0 %v7533_v54 }
 0x5ec   : > { %3801 = vmatmul.mubr.f32.gmra.mrb[132].mxu1 %v3453_v10 }
 0x5ed   : > { %3806 = vmatprep.mubr.f32.mxu1 %v7533_v54 }
 0x5ee   : > { %3646 = vmatmul.mubr.f32.gmra.mrb[134].mxu0 %v3454_v58 }
 0x5ef   : > { %3651 = vmatprep.mubr.f32.mxu0 %v7533_v54 }
 0x5f0   : > { %3807 = vmatmul.mubr.f32.gmra.mrb[134].mxu1 %v3454_v58 }
 0x5f1   : > { %3812 = vmatprep.mubr.f32.mxu1 %v7533_v54 }
 0x5f2   : > { %3652 = vmatmul.mubr.f32.gmra.mrb[136].mxu0 %v3455_v12 }
 0x5f3   : > { %3657 = vmatprep.mubr.f32.mxu0 %v7533_v54 }
 0x5f4   : > { %3813 = vmatmul.mubr.f32.gmra.mrb[136].mxu1 %v3455_v12 }
 0x5f5   : > { %3818 = vmatprep.mubr.f32.mxu1 %v7533_v54 }
 0x5f6   : > { %3658 = vmatmul.mubr.f32.gmra.mrb[138].mxu0 %v3456_v59 }
 0x5f7   : > { %3663 = vmatprep.mubr.f32.mxu0 %v7533_v54 }
 0x5f8   : > { %3819 = vmatmul.mubr.f32.gmra.mrb[138].mxu1 %v3456_v59 }
 0x5f9   : > { %3824 = vmatprep.mubr.f32.mxu1 %v7533_v54 }
 0x5fa   : > { %3664 = vmatmul.mubr.f32.gmra.mrb[140].mxu0 %v3457_v62 }
 0x5fb   : > { %3669 = vmatprep.mubr.f32.mxu0 %v7533_v54 }
 0x5fc   : > { %3825 = vmatmul.mubr.f32.gmra.mrb[140].mxu1 %v3457_v62  ;;  %v3496_v62 = vpop.permute.xlu0 %3495 }
 0x5fd   : > { %3830 = vmatprep.mubr.f32.mxu1 %v7533_v54 }
 0x5fe   : > { %3670 = vmatmul.mubr.f32.gmra.mrb[142].mxu0 %v3458_v17 }
 0x5ff   : > { %3675 = vmatprep.mubr.f32.mxu0 %v7533_v54 }
 0x600   : > { %3831 = vmatmul.mubr.f32.gmra.mrb[142].mxu1 %v3458_v17 }
 0x601   : > { %3836 = vmatprep.mubr.f32.mxu1 %v7533_v54 }
 0x602   : > { %3676 = vmatmul.mubr.f32.gmra.mrb[144].mxu0 %v3459_v35 }
 0x603   : > { %3681 = vmatprep.mubr.f32.mxu0 %v7533_v54 }
 0x604   : > { %3837 = vmatmul.mubr.f32.gmra.mrb[144].mxu1 %v3459_v35 }
 0x605   : > { %3842 = vmatprep.mubr.f32.mxu1 %v7533_v54 }
 0x606   : > { %3682 = vmatmul.mubr.f32.gmra.mrb[146].mxu0 %v3460_v15 }
 0x607   : > { %3687 = vmatprep.mubr.f32.mxu0 %v7533_v54 }
 0x608   : > { %3843 = vmatmul.mubr.f32.gmra.mrb[146].mxu1 %v3460_v15 }
 0x609   : > { %3848 = vmatprep.mubr.f32.mxu1 %v7533_v54 }
 0x60a   : > { %3688 = vmatmul.mubr.f32.gmra.mrb[148].mxu0 %v3461_v2 }
 0x60b   : > { %3693 = vmatprep.mubr.f32.mxu0 %v7533_v54 }
 0x60c   : > { %3849 = vmatmul.mubr.f32.gmra.mrb[148].mxu1 %v3461_v2 }
 0x60d   : > { %3854 = vmatprep.mubr.f32.mxu1 %v7533_v54 }
 0x60e   : > { %3694 = vmatmul.mubr.f32.gmra.mrb[150].mxu0 %v3462_v4 }
 0x60f   : > { %3699 = vmatprep.mubr.f32.mxu0 %v7533_v54 }
 0x610   : > { %3855 = vmatmul.mubr.f32.gmra.mrb[150].mxu1 %v3462_v4 }
 0x611   : > { %3860 = vmatprep.mubr.f32.mxu1 %v7533_v54 }
 0x612   : > { %3700 = vmatmul.mubr.f32.gmra.mrb[152].mxu0 %v3463_v49 }
 0x613   : > { %3705 = vmatprep.mubr.f32.mxu0 %v7533_v54 }
 0x614   : > { %3861 = vmatmul.mubr.f32.gmra.mrb[152].mxu1 %v3463_v49 }
 0x615   : > { %3866 = vmatprep.mubr.f32.mxu1 %v7533_v54 }
 0x616   : > { %3706 = vmatmul.mubr.f32.gmra.mrb[154].mxu0 %v3464_v7 }
 0x617   : > { %3711 = vmatprep.mubr.f32.mxu0 %v7533_v54 }
 0x618   : > { %3867 = vmatmul.mubr.f32.gmra.mrb[154].mxu1 %v3464_v7 }
 0x619   : > { %3872 = vmatprep.mubr.f32.mxu1 %v7533_v54 }
 0x61a   : > { %3712 = vmatmul.mubr.f32.gmra.mrb[156].mxu0 %v3465_v20 }
 0x61b   : > { %3717 = vmatprep.mubr.f32.mxu0 %v7533_v54 }
 0x61c   : > { %3873 = vmatmul.mubr.f32.gmra.mrb[156].mxu1 %v3465_v20 }
 0x61d   : > { %3878 = vmatprep.mubr.f32.mxu1 %v7533_v54 }
 0x61e   : > { %3718 = vmatmul.mubr.f32.gmra.mrb[158].mxu0 %v3466_v1 }
 0x61f   : > { %4078 = vmatprep.mubr.f32.mxu0 %v7533_v54 }
 0x620   : > { %3879 = vmatmul.mubr.f32.gmra.mrb[158].mxu1 %v3466_v1  ;;  %v3501_v1 = vpop.permute.xlu1 %3500 }
 0x621   : > { %4149 = vmatprep.mubr.f32.mxu1 %v7533_v54 }
 0x6b5   : > { %v3629_v5 = vpop.f32.mrb[128].mxu0 }
 0x6b6   : > { %v3630_v32 = vadd.f32 %v3629_v5, %v3486_v39  ;;  %v3631_v24 = vpop.f32.mrb[129].mxu0 }
 0x6b7   : > { %v3790_v3 = vpop.f32.mrb[128].mxu1  ;;  %v3632_v61 = vadd.f32 %v3631_v24, %v3486_v39 }
 0x6b8   : > { %5363 = vtanh.f32 %v3630_v32  ;;  %v3791_v56 = vadd.f32 %v3790_v3, %v3486_v39  ;;  %v3792_v55 = vpop.f32.mrb[129].mxu1 }
 0x6b9   : > { %5365 = vtanh.f32 %v3632_v61  ;;  %v3793_v27 = vadd.f32 %v3792_v55, %v3486_v39  ;;  %v3635_v23 = vpop.f32.mrb[130].mxu0 }
 0x6ba   : > { %5367 = vtanh.f32 %v3791_v56  ;;  %v3636_v0 = vadd.f32 %v3635_v23, %v3491_v42  ;;  %v3637_v10 = vpop.f32.mrb[131].mxu0 }
 0x6bb   : > { %5369 = vtanh.f32 %v3793_v27  ;;  %v3796_v58 = vpop.f32.mrb[130].mxu1  ;;  %v3638_v12 = vadd.f32 %v3637_v10, %v3491_v42  ;;  %v3506_v10 = vpop.permute.xlu0 %3505 }
 0x6bc   : > { %5371 = vtanh.f32 %v3636_v0  ;;  %v3797_v54 = vadd.f32 %v3796_v58, %v3491_v42  ;;  %v3798_v59 = vpop.f32.mrb[131].mxu1 }
 0x6bd   : > { %5373 = vtanh.f32 %v3638_v12  ;;  %v3799_v17 = vadd.f32 %v3798_v59, %v3491_v42  ;;  %v3641_v35 = vpop.f32.mrb[132].mxu0 }
 0x6be   : > { %5375 = vtanh.f32 %v3797_v54  ;;  %v3642_v15 = vadd.f32 %v3641_v35, %v3496_v62  ;;  %v3643_v2 = vpop.f32.mrb[133].mxu0 }
 0x6bf   : > { %5377 = vtanh.f32 %v3799_v17  ;;  %v3802_v4 = vpop.f32.mrb[132].mxu1  ;;  %v3644_v49 = vadd.f32 %v3643_v2, %v3496_v62 }
 0x6c0   : > { %5379 = vtanh.f32 %v3642_v15  ;;  %v3803_v7 = vadd.f32 %v3802_v4, %v3496_v62  ;;  %v3804_v20 = vpop.f32.mrb[133].mxu1 }
 0x6c1   : > { %5381 = vtanh.f32 %v3644_v49  ;;  %v3805_v39 = vadd.f32 %v3804_v20, %v3496_v62  ;;  %v3647_v5 = vpop.f32.mrb[134].mxu0 }
 0x6c2   : > { %v5364_v32 = vpop.eup %5363  ;;  %5383 = vtanh.f32 %v3803_v7  ;;  %v3648_v24 = vadd.f32 %v3647_v5, %v3501_v1  ;;  %v3649_v3 = vpop.f32.mrb[135].mxu0 }
 0x6c3   : > { %v5366_v61 = vpop.eup %5365  ;;  %5385 = vtanh.f32 %v3805_v39  ;;  %v3808_v56 = vpop.f32.mrb[134].mxu1  ;;  %v3650_v55 = vadd.f32 %v3649_v3, %v3501_v1  ;;  %v3949_v35 = vadd.f32 %v5364_v32, %v6919_v28 }
 0x6c4   : > { %v5368_v42 = vpop.eup %5367  ;;  %5387 = vtanh.f32 %v3648_v24  ;;  %v3809_v27 = vadd.f32 %v3808_v56, %v3501_v1  ;;  %v3810_v23 = vpop.f32.mrb[135].mxu1  ;;  %v3950_v17 = vadd.f32 %v5366_v61, %v6925_v22 }
 0x6c5   : > { %v5370_v0 = vpop.eup %5369  ;;  %5389 = vtanh.f32 %v3650_v55  ;;  %v3811_v58 = vadd.f32 %v3810_v23, %v3501_v1  ;;  %v3653_v12 = vpop.f32.mrb[136].mxu0  ;;  %v3951_v7 = vadd.f32 %v5368_v42, %v6944_v46 }
 0x6c6   : > { %v5372_v54 = vpop.eup %5371  ;;  %5391 = vtanh.f32 %v3809_v27  ;;  %v3654_v59 = vadd.f32 %v3653_v12, %v3506_v10  ;;  %v3655_v62 = vpop.f32.mrb[137].mxu0  ;;  %v3952_v24 = vadd.f32 %v5370_v0, %v6931_v52 }
 0x6c7   : > { %v5374_v15 = vpop.eup %5373  ;;  %5393 = vtanh.f32 %v3811_v58  ;;  %v3814_v2 = vpop.f32.mrb[136].mxu1  ;;  %v3656_v4 = vadd.f32 %v3655_v62, %v3506_v10  ;;  %v3953_v49 = vadd.f32 %v5372_v54, %v6922_v43 }
 0x6c8   : > { %v5376_v20 = vpop.eup %5375  ;;  %5395 = vtanh.f32 %v3654_v59  ;;  %v3815_v1 = vadd.f32 %v3814_v2, %v3506_v10  ;;  %v3816_v39 = vpop.f32.mrb[137].mxu1  ;;  %v3954_v5 = vadd.f32 %v5374_v15, %v6928_v47 }
 0x6c9   : > { %v5378_v3 = vpop.eup %5377  ;;  %v3511_v22 = vpop.permute.xlu1 %3510  ;;  %5397 = vtanh.f32 %v3656_v4  ;;  %v3817_v28 = vadd.f32 %v3816_v39, %v3506_v10  ;;  %v4600_v61 = vpack.c.bf16 %v3953_v49, %v3949_v35  ;;  %v3955_v56 = vadd.f32 %v5376_v20, %v6934_v8 }
 0x6ca   : > { %v3659_v32 = vpop.f32.mrb[138].mxu0  ;;  %v5380_v55 = vpop.eup %5379  ;;  %5399 = vtanh.f32 %v3815_v1  ;;  %v4598_v42 = vpack.c.bf16 %v3954_v5, %v3950_v17  ;;  %v3956_v27 = vadd.f32 %v5378_v3, %v6939_v45 }
 0x6cb   : > { %v3660_v43 = vadd.f32 %v3659_v32, %v3511_v22  ;;  %v3661_v46 = vpop.f32.mrb[139].mxu0  ;;  %v5382_v23 = vpop.eup %5381  ;;  %5401 = vtanh.f32 %v3817_v28  ;;  %v4632_v52 = vpack.c.bf16 %v3955_v56, %v3951_v7  ;;  %v3957_v4 = vadd.f32 %v5380_v55, %v6951_v9 }
 0x6cc   : > { %v3820_v47 = vpop.f32.mrb[138].mxu1  ;;  %v3662_v58 = vadd.f32 %v3661_v46, %v3511_v22  ;;  %v5384_v0 = vpop.eup %5383  ;;  %4599 = vmatprep.subr.bf16.mxu0 %v4598_v42  ;;  %v4630_v54 = vpack.c.bf16 %v3956_v27, %v3952_v24  ;;  %v3958_v2 = vadd.f32 %v5382_v23, %v6957_v16 }
 0x6cd   : > { %5403 = vtanh.f32 %v3660_v43  ;;  %v3821_v12 = vadd.f32 %v3820_v47, %v3511_v22  ;;  %v3822_v10 = vpop.f32.mrb[139].mxu1  ;;  %v5386_v59 = vpop.eup %5385  ;;  %4601 = vmatpush1.bf16.msra.mxu0 %v4600_v61  ;;  %v3959_v39 = vadd.f32 %v5384_v0, %v6976_v53 }
 0x6ce   : > { %v3516_v8 = vpop.permute.xlu0 %3515  ;;  %5405 = vtanh.f32 %v3662_v58  ;;  %v3823_v62 = vadd.f32 %v3822_v10, %v3511_v22  ;;  %v3665_v35 = vpop.f32.mrb[140].mxu0  ;;  %4631 = vmatprep.subr.bf16.mxu1 %v4630_v54  ;;  %v3960_v28 = vadd.f32 %v5386_v59, %v6963_v41 }
 0x6cf   : > { %v5388_v17 = vpop.eup %5387  ;;  %5407 = vtanh.f32 %v3821_v12  ;;  %v3666_v45 = vadd.f32 %v3665_v35, %v3516_v8  ;;  %v3667_v15 = vpop.f32.mrb[141].mxu0  ;;  %4633 = vmatpush1.bf16.msra.mxu1 %v4632_v52 }
 0x6d0   : > { %v5390_v49 = vpop.eup %5389  ;;  %5409 = vtanh.f32 %v3823_v62  ;;  %v3826_v7 = vpop.f32.mrb[140].mxu1  ;;  %v3668_v20 = vadd.f32 %v3667_v15, %v3516_v8  ;;  %v3961_v1 = vadd.f32 %v5388_v17, %v6954_v29 }
 0x6d1   : > { %v5392_v5 = vpop.eup %5391  ;;  %5411 = vtanh.f32 %v3666_v45  ;;  %v3827_v24 = vadd.f32 %v3826_v7, %v3516_v8  ;;  %v3828_v3 = vpop.f32.mrb[141].mxu1  ;;  %v3962_v22 = vadd.f32 %v5390_v49, %v6960_v11 }
 0x6d2   : > { %v5394_v16 = vpop.eup %5393  ;;  %v3521_v32 = vpop.permute.xlu1 %3520  ;;  %5413 = vtanh.f32 %v3668_v20  ;;  %v3829_v9 = vadd.f32 %v3828_v3, %v3516_v8  ;;  %v4604_v56 = vpack.c.bf16 %v3961_v1, %v3957_v4  ;;  %v3963_v55 = vadd.f32 %v5392_v5, %v6966_v6 }
 0x6d3   : > { %v3671_v61 = vpop.f32.mrb[142].mxu0  ;;  %v5396_v43 = vpop.eup %5395  ;;  %5415 = vtanh.f32 %v3827_v24  ;;  %v4602_v46 = vpack.c.bf16 %v3962_v22, %v3958_v2  ;;  %v3964_v42 = vadd.f32 %v5394_v16, %v6971_v19 }
 0x6d4   : > { %v3672_v29 = vadd.f32 %v3671_v61, %v3521_v32  ;;  %v3673_v53 = vpop.f32.mrb[143].mxu0  ;;  %v5398_v27 = vpop.eup %5397  ;;  %5417 = vtanh.f32 %v3829_v9  ;;  %v4636_v41 = vpack.c.bf16 %v3963_v55, %v3959_v39  ;;  %v3965_v35 = vadd.f32 %v5396_v43, %v6983_v34 }
 0x6d5   : > { %v3832_v11 = vpop.f32.mrb[142].mxu1  ;;  %v3674_v23 = vadd.f32 %v3673_v53, %v3521_v32  ;;  %v5400_v47 = vpop.eup %5399  ;;  %4603 = vmatprep.subr.bf16.mxu0 %v4602_v46  ;;  %v4634_v0 = vpack.c.bf16 %v3964_v42, %v3960_v28  ;;  %v3966_v62 = vadd.f32 %v5398_v27, %v6989_v50 }
 0x6d6   : > { %5419 = vtanh.f32 %v3672_v29  ;;  %v3833_v58 = vadd.f32 %v3832_v11, %v3521_v32  ;;  %v3834_v52 = vpop.f32.mrb[143].mxu1  ;;  %v5402_v12 = vpop.eup %5401  ;;  %4605 = vmatpush1.bf16.msra.mxu0 %v4604_v56  ;;  %v3967_v4 = vadd.f32 %v5400_v47, %v7008_v37 }
 0x6d7   : > { %v3526_v6 = vpop.permute.xlu0 %3525  ;;  %5421 = vtanh.f32 %v3674_v23  ;;  %v3835_v10 = vadd.f32 %v3834_v52, %v3521_v32  ;;  %v3677_v54 = vpop.f32.mrb[144].mxu0  ;;  %4635 = vmatprep.subr.bf16.mxu1 %v4634_v0  ;;  %v3968_v39 = vadd.f32 %v5402_v12, %v6995_v21 }
 0x6d8   : > { %v5404_v59 = vpop.eup %5403  ;;  %5423 = vtanh.f32 %v3833_v58  ;;  %v3678_v19 = vadd.f32 %v3677_v54, %v3526_v6  ;;  %v3679_v8 = vpop.f32.mrb[145].mxu0  ;;  %4637 = vmatpush1.bf16.msra.mxu1 %v4636_v41 }
 0x6d9   : > { %v5406_v17 = vpop.eup %5405  ;;  %5425 = vtanh.f32 %v3835_v10  ;;  %v3838_v45 = vpop.f32.mrb[144].mxu1  ;;  %v3680_v15 = vadd.f32 %v3679_v8, %v3526_v6  ;;  %v3969_v2 = vadd.f32 %v5404_v59, %v6986_v18 }
 0x6da   : > { %v5408_v49 = vpop.eup %5407  ;;  %5427 = vtanh.f32 %v3678_v19  ;;  %v3839_v7 = vadd.f32 %v3838_v45, %v3526_v6  ;;  %v3840_v20 = vpop.f32.mrb[145].mxu1  ;;  %v3970_v1 = vadd.f32 %v5406_v17, %v6992_v31 }
 0x6db   : > { %v5410_v50 = vpop.eup %5409  ;;  %v3531_v5 = vpop.permute.xlu1 %3530  ;;  %5429 = vtanh.f32 %v3680_v15  ;;  %v3841_v34 = vadd.f32 %v3840_v20, %v3526_v6  ;;  %v4608_v3 = vpack.c.bf16 %v3969_v2, %v3965_v35  ;;  %v3971_v22 = vadd.f32 %v5408_v49, %v6998_v36 }
 0x6dc   : > { %v3683_v24 = vpop.f32.mrb[146].mxu0  ;;  %v5412_v28 = vpop.eup %5411  ;;  %5431 = vtanh.f32 %v3839_v7  ;;  %v4606_v16 = vpack.c.bf16 %v3970_v1, %v3966_v62  ;;  %v3972_v32 = vadd.f32 %v5410_v50, %v7003_v33 }
 0x6dd   : > { %v3684_v18 = vadd.f32 %v3683_v24, %v3531_v5  ;;  %v3685_v37 = vpop.f32.mrb[147].mxu0  ;;  %v5414_v9 = vpop.eup %5413  ;;  %5433 = vtanh.f32 %v3841_v34  ;;  %v4640_v21 = vpack.c.bf16 %v3971_v22, %v3967_v4  ;;  %v3973_v41 = vadd.f32 %v5412_v28, %v7015_v38 }
 0x6de   : > { %v3844_v31 = vpop.f32.mrb[146].mxu1  ;;  %v3686_v61 = vadd.f32 %v3685_v37, %v3531_v5  ;;  %v5416_v56 = vpop.eup %5415  ;;  %4607 = vmatprep.subr.bf16.mxu0 %v4606_v16  ;;  %v4638_v29 = vpack.c.bf16 %v3972_v32, %v3968_v39  ;;  %v3974_v23 = vadd.f32 %v5414_v9, %v7021_v30 }
 0x6df   : > { %5435 = vtanh.f32 %v3684_v18  ;;  %v3845_v55 = vadd.f32 %v3844_v31, %v3531_v5  ;;  %v3846_v43 = vpop.f32.mrb[147].mxu1  ;;  %v5418_v53 = vpop.eup %5417  ;;  %4609 = vmatpush1.bf16.msra.mxu0 %v4608_v3  ;;  %v3975_v12 = vadd.f32 %v5416_v56, %v7040_v14 }
 0x6e0   : > { %v3536_v36 = vpop.permute.xlu0 %3535  ;;  %5437 = vtanh.f32 %v3686_v61  ;;  %v3847_v46 = vadd.f32 %v3846_v43, %v3531_v5  ;;  %v3689_v42 = vpop.f32.mrb[148].mxu0  ;;  %4639 = vmatprep.subr.bf16.mxu1 %v4638_v29  ;;  %v3976_v19 = vadd.f32 %v5418_v53, %v7027_v51 }
 0x6e1   : > { %v5420_v27 = vpop.eup %5419  ;;  %5439 = vtanh.f32 %v3845_v55  ;;  %v3690_v33 = vadd.f32 %v3689_v42, %v3536_v36  ;;  %v3691_v11 = vpop.f32.mrb[149].mxu0  ;;  %4641 = vmatpush1.bf16.msra.mxu1 %v4640_v21  ;;  %v7615_v55 = vld [vmem:[#allocation34_spill] sm:$0xff] }
 0x6e2   : > { %v5422_v47 = vpop.eup %5421  ;;  %5441 = vtanh.f32 %v3847_v46  ;;  %v3850_v58 = vpop.f32.mrb[148].mxu1  ;;  %v3692_v52 = vadd.f32 %v3691_v11, %v3536_v36  ;;  %v3977_v0 = vadd.f32 %v5420_v27, %v7018_v26  ;;  %v7616_v46 = vld [vmem:[#allocation7_spill] sm:$0xff]  ;;  %v7617_v11 = vld [vmem:[#allocation8_spill] sm:$0xff] }
 0x6e3   : > { %v5424_v6 = vpop.eup %5423  ;;  %5443 = vtanh.f32 %v3690_v33  ;;  %v3851_v10 = vadd.f32 %v3850_v58, %v3536_v36  ;;  %v3852_v54 = vpop.f32.mrb[149].mxu1  ;;  %v3978_v59 = vadd.f32 %v5422_v47, %v7024_v63 }
 0x6e4   : > { %v5426_v30 = vpop.eup %5425  ;;  %v3541_v8 = vpop.permute.xlu1 %3540  ;;  %5445 = vtanh.f32 %v3692_v52  ;;  %v3853_v38 = vadd.f32 %v3852_v54, %v3536_v36  ;;  %v4612_v35 = vpack.c.bf16 %v3977_v0, %v3973_v41  ;;  %v3979_v17 = vadd.f32 %v5424_v6, %v7030_v44 }
 0x6e5   : > { %v3695_v62 = vpop.f32.mrb[150].mxu0  ;;  %v5428_v45 = vpop.eup %5427  ;;  %5447 = vtanh.f32 %v3851_v10  ;;  %v4610_v15 = vpack.c.bf16 %v3978_v59, %v3974_v23  ;;  %v3980_v2 = vadd.f32 %v5426_v30, %v7035_v25 }
 0x6e6   : > { %v3696_v26 = vadd.f32 %v3695_v62, %v3541_v8  ;;  %v3697_v14 = vpop.f32.mrb[151].mxu0  ;;  %v5430_v4 = vpop.eup %5429  ;;  %5449 = vtanh.f32 %v3853_v38  ;;  %v4644_v51 = vpack.c.bf16 %v3979_v17, %v3975_v12  ;;  %v3981_v28 = vadd.f32 %v5428_v45, %v7047_v60  ;;  %v7618_v62 = vld [vmem:[#allocation13_spill] sm:$0xff] }
 0x6e7   : > { %v3856_v63 = vpop.f32.mrb[150].mxu1  ;;  %v3698_v49 = vadd.f32 %v3697_v14, %v3541_v8  ;;  %v5432_v7 = vpop.eup %5431  ;;  %4611 = vmatprep.subr.bf16.mxu0 %v4610_v15  ;;  %v4642_v39 = vpack.c.bf16 %v3980_v2, %v3976_v19  ;;  %v3982_v22 = vadd.f32 %v5430_v4, %v7053_v40  ;;  %v7619_v17 = vld [vmem:[#allocation9_spill] sm:$0xff]  ;;  %v7620_v2 = vld [vmem:[#allocation10_spill] sm:$0xff] }
 0x6e8   : > { %5451 = vtanh.f32 %v3696_v26  ;;  %v3857_v20 = vadd.f32 %v3856_v63, %v3541_v8  ;;  %v3858_v1 = vpop.f32.mrb[151].mxu1  ;;  %v5434_v50 = vpop.eup %5433  ;;  %4613 = vmatpush1.bf16.msra.mxu0 %v4612_v35  ;;  %v3983_v9 = vadd.f32 %v5432_v7, %v7072_v13  ;;  %v7621_v63 = vld [vmem:[#allocation16_spill] sm:$0xff] }
 0x6e9   : > { %v3546_v44 = vpop.permute.xlu0 %3545  ;;  %5453 = vtanh.f32 %v3698_v49  ;;  %v3859_v5 = vadd.f32 %v3858_v1, %v3541_v8  ;;  %v3701_v34 = vpop.f32.mrb[152].mxu0  ;;  %4643 = vmatprep.subr.bf16.mxu1 %v4642_v39  ;;  %v3984_v43 = vadd.f32 %v5434_v50, %v7615_v55  ;;  %v7622_v1 = vld [vmem:[#allocation11_spill] sm:$0xff]  ;;  %v7623_v50 = vld [vmem:[#allocation14_spill] sm:$0xff] }
 0x6ea   : > { %v5436_v24 = vpop.eup %5435  ;;  %5455 = vtanh.f32 %v3857_v20  ;;  %v3702_v25 = vadd.f32 %v3701_v34, %v3546_v44  ;;  %v3703_v3 = vpop.f32.mrb[153].mxu0  ;;  %4645 = vmatpush1.bf16.msra.mxu1 %v4644_v51 }
 0x6eb   : > { %v5438_v18 = vpop.eup %5437  ;;  %5457 = vtanh.f32 %v3859_v5  ;;  %v3862_v37 = vpop.f32.mrb[152].mxu1  ;;  %v3704_v16 = vadd.f32 %v3703_v3, %v3546_v44  ;;  %v3985_v32 = vadd.f32 %v5436_v24, %v7050_v48 }
 0x6ec   : > { %v5440_v31 = vpop.eup %5439  ;;  %5459 = vtanh.f32 %v3702_v25  ;;  %v3863_v61 = vadd.f32 %v3862_v37, %v3546_v44  ;;  %v3864_v21 = vpop.f32.mrb[153].mxu1  ;;  %v3986_v56 = vadd.f32 %v5438_v18, %v7056_v57 }
 0x6ed   : > { %v5442_v40 = vpop.eup %5441  ;;  %v3551_v29 = vpop.permute.xlu1 %3550  ;;  %5461 = vtanh.f32 %v3704_v16  ;;  %v3865_v60 = vadd.f32 %v3864_v21, %v3546_v44  ;;  %v4616_v36 = vpack.c.bf16 %v3985_v32, %v3981_v28  ;;  %v3987_v42 = vadd.f32 %v5440_v31, %v7616_v46 }
 0x6ee   : > { %v3707_v53 = vpop.f32.mrb[154].mxu0  ;;  %v5444_v27 = vpop.eup %5443  ;;  %5463 = vtanh.f32 %v3863_v61  ;;  %v4614_v33 = vpack.c.bf16 %v3986_v56, %v3982_v22  ;;  %v3988_v23 = vadd.f32 %v5442_v40, %v7617_v11  ;;  %v7624_v22 = vld [vmem:[#allocation12_spill] sm:$0xff] }
 0x6ef   : > { %v3708_v48 = vadd.f32 %v3707_v53, %v3551_v29  ;;  %v3709_v13 = vpop.f32.mrb[155].mxu0  ;;  %v5446_v41 = vpop.eup %5445  ;;  %5465 = vtanh.f32 %v3865_v60  ;;  %v4648_v58 = vpack.c.bf16 %v3987_v42, %v3983_v9  ;;  %v3989_v45 = vadd.f32 %v5444_v27, %v7619_v17  ;;  %v7625_v9 = vld [vmem:[#allocation15_spill] sm:$0xff]  ;;  %v7626_v27 = vld [vmem:[#allocation22_spill] sm:$0xff] }
 0x6f0   : > { %v3868_v57 = vpop.f32.mrb[154].mxu1  ;;  %v3710_v47 = vadd.f32 %v3709_v13, %v3551_v29  ;;  %v5448_v52 = vpop.eup %5447  ;;  %4615 = vmatprep.subr.bf16.mxu0 %v4614_v33  ;;  %v4646_v6 = vpack.c.bf16 %v3988_v23, %v3984_v43  ;;  %v3990_v35 = vadd.f32 %v5446_v41, %v7618_v62  ;;  %v7627_v13 = vld [vmem:[#allocation17_spill] sm:$0xff] }
 0x6f1   : > { %5467 = vtanh.f32 %v3708_v48  ;;  %v3869_v0 = vadd.f32 %v3868_v57, %v3551_v29  ;;  %v3870_v12 = vpop.f32.mrb[155].mxu1  ;;  %v5450_v10 = vpop.eup %5449  ;;  %4617 = vmatpush1.bf16.msra.mxu0 %v4616_v36  ;;  %v3991_v49 = vadd.f32 %v5448_v52, %v7621_v63  ;;  %v7628_v23 = vld [vmem:[#allocation21_spill] sm:$0xff]  ;;  %v7629_v57 = vld [vmem:[#allocation19_spill] sm:$0xff] }
 0x6f2   : > { %v3556_v54 = vpop.permute.xlu0 %3555  ;;  %5469 = vtanh.f32 %v3710_v47  ;;  %v3871_v59 = vadd.f32 %v3870_v12, %v3551_v29  ;;  %v3713_v19 = vpop.f32.mrb[156].mxu0  ;;  %4647 = vmatprep.subr.bf16.mxu1 %v4646_v6  ;;  %v3992_v44 = vadd.f32 %v5450_v10, %v7623_v50  ;;  %v7631_v6 = vld [vmem:[#allocation18_spill] sm:$0xff]  ;;  %v7635_v63 = vld [vmem:[#allocation25_spill] sm:$0xff] }
 0x6f3   : > { %v5452_v30 = vpop.eup %5451  ;;  %5471 = vtanh.f32 %v3869_v0  ;;  %v3714_v8 = vadd.f32 %v3713_v19, %v3556_v54  ;;  %v3715_v38 = vpop.f32.mrb[157].mxu0  ;;  %4649 = vmatpush1.bf16.msra.mxu1 %v4648_v58  ;;  %v7630_v0 = vld [vmem:[#allocation24_spill] sm:$0xff]  ;;  %v7632_v19 = vld [vmem:[#allocation23_spill] sm:$0xff] }
 0x6f4   : > { %v5454_v26 = vpop.eup %5453  ;;  %5473 = vtanh.f32 %v3871_v59  ;;  %v3874_v14 = vpop.f32.mrb[156].mxu1  ;;  %v3716_v15 = vadd.f32 %v3715_v38, %v3556_v54  ;;  %v3993_v4 = vadd.f32 %v5452_v30, %v7620_v2  ;;  %v7634_v2 = vld [vmem:[#allocation30_spill] sm:$0xff] }
 0x6f5   : > { %v5456_v51 = vpop.eup %5455  ;;  %5475 = vtanh.f32 %v3714_v8  ;;  %v3875_v7 = vadd.f32 %v3874_v14, %v3556_v54  ;;  %v3876_v20 = vpop.f32.mrb[157].mxu1  ;;  %v3994_v39 = vadd.f32 %v5454_v26, %v7622_v1  ;;  %v7633_v8 = vld [vmem:[#allocation20_spill] sm:$0xff]  ;;  %v7637_v1 = vld [vmem:[#allocation27_spill] sm:$0xff] }
 0x6f6   : > { %v5458_v5 = vpop.eup %5457  ;;  %v3561_v34 = vpop.permute.xlu1 %3560  ;;  %5477 = vtanh.f32 %v3716_v15  ;;  %v3877_v24 = vadd.f32 %v3876_v20, %v3556_v54  ;;  %v4620_v3 = vpack.c.bf16 %v3993_v4, %v3989_v45  ;;  %v3995_v28 = vadd.f32 %v5456_v51, %v7624_v22  ;;  %v7640_v22 = vld [vmem:[#allocation31_spill] sm:$0xff] }
 0x6f7   : > { %v3719_v25 = vpop.f32.mrb[158].mxu0  ;;  %v5460_v18 = vpop.eup %5459  ;;  %5479 = vtanh.f32 %v3875_v7  ;;  %v4618_v32 = vpack.c.bf16 %v3994_v39, %v3990_v35  ;;  %v3996_v31 = vadd.f32 %v5458_v5, %v7625_v9  ;;  %v7636_v7 = vld [vmem:[#allocation29_spill] sm:$0xff]  ;;  %v7638_v5 = vld [vmem:[#allocation32_spill] sm:$0xff] }
 0x6f8   : > { %v3720_v37 = vadd.f32 %v3719_v25, %v3561_v34  ;;  %v3721_v16 = vpop.f32.mrb[159].mxu0  ;;  %v5462_v61 = vpop.eup %5461  ;;  %5481 = vtanh.f32 %v3877_v24  ;;  %v4652_v55 = vpack.c.bf16 %v3995_v28, %v3991_v49  ;;  %v3997_v48 = vadd.f32 %v5460_v18, %v7626_v27  ;;  %v7639_v24 = vld [vmem:[#allocation26_spill] sm:$0xff]  ;;  %v7641_v18 = vld [vmem:[#allocation28_spill] sm:$0xff]  ;;  %v4013_v9 = vld [vmem:[%s7463_s13] sm:$0x1] }
 0x6f9   : > { %v3880_v21 = vpop.f32.mrb[158].mxu1  ;;  %v3722_v56 = vadd.f32 %v3721_v16, %v3561_v34  ;;  %v5464_v43 = vpop.eup %5463  ;;  %4619 = vmatprep.subr.bf16.mxu0 %v4618_v32  ;;  %v4650_v60 = vpack.c.bf16 %v3996_v31, %v3992_v44  ;;  %v3998_v41 = vadd.f32 %v5462_v61, %v7628_v23  ;;  %v5558_v31 = vmov 1966171168  }
 0x6fa   : > { %5483 = vtanh.f32 %v3720_v37  ;;  %v3881_v40 = vadd.f32 %v3880_v21, %v3561_v34  ;;  %v3882_v29 = vpop.f32.mrb[159].mxu1  ;;  %v5466_v53 = vpop.eup %5465  ;;  %4621 = vmatpush1.bf16.msra.mxu0 %v4620_v3  ;;  %v3999_v12 = vadd.f32 %v5464_v43, %v7630_v0  ;;  %v4163_v61 = vunpack.c.l.s4 %v5558_v31 }
 0x6fb   : > { %5485 = vtanh.f32 %v3722_v56  ;;  %v3883_v36 = vadd.f32 %v3882_v29, %v3561_v34  ;;  %v5468_v46 = vpop.eup %5467  ;;  %4651 = vmatprep.subr.bf16.mxu1 %v4650_v60  ;;  %v4000_v30 = vadd.f32 %v5466_v53, %v7632_v19 }
 0x6fc   : > { %5487 = vtanh.f32 %v3881_v40  ;;  %v5470_v42 = vpop.eup %5469  ;;  %4653 = vmatpush1.bf16.msra.mxu1 %v4652_v55  ;;  %v4001_v33 = vadd.f32 %v5468_v46, %v7627_v13  ;;  %v4164_v21 = vunpack.c.0.s8 %v4163_v61  ;;  %v7642_v55 = vld [vmem:[#allocation6_spill] sm:$0xff] }
 0x6fd   : > { %5489 = vtanh.f32 %v3883_v36  ;;  %v5472_v11 = vpop.eup %5471  ;;  %v4002_v47 = vadd.f32 %v5470_v42, %v7629_v57 }
 0x6fe   : > { %v5474_v58 = vpop.eup %5473  ;;  %v4624_v52 = vpack.c.bf16 %v4001_v33, %v3997_v48  ;;  %v4003_v10 = vadd.f32 %v5472_v11, %v7631_v6  ;;  %v4167_v43 = vsub.s32 %v4164_v21, %v7642_v55  ;;  %v7643_v48 = vlaneseq }
 0x6ff   : > { %v5476_v54 = vpop.eup %5475  ;;  %v4622_v59 = vpack.c.bf16 %v4002_v47, %v3998_v41  ;;  %v4004_v38 = vadd.f32 %v5474_v58, %v7633_v8 }
 0x700   : > { %v5478_v62 = vpop.eup %5477  ;;  %v4656_v35 = vpack.c.bf16 %v4003_v10, %v3999_v12  ;;  %v4005_v4 = vadd.f32 %v5476_v54, %v7634_v2  ;;  %vm4187_vm2 = vcmp.lt.s32.totalorder %v7643_v48, 512 }
 0x701   : > { %v5480_v17 = vpop.eup %5479  ;;  %4623 = vmatprep.subr.bf16.mxu0 %v4622_v59  ;;  %v4654_v45 = vpack.c.bf16 %v4004_v38, %v4000_v30  ;;  %v4006_v20 = vadd.f32 %v5478_v62, %v7636_v7 }
 0x702   : > { %v5482_v26 = vpop.eup %5481  ;;  %4625 = vmatpush1.bf16.msra.mxu0 %v4624_v52  ;;  %v4007_v34 = vadd.f32 %v5480_v17, %v7638_v5 }
 0x703   : > { %4655 = vmatprep.subr.bf16.mxu1 %v4654_v45  ;;  %v4008_v28 = vadd.f32 %v5482_v26, %v7640_v22 }
 0x704   : > { %v5484_v14 = vpop.eup %5483  ;;  %4657 = vmatpush1.bf16.msra.mxu1 %v4656_v35 }
 0x705   : > { %v5486_v15 = vpop.eup %5485  ;;  %v4009_v49 = vadd.f32 %v5484_v14, %v7635_v63 }
 0x706   : > { %v5488_v51 = vpop.eup %5487  ;;  %v4010_v39 = vadd.f32 %v5486_v15, %v7637_v1 }
 0x707   : > { %v5490_v50 = vpop.eup %5489  ;;  %v4628_v44 = vpack.c.bf16 %v4009_v49, %v4005_v4  ;;  %v4011_v25 = vadd.f32 %v5488_v51, %v7639_v24 }
 0x708   : > { %v4626_v3 = vpack.c.bf16 %v4010_v39, %v4006_v20  ;;  %v4012_v37 = vadd.f32 %v5490_v50, %v7641_v18 }
 0x709   : > { %v4660_v16 = vpack.c.bf16 %v4011_v25, %v4007_v34 }
 0x70a   : > { %4627 = vmatprep.subr.bf16.mxu0 %v4626_v3  ;;  %v4658_v32 = vpack.c.bf16 %v4012_v37, %v4008_v28 }
 0x70b   : > { %4629 = vmatpush1.bf16.msra.mxu0 %v4628_v44 }
 0x70c   : > { %4659 = vmatprep.subr.bf16.mxu1 %v4658_v32 }
 0x70d   : > { %4661 = vmatpush1.bf16.msra.mxu1 %v4660_v16 }
 0x70e   : > { %4079 = vmatmul.mubr.f32.vlgmr.msra.gmra.mrb[160].mxu0 %v4013_v9 }
 0x710   : > { %4150 = vmatmul.mubr.f32.vlgmr.msra.gmra.mrb[160].mxu1 %v4013_v9 }
 0x7e1   : > { %v4080_v56 = vpop.f32.mrb[160].mxu0 }
 0x7e2   : > { %v4082_v40 = vpop.f32.mrb[161].mxu0 }
 0x7e3   : > { %v4151_v29 = vpop.f32.mrb[160].mxu1  ;;  %v4160_v60 = vcombine.low %v4080_v56, %v4082_v40 }
 0x7e4   : > { %v4153_v53 = vpop.f32.mrb[161].mxu1 }
 0x7e5   : > { %v4168_v36 = vrot.slane %v4160_v60, %v4167_v43  ;;  %v4161_v46 = vcombine.low %v4151_v29, %v4153_v53 }
 0x7e7   : > { %v4175_v42 = vrot.slane %v4161_v46, %v4167_v43 }
 0x7e9   : > { %v4176_v27 = vcombine.low %v4168_v36, %v4175_v42 }
 0x7eb   : > { %v4183_v13 = vrot.slane %v4176_v27, %v4167_v43 }
 0x7ed   : > { %4189 = vst.msk [vmem:[%s461_s27] sm:$0xf] %vm4187_vm2, %v4183_v13 }
 0x7ee   : > { %5504 = shalt.err (!%p5501_p3)
}
 0x7ef   : > { %s5505_s21 = scalar_lea.hbm %s7408_s20, 64  ;;  %s5509_s25 = scalar_lea.hbm %s7464_s14, 128 }
 0x7f0   : > { %p5506_p4 = scmp.ne.s32.totalorder %s7408_s20, %s5505_s21  ;;  %p5510_p9 = scmp.lt.u32.totalorder %s7408_s20, %s7464_s14 }
 0x7f1   : > { %p5511_p10 = scmp.lt.u32.totalorder %s5509_s25, %s5505_s21  ;;  %p5513_p12 = scmp.lt.u32.totalorder %s5505_s21, %s7408_s20 }
 0x7f2   : > { %p5507_p7 = pnand %p5506_p4, %p5673_p5 }
 0x7f3   : > { %p5512_p11 = por %p5511_p10, %p5510_p9 }
 0x7f4   : > { %p5508_p8 = pneg %p5507_p7 }
 0x7f5   : > { %p5514_p13 = por %p5513_p12, %p5512_p11 }
 0x7f7   : > { %p5515_p0 = pnand %p5514_p13, %p5508_p8 }
 0x7f9   : > { %5518 = shalt.err (!%p5515_p0)
}
 0x7fa   : > { %4662 = dma.vmem_to_hbm [thread:$0]  (%p5673_p5), %s7410_s28, 64, %s7408_s20, %s4191_s2  }
 0x7fb PF: > { %p4668_p1 = scmp.ge.s32.totalorder %s5553_s16, 2  ;;  %s4217_s0 = sand.u32 1, %s5541_s29  }
 0x7fc   : > { %s4218_s22 = scalar_lea.sflag [#allocation3], %s4217_s0 }
 0x7fd   : > { %p4665_p2 = pnand %p4668_p1, %p5677_p6 }
 0x7ff   : > { %5536 = dma.done.wait (!%p4665_p2), %s4218_s22, 64  }
 0x800   : > { %5538 = vsyncadd (!%p4665_p2), %s4218_s22, 4294967232  ;;  %s7644_s1 = sld [smem:[#allocation5_spill]]  ;;  %p24_p3 = scmp.ge.s32.totalorder %s5660_s19, 4  }
 0x801   : > { %s7645_s29 = smov %s5545_s30  ;;  %s7646_s30 = smov %s5549_s15 }
 0x802   : > { %s7648_s16 = smov %s5660_s19  ;;  %26 = sbr.rel (!%p24_p3) target bundleno = 7 (0x7), region = 112 }
 0x806   : > { %s7647_s15 = smov %s7644_s1 }
 0x809   :  { %4223 = vsyncpa [#allocation3], 1 }
 0x80a   :  { %4225 = vsyncpa [#allocation3 + $0x1], 1 }

</bundles_post_ra>
